<compile_context>
chip_gen: v6e
topology: v6e:2x2x1
jax: 0.10.0
libtpu: 0.0.40
codegen_flags: <defaults>
</compile_context>

<pallas_src>
import jax
import jax.numpy as jnp
from jax import lax
from jax.experimental import pallas as pl
from jax.experimental.pallas import tpu as pltpu


def _gru_step(xp, h, wh, bhn):
    """One GRU step with the x-projection precomputed.

    xp : (B, 3H) = x @ Wi_fused + [bi_r+bh_r, bi_z+bh_z, bi_n]   (f32)
    h  : (B, H)   previous hidden state                           (f32)
    wh : (H, 3H)  gate-fused recurrent weights                    (bf16)
    bhn: (1, H)   recurrent bias of the candidate gate            (f32)
    """
    H = h.shape[-1]
    hp = jnp.dot(h.astype(wh.dtype), wh, preferred_element_type=jnp.float32)  # (B, 3H)
    r = jax.nn.sigmoid(xp[:, 0 * H:1 * H] + hp[:, 0 * H:1 * H])
    z = jax.nn.sigmoid(xp[:, 1 * H:2 * H] + hp[:, 1 * H:2 * H])
    n = jnp.tanh(xp[:, 2 * H:3 * H] + r * (hp[:, 2 * H:3 * H] + bhn))
    return (1.0 - z) * n + z * h


def discriminator_kernel(emb_ref,
                         wi0f_ref, bx0f_ref, wh0f_ref, bh0fn_ref,
                         wi0b_ref, bx0b_ref, wh0b_ref, bh0bn_ref,
                         wi1ft_ref, wi1fb_ref, bx1f_ref, wh1f_ref, bh1fn_ref,
                         wi1bt_ref, wi1bb_ref, bx1b_ref, wh1b_ref, bh1bn_ref,
                         wg2h_ref, bg2h_ref, wh2o_ref, bh2o_ref,
                         out_ref,
                         seqf_ref, seqb_ref, xpf_ref, xpb_ref):
    T, B, _ = emb_ref.shape
    H = wh0f_ref.shape[0]
    f32 = jnp.float32
    cdt = wi0f_ref.dtype          # bf16 MXU-operand dtype

    # ---- layer 0: hoisted input projections (independent of h -> off the critical path) ----
    # TODO(synk): at production T*B these per-t dots should become one (T*B, E)x(E, 3H) matmul.
    wi0f, bx0f = wi0f_ref[...], bx0f_ref[...]
    wi0b, bx0b = wi0b_ref[...], bx0b_ref[...]

    @pl.loop(0, T, unroll=True)
    def _(t):
        e_t = emb_ref[t].astype(cdt)                                   # (B, E)
        xpf_ref[t] = jnp.dot(e_t, wi0f, preferred_element_type=f32) + bx0f
        xpb_ref[t] = jnp.dot(e_t, wi0b, preferred_element_type=f32) + bx0b

    zero_h = jnp.zeros((B, H), f32)   # init_hidden: zeros

    # ---- layer 0 recurrence: forward + backward merged into one loop ----
    wh0f, bh0fn = wh0f_ref[...], bh0fn_ref[...]
    wh0b, bh0bn = wh0b_ref[...], bh0bn_ref[...]

    def l0_body(i, carry):
        hf, hb = carry
        tr = T - 1 - i
        hf = _gru_step(xpf_ref[i], hf, wh0f, bh0fn)
        hb = _gru_step(xpb_ref[tr], hb, wh0b, bh0bn)
        seqf_ref[i] = hf
        seqb_ref[tr] = hb
        return hf, hb

    h0f, h0b = lax.fori_loop(0, T, l0_body, (zero_h, zero_h), unroll=True)

    # ---- layer 1: hoisted input projections; concat(fwd,bwd) folded into top/bot weights ----
    # (inter-layer GRU dropout p=0.2 is identity at inference)
    wi1ft, wi1fb, bx1f = wi1ft_ref[...], wi1fb_ref[...], bx1f_ref[...]
    wi1bt, wi1bb, bx1b = wi1bt_ref[...], wi1bb_ref[...], bx1b_ref[...]

    @pl.loop(0, T, unroll=True)
    def _(t):
        sf = seqf_ref[t].astype(cdt)                                   # (B, H)
        sb = seqb_ref[t].astype(cdt)                                   # (B, H)
        xpf_ref[t] = (jnp.dot(sf, wi1ft, preferred_element_type=f32)
                      + jnp.dot(sb, wi1fb, preferred_element_type=f32) + bx1f)
        xpb_ref[t] = (jnp.dot(sf, wi1bt, preferred_element_type=f32)
                      + jnp.dot(sb, wi1bb, preferred_element_type=f32) + bx1b)

    # ---- layer 1 recurrence: forward + backward merged ----
    wh1f, bh1fn = wh1f_ref[...], bh1fn_ref[...]
    wh1b, bh1bn = wh1b_ref[...], bh1bn_ref[...]

    def l1_body(i, carry):
        hf, hb = carry
        tr = T - 1 - i
        hf = _gru_step(xpf_ref[i], hf, wh1f, bh1fn)
        hb = _gru_step(xpb_ref[tr], hb, wh1b, bh1bn)
        return hf, hb

    h1f, h1b = lax.fori_loop(0, T, l1_body, (zero_h, zero_h), unroll=True)

    # ---- MLP head: hidden.permute(1,0,2).view(-1, 4H) -> Linear -> tanh -> Linear -> sigmoid ----
    hid = jnp.concatenate([h0f, h0b, h1f, h1b], axis=-1)               # (B, 4H), lane-dense
    g = jnp.tanh(jnp.dot(hid, wg2h_ref[...], preferred_element_type=f32) + bg2h_ref[...])
    # dropout_linear: identity at inference.
    # hidden2out as VPU multiply + lane reduction (an N=1 matmul wastes 127/128 MXU columns).
    logit = jnp.sum(g * wh2o_ref[...], axis=-1, keepdims=True) + bh2o_ref[...]
    out_ref[...] = jax.nn.sigmoid(logit).astype(out_ref.dtype)


def _pack_dir(p, compute_dtype=jnp.bfloat16):
    """Fuse the 3 GRU gates (r,z,n) and pre-fold biases for one direction.

    Input layout (already transposed vs. torch): wi (3, in, H), wh (3, H, H), bi/bh (3, 1, H).
    Returns: wi_fused (in, 3H) bf16, wh_fused (H, 3H) bf16,
             bx (1, 3H) f32 = [bi_r+bh_r, bi_z+bh_z, bi_n], bhn (1, H) f32.
    """
    wi = jnp.concatenate([p["wi"][0], p["wi"][1], p["wi"][2]], axis=-1).astype(compute_dtype)
    wh = jnp.concatenate([p["wh"][0], p["wh"][1], p["wh"][2]], axis=-1).astype(compute_dtype)
    bx = jnp.concatenate([p["bi"][0] + p["bh"][0],
                          p["bi"][1] + p["bh"][1],
                          p["bi"][2]], axis=-1).astype(jnp.float32)
    bhn = p["bh"][2].astype(jnp.float32)
    return wi, wh, bx, bhn


def discriminator_forward(token_ids, params, *, block_b=None):
    """token_ids: (B, T) int32 -> (B, 1) float32 sigmoid scores."""
    emb = params["embedding"][token_ids]                       # (B, T, E) gather (plain JAX glue)
    emb = jnp.transpose(emb, (1, 0, 2)).astype(jnp.float32)    # (T, B, E) time-major
    T, B, E = emb.shape
    H = params["gru"]["l0f"]["wh"].shape[1]

    wi0f, wh0f, bx0f, bh0fn = _pack_dir(params["gru"]["l0f"])
    wi0b, wh0b, bx0b, bh0bn = _pack_dir(params["gru"]["l0b"])
    wi1f, wh1f, bx1f, bh1fn = _pack_dir(params["gru"]["l1f"])
    wi1b, wh1b, bx1b, bh1bn = _pack_dir(params["gru"]["l1b"])
    # layer-1 input is concat(fwd, bwd): split its Wi into the fwd-half / bwd-half rows
    wi1ft, wi1fb = wi1f[:H], wi1f[H:]
    wi1bt, wi1bb = wi1b[:H], wi1b[H:]

    wg2h = params["g2h"]["w"].astype(jnp.float32)              # (4H, H)
    bg2h = params["g2h"]["b"].astype(jnp.float32)              # (1, H)
    wh2o = params["h2o"]["w"].astype(jnp.float32).T            # (1, H)  row form for VPU reduce
    bh2o = params["h2o"]["b"].astype(jnp.float32)              # (1, 1)

    if block_b is None:
        block_b = B if B <= 64 else 64                         # re-derive for v7x's smaller VMEM
    nb = pl.cdiv(B, block_b)

    args = (emb,
            wi0f, bx0f, wh0f, bh0fn,
            wi0b, bx0b, wh0b, bh0bn,
            wi1ft, wi1fb, bx1f, wh1f, bh1fn,
            wi1bt, wi1bb, bx1b, wh1b, bh1bn,
            wg2h, bg2h, wh2o, bh2o)

    whole_vmem = pl.BlockSpec(memory_space=pltpu.MemorySpace.VMEM)
    in_specs = ([pl.BlockSpec((T, block_b, E), lambda b: (0, b, 0))]
                + [whole_vmem] * (len(args) - 1))

    return pl.pallas_call(
        discriminator_kernel,
        out_shape=jax.ShapeDtypeStruct((B, 1), jnp.float32),
        grid=(nb,),
        in_specs=in_specs,
        out_specs=pl.BlockSpec((block_b, 1), lambda b: (b, 0)),
        scratch_shapes=[pltpu.VMEM((T, block_b, H), jnp.float32),      # layer-0 fwd outputs
                        pltpu.VMEM((T, block_b, H), jnp.float32),      # layer-0 bwd outputs
                        pltpu.VMEM((T, block_b, 3 * H), jnp.float32),  # fwd x-projections (reused)
                        pltpu.VMEM((T, block_b, 3 * H), jnp.float32)], # bwd x-projections (reused)
        compiler_params=pltpu.CompilerParams(
            dimension_semantics=("parallel",)),
    )(*args)


# ----------------------------- pure-JAX reference (f32) -----------------------------

def _gru_cell_ref(x, h, wi, wh, bi, bh):
    """PyTorch GRU cell. x:(B,in), h:(B,H), wi:(3,in,H), wh:(3,H,H), bi/bh:(3,1,H)."""
    r = jax.nn.sigmoid(x @ wi[0] + bi[0] + h @ wh[0] + bh[0])
    z = jax.nn.sigmoid(x @ wi[1] + bi[1] + h @ wh[1] + bh[1])
    n = jnp.tanh(x @ wi[2] + bi[2] + r * (h @ wh[2] + bh[2]))
    return (1.0 - z) * n + z * h


def ref_forward(token_ids, params):
    emb = params["embedding"][token_ids]
    emb = jnp.transpose(emb, (1, 0, 2)).astype(jnp.float32)    # (T, B, E)
    T, B, _ = emb.shape
    H = params["gru"]["l0f"]["wh"].shape[1]

    def run(xs, p, reverse):
        h = jnp.zeros((B, H), jnp.float32)
        order = range(T - 1, -1, -1) if reverse else range(T)
        outs = [None] * T
        for t in order:
            h = _gru_cell_ref(xs[t], h, p["wi"], p["wh"], p["bi"], p["bh"])
            outs[t] = h
        return jnp.stack(outs, axis=0), h

    of, h0f = run(emb, params["gru"]["l0f"], False)
    ob, h0b = run(emb, params["gru"]["l0b"], True)
    x1 = jnp.concatenate([of, ob], axis=-1)
    _, h1f = run(x1, params["gru"]["l1f"], False)
    _, h1b = run(x1, params["gru"]["l1b"], True)

    hid = jnp.concatenate([h0f, h0b, h1f, h1b], axis=-1)
    g = jnp.tanh(hid @ params["g2h"]["w"] + params["g2h"]["b"])
    return jax.nn.sigmoid(g @ params["h2o"]["w"] + params["h2o"]["b"])


def init_params(key, vocab_size, E, H):
    keys = iter(jax.random.split(key, 32))

    def nrm(shape, scale=0.1):
        return (scale * jax.random.normal(next(keys), shape)).astype(jnp.float32)

    def gru_dir(in_dim):
        return {"wi": nrm((3, in_dim, H)), "wh": nrm((3, H, H)),
                "bi": nrm((3, 1, H)), "bh": nrm((3, 1, H))}

    return {
        "embedding": nrm((vocab_size, E), scale=1.0),
        "gru": {"l0f": gru_dir(E), "l0b": gru_dir(E),
                "l1f": gru_dir(2 * H), "l1b": gru_dir(2 * H)},
        "g2h": {"w": nrm((4 * H, H)), "b": nrm((1, H))},
        "h2o": {"w": nrm((H, 1)), "b": nrm((1, 1))},
    }


if __name__ == "__main__":
    B, T, V, E, H = 2, 8, 50, 32, 32   # small shapes: batch=2, seq=8, vocab=50, emb=32, hidden=32

    key = jax.random.PRNGKey(0)
    pkey, dkey = jax.random.split(key)
    params = init_params(pkey, V, E, H)
    token_ids = jax.random.randint(dkey, (B, T), 0, V, dtype=jnp.int32)

    out = discriminator_forward(token_ids, params)
    out = jax.block_until_ready(out)

    ref = ref_forward(token_ids, params)
    assert out.shape == (B, 1), out.shape
    assert bool(jnp.all(jnp.isfinite(out)))
    # Kernel uses bf16 MXU operands with f32 accumulation -> slightly looser tolerance vs f32 ref.
    assert bool(jnp.allclose(out, ref, rtol=5e-2, atol=1e-2)), (out, ref)

    print("KERNEL_OK")
</pallas_src>

<mosaic_0001>
module attributes {stable_mosaic.version = 11 : i64} {
  func.func @discriminator_kernel(%arg0: i32, %arg1: memref<8x2x32xf32, #tpu.memory_space<vmem>>, %arg2: memref<32x96xbf16, #tpu.memory_space<vmem>>, %arg3: memref<1x96xf32, #tpu.memory_space<vmem>>, %arg4: memref<32x96xbf16, #tpu.memory_space<vmem>>, %arg5: memref<1x32xf32, #tpu.memory_space<vmem>>, %arg6: memref<32x96xbf16, #tpu.memory_space<vmem>>, %arg7: memref<1x96xf32, #tpu.memory_space<vmem>>, %arg8: memref<32x96xbf16, #tpu.memory_space<vmem>>, %arg9: memref<1x32xf32, #tpu.memory_space<vmem>>, %arg10: memref<32x96xbf16, #tpu.memory_space<vmem>>, %arg11: memref<32x96xbf16, #tpu.memory_space<vmem>>, %arg12: memref<1x96xf32, #tpu.memory_space<vmem>>, %arg13: memref<32x96xbf16, #tpu.memory_space<vmem>>, %arg14: memref<1x32xf32, #tpu.memory_space<vmem>>, %arg15: memref<32x96xbf16, #tpu.memory_space<vmem>>, %arg16: memref<32x96xbf16, #tpu.memory_space<vmem>>, %arg17: memref<1x96xf32, #tpu.memory_space<vmem>>, %arg18: memref<32x96xbf16, #tpu.memory_space<vmem>>, %arg19: memref<1x32xf32, #tpu.memory_space<vmem>>, %arg20: memref<128x32xf32, #tpu.memory_space<vmem>>, %arg21: memref<1x32xf32, #tpu.memory_space<vmem>>, %arg22: memref<1x32xf32, #tpu.memory_space<vmem>>, %arg23: memref<1x1xf32, #tpu.memory_space<vmem>>, %arg24: memref<2x1xf32, #tpu.memory_space<vmem>>, %arg25: memref<8x2x32xf32, #tpu.memory_space<vmem>>, %arg26: memref<8x2x32xf32, #tpu.memory_space<vmem>>, %arg27: memref<8x2x96xf32, #tpu.memory_space<vmem>>, %arg28: memref<8x2x96xf32, #tpu.memory_space<vmem>>) attributes {dimension_semantics = [#tpu.dimension_semantics<parallel>], iteration_bounds = array<i64: 1>, scalar_prefetch = 0 : i64, scratch_operands = 4 : i64, tpu.core_type = #tpu.core_type<tc>, window_params = [{transform_indices = @transform_0, window_bounds = array<i64: 8, 2, 32>}, {pipeline_mode = #tpu.pipeline_mode<synchronous>, transform_indices = @transform_1, window_bounds = array<i64: 32, 96>}, {pipeline_mode = #tpu.pipeline_mode<synchronous>, transform_indices = @transform_2, window_bounds = array<i64: 1, 96>}, {pipeline_mode = #tpu.pipeline_mode<synchronous>, transform_indices = @transform_3, window_bounds = array<i64: 32, 96>}, {pipeline_mode = #tpu.pipeline_mode<synchronous>, transform_indices = @transform_4, window_bounds = array<i64: 1, 32>}, {pipeline_mode = #tpu.pipeline_mode<synchronous>, transform_indices = @transform_5, window_bounds = array<i64: 32, 96>}, {pipeline_mode = #tpu.pipeline_mode<synchronous>, transform_indices = @transform_6, window_bounds = array<i64: 1, 96>}, {pipeline_mode = #tpu.pipeline_mode<synchronous>, transform_indices = @transform_7, window_bounds = array<i64: 32, 96>}, {pipeline_mode = #tpu.pipeline_mode<synchronous>, transform_indices = @transform_8, window_bounds = array<i64: 1, 32>}, {pipeline_mode = #tpu.pipeline_mode<synchronous>, transform_indices = @transform_9, window_bounds = array<i64: 32, 96>}, {pipeline_mode = #tpu.pipeline_mode<synchronous>, transform_indices = @transform_10, window_bounds = array<i64: 32, 96>}, {pipeline_mode = #tpu.pipeline_mode<synchronous>, transform_indices = @transform_11, window_bounds = array<i64: 1, 96>}, {pipeline_mode = #tpu.pipeline_mode<synchronous>, transform_indices = @transform_12, window_bounds = array<i64: 32, 96>}, {pipeline_mode = #tpu.pipeline_mode<synchronous>, transform_indices = @transform_13, window_bounds = array<i64: 1, 32>}, {pipeline_mode = #tpu.pipeline_mode<synchronous>, transform_indices = @transform_14, window_bounds = array<i64: 32, 96>}, {pipeline_mode = #tpu.pipeline_mode<synchronous>, transform_indices = @transform_15, window_bounds = array<i64: 32, 96>}, {pipeline_mode = #tpu.pipeline_mode<synchronous>, transform_indices = @transform_16, window_bounds = array<i64: 1, 96>}, {pipeline_mode = #tpu.pipeline_mode<synchronous>, transform_indices = @transform_17, window_bounds = array<i64: 32, 96>}, {pipeline_mode = #tpu.pipeline_mode<synchronous>, transform_indices = @transform_18, window_bounds = array<i64: 1, 32>}, {pipeline_mode = #tpu.pipeline_mode<synchronous>, transform_indices = @transform_19, window_bounds = array<i64: 128, 32>}, {pipeline_mode = #tpu.pipeline_mode<synchronous>, transform_indices = @transform_20, window_bounds = array<i64: 1, 32>}, {pipeline_mode = #tpu.pipeline_mode<synchronous>, transform_indices = @transform_21, window_bounds = array<i64: 1, 32>}, {pipeline_mode = #tpu.pipeline_mode<synchronous>, transform_indices = @transform_22, window_bounds = array<i64: 1, 1>}, {transform_indices = @transform_23, window_bounds = array<i64: 2, 1>}]} {
    %c0 = arith.constant 0 : index
    %c0_0 = arith.constant 0 : index
    %0 = vector.load %arg2[%c0, %c0_0] : memref<32x96xbf16, #tpu.memory_space<vmem>>, vector<32x96xbf16>
    %c0_1 = arith.constant 0 : index
    %c0_2 = arith.constant 0 : index
    %1 = vector.load %arg3[%c0_1, %c0_2] : memref<1x96xf32, #tpu.memory_space<vmem>>, vector<1x96xf32>
    %c0_3 = arith.constant 0 : index
    %c0_4 = arith.constant 0 : index
    %2 = vector.load %arg6[%c0_3, %c0_4] : memref<32x96xbf16, #tpu.memory_space<vmem>>, vector<32x96xbf16>
    %c0_5 = arith.constant 0 : index
    %c0_6 = arith.constant 0 : index
    %3 = vector.load %arg7[%c0_5, %c0_6] : memref<1x96xf32, #tpu.memory_space<vmem>>, vector<1x96xf32>
    %c0_i32 = arith.constant 0 : i32
    %c1_i32 = arith.constant 1 : i32
    %4 = arith.muli %c0_i32, %c1_i32 : i32
    %c0_i32_7 = arith.constant 0 : i32
    %5 = arith.addi %c0_i32_7, %4 : i32
    %6 = arith.index_cast %5 : i32 to index
    %c0_8 = arith.constant 0 : index
    %c0_9 = arith.constant 0 : index
    %7 = vector.load %arg1[%6, %c0_8, %c0_9] : memref<8x2x32xf32, #tpu.memory_space<vmem>>, vector<1x2x32xf32>
    %8 = vector.shape_cast %7 : vector<1x2x32xf32> to vector<2x32xf32>
    %9 = arith.truncf %8 : vector<2x32xf32> to vector<2x32xbf16>
    %cst = arith.constant dense<0.000000e+00> : vector<2x96xf32>
    %10 = tpu.matmul %9, %0, %cst {dimension_numbers = #tpu.dot_dimension_numbers<[1], [0], [0], [1], [0, 0, 1, 1], [], []>} : vector<2x32xbf16>, vector<32x96xbf16>, vector<2x96xf32> -> vector<2x96xf32>
    %11 = vector.broadcast %1 : vector<1x96xf32> to vector<2x96xf32>
    %12 = arith.addf %10, %11 : vector<2x96xf32>
    %13 = arith.index_cast %5 : i32 to index
    %c0_10 = arith.constant 0 : index
    %c0_11 = arith.constant 0 : index
    %14 = vector.load %arg27[%13, %c0_10, %c0_11] : memref<8x2x96xf32, #tpu.memory_space<vmem>>, vector<1x2x96xf32>
    %15 = vector.shape_cast %14 : vector<1x2x96xf32> to vector<2x96xf32>
    %16 = vector.shape_cast %12 : vector<2x96xf32> to vector<1x2x96xf32>
    tpu.vector_store %arg27[%13, %c0_10, %c0_11], %16 {strides = array<i32>} : memref<8x2x96xf32, #tpu.memory_space<vmem>>, vector<1x2x96xf32>,
    %cst_12 = arith.constant dense<0.000000e+00> : vector<2x96xf32>
    %17 = tpu.matmul %9, %2, %cst_12 {dimension_numbers = #tpu.dot_dimension_numbers<[1], [0], [0], [1], [0, 0, 1, 1], [], []>} : vector<2x32xbf16>, vector<32x96xbf16>, vector<2x96xf32> -> vector<2x96xf32>
    %18 = vector.broadcast %3 : vector<1x96xf32> to vector<2x96xf32>
    %19 = arith.addf %17, %18 : vector<2x96xf32>
    %20 = arith.index_cast %5 : i32 to index
    %c0_13 = arith.constant 0 : index
    %c0_14 = arith.constant 0 : index
    %21 = vector.load %arg28[%20, %c0_13, %c0_14] : memref<8x2x96xf32, #tpu.memory_space<vmem>>, vector<1x2x96xf32>
    %22 = vector.shape_cast %21 : vector<1x2x96xf32> to vector<2x96xf32>
    %23 = vector.shape_cast %19 : vector<2x96xf32> to vector<1x2x96xf32>
    tpu.vector_store %arg28[%20, %c0_13, %c0_14], %23 {strides = array<i32>} : memref<8x2x96xf32, #tpu.memory_space<vmem>>, vector<1x2x96xf32>,
    %c1_i32_15 = arith.constant 1 : i32
    %c1_i32_16 = arith.constant 1 : i32
    %24 = arith.muli %c1_i32_15, %c1_i32_16 : i32
    %c0_i32_17 = arith.constant 0 : i32
    %25 = arith.addi %c0_i32_17, %24 : i32
    %26 = arith.index_cast %25 : i32 to index
    %c0_18 = arith.constant 0 : index
    %c0_19 = arith.constant 0 : index
    %27 = vector.load %arg1[%26, %c0_18, %c0_19] : memref<8x2x32xf32, #tpu.memory_space<vmem>>, vector<1x2x32xf32>
    %28 = vector.shape_cast %27 : vector<1x2x32xf32> to vector<2x32xf32>
    %29 = arith.truncf %28 : vector<2x32xf32> to vector<2x32xbf16>
    %cst_20 = arith.constant dense<0.000000e+00> : vector<2x96xf32>
    %30 = tpu.matmul %29, %0, %cst_20 {dimension_numbers = #tpu.dot_dimension_numbers<[1], [0], [0], [1], [0, 0, 1, 1], [], []>} : vector<2x32xbf16>, vector<32x96xbf16>, vector<2x96xf32> -> vector<2x96xf32>
    %31 = vector.broadcast %1 : vector<1x96xf32> to vector<2x96xf32>
    %32 = arith.addf %30, %31 : vector<2x96xf32>
    %33 = arith.index_cast %25 : i32 to index
    %c0_21 = arith.constant 0 : index
    %c0_22 = arith.constant 0 : index
    %34 = vector.load %arg27[%33, %c0_21, %c0_22] : memref<8x2x96xf32, #tpu.memory_space<vmem>>, vector<1x2x96xf32>
    %35 = vector.shape_cast %34 : vector<1x2x96xf32> to vector<2x96xf32>
    %36 = vector.shape_cast %32 : vector<2x96xf32> to vector<1x2x96xf32>
    tpu.vector_store %arg27[%33, %c0_21, %c0_22], %36 {strides = array<i32>} : memref<8x2x96xf32, #tpu.memory_space<vmem>>, vector<1x2x96xf32>,
    %cst_23 = arith.constant dense<0.000000e+00> : vector<2x96xf32>
    %37 = tpu.matmul %29, %2, %cst_23 {dimension_numbers = #tpu.dot_dimension_numbers<[1], [0], [0], [1], [0, 0, 1, 1], [], []>} : vector<2x32xbf16>, vector<32x96xbf16>, vector<2x96xf32> -> vector<2x96xf32>
    %38 = vector.broadcast %3 : vector<1x96xf32> to vector<2x96xf32>
    %39 = arith.addf %37, %38 : vector<2x96xf32>
    %40 = arith.index_cast %25 : i32 to index
    %c0_24 = arith.constant 0 : index
    %c0_25 = arith.constant 0 : index
    %41 = vector.load %arg28[%40, %c0_24, %c0_25] : memref<8x2x96xf32, #tpu.memory_space<vmem>>, vector<1x2x96xf32>
    %42 = vector.shape_cast %41 : vector<1x2x96xf32> to vector<2x96xf32>
    %43 = vector.shape_cast %39 : vector<2x96xf32> to vector<1x2x96xf32>
    tpu.vector_store %arg28[%40, %c0_24, %c0_25], %43 {strides = array<i32>} : memref<8x2x96xf32, #tpu.memory_space<vmem>>, vector<1x2x96xf32>,
    %c2_i32 = arith.constant 2 : i32
    %c1_i32_26 = arith.constant 1 : i32
    %44 = arith.muli %c2_i32, %c1_i32_26 : i32
    %c0_i32_27 = arith.constant 0 : i32
    %45 = arith.addi %c0_i32_27, %44 : i32
    %46 = arith.index_cast %45 : i32 to index
    %c0_28 = arith.constant 0 : index
    %c0_29 = arith.constant 0 : index
    %47 = vector.load %arg1[%46, %c0_28, %c0_29] : memref<8x2x32xf32, #tpu.memory_space<vmem>>, vector<1x2x32xf32>
    %48 = vector.shape_cast %47 : vector<1x2x32xf32> to vector<2x32xf32>
    %49 = arith.truncf %48 : vector<2x32xf32> to vector<2x32xbf16>
    %cst_30 = arith.constant dense<0.000000e+00> : vector<2x96xf32>
    %50 = tpu.matmul %49, %0, %cst_30 {dimension_numbers = #tpu.dot_dimension_numbers<[1], [0], [0], [1], [0, 0, 1, 1], [], []>} : vector<2x32xbf16>, vector<32x96xbf16>, vector<2x96xf32> -> vector<2x96xf32>
    %51 = vector.broadcast %1 : vector<1x96xf32> to vector<2x96xf32>
    %52 = arith.addf %50, %51 : vector<2x96xf32>
    %53 = arith.index_cast %45 : i32 to index
    %c0_31 = arith.constant 0 : index
    %c0_32 = arith.constant 0 : index
    %54 = vector.load %arg27[%53, %c0_31, %c0_32] : memref<8x2x96xf32, #tpu.memory_space<vmem>>, vector<1x2x96xf32>
    %55 = vector.shape_cast %54 : vector<1x2x96xf32> to vector<2x96xf32>
    %56 = vector.shape_cast %52 : vector<2x96xf32> to vector<1x2x96xf32>
    tpu.vector_store %arg27[%53, %c0_31, %c0_32], %56 {strides = array<i32>} : memref<8x2x96xf32, #tpu.memory_space<vmem>>, vector<1x2x96xf32>,
    %cst_33 = arith.constant dense<0.000000e+00> : vector<2x96xf32>
    %57 = tpu.matmul %49, %2, %cst_33 {dimension_numbers = #tpu.dot_dimension_numbers<[1], [0], [0], [1], [0, 0, 1, 1], [], []>} : vector<2x32xbf16>, vector<32x96xbf16>, vector<2x96xf32> -> vector<2x96xf32>
    %58 = vector.broadcast %3 : vector<1x96xf32> to vector<2x96xf32>
    %59 = arith.addf %57, %58 : vector<2x96xf32>
    %60 = arith.index_cast %45 : i32 to index
    %c0_34 = arith.constant 0 : index
    %c0_35 = arith.constant 0 : index
    %61 = vector.load %arg28[%60, %c0_34, %c0_35] : memref<8x2x96xf32, #tpu.memory_space<vmem>>, vector<1x2x96xf32>
    %62 = vector.shape_cast %61 : vector<1x2x96xf32> to vector<2x96xf32>
    %63 = vector.shape_cast %59 : vector<2x96xf32> to vector<1x2x96xf32>
    tpu.vector_store %arg28[%60, %c0_34, %c0_35], %63 {strides = array<i32>} : memref<8x2x96xf32, #tpu.memory_space<vmem>>, vector<1x2x96xf32>,
    %c3_i32 = arith.constant 3 : i32
    %c1_i32_36 = arith.constant 1 : i32
    %64 = arith.muli %c3_i32, %c1_i32_36 : i32
    %c0_i32_37 = arith.constant 0 : i32
    %65 = arith.addi %c0_i32_37, %64 : i32
    %66 = arith.index_cast %65 : i32 to index
    %c0_38 = arith.constant 0 : index
    %c0_39 = arith.constant 0 : index
    %67 = vector.load %arg1[%66, %c0_38, %c0_39] : memref<8x2x32xf32, #tpu.memory_space<vmem>>, vector<1x2x32xf32>
    %68 = vector.shape_cast %67 : vector<1x2x32xf32> to vector<2x32xf32>
    %69 = arith.truncf %68 : vector<2x32xf32> to vector<2x32xbf16>
    %cst_40 = arith.constant dense<0.000000e+00> : vector<2x96xf32>
    %70 = tpu.matmul %69, %0, %cst_40 {dimension_numbers = #tpu.dot_dimension_numbers<[1], [0], [0], [1], [0, 0, 1, 1], [], []>} : vector<2x32xbf16>, vector<32x96xbf16>, vector<2x96xf32> -> vector<2x96xf32>
    %71 = vector.broadcast %1 : vector<1x96xf32> to vector<2x96xf32>
    %72 = arith.addf %70, %71 : vector<2x96xf32>
    %73 = arith.index_cast %65 : i32 to index
    %c0_41 = arith.constant 0 : index
    %c0_42 = arith.constant 0 : index
    %74 = vector.load %arg27[%73, %c0_41, %c0_42] : memref<8x2x96xf32, #tpu.memory_space<vmem>>, vector<1x2x96xf32>
    %75 = vector.shape_cast %74 : vector<1x2x96xf32> to vector<2x96xf32>
    %76 = vector.shape_cast %72 : vector<2x96xf32> to vector<1x2x96xf32>
    tpu.vector_store %arg27[%73, %c0_41, %c0_42], %76 {strides = array<i32>} : memref<8x2x96xf32, #tpu.memory_space<vmem>>, vector<1x2x96xf32>,
    %cst_43 = arith.constant dense<0.000000e+00> : vector<2x96xf32>
    %77 = tpu.matmul %69, %2, %cst_43 {dimension_numbers = #tpu.dot_dimension_numbers<[1], [0], [0], [1], [0, 0, 1, 1], [], []>} : vector<2x32xbf16>, vector<32x96xbf16>, vector<2x96xf32> -> vector<2x96xf32>
    %78 = vector.broadcast %3 : vector<1x96xf32> to vector<2x96xf32>
    %79 = arith.addf %77, %78 : vector<2x96xf32>
    %80 = arith.index_cast %65 : i32 to index
    %c0_44 = arith.constant 0 : index
    %c0_45 = arith.constant 0 : index
    %81 = vector.load %arg28[%80, %c0_44, %c0_45] : memref<8x2x96xf32, #tpu.memory_space<vmem>>, vector<1x2x96xf32>
    %82 = vector.shape_cast %81 : vector<1x2x96xf32> to vector<2x96xf32>
    %83 = vector.shape_cast %79 : vector<2x96xf32> to vector<1x2x96xf32>
    tpu.vector_store %arg28[%80, %c0_44, %c0_45], %83 {strides = array<i32>} : memref<8x2x96xf32, #tpu.memory_space<vmem>>, vector<1x2x96xf32>,
    %c4_i32 = arith.constant 4 : i32
    %c1_i32_46 = arith.constant 1 : i32
    %84 = arith.muli %c4_i32, %c1_i32_46 : i32
    %c0_i32_47 = arith.constant 0 : i32
    %85 = arith.addi %c0_i32_47, %84 : i32
    %86 = arith.index_cast %85 : i32 to index
    %c0_48 = arith.constant 0 : index
    %c0_49 = arith.constant 0 : index
    %87 = vector.load %arg1[%86, %c0_48, %c0_49] : memref<8x2x32xf32, #tpu.memory_space<vmem>>, vector<1x2x32xf32>
    %88 = vector.shape_cast %87 : vector<1x2x32xf32> to vector<2x32xf32>
    %89 = arith.truncf %88 : vector<2x32xf32> to vector<2x32xbf16>
    %cst_50 = arith.constant dense<0.000000e+00> : vector<2x96xf32>
    %90 = tpu.matmul %89, %0, %cst_50 {dimension_numbers = #tpu.dot_dimension_numbers<[1], [0], [0], [1], [0, 0, 1, 1], [], []>} : vector<2x32xbf16>, vector<32x96xbf16>, vector<2x96xf32> -> vector<2x96xf32>
    %91 = vector.broadcast %1 : vector<1x96xf32> to vector<2x96xf32>
    %92 = arith.addf %90, %91 : vector<2x96xf32>
    %93 = arith.index_cast %85 : i32 to index
    %c0_51 = arith.constant 0 : index
    %c0_52 = arith.constant 0 : index
    %94 = vector.load %arg27[%93, %c0_51, %c0_52] : memref<8x2x96xf32, #tpu.memory_space<vmem>>, vector<1x2x96xf32>
    %95 = vector.shape_cast %94 : vector<1x2x96xf32> to vector<2x96xf32>
    %96 = vector.shape_cast %92 : vector<2x96xf32> to vector<1x2x96xf32>
    tpu.vector_store %arg27[%93, %c0_51, %c0_52], %96 {strides = array<i32>} : memref<8x2x96xf32, #tpu.memory_space<vmem>>, vector<1x2x96xf32>,
    %cst_53 = arith.constant dense<0.000000e+00> : vector<2x96xf32>
    %97 = tpu.matmul %89, %2, %cst_53 {dimension_numbers = #tpu.dot_dimension_numbers<[1], [0], [0], [1], [0, 0, 1, 1], [], []>} : vector<2x32xbf16>, vector<32x96xbf16>, vector<2x96xf32> -> vector<2x96xf32>
    %98 = vector.broadcast %3 : vector<1x96xf32> to vector<2x96xf32>
    %99 = arith.addf %97, %98 : vector<2x96xf32>
    %100 = arith.index_cast %85 : i32 to index
    %c0_54 = arith.constant 0 : index
    %c0_55 = arith.constant 0 : index
    %101 = vector.load %arg28[%100, %c0_54, %c0_55] : memref<8x2x96xf32, #tpu.memory_space<vmem>>, vector<1x2x96xf32>
    %102 = vector.shape_cast %101 : vector<1x2x96xf32> to vector<2x96xf32>
    %103 = vector.shape_cast %99 : vector<2x96xf32> to vector<1x2x96xf32>
    tpu.vector_store %arg28[%100, %c0_54, %c0_55], %103 {strides = array<i32>} : memref<8x2x96xf32, #tpu.memory_space<vmem>>, vector<1x2x96xf32>,
    %c5_i32 = arith.constant 5 : i32
    %c1_i32_56 = arith.constant 1 : i32
    %104 = arith.muli %c5_i32, %c1_i32_56 : i32
    %c0_i32_57 = arith.constant 0 : i32
    %105 = arith.addi %c0_i32_57, %104 : i32
    %106 = arith.index_cast %105 : i32 to index
    %c0_58 = arith.constant 0 : index
    %c0_59 = arith.constant 0 : index
    %107 = vector.load %arg1[%106, %c0_58, %c0_59] : memref<8x2x32xf32, #tpu.memory_space<vmem>>, vector<1x2x32xf32>
    %108 = vector.shape_cast %107 : vector<1x2x32xf32> to vector<2x32xf32>
    %109 = arith.truncf %108 : vector<2x32xf32> to vector<2x32xbf16>
    %cst_60 = arith.constant dense<0.000000e+00> : vector<2x96xf32>
    %110 = tpu.matmul %109, %0, %cst_60 {dimension_numbers = #tpu.dot_dimension_numbers<[1], [0], [0], [1], [0, 0, 1, 1], [], []>} : vector<2x32xbf16>, vector<32x96xbf16>, vector<2x96xf32> -> vector<2x96xf32>
    %111 = vector.broadcast %1 : vector<1x96xf32> to vector<2x96xf32>
    %112 = arith.addf %110, %111 : vector<2x96xf32>
    %113 = arith.index_cast %105 : i32 to index
    %c0_61 = arith.constant 0 : index
    %c0_62 = arith.constant 0 : index
    %114 = vector.load %arg27[%113, %c0_61, %c0_62] : memref<8x2x96xf32, #tpu.memory_space<vmem>>, vector<1x2x96xf32>
    %115 = vector.shape_cast %114 : vector<1x2x96xf32> to vector<2x96xf32>
    %116 = vector.shape_cast %112 : vector<2x96xf32> to vector<1x2x96xf32>
    tpu.vector_store %arg27[%113, %c0_61, %c0_62], %116 {strides = array<i32>} : memref<8x2x96xf32, #tpu.memory_space<vmem>>, vector<1x2x96xf32>,
    %cst_63 = arith.constant dense<0.000000e+00> : vector<2x96xf32>
    %117 = tpu.matmul %109, %2, %cst_63 {dimension_numbers = #tpu.dot_dimension_numbers<[1], [0], [0], [1], [0, 0, 1, 1], [], []>} : vector<2x32xbf16>, vector<32x96xbf16>, vector<2x96xf32> -> vector<2x96xf32>
    %118 = vector.broadcast %3 : vector<1x96xf32> to vector<2x96xf32>
    %119 = arith.addf %117, %118 : vector<2x96xf32>
    %120 = arith.index_cast %105 : i32 to index
    %c0_64 = arith.constant 0 : index
    %c0_65 = arith.constant 0 : index
    %121 = vector.load %arg28[%120, %c0_64, %c0_65] : memref<8x2x96xf32, #tpu.memory_space<vmem>>, vector<1x2x96xf32>
    %122 = vector.shape_cast %121 : vector<1x2x96xf32> to vector<2x96xf32>
    %123 = vector.shape_cast %119 : vector<2x96xf32> to vector<1x2x96xf32>
    tpu.vector_store %arg28[%120, %c0_64, %c0_65], %123 {strides = array<i32>} : memref<8x2x96xf32, #tpu.memory_space<vmem>>, vector<1x2x96xf32>,
    %c6_i32 = arith.constant 6 : i32
    %c1_i32_66 = arith.constant 1 : i32
    %124 = arith.muli %c6_i32, %c1_i32_66 : i32
    %c0_i32_67 = arith.constant 0 : i32
    %125 = arith.addi %c0_i32_67, %124 : i32
    %126 = arith.index_cast %125 : i32 to index
    %c0_68 = arith.constant 0 : index
    %c0_69 = arith.constant 0 : index
    %127 = vector.load %arg1[%126, %c0_68, %c0_69] : memref<8x2x32xf32, #tpu.memory_space<vmem>>, vector<1x2x32xf32>
    %128 = vector.shape_cast %127 : vector<1x2x32xf32> to vector<2x32xf32>
    %129 = arith.truncf %128 : vector<2x32xf32> to vector<2x32xbf16>
    %cst_70 = arith.constant dense<0.000000e+00> : vector<2x96xf32>
    %130 = tpu.matmul %129, %0, %cst_70 {dimension_numbers = #tpu.dot_dimension_numbers<[1], [0], [0], [1], [0, 0, 1, 1], [], []>} : vector<2x32xbf16>, vector<32x96xbf16>, vector<2x96xf32> -> vector<2x96xf32>
    %131 = vector.broadcast %1 : vector<1x96xf32> to vector<2x96xf32>
    %132 = arith.addf %130, %131 : vector<2x96xf32>
    %133 = arith.index_cast %125 : i32 to index
    %c0_71 = arith.constant 0 : index
    %c0_72 = arith.constant 0 : index
    %134 = vector.load %arg27[%133, %c0_71, %c0_72] : memref<8x2x96xf32, #tpu.memory_space<vmem>>, vector<1x2x96xf32>
    %135 = vector.shape_cast %134 : vector<1x2x96xf32> to vector<2x96xf32>
    %136 = vector.shape_cast %132 : vector<2x96xf32> to vector<1x2x96xf32>
    tpu.vector_store %arg27[%133, %c0_71, %c0_72], %136 {strides = array<i32>} : memref<8x2x96xf32, #tpu.memory_space<vmem>>, vector<1x2x96xf32>,
    %cst_73 = arith.constant dense<0.000000e+00> : vector<2x96xf32>
    %137 = tpu.matmul %129, %2, %cst_73 {dimension_numbers = #tpu.dot_dimension_numbers<[1], [0], [0], [1], [0, 0, 1, 1], [], []>} : vector<2x32xbf16>, vector<32x96xbf16>, vector<2x96xf32> -> vector<2x96xf32>
    %138 = vector.broadcast %3 : vector<1x96xf32> to vector<2x96xf32>
    %139 = arith.addf %137, %138 : vector<2x96xf32>
    %140 = arith.index_cast %125 : i32 to index
    %c0_74 = arith.constant 0 : index
    %c0_75 = arith.constant 0 : index
    %141 = vector.load %arg28[%140, %c0_74, %c0_75] : memref<8x2x96xf32, #tpu.memory_space<vmem>>, vector<1x2x96xf32>
    %142 = vector.shape_cast %141 : vector<1x2x96xf32> to vector<2x96xf32>
    %143 = vector.shape_cast %139 : vector<2x96xf32> to vector<1x2x96xf32>
    tpu.vector_store %arg28[%140, %c0_74, %c0_75], %143 {strides = array<i32>} : memref<8x2x96xf32, #tpu.memory_space<vmem>>, vector<1x2x96xf32>,
    %c7_i32 = arith.constant 7 : i32
    %c1_i32_76 = arith.constant 1 : i32
    %144 = arith.muli %c7_i32, %c1_i32_76 : i32
    %c0_i32_77 = arith.constant 0 : i32
    %145 = arith.addi %c0_i32_77, %144 : i32
    %146 = arith.index_cast %145 : i32 to index
    %c0_78 = arith.constant 0 : index
    %c0_79 = arith.constant 0 : index
    %147 = vector.load %arg1[%146, %c0_78, %c0_79] : memref<8x2x32xf32, #tpu.memory_space<vmem>>, vector<1x2x32xf32>
    %148 = vector.shape_cast %147 : vector<1x2x32xf32> to vector<2x32xf32>
    %149 = arith.truncf %148 : vector<2x32xf32> to vector<2x32xbf16>
    %cst_80 = arith.constant dense<0.000000e+00> : vector<2x96xf32>
    %150 = tpu.matmul %149, %0, %cst_80 {dimension_numbers = #tpu.dot_dimension_numbers<[1], [0], [0], [1], [0, 0, 1, 1], [], []>} : vector<2x32xbf16>, vector<32x96xbf16>, vector<2x96xf32> -> vector<2x96xf32>
    %151 = vector.broadcast %1 : vector<1x96xf32> to vector<2x96xf32>
    %152 = arith.addf %150, %151 : vector<2x96xf32>
    %153 = arith.index_cast %145 : i32 to index
    %c0_81 = arith.constant 0 : index
    %c0_82 = arith.constant 0 : index
    %154 = vector.load %arg27[%153, %c0_81, %c0_82] : memref<8x2x96xf32, #tpu.memory_space<vmem>>, vector<1x2x96xf32>
    %155 = vector.shape_cast %154 : vector<1x2x96xf32> to vector<2x96xf32>
    %156 = vector.shape_cast %152 : vector<2x96xf32> to vector<1x2x96xf32>
    tpu.vector_store %arg27[%153, %c0_81, %c0_82], %156 {strides = array<i32>} : memref<8x2x96xf32, #tpu.memory_space<vmem>>, vector<1x2x96xf32>,
    %cst_83 = arith.constant dense<0.000000e+00> : vector<2x96xf32>
    %157 = tpu.matmul %149, %2, %cst_83 {dimension_numbers = #tpu.dot_dimension_numbers<[1], [0], [0], [1], [0, 0, 1, 1], [], []>} : vector<2x32xbf16>, vector<32x96xbf16>, vector<2x96xf32> -> vector<2x96xf32>
    %158 = vector.broadcast %3 : vector<1x96xf32> to vector<2x96xf32>
    %159 = arith.addf %157, %158 : vector<2x96xf32>
    %160 = arith.index_cast %145 : i32 to index
    %c0_84 = arith.constant 0 : index
    %c0_85 = arith.constant 0 : index
    %161 = vector.load %arg28[%160, %c0_84, %c0_85] : memref<8x2x96xf32, #tpu.memory_space<vmem>>, vector<1x2x96xf32>
    %162 = vector.shape_cast %161 : vector<1x2x96xf32> to vector<2x96xf32>
    %163 = vector.shape_cast %159 : vector<2x96xf32> to vector<1x2x96xf32>
    tpu.vector_store %arg28[%160, %c0_84, %c0_85], %163 {strides = array<i32>} : memref<8x2x96xf32, #tpu.memory_space<vmem>>, vector<1x2x96xf32>,
    %c8_i32 = arith.constant 8 : i32
    %cst_86 = arith.constant 0.000000e+00 : f32
    %164 = vector.broadcast %cst_86 : f32 to vector<2x32xf32>
    %c0_87 = arith.constant 0 : index
    %c0_88 = arith.constant 0 : index
    %165 = vector.load %arg4[%c0_87, %c0_88] : memref<32x96xbf16, #tpu.memory_space<vmem>>, vector<32x96xbf16>
    %c0_89 = arith.constant 0 : index
    %c0_90 = arith.constant 0 : index
    %166 = vector.load %arg5[%c0_89, %c0_90] : memref<1x32xf32, #tpu.memory_space<vmem>>, vector<1x32xf32>
    %c0_91 = arith.constant 0 : index
    %c0_92 = arith.constant 0 : index
    %167 = vector.load %arg8[%c0_91, %c0_92] : memref<32x96xbf16, #tpu.memory_space<vmem>>, vector<32x96xbf16>
    %c0_93 = arith.constant 0 : index
    %c0_94 = arith.constant 0 : index
    %168 = vector.load %arg9[%c0_93, %c0_94] : memref<1x32xf32, #tpu.memory_space<vmem>>, vector<1x32xf32>
    %c0_i32_95 = arith.constant 0 : i32
    %c7_i32_96 = arith.constant 7 : i32
    %169 = arith.subi %c7_i32_96, %c0_i32_95 : i32
    %170 = arith.index_cast %c0_i32_95 : i32 to index
    %c0_97 = arith.constant 0 : index
    %c0_98 = arith.constant 0 : index
    %171 = vector.load %arg27[%170, %c0_97, %c0_98] : memref<8x2x96xf32, #tpu.memory_space<vmem>>, vector<1x2x96xf32>
    %172 = vector.shape_cast %171 : vector<1x2x96xf32> to vector<2x96xf32>
    %173 = arith.truncf %164 : vector<2x32xf32> to vector<2x32xbf16>
    %cst_99 = arith.constant dense<0.000000e+00> : vector<2x96xf32>
    %174 = tpu.matmul %173, %165, %cst_99 {dimension_numbers = #tpu.dot_dimension_numbers<[1], [0], [0], [1], [0, 0, 1, 1], [], []>} : vector<2x32xbf16>, vector<32x96xbf16>, vector<2x96xf32> -> vector<2x96xf32>
    %175 = vector.extract_strided_slice %172 {offsets = [0, 0], sizes = [2, 32], strides = [1, 1]} : vector<2x96xf32> to vector<2x32xf32>
    %176 = vector.extract_strided_slice %174 {offsets = [0, 0], sizes = [2, 32], strides = [1, 1]} : vector<2x96xf32> to vector<2x32xf32>
    %177 = arith.addf %175, %176 : vector<2x32xf32>
    %178 = arith.negf %177 : vector<2x32xf32>
    %179 = math.exp %178 : vector<2x32xf32>
    %cst_100 = arith.constant 1.000000e+00 : f32
    %180 = vector.broadcast %cst_100 : f32 to vector<2x32xf32>
    %181 = arith.addf %180, %179 : vector<2x32xf32>
    %182 = arith.divf %180, %181 : vector<2x32xf32>
    %183 = vector.extract_strided_slice %172 {offsets = [0, 32], sizes = [2, 32], strides = [1, 1]} : vector<2x96xf32> to vector<2x32xf32>
    %184 = vector.extract_strided_slice %174 {offsets = [0, 32], sizes = [2, 32], strides = [1, 1]} : vector<2x96xf32> to vector<2x32xf32>
    %185 = arith.addf %183, %184 : vector<2x32xf32>
    %186 = arith.negf %185 : vector<2x32xf32>
    %187 = math.exp %186 : vector<2x32xf32>
    %cst_101 = arith.constant 1.000000e+00 : f32
    %188 = vector.broadcast %cst_101 : f32 to vector<2x32xf32>
    %189 = arith.addf %188, %187 : vector<2x32xf32>
    %190 = arith.divf %188, %189 : vector<2x32xf32>
    %191 = vector.extract_strided_slice %172 {offsets = [0, 64], sizes = [2, 32], strides = [1, 1]} : vector<2x96xf32> to vector<2x32xf32>
    %192 = vector.extract_strided_slice %174 {offsets = [0, 64], sizes = [2, 32], strides = [1, 1]} : vector<2x96xf32> to vector<2x32xf32>
    %193 = vector.broadcast %166 : vector<1x32xf32> to vector<2x32xf32>
    %194 = arith.addf %192, %193 : vector<2x32xf32>
    %195 = arith.mulf %182, %194 : vector<2x32xf32>
    %196 = arith.addf %191, %195 : vector<2x32xf32>
    %197 = math.tanh %196 : vector<2x32xf32>
    %cst_102 = arith.constant 1.000000e+00 : f32
    %198 = vector.broadcast %cst_102 : f32 to vector<2x32xf32>
    %199 = arith.subf %198, %190 : vector<2x32xf32>
    %200 = arith.mulf %199, %197 : vector<2x32xf32>
    %201 = arith.mulf %190, %164 : vector<2x32xf32>
    %202 = arith.addf %200, %201 : vector<2x32xf32>
    %203 = arith.index_cast %169 : i32 to index
    %c0_103 = arith.constant 0 : index
    %c0_104 = arith.constant 0 : index
    %204 = vector.load %arg28[%203, %c0_103, %c0_104] : memref<8x2x96xf32, #tpu.memory_space<vmem>>, vector<1x2x96xf32>
    %205 = vector.shape_cast %204 : vector<1x2x96xf32> to vector<2x96xf32>
    %206 = arith.truncf %164 : vector<2x32xf32> to vector<2x32xbf16>
    %cst_105 = arith.constant dense<0.000000e+00> : vector<2x96xf32>
    %207 = tpu.matmul %206, %167, %cst_105 {dimension_numbers = #tpu.dot_dimension_numbers<[1], [0], [0], [1], [0, 0, 1, 1], [], []>} : vector<2x32xbf16>, vector<32x96xbf16>, vector<2x96xf32> -> vector<2x96xf32>
    %208 = vector.extract_strided_slice %205 {offsets = [0, 0], sizes = [2, 32], strides = [1, 1]} : vector<2x96xf32> to vector<2x32xf32>
    %209 = vector.extract_strided_slice %207 {offsets = [0, 0], sizes = [2, 32], strides = [1, 1]} : vector<2x96xf32> to vector<2x32xf32>
    %210 = arith.addf %208, %209 : vector<2x32xf32>
    %211 = arith.negf %210 : vector<2x32xf32>
    %212 = math.exp %211 : vector<2x32xf32>
    %cst_106 = arith.constant 1.000000e+00 : f32
    %213 = vector.broadcast %cst_106 : f32 to vector<2x32xf32>
    %214 = arith.addf %213, %212 : vector<2x32xf32>
    %215 = arith.divf %213, %214 : vector<2x32xf32>
    %216 = vector.extract_strided_slice %205 {offsets = [0, 32], sizes = [2, 32], strides = [1, 1]} : vector<2x96xf32> to vector<2x32xf32>
    %217 = vector.extract_strided_slice %207 {offsets = [0, 32], sizes = [2, 32], strides = [1, 1]} : vector<2x96xf32> to vector<2x32xf32>
    %218 = arith.addf %216, %217 : vector<2x32xf32>
    %219 = arith.negf %218 : vector<2x32xf32>
    %220 = math.exp %219 : vector<2x32xf32>
    %cst_107 = arith.constant 1.000000e+00 : f32
    %221 = vector.broadcast %cst_107 : f32 to vector<2x32xf32>
    %222 = arith.addf %221, %220 : vector<2x32xf32>
    %223 = arith.divf %221, %222 : vector<2x32xf32>
    %224 = vector.extract_strided_slice %205 {offsets = [0, 64], sizes = [2, 32], strides = [1, 1]} : vector<2x96xf32> to vector<2x32xf32>
    %225 = vector.extract_strided_slice %207 {offsets = [0, 64], sizes = [2, 32], strides = [1, 1]} : vector<2x96xf32> to vector<2x32xf32>
    %226 = vector.broadcast %168 : vector<1x32xf32> to vector<2x32xf32>
    %227 = arith.addf %225, %226 : vector<2x32xf32>
    %228 = arith.mulf %215, %227 : vector<2x32xf32>
    %229 = arith.addf %224, %228 : vector<2x32xf32>
    %230 = math.tanh %229 : vector<2x32xf32>
    %cst_108 = arith.constant 1.000000e+00 : f32
    %231 = vector.broadcast %cst_108 : f32 to vector<2x32xf32>
    %232 = arith.subf %231, %223 : vector<2x32xf32>
    %233 = arith.mulf %232, %230 : vector<2x32xf32>
    %234 = arith.mulf %223, %164 : vector<2x32xf32>
    %235 = arith.addf %233, %234 : vector<2x32xf32>
    %236 = arith.index_cast %c0_i32_95 : i32 to index
    %c0_109 = arith.constant 0 : index
    %c0_110 = arith.constant 0 : index
    %237 = vector.load %arg25[%236, %c0_109, %c0_110] : memref<8x2x32xf32, #tpu.memory_space<vmem>>, vector<1x2x32xf32>
    %238 = vector.shape_cast %237 : vector<1x2x32xf32> to vector<2x32xf32>
    %239 = vector.shape_cast %202 : vector<2x32xf32> to vector<1x2x32xf32>
    tpu.vector_store %arg25[%236, %c0_109, %c0_110], %239 {strides = array<i32>} : memref<8x2x32xf32, #tpu.memory_space<vmem>>, vector<1x2x32xf32>,
    %240 = arith.index_cast %169 : i32 to index
    %c0_111 = arith.constant 0 : index
    %c0_112 = arith.constant 0 : index
    %241 = vector.load %arg26[%240, %c0_111, %c0_112] : memref<8x2x32xf32, #tpu.memory_space<vmem>>, vector<1x2x32xf32>
    %242 = vector.shape_cast %241 : vector<1x2x32xf32> to vector<2x32xf32>
    %243 = vector.shape_cast %235 : vector<2x32xf32> to vector<1x2x32xf32>
    tpu.vector_store %arg26[%240, %c0_111, %c0_112], %243 {strides = array<i32>} : memref<8x2x32xf32, #tpu.memory_space<vmem>>, vector<1x2x32xf32>,
    %c1_i32_113 = arith.constant 1 : i32
    %c7_i32_114 = arith.constant 7 : i32
    %244 = arith.subi %c7_i32_114, %c1_i32_113 : i32
    %245 = arith.index_cast %c1_i32_113 : i32 to index
    %c0_115 = arith.constant 0 : index
    %c0_116 = arith.constant 0 : index
    %246 = vector.load %arg27[%245, %c0_115, %c0_116] : memref<8x2x96xf32, #tpu.memory_space<vmem>>, vector<1x2x96xf32>
    %247 = vector.shape_cast %246 : vector<1x2x96xf32> to vector<2x96xf32>
    %248 = arith.truncf %202 : vector<2x32xf32> to vector<2x32xbf16>
    %cst_117 = arith.constant dense<0.000000e+00> : vector<2x96xf32>
    %249 = tpu.matmul %248, %165, %cst_117 {dimension_numbers = #tpu.dot_dimension_numbers<[1], [0], [0], [1], [0, 0, 1, 1], [], []>} : vector<2x32xbf16>, vector<32x96xbf16>, vector<2x96xf32> -> vector<2x96xf32>
    %250 = vector.extract_strided_slice %247 {offsets = [0, 0], sizes = [2, 32], strides = [1, 1]} : vector<2x96xf32> to vector<2x32xf32>
    %251 = vector.extract_strided_slice %249 {offsets = [0, 0], sizes = [2, 32], strides = [1, 1]} : vector<2x96xf32> to vector<2x32xf32>
    %252 = arith.addf %250, %251 : vector<2x32xf32>
    %253 = arith.negf %252 : vector<2x32xf32>
    %254 = math.exp %253 : vector<2x32xf32>
    %cst_118 = arith.constant 1.000000e+00 : f32
    %255 = vector.broadcast %cst_118 : f32 to vector<2x32xf32>
    %256 = arith.addf %255, %254 : vector<2x32xf32>
    %257 = arith.divf %255, %256 : vector<2x32xf32>
    %258 = vector.extract_strided_slice %247 {offsets = [0, 32], sizes = [2, 32], strides = [1, 1]} : vector<2x96xf32> to vector<2x32xf32>
    %259 = vector.extract_strided_slice %249 {offsets = [0, 32], sizes = [2, 32], strides = [1, 1]} : vector<2x96xf32> to vector<2x32xf32>
    %260 = arith.addf %258, %259 : vector<2x32xf32>
    %261 = arith.negf %260 : vector<2x32xf32>
    %262 = math.exp %261 : vector<2x32xf32>
    %cst_119 = arith.constant 1.000000e+00 : f32
    %263 = vector.broadcast %cst_119 : f32 to vector<2x32xf32>
    %264 = arith.addf %263, %262 : vector<2x32xf32>
    %265 = arith.divf %263, %264 : vector<2x32xf32>
    %266 = vector.extract_strided_slice %247 {offsets = [0, 64], sizes = [2, 32], strides = [1, 1]} : vector<2x96xf32> to vector<2x32xf32>
    %267 = vector.extract_strided_slice %249 {offsets = [0, 64], sizes = [2, 32], strides = [1, 1]} : vector<2x96xf32> to vector<2x32xf32>
    %268 = vector.broadcast %166 : vector<1x32xf32> to vector<2x32xf32>
    %269 = arith.addf %267, %268 : vector<2x32xf32>
    %270 = arith.mulf %257, %269 : vector<2x32xf32>
    %271 = arith.addf %266, %270 : vector<2x32xf32>
    %272 = math.tanh %271 : vector<2x32xf32>
    %cst_120 = arith.constant 1.000000e+00 : f32
    %273 = vector.broadcast %cst_120 : f32 to vector<2x32xf32>
    %274 = arith.subf %273, %265 : vector<2x32xf32>
    %275 = arith.mulf %274, %272 : vector<2x32xf32>
    %276 = arith.mulf %265, %202 : vector<2x32xf32>
    %277 = arith.addf %275, %276 : vector<2x32xf32>
    %278 = arith.index_cast %244 : i32 to index
    %c0_121 = arith.constant 0 : index
    %c0_122 = arith.constant 0 : index
    %279 = vector.load %arg28[%278, %c0_121, %c0_122] : memref<8x2x96xf32, #tpu.memory_space<vmem>>, vector<1x2x96xf32>
    %280 = vector.shape_cast %279 : vector<1x2x96xf32> to vector<2x96xf32>
    %281 = arith.truncf %235 : vector<2x32xf32> to vector<2x32xbf16>
    %cst_123 = arith.constant dense<0.000000e+00> : vector<2x96xf32>
    %282 = tpu.matmul %281, %167, %cst_123 {dimension_numbers = #tpu.dot_dimension_numbers<[1], [0], [0], [1], [0, 0, 1, 1], [], []>} : vector<2x32xbf16>, vector<32x96xbf16>, vector<2x96xf32> -> vector<2x96xf32>
    %283 = vector.extract_strided_slice %280 {offsets = [0, 0], sizes = [2, 32], strides = [1, 1]} : vector<2x96xf32> to vector<2x32xf32>
    %284 = vector.extract_strided_slice %282 {offsets = [0, 0], sizes = [2, 32], strides = [1, 1]} : vector<2x96xf32> to vector<2x32xf32>
    %285 = arith.addf %283, %284 : vector<2x32xf32>
    %286 = arith.negf %285 : vector<2x32xf32>
    %287 = math.exp %286 : vector<2x32xf32>
    %cst_124 = arith.constant 1.000000e+00 : f32
    %288 = vector.broadcast %cst_124 : f32 to vector<2x32xf32>
    %289 = arith.addf %288, %287 : vector<2x32xf32>
    %290 = arith.divf %288, %289 : vector<2x32xf32>
    %291 = vector.extract_strided_slice %280 {offsets = [0, 32], sizes = [2, 32], strides = [1, 1]} : vector<2x96xf32> to vector<2x32xf32>
    %292 = vector.extract_strided_slice %282 {offsets = [0, 32], sizes = [2, 32], strides = [1, 1]} : vector<2x96xf32> to vector<2x32xf32>
    %293 = arith.addf %291, %292 : vector<2x32xf32>
    %294 = arith.negf %293 : vector<2x32xf32>
    %295 = math.exp %294 : vector<2x32xf32>
    %cst_125 = arith.constant 1.000000e+00 : f32
    %296 = vector.broadcast %cst_125 : f32 to vector<2x32xf32>
    %297 = arith.addf %296, %295 : vector<2x32xf32>
    %298 = arith.divf %296, %297 : vector<2x32xf32>
    %299 = vector.extract_strided_slice %280 {offsets = [0, 64], sizes = [2, 32], strides = [1, 1]} : vector<2x96xf32> to vector<2x32xf32>
    %300 = vector.extract_strided_slice %282 {offsets = [0, 64], sizes = [2, 32], strides = [1, 1]} : vector<2x96xf32> to vector<2x32xf32>
    %301 = vector.broadcast %168 : vector<1x32xf32> to vector<2x32xf32>
    %302 = arith.addf %300, %301 : vector<2x32xf32>
    %303 = arith.mulf %290, %302 : vector<2x32xf32>
    %304 = arith.addf %299, %303 : vector<2x32xf32>
    %305 = math.tanh %304 : vector<2x32xf32>
    %cst_126 = arith.constant 1.000000e+00 : f32
    %306 = vector.broadcast %cst_126 : f32 to vector<2x32xf32>
    %307 = arith.subf %306, %298 : vector<2x32xf32>
    %308 = arith.mulf %307, %305 : vector<2x32xf32>
    %309 = arith.mulf %298, %235 : vector<2x32xf32>
    %310 = arith.addf %308, %309 : vector<2x32xf32>
    %311 = arith.index_cast %c1_i32_113 : i32 to index
    %c0_127 = arith.constant 0 : index
    %c0_128 = arith.constant 0 : index
    %312 = vector.load %arg25[%311, %c0_127, %c0_128] : memref<8x2x32xf32, #tpu.memory_space<vmem>>, vector<1x2x32xf32>
    %313 = vector.shape_cast %312 : vector<1x2x32xf32> to vector<2x32xf32>
    %314 = vector.shape_cast %277 : vector<2x32xf32> to vector<1x2x32xf32>
    tpu.vector_store %arg25[%311, %c0_127, %c0_128], %314 {strides = array<i32>} : memref<8x2x32xf32, #tpu.memory_space<vmem>>, vector<1x2x32xf32>,
    %315 = arith.index_cast %244 : i32 to index
    %c0_129 = arith.constant 0 : index
    %c0_130 = arith.constant 0 : index
    %316 = vector.load %arg26[%315, %c0_129, %c0_130] : memref<8x2x32xf32, #tpu.memory_space<vmem>>, vector<1x2x32xf32>
    %317 = vector.shape_cast %316 : vector<1x2x32xf32> to vector<2x32xf32>
    %318 = vector.shape_cast %310 : vector<2x32xf32> to vector<1x2x32xf32>
    tpu.vector_store %arg26[%315, %c0_129, %c0_130], %318 {strides = array<i32>} : memref<8x2x32xf32, #tpu.memory_space<vmem>>, vector<1x2x32xf32>,
    %c2_i32_131 = arith.constant 2 : i32
    %c7_i32_132 = arith.constant 7 : i32
    %319 = arith.subi %c7_i32_132, %c2_i32_131 : i32
    %320 = arith.index_cast %c2_i32_131 : i32 to index
    %c0_133 = arith.constant 0 : index
    %c0_134 = arith.constant 0 : index
    %321 = vector.load %arg27[%320, %c0_133, %c0_134] : memref<8x2x96xf32, #tpu.memory_space<vmem>>, vector<1x2x96xf32>
    %322 = vector.shape_cast %321 : vector<1x2x96xf32> to vector<2x96xf32>
    %323 = arith.truncf %277 : vector<2x32xf32> to vector<2x32xbf16>
    %cst_135 = arith.constant dense<0.000000e+00> : vector<2x96xf32>
    %324 = tpu.matmul %323, %165, %cst_135 {dimension_numbers = #tpu.dot_dimension_numbers<[1], [0], [0], [1], [0, 0, 1, 1], [], []>} : vector<2x32xbf16>, vector<32x96xbf16>, vector<2x96xf32> -> vector<2x96xf32>
    %325 = vector.extract_strided_slice %322 {offsets = [0, 0], sizes = [2, 32], strides = [1, 1]} : vector<2x96xf32> to vector<2x32xf32>
    %326 = vector.extract_strided_slice %324 {offsets = [0, 0], sizes = [2, 32], strides = [1, 1]} : vector<2x96xf32> to vector<2x32xf32>
    %327 = arith.addf %325, %326 : vector<2x32xf32>
    %328 = arith.negf %327 : vector<2x32xf32>
    %329 = math.exp %328 : vector<2x32xf32>
    %cst_136 = arith.constant 1.000000e+00 : f32
    %330 = vector.broadcast %cst_136 : f32 to vector<2x32xf32>
    %331 = arith.addf %330, %329 : vector<2x32xf32>
    %332 = arith.divf %330, %331 : vector<2x32xf32>
    %333 = vector.extract_strided_slice %322 {offsets = [0, 32], sizes = [2, 32], strides = [1, 1]} : vector<2x96xf32> to vector<2x32xf32>
    %334 = vector.extract_strided_slice %324 {offsets = [0, 32], sizes = [2, 32], strides = [1, 1]} : vector<2x96xf32> to vector<2x32xf32>
    %335 = arith.addf %333, %334 : vector<2x32xf32>
    %336 = arith.negf %335 : vector<2x32xf32>
    %337 = math.exp %336 : vector<2x32xf32>
    %cst_137 = arith.constant 1.000000e+00 : f32
    %338 = vector.broadcast %cst_137 : f32 to vector<2x32xf32>
    %339 = arith.addf %338, %337 : vector<2x32xf32>
    %340 = arith.divf %338, %339 : vector<2x32xf32>
    %341 = vector.extract_strided_slice %322 {offsets = [0, 64], sizes = [2, 32], strides = [1, 1]} : vector<2x96xf32> to vector<2x32xf32>
    %342 = vector.extract_strided_slice %324 {offsets = [0, 64], sizes = [2, 32], strides = [1, 1]} : vector<2x96xf32> to vector<2x32xf32>
    %343 = vector.broadcast %166 : vector<1x32xf32> to vector<2x32xf32>
    %344 = arith.addf %342, %343 : vector<2x32xf32>
    %345 = arith.mulf %332, %344 : vector<2x32xf32>
    %346 = arith.addf %341, %345 : vector<2x32xf32>
    %347 = math.tanh %346 : vector<2x32xf32>
    %cst_138 = arith.constant 1.000000e+00 : f32
    %348 = vector.broadcast %cst_138 : f32 to vector<2x32xf32>
    %349 = arith.subf %348, %340 : vector<2x32xf32>
    %350 = arith.mulf %349, %347 : vector<2x32xf32>
    %351 = arith.mulf %340, %277 : vector<2x32xf32>
    %352 = arith.addf %350, %351 : vector<2x32xf32>
    %353 = arith.index_cast %319 : i32 to index
    %c0_139 = arith.constant 0 : index
    %c0_140 = arith.constant 0 : index
    %354 = vector.load %arg28[%353, %c0_139, %c0_140] : memref<8x2x96xf32, #tpu.memory_space<vmem>>, vector<1x2x96xf32>
    %355 = vector.shape_cast %354 : vector<1x2x96xf32> to vector<2x96xf32>
    %356 = arith.truncf %310 : vector<2x32xf32> to vector<2x32xbf16>
    %cst_141 = arith.constant dense<0.000000e+00> : vector<2x96xf32>
    %357 = tpu.matmul %356, %167, %cst_141 {dimension_numbers = #tpu.dot_dimension_numbers<[1], [0], [0], [1], [0, 0, 1, 1], [], []>} : vector<2x32xbf16>, vector<32x96xbf16>, vector<2x96xf32> -> vector<2x96xf32>
    %358 = vector.extract_strided_slice %355 {offsets = [0, 0], sizes = [2, 32], strides = [1, 1]} : vector<2x96xf32> to vector<2x32xf32>
    %359 = vector.extract_strided_slice %357 {offsets = [0, 0], sizes = [2, 32], strides = [1, 1]} : vector<2x96xf32> to vector<2x32xf32>
    %360 = arith.addf %358, %359 : vector<2x32xf32>
    %361 = arith.negf %360 : vector<2x32xf32>
    %362 = math.exp %361 : vector<2x32xf32>
    %cst_142 = arith.constant 1.000000e+00 : f32
    %363 = vector.broadcast %cst_142 : f32 to vector<2x32xf32>
    %364 = arith.addf %363, %362 : vector<2x32xf32>
    %365 = arith.divf %363, %364 : vector<2x32xf32>
    %366 = vector.extract_strided_slice %355 {offsets = [0, 32], sizes = [2, 32], strides = [1, 1]} : vector<2x96xf32> to vector<2x32xf32>
    %367 = vector.extract_strided_slice %357 {offsets = [0, 32], sizes = [2, 32], strides = [1, 1]} : vector<2x96xf32> to vector<2x32xf32>
    %368 = arith.addf %366, %367 : vector<2x32xf32>
    %369 = arith.negf %368 : vector<2x32xf32>
    %370 = math.exp %369 : vector<2x32xf32>
    %cst_143 = arith.constant 1.000000e+00 : f32
    %371 = vector.broadcast %cst_143 : f32 to vector<2x32xf32>
    %372 = arith.addf %371, %370 : vector<2x32xf32>
    %373 = arith.divf %371, %372 : vector<2x32xf32>
    %374 = vector.extract_strided_slice %355 {offsets = [0, 64], sizes = [2, 32], strides = [1, 1]} : vector<2x96xf32> to vector<2x32xf32>
    %375 = vector.extract_strided_slice %357 {offsets = [0, 64], sizes = [2, 32], strides = [1, 1]} : vector<2x96xf32> to vector<2x32xf32>
    %376 = vector.broadcast %168 : vector<1x32xf32> to vector<2x32xf32>
    %377 = arith.addf %375, %376 : vector<2x32xf32>
    %378 = arith.mulf %365, %377 : vector<2x32xf32>
    %379 = arith.addf %374, %378 : vector<2x32xf32>
    %380 = math.tanh %379 : vector<2x32xf32>
    %cst_144 = arith.constant 1.000000e+00 : f32
    %381 = vector.broadcast %cst_144 : f32 to vector<2x32xf32>
    %382 = arith.subf %381, %373 : vector<2x32xf32>
    %383 = arith.mulf %382, %380 : vector<2x32xf32>
    %384 = arith.mulf %373, %310 : vector<2x32xf32>
    %385 = arith.addf %383, %384 : vector<2x32xf32>
    %386 = arith.index_cast %c2_i32_131 : i32 to index
    %c0_145 = arith.constant 0 : index
    %c0_146 = arith.constant 0 : index
    %387 = vector.load %arg25[%386, %c0_145, %c0_146] : memref<8x2x32xf32, #tpu.memory_space<vmem>>, vector<1x2x32xf32>
    %388 = vector.shape_cast %387 : vector<1x2x32xf32> to vector<2x32xf32>
    %389 = vector.shape_cast %352 : vector<2x32xf32> to vector<1x2x32xf32>
    tpu.vector_store %arg25[%386, %c0_145, %c0_146], %389 {strides = array<i32>} : memref<8x2x32xf32, #tpu.memory_space<vmem>>, vector<1x2x32xf32>,
    %390 = arith.index_cast %319 : i32 to index
    %c0_147 = arith.constant 0 : index
    %c0_148 = arith.constant 0 : index
    %391 = vector.load %arg26[%390, %c0_147, %c0_148] : memref<8x2x32xf32, #tpu.memory_space<vmem>>, vector<1x2x32xf32>
    %392 = vector.shape_cast %391 : vector<1x2x32xf32> to vector<2x32xf32>
    %393 = vector.shape_cast %385 : vector<2x32xf32> to vector<1x2x32xf32>
    tpu.vector_store %arg26[%390, %c0_147, %c0_148], %393 {strides = array<i32>} : memref<8x2x32xf32, #tpu.memory_space<vmem>>, vector<1x2x32xf32>,
    %c3_i32_149 = arith.constant 3 : i32
    %c7_i32_150 = arith.constant 7 : i32
    %394 = arith.subi %c7_i32_150, %c3_i32_149 : i32
    %395 = arith.index_cast %c3_i32_149 : i32 to index
    %c0_151 = arith.constant 0 : index
    %c0_152 = arith.constant 0 : index
    %396 = vector.load %arg27[%395, %c0_151, %c0_152] : memref<8x2x96xf32, #tpu.memory_space<vmem>>, vector<1x2x96xf32>
    %397 = vector.shape_cast %396 : vector<1x2x96xf32> to vector<2x96xf32>
    %398 = arith.truncf %352 : vector<2x32xf32> to vector<2x32xbf16>
    %cst_153 = arith.constant dense<0.000000e+00> : vector<2x96xf32>
    %399 = tpu.matmul %398, %165, %cst_153 {dimension_numbers = #tpu.dot_dimension_numbers<[1], [0], [0], [1], [0, 0, 1, 1], [], []>} : vector<2x32xbf16>, vector<32x96xbf16>, vector<2x96xf32> -> vector<2x96xf32>
    %400 = vector.extract_strided_slice %397 {offsets = [0, 0], sizes = [2, 32], strides = [1, 1]} : vector<2x96xf32> to vector<2x32xf32>
    %401 = vector.extract_strided_slice %399 {offsets = [0, 0], sizes = [2, 32], strides = [1, 1]} : vector<2x96xf32> to vector<2x32xf32>
    %402 = arith.addf %400, %401 : vector<2x32xf32>
    %403 = arith.negf %402 : vector<2x32xf32>
    %404 = math.exp %403 : vector<2x32xf32>
    %cst_154 = arith.constant 1.000000e+00 : f32
    %405 = vector.broadcast %cst_154 : f32 to vector<2x32xf32>
    %406 = arith.addf %405, %404 : vector<2x32xf32>
    %407 = arith.divf %405, %406 : vector<2x32xf32>
    %408 = vector.extract_strided_slice %397 {offsets = [0, 32], sizes = [2, 32], strides = [1, 1]} : vector<2x96xf32> to vector<2x32xf32>
    %409 = vector.extract_strided_slice %399 {offsets = [0, 32], sizes = [2, 32], strides = [1, 1]} : vector<2x96xf32> to vector<2x32xf32>
    %410 = arith.addf %408, %409 : vector<2x32xf32>
    %411 = arith.negf %410 : vector<2x32xf32>
    %412 = math.exp %411 : vector<2x32xf32>
    %cst_155 = arith.constant 1.000000e+00 : f32
    %413 = vector.broadcast %cst_155 : f32 to vector<2x32xf32>
    %414 = arith.addf %413, %412 : vector<2x32xf32>
    %415 = arith.divf %413, %414 : vector<2x32xf32>
    %416 = vector.extract_strided_slice %397 {offsets = [0, 64], sizes = [2, 32], strides = [1, 1]} : vector<2x96xf32> to vector<2x32xf32>
    %417 = vector.extract_strided_slice %399 {offsets = [0, 64], sizes = [2, 32], strides = [1, 1]} : vector<2x96xf32> to vector<2x32xf32>
    %418 = vector.broadcast %166 : vector<1x32xf32> to vector<2x32xf32>
    %419 = arith.addf %417, %418 : vector<2x32xf32>
    %420 = arith.mulf %407, %419 : vector<2x32xf32>
    %421 = arith.addf %416, %420 : vector<2x32xf32>
    %422 = math.tanh %421 : vector<2x32xf32>
    %cst_156 = arith.constant 1.000000e+00 : f32
    %423 = vector.broadcast %cst_156 : f32 to vector<2x32xf32>
    %424 = arith.subf %423, %415 : vector<2x32xf32>
    %425 = arith.mulf %424, %422 : vector<2x32xf32>
    %426 = arith.mulf %415, %352 : vector<2x32xf32>
    %427 = arith.addf %425, %426 : vector<2x32xf32>
    %428 = arith.index_cast %394 : i32 to index
    %c0_157 = arith.constant 0 : index
    %c0_158 = arith.constant 0 : index
    %429 = vector.load %arg28[%428, %c0_157, %c0_158] : memref<8x2x96xf32, #tpu.memory_space<vmem>>, vector<1x2x96xf32>
    %430 = vector.shape_cast %429 : vector<1x2x96xf32> to vector<2x96xf32>
    %431 = arith.truncf %385 : vector<2x32xf32> to vector<2x32xbf16>
    %cst_159 = arith.constant dense<0.000000e+00> : vector<2x96xf32>
    %432 = tpu.matmul %431, %167, %cst_159 {dimension_numbers = #tpu.dot_dimension_numbers<[1], [0], [0], [1], [0, 0, 1, 1], [], []>} : vector<2x32xbf16>, vector<32x96xbf16>, vector<2x96xf32> -> vector<2x96xf32>
    %433 = vector.extract_strided_slice %430 {offsets = [0, 0], sizes = [2, 32], strides = [1, 1]} : vector<2x96xf32> to vector<2x32xf32>
    %434 = vector.extract_strided_slice %432 {offsets = [0, 0], sizes = [2, 32], strides = [1, 1]} : vector<2x96xf32> to vector<2x32xf32>
    %435 = arith.addf %433, %434 : vector<2x32xf32>
    %436 = arith.negf %435 : vector<2x32xf32>
    %437 = math.exp %436 : vector<2x32xf32>
    %cst_160 = arith.constant 1.000000e+00 : f32
    %438 = vector.broadcast %cst_160 : f32 to vector<2x32xf32>
    %439 = arith.addf %438, %437 : vector<2x32xf32>
    %440 = arith.divf %438, %439 : vector<2x32xf32>
    %441 = vector.extract_strided_slice %430 {offsets = [0, 32], sizes = [2, 32], strides = [1, 1]} : vector<2x96xf32> to vector<2x32xf32>
    %442 = vector.extract_strided_slice %432 {offsets = [0, 32], sizes = [2, 32], strides = [1, 1]} : vector<2x96xf32> to vector<2x32xf32>
    %443 = arith.addf %441, %442 : vector<2x32xf32>
    %444 = arith.negf %443 : vector<2x32xf32>
    %445 = math.exp %444 : vector<2x32xf32>
    %cst_161 = arith.constant 1.000000e+00 : f32
    %446 = vector.broadcast %cst_161 : f32 to vector<2x32xf32>
    %447 = arith.addf %446, %445 : vector<2x32xf32>
    %448 = arith.divf %446, %447 : vector<2x32xf32>
    %449 = vector.extract_strided_slice %430 {offsets = [0, 64], sizes = [2, 32], strides = [1, 1]} : vector<2x96xf32> to vector<2x32xf32>
    %450 = vector.extract_strided_slice %432 {offsets = [0, 64], sizes = [2, 32], strides = [1, 1]} : vector<2x96xf32> to vector<2x32xf32>
    %451 = vector.broadcast %168 : vector<1x32xf32> to vector<2x32xf32>
    %452 = arith.addf %450, %451 : vector<2x32xf32>
    %453 = arith.mulf %440, %452 : vector<2x32xf32>
    %454 = arith.addf %449, %453 : vector<2x32xf32>
    %455 = math.tanh %454 : vector<2x32xf32>
    %cst_162 = arith.constant 1.000000e+00 : f32
    %456 = vector.broadcast %cst_162 : f32 to vector<2x32xf32>
    %457 = arith.subf %456, %448 : vector<2x32xf32>
    %458 = arith.mulf %457, %455 : vector<2x32xf32>
    %459 = arith.mulf %448, %385 : vector<2x32xf32>
    %460 = arith.addf %458, %459 : vector<2x32xf32>
    %461 = arith.index_cast %c3_i32_149 : i32 to index
    %c0_163 = arith.constant 0 : index
    %c0_164 = arith.constant 0 : index
    %462 = vector.load %arg25[%461, %c0_163, %c0_164] : memref<8x2x32xf32, #tpu.memory_space<vmem>>, vector<1x2x32xf32>
    %463 = vector.shape_cast %462 : vector<1x2x32xf32> to vector<2x32xf32>
    %464 = vector.shape_cast %427 : vector<2x32xf32> to vector<1x2x32xf32>
    tpu.vector_store %arg25[%461, %c0_163, %c0_164], %464 {strides = array<i32>} : memref<8x2x32xf32, #tpu.memory_space<vmem>>, vector<1x2x32xf32>,
    %465 = arith.index_cast %394 : i32 to index
    %c0_165 = arith.constant 0 : index
    %c0_166 = arith.constant 0 : index
    %466 = vector.load %arg26[%465, %c0_165, %c0_166] : memref<8x2x32xf32, #tpu.memory_space<vmem>>, vector<1x2x32xf32>
    %467 = vector.shape_cast %466 : vector<1x2x32xf32> to vector<2x32xf32>
    %468 = vector.shape_cast %460 : vector<2x32xf32> to vector<1x2x32xf32>
    tpu.vector_store %arg26[%465, %c0_165, %c0_166], %468 {strides = array<i32>} : memref<8x2x32xf32, #tpu.memory_space<vmem>>, vector<1x2x32xf32>,
    %c4_i32_167 = arith.constant 4 : i32
    %c7_i32_168 = arith.constant 7 : i32
    %469 = arith.subi %c7_i32_168, %c4_i32_167 : i32
    %470 = arith.index_cast %c4_i32_167 : i32 to index
    %c0_169 = arith.constant 0 : index
    %c0_170 = arith.constant 0 : index
    %471 = vector.load %arg27[%470, %c0_169, %c0_170] : memref<8x2x96xf32, #tpu.memory_space<vmem>>, vector<1x2x96xf32>
    %472 = vector.shape_cast %471 : vector<1x2x96xf32> to vector<2x96xf32>
    %473 = arith.truncf %427 : vector<2x32xf32> to vector<2x32xbf16>
    %cst_171 = arith.constant dense<0.000000e+00> : vector<2x96xf32>
    %474 = tpu.matmul %473, %165, %cst_171 {dimension_numbers = #tpu.dot_dimension_numbers<[1], [0], [0], [1], [0, 0, 1, 1], [], []>} : vector<2x32xbf16>, vector<32x96xbf16>, vector<2x96xf32> -> vector<2x96xf32>
    %475 = vector.extract_strided_slice %472 {offsets = [0, 0], sizes = [2, 32], strides = [1, 1]} : vector<2x96xf32> to vector<2x32xf32>
    %476 = vector.extract_strided_slice %474 {offsets = [0, 0], sizes = [2, 32], strides = [1, 1]} : vector<2x96xf32> to vector<2x32xf32>
    %477 = arith.addf %475, %476 : vector<2x32xf32>
    %478 = arith.negf %477 : vector<2x32xf32>
    %479 = math.exp %478 : vector<2x32xf32>
    %cst_172 = arith.constant 1.000000e+00 : f32
    %480 = vector.broadcast %cst_172 : f32 to vector<2x32xf32>
    %481 = arith.addf %480, %479 : vector<2x32xf32>
    %482 = arith.divf %480, %481 : vector<2x32xf32>
    %483 = vector.extract_strided_slice %472 {offsets = [0, 32], sizes = [2, 32], strides = [1, 1]} : vector<2x96xf32> to vector<2x32xf32>
    %484 = vector.extract_strided_slice %474 {offsets = [0, 32], sizes = [2, 32], strides = [1, 1]} : vector<2x96xf32> to vector<2x32xf32>
    %485 = arith.addf %483, %484 : vector<2x32xf32>
    %486 = arith.negf %485 : vector<2x32xf32>
    %487 = math.exp %486 : vector<2x32xf32>
    %cst_173 = arith.constant 1.000000e+00 : f32
    %488 = vector.broadcast %cst_173 : f32 to vector<2x32xf32>
    %489 = arith.addf %488, %487 : vector<2x32xf32>
    %490 = arith.divf %488, %489 : vector<2x32xf32>
    %491 = vector.extract_strided_slice %472 {offsets = [0, 64], sizes = [2, 32], strides = [1, 1]} : vector<2x96xf32> to vector<2x32xf32>
    %492 = vector.extract_strided_slice %474 {offsets = [0, 64], sizes = [2, 32], strides = [1, 1]} : vector<2x96xf32> to vector<2x32xf32>
    %493 = vector.broadcast %166 : vector<1x32xf32> to vector<2x32xf32>
    %494 = arith.addf %492, %493 : vector<2x32xf32>
    %495 = arith.mulf %482, %494 : vector<2x32xf32>
    %496 = arith.addf %491, %495 : vector<2x32xf32>
    %497 = math.tanh %496 : vector<2x32xf32>
    %cst_174 = arith.constant 1.000000e+00 : f32
    %498 = vector.broadcast %cst_174 : f32 to vector<2x32xf32>
    %499 = arith.subf %498, %490 : vector<2x32xf32>
    %500 = arith.mulf %499, %497 : vector<2x32xf32>
    %501 = arith.mulf %490, %427 : vector<2x32xf32>
    %502 = arith.addf %500, %501 : vector<2x32xf32>
    %503 = arith.index_cast %469 : i32 to index
    %c0_175 = arith.constant 0 : index
    %c0_176 = arith.constant 0 : index
    %504 = vector.load %arg28[%503, %c0_175, %c0_176] : memref<8x2x96xf32, #tpu.memory_space<vmem>>, vector<1x2x96xf32>
    %505 = vector.shape_cast %504 : vector<1x2x96xf32> to vector<2x96xf32>
    %506 = arith.truncf %460 : vector<2x32xf32> to vector<2x32xbf16>
    %cst_177 = arith.constant dense<0.000000e+00> : vector<2x96xf32>
    %507 = tpu.matmul %506, %167, %cst_177 {dimension_numbers = #tpu.dot_dimension_numbers<[1], [0], [0], [1], [0, 0, 1, 1], [], []>} : vector<2x32xbf16>, vector<32x96xbf16>, vector<2x96xf32> -> vector<2x96xf32>
    %508 = vector.extract_strided_slice %505 {offsets = [0, 0], sizes = [2, 32], strides = [1, 1]} : vector<2x96xf32> to vector<2x32xf32>
    %509 = vector.extract_strided_slice %507 {offsets = [0, 0], sizes = [2, 32], strides = [1, 1]} : vector<2x96xf32> to vector<2x32xf32>
    %510 = arith.addf %508, %509 : vector<2x32xf32>
    %511 = arith.negf %510 : vector<2x32xf32>
    %512 = math.exp %511 : vector<2x32xf32>
    %cst_178 = arith.constant 1.000000e+00 : f32
    %513 = vector.broadcast %cst_178 : f32 to vector<2x32xf32>
    %514 = arith.addf %513, %512 : vector<2x32xf32>
    %515 = arith.divf %513, %514 : vector<2x32xf32>
    %516 = vector.extract_strided_slice %505 {offsets = [0, 32], sizes = [2, 32], strides = [1, 1]} : vector<2x96xf32> to vector<2x32xf32>
    %517 = vector.extract_strided_slice %507 {offsets = [0, 32], sizes = [2, 32], strides = [1, 1]} : vector<2x96xf32> to vector<2x32xf32>
    %518 = arith.addf %516, %517 : vector<2x32xf32>
    %519 = arith.negf %518 : vector<2x32xf32>
    %520 = math.exp %519 : vector<2x32xf32>
    %cst_179 = arith.constant 1.000000e+00 : f32
    %521 = vector.broadcast %cst_179 : f32 to vector<2x32xf32>
    %522 = arith.addf %521, %520 : vector<2x32xf32>
    %523 = arith.divf %521, %522 : vector<2x32xf32>
    %524 = vector.extract_strided_slice %505 {offsets = [0, 64], sizes = [2, 32], strides = [1, 1]} : vector<2x96xf32> to vector<2x32xf32>
    %525 = vector.extract_strided_slice %507 {offsets = [0, 64], sizes = [2, 32], strides = [1, 1]} : vector<2x96xf32> to vector<2x32xf32>
    %526 = vector.broadcast %168 : vector<1x32xf32> to vector<2x32xf32>
    %527 = arith.addf %525, %526 : vector<2x32xf32>
    %528 = arith.mulf %515, %527 : vector<2x32xf32>
    %529 = arith.addf %524, %528 : vector<2x32xf32>
    %530 = math.tanh %529 : vector<2x32xf32>
    %cst_180 = arith.constant 1.000000e+00 : f32
    %531 = vector.broadcast %cst_180 : f32 to vector<2x32xf32>
    %532 = arith.subf %531, %523 : vector<2x32xf32>
    %533 = arith.mulf %532, %530 : vector<2x32xf32>
    %534 = arith.mulf %523, %460 : vector<2x32xf32>
    %535 = arith.addf %533, %534 : vector<2x32xf32>
    %536 = arith.index_cast %c4_i32_167 : i32 to index
    %c0_181 = arith.constant 0 : index
    %c0_182 = arith.constant 0 : index
    %537 = vector.load %arg25[%536, %c0_181, %c0_182] : memref<8x2x32xf32, #tpu.memory_space<vmem>>, vector<1x2x32xf32>
    %538 = vector.shape_cast %537 : vector<1x2x32xf32> to vector<2x32xf32>
    %539 = vector.shape_cast %502 : vector<2x32xf32> to vector<1x2x32xf32>
    tpu.vector_store %arg25[%536, %c0_181, %c0_182], %539 {strides = array<i32>} : memref<8x2x32xf32, #tpu.memory_space<vmem>>, vector<1x2x32xf32>,
    %540 = arith.index_cast %469 : i32 to index
    %c0_183 = arith.constant 0 : index
    %c0_184 = arith.constant 0 : index
    %541 = vector.load %arg26[%540, %c0_183, %c0_184] : memref<8x2x32xf32, #tpu.memory_space<vmem>>, vector<1x2x32xf32>
    %542 = vector.shape_cast %541 : vector<1x2x32xf32> to vector<2x32xf32>
    %543 = vector.shape_cast %535 : vector<2x32xf32> to vector<1x2x32xf32>
    tpu.vector_store %arg26[%540, %c0_183, %c0_184], %543 {strides = array<i32>} : memref<8x2x32xf32, #tpu.memory_space<vmem>>, vector<1x2x32xf32>,
    %c5_i32_185 = arith.constant 5 : i32
    %c7_i32_186 = arith.constant 7 : i32
    %544 = arith.subi %c7_i32_186, %c5_i32_185 : i32
    %545 = arith.index_cast %c5_i32_185 : i32 to index
    %c0_187 = arith.constant 0 : index
    %c0_188 = arith.constant 0 : index
    %546 = vector.load %arg27[%545, %c0_187, %c0_188] : memref<8x2x96xf32, #tpu.memory_space<vmem>>, vector<1x2x96xf32>
    %547 = vector.shape_cast %546 : vector<1x2x96xf32> to vector<2x96xf32>
    %548 = arith.truncf %502 : vector<2x32xf32> to vector<2x32xbf16>
    %cst_189 = arith.constant dense<0.000000e+00> : vector<2x96xf32>
    %549 = tpu.matmul %548, %165, %cst_189 {dimension_numbers = #tpu.dot_dimension_numbers<[1], [0], [0], [1], [0, 0, 1, 1], [], []>} : vector<2x32xbf16>, vector<32x96xbf16>, vector<2x96xf32> -> vector<2x96xf32>
    %550 = vector.extract_strided_slice %547 {offsets = [0, 0], sizes = [2, 32], strides = [1, 1]} : vector<2x96xf32> to vector<2x32xf32>
    %551 = vector.extract_strided_slice %549 {offsets = [0, 0], sizes = [2, 32], strides = [1, 1]} : vector<2x96xf32> to vector<2x32xf32>
    %552 = arith.addf %550, %551 : vector<2x32xf32>
    %553 = arith.negf %552 : vector<2x32xf32>
    %554 = math.exp %553 : vector<2x32xf32>
    %cst_190 = arith.constant 1.000000e+00 : f32
    %555 = vector.broadcast %cst_190 : f32 to vector<2x32xf32>
    %556 = arith.addf %555, %554 : vector<2x32xf32>
    %557 = arith.divf %555, %556 : vector<2x32xf32>
    %558 = vector.extract_strided_slice %547 {offsets = [0, 32], sizes = [2, 32], strides = [1, 1]} : vector<2x96xf32> to vector<2x32xf32>
    %559 = vector.extract_strided_slice %549 {offsets = [0, 32], sizes = [2, 32], strides = [1, 1]} : vector<2x96xf32> to vector<2x32xf32>
    %560 = arith.addf %558, %559 : vector<2x32xf32>
    %561 = arith.negf %560 : vector<2x32xf32>
    %562 = math.exp %561 : vector<2x32xf32>
    %cst_191 = arith.constant 1.000000e+00 : f32
    %563 = vector.broadcast %cst_191 : f32 to vector<2x32xf32>
    %564 = arith.addf %563, %562 : vector<2x32xf32>
    %565 = arith.divf %563, %564 : vector<2x32xf32>
    %566 = vector.extract_strided_slice %547 {offsets = [0, 64], sizes = [2, 32], strides = [1, 1]} : vector<2x96xf32> to vector<2x32xf32>
    %567 = vector.extract_strided_slice %549 {offsets = [0, 64], sizes = [2, 32], strides = [1, 1]} : vector<2x96xf32> to vector<2x32xf32>
    %568 = vector.broadcast %166 : vector<1x32xf32> to vector<2x32xf32>
    %569 = arith.addf %567, %568 : vector<2x32xf32>
    %570 = arith.mulf %557, %569 : vector<2x32xf32>
    %571 = arith.addf %566, %570 : vector<2x32xf32>
    %572 = math.tanh %571 : vector<2x32xf32>
    %cst_192 = arith.constant 1.000000e+00 : f32
    %573 = vector.broadcast %cst_192 : f32 to vector<2x32xf32>
    %574 = arith.subf %573, %565 : vector<2x32xf32>
    %575 = arith.mulf %574, %572 : vector<2x32xf32>
    %576 = arith.mulf %565, %502 : vector<2x32xf32>
    %577 = arith.addf %575, %576 : vector<2x32xf32>
    %578 = arith.index_cast %544 : i32 to index
    %c0_193 = arith.constant 0 : index
    %c0_194 = arith.constant 0 : index
    %579 = vector.load %arg28[%578, %c0_193, %c0_194] : memref<8x2x96xf32, #tpu.memory_space<vmem>>, vector<1x2x96xf32>
    %580 = vector.shape_cast %579 : vector<1x2x96xf32> to vector<2x96xf32>
    %581 = arith.truncf %535 : vector<2x32xf32> to vector<2x32xbf16>
    %cst_195 = arith.constant dense<0.000000e+00> : vector<2x96xf32>
    %582 = tpu.matmul %581, %167, %cst_195 {dimension_numbers = #tpu.dot_dimension_numbers<[1], [0], [0], [1], [0, 0, 1, 1], [], []>} : vector<2x32xbf16>, vector<32x96xbf16>, vector<2x96xf32> -> vector<2x96xf32>
    %583 = vector.extract_strided_slice %580 {offsets = [0, 0], sizes = [2, 32], strides = [1, 1]} : vector<2x96xf32> to vector<2x32xf32>
    %584 = vector.extract_strided_slice %582 {offsets = [0, 0], sizes = [2, 32], strides = [1, 1]} : vector<2x96xf32> to vector<2x32xf32>
    %585 = arith.addf %583, %584 : vector<2x32xf32>
    %586 = arith.negf %585 : vector<2x32xf32>
    %587 = math.exp %586 : vector<2x32xf32>
    %cst_196 = arith.constant 1.000000e+00 : f32
    %588 = vector.broadcast %cst_196 : f32 to vector<2x32xf32>
    %589 = arith.addf %588, %587 : vector<2x32xf32>
    %590 = arith.divf %588, %589 : vector<2x32xf32>
    %591 = vector.extract_strided_slice %580 {offsets = [0, 32], sizes = [2, 32], strides = [1, 1]} : vector<2x96xf32> to vector<2x32xf32>
    %592 = vector.extract_strided_slice %582 {offsets = [0, 32], sizes = [2, 32], strides = [1, 1]} : vector<2x96xf32> to vector<2x32xf32>
    %593 = arith.addf %591, %592 : vector<2x32xf32>
    %594 = arith.negf %593 : vector<2x32xf32>
    %595 = math.exp %594 : vector<2x32xf32>
    %cst_197 = arith.constant 1.000000e+00 : f32
    %596 = vector.broadcast %cst_197 : f32 to vector<2x32xf32>
    %597 = arith.addf %596, %595 : vector<2x32xf32>
    %598 = arith.divf %596, %597 : vector<2x32xf32>
    %599 = vector.extract_strided_slice %580 {offsets = [0, 64], sizes = [2, 32], strides = [1, 1]} : vector<2x96xf32> to vector<2x32xf32>
    %600 = vector.extract_strided_slice %582 {offsets = [0, 64], sizes = [2, 32], strides = [1, 1]} : vector<2x96xf32> to vector<2x32xf32>
    %601 = vector.broadcast %168 : vector<1x32xf32> to vector<2x32xf32>
    %602 = arith.addf %600, %601 : vector<2x32xf32>
    %603 = arith.mulf %590, %602 : vector<2x32xf32>
    %604 = arith.addf %599, %603 : vector<2x32xf32>
    %605 = math.tanh %604 : vector<2x32xf32>
    %cst_198 = arith.constant 1.000000e+00 : f32
    %606 = vector.broadcast %cst_198 : f32 to vector<2x32xf32>
    %607 = arith.subf %606, %598 : vector<2x32xf32>
    %608 = arith.mulf %607, %605 : vector<2x32xf32>
    %609 = arith.mulf %598, %535 : vector<2x32xf32>
    %610 = arith.addf %608, %609 : vector<2x32xf32>
    %611 = arith.index_cast %c5_i32_185 : i32 to index
    %c0_199 = arith.constant 0 : index
    %c0_200 = arith.constant 0 : index
    %612 = vector.load %arg25[%611, %c0_199, %c0_200] : memref<8x2x32xf32, #tpu.memory_space<vmem>>, vector<1x2x32xf32>
    %613 = vector.shape_cast %612 : vector<1x2x32xf32> to vector<2x32xf32>
    %614 = vector.shape_cast %577 : vector<2x32xf32> to vector<1x2x32xf32>
    tpu.vector_store %arg25[%611, %c0_199, %c0_200], %614 {strides = array<i32>} : memref<8x2x32xf32, #tpu.memory_space<vmem>>, vector<1x2x32xf32>,
    %615 = arith.index_cast %544 : i32 to index
    %c0_201 = arith.constant 0 : index
    %c0_202 = arith.constant 0 : index
    %616 = vector.load %arg26[%615, %c0_201, %c0_202] : memref<8x2x32xf32, #tpu.memory_space<vmem>>, vector<1x2x32xf32>
    %617 = vector.shape_cast %616 : vector<1x2x32xf32> to vector<2x32xf32>
    %618 = vector.shape_cast %610 : vector<2x32xf32> to vector<1x2x32xf32>
    tpu.vector_store %arg26[%615, %c0_201, %c0_202], %618 {strides = array<i32>} : memref<8x2x32xf32, #tpu.memory_space<vmem>>, vector<1x2x32xf32>,
    %c6_i32_203 = arith.constant 6 : i32
    %c7_i32_204 = arith.constant 7 : i32
    %619 = arith.subi %c7_i32_204, %c6_i32_203 : i32
    %620 = arith.index_cast %c6_i32_203 : i32 to index
    %c0_205 = arith.constant 0 : index
    %c0_206 = arith.constant 0 : index
    %621 = vector.load %arg27[%620, %c0_205, %c0_206] : memref<8x2x96xf32, #tpu.memory_space<vmem>>, vector<1x2x96xf32>
    %622 = vector.shape_cast %621 : vector<1x2x96xf32> to vector<2x96xf32>
    %623 = arith.truncf %577 : vector<2x32xf32> to vector<2x32xbf16>
    %cst_207 = arith.constant dense<0.000000e+00> : vector<2x96xf32>
    %624 = tpu.matmul %623, %165, %cst_207 {dimension_numbers = #tpu.dot_dimension_numbers<[1], [0], [0], [1], [0, 0, 1, 1], [], []>} : vector<2x32xbf16>, vector<32x96xbf16>, vector<2x96xf32> -> vector<2x96xf32>
    %625 = vector.extract_strided_slice %622 {offsets = [0, 0], sizes = [2, 32], strides = [1, 1]} : vector<2x96xf32> to vector<2x32xf32>
    %626 = vector.extract_strided_slice %624 {offsets = [0, 0], sizes = [2, 32], strides = [1, 1]} : vector<2x96xf32> to vector<2x32xf32>
    %627 = arith.addf %625, %626 : vector<2x32xf32>
    %628 = arith.negf %627 : vector<2x32xf32>
    %629 = math.exp %628 : vector<2x32xf32>
    %cst_208 = arith.constant 1.000000e+00 : f32
    %630 = vector.broadcast %cst_208 : f32 to vector<2x32xf32>
    %631 = arith.addf %630, %629 : vector<2x32xf32>
    %632 = arith.divf %630, %631 : vector<2x32xf32>
    %633 = vector.extract_strided_slice %622 {offsets = [0, 32], sizes = [2, 32], strides = [1, 1]} : vector<2x96xf32> to vector<2x32xf32>
    %634 = vector.extract_strided_slice %624 {offsets = [0, 32], sizes = [2, 32], strides = [1, 1]} : vector<2x96xf32> to vector<2x32xf32>
    %635 = arith.addf %633, %634 : vector<2x32xf32>
    %636 = arith.negf %635 : vector<2x32xf32>
    %637 = math.exp %636 : vector<2x32xf32>
    %cst_209 = arith.constant 1.000000e+00 : f32
    %638 = vector.broadcast %cst_209 : f32 to vector<2x32xf32>
    %639 = arith.addf %638, %637 : vector<2x32xf32>
    %640 = arith.divf %638, %639 : vector<2x32xf32>
    %641 = vector.extract_strided_slice %622 {offsets = [0, 64], sizes = [2, 32], strides = [1, 1]} : vector<2x96xf32> to vector<2x32xf32>
    %642 = vector.extract_strided_slice %624 {offsets = [0, 64], sizes = [2, 32], strides = [1, 1]} : vector<2x96xf32> to vector<2x32xf32>
    %643 = vector.broadcast %166 : vector<1x32xf32> to vector<2x32xf32>
    %644 = arith.addf %642, %643 : vector<2x32xf32>
    %645 = arith.mulf %632, %644 : vector<2x32xf32>
    %646 = arith.addf %641, %645 : vector<2x32xf32>
    %647 = math.tanh %646 : vector<2x32xf32>
    %cst_210 = arith.constant 1.000000e+00 : f32
    %648 = vector.broadcast %cst_210 : f32 to vector<2x32xf32>
    %649 = arith.subf %648, %640 : vector<2x32xf32>
    %650 = arith.mulf %649, %647 : vector<2x32xf32>
    %651 = arith.mulf %640, %577 : vector<2x32xf32>
    %652 = arith.addf %650, %651 : vector<2x32xf32>
    %653 = arith.index_cast %619 : i32 to index
    %c0_211 = arith.constant 0 : index
    %c0_212 = arith.constant 0 : index
    %654 = vector.load %arg28[%653, %c0_211, %c0_212] : memref<8x2x96xf32, #tpu.memory_space<vmem>>, vector<1x2x96xf32>
    %655 = vector.shape_cast %654 : vector<1x2x96xf32> to vector<2x96xf32>
    %656 = arith.truncf %610 : vector<2x32xf32> to vector<2x32xbf16>
    %cst_213 = arith.constant dense<0.000000e+00> : vector<2x96xf32>
    %657 = tpu.matmul %656, %167, %cst_213 {dimension_numbers = #tpu.dot_dimension_numbers<[1], [0], [0], [1], [0, 0, 1, 1], [], []>} : vector<2x32xbf16>, vector<32x96xbf16>, vector<2x96xf32> -> vector<2x96xf32>
    %658 = vector.extract_strided_slice %655 {offsets = [0, 0], sizes = [2, 32], strides = [1, 1]} : vector<2x96xf32> to vector<2x32xf32>
    %659 = vector.extract_strided_slice %657 {offsets = [0, 0], sizes = [2, 32], strides = [1, 1]} : vector<2x96xf32> to vector<2x32xf32>
    %660 = arith.addf %658, %659 : vector<2x32xf32>
    %661 = arith.negf %660 : vector<2x32xf32>
    %662 = math.exp %661 : vector<2x32xf32>
    %cst_214 = arith.constant 1.000000e+00 : f32
    %663 = vector.broadcast %cst_214 : f32 to vector<2x32xf32>
    %664 = arith.addf %663, %662 : vector<2x32xf32>
    %665 = arith.divf %663, %664 : vector<2x32xf32>
    %666 = vector.extract_strided_slice %655 {offsets = [0, 32], sizes = [2, 32], strides = [1, 1]} : vector<2x96xf32> to vector<2x32xf32>
    %667 = vector.extract_strided_slice %657 {offsets = [0, 32], sizes = [2, 32], strides = [1, 1]} : vector<2x96xf32> to vector<2x32xf32>
    %668 = arith.addf %666, %667 : vector<2x32xf32>
    %669 = arith.negf %668 : vector<2x32xf32>
    %670 = math.exp %669 : vector<2x32xf32>
    %cst_215 = arith.constant 1.000000e+00 : f32
    %671 = vector.broadcast %cst_215 : f32 to vector<2x32xf32>
    %672 = arith.addf %671, %670 : vector<2x32xf32>
    %673 = arith.divf %671, %672 : vector<2x32xf32>
    %674 = vector.extract_strided_slice %655 {offsets = [0, 64], sizes = [2, 32], strides = [1, 1]} : vector<2x96xf32> to vector<2x32xf32>
    %675 = vector.extract_strided_slice %657 {offsets = [0, 64], sizes = [2, 32], strides = [1, 1]} : vector<2x96xf32> to vector<2x32xf32>
    %676 = vector.broadcast %168 : vector<1x32xf32> to vector<2x32xf32>
    %677 = arith.addf %675, %676 : vector<2x32xf32>
    %678 = arith.mulf %665, %677 : vector<2x32xf32>
    %679 = arith.addf %674, %678 : vector<2x32xf32>
    %680 = math.tanh %679 : vector<2x32xf32>
    %cst_216 = arith.constant 1.000000e+00 : f32
    %681 = vector.broadcast %cst_216 : f32 to vector<2x32xf32>
    %682 = arith.subf %681, %673 : vector<2x32xf32>
    %683 = arith.mulf %682, %680 : vector<2x32xf32>
    %684 = arith.mulf %673, %610 : vector<2x32xf32>
    %685 = arith.addf %683, %684 : vector<2x32xf32>
    %686 = arith.index_cast %c6_i32_203 : i32 to index
    %c0_217 = arith.constant 0 : index
    %c0_218 = arith.constant 0 : index
    %687 = vector.load %arg25[%686, %c0_217, %c0_218] : memref<8x2x32xf32, #tpu.memory_space<vmem>>, vector<1x2x32xf32>
    %688 = vector.shape_cast %687 : vector<1x2x32xf32> to vector<2x32xf32>
    %689 = vector.shape_cast %652 : vector<2x32xf32> to vector<1x2x32xf32>
    tpu.vector_store %arg25[%686, %c0_217, %c0_218], %689 {strides = array<i32>} : memref<8x2x32xf32, #tpu.memory_space<vmem>>, vector<1x2x32xf32>,
    %690 = arith.index_cast %619 : i32 to index
    %c0_219 = arith.constant 0 : index
    %c0_220 = arith.constant 0 : index
    %691 = vector.load %arg26[%690, %c0_219, %c0_220] : memref<8x2x32xf32, #tpu.memory_space<vmem>>, vector<1x2x32xf32>
    %692 = vector.shape_cast %691 : vector<1x2x32xf32> to vector<2x32xf32>
    %693 = vector.shape_cast %685 : vector<2x32xf32> to vector<1x2x32xf32>
    tpu.vector_store %arg26[%690, %c0_219, %c0_220], %693 {strides = array<i32>} : memref<8x2x32xf32, #tpu.memory_space<vmem>>, vector<1x2x32xf32>,
    %c7_i32_221 = arith.constant 7 : i32
    %c7_i32_222 = arith.constant 7 : i32
    %694 = arith.subi %c7_i32_222, %c7_i32_221 : i32
    %695 = arith.index_cast %c7_i32_221 : i32 to index
    %c0_223 = arith.constant 0 : index
    %c0_224 = arith.constant 0 : index
    %696 = vector.load %arg27[%695, %c0_223, %c0_224] : memref<8x2x96xf32, #tpu.memory_space<vmem>>, vector<1x2x96xf32>
    %697 = vector.shape_cast %696 : vector<1x2x96xf32> to vector<2x96xf32>
    %698 = arith.truncf %652 : vector<2x32xf32> to vector<2x32xbf16>
    %cst_225 = arith.constant dense<0.000000e+00> : vector<2x96xf32>
    %699 = tpu.matmul %698, %165, %cst_225 {dimension_numbers = #tpu.dot_dimension_numbers<[1], [0], [0], [1], [0, 0, 1, 1], [], []>} : vector<2x32xbf16>, vector<32x96xbf16>, vector<2x96xf32> -> vector<2x96xf32>
    %700 = vector.extract_strided_slice %697 {offsets = [0, 0], sizes = [2, 32], strides = [1, 1]} : vector<2x96xf32> to vector<2x32xf32>
    %701 = vector.extract_strided_slice %699 {offsets = [0, 0], sizes = [2, 32], strides = [1, 1]} : vector<2x96xf32> to vector<2x32xf32>
    %702 = arith.addf %700, %701 : vector<2x32xf32>
    %703 = arith.negf %702 : vector<2x32xf32>
    %704 = math.exp %703 : vector<2x32xf32>
    %cst_226 = arith.constant 1.000000e+00 : f32
    %705 = vector.broadcast %cst_226 : f32 to vector<2x32xf32>
    %706 = arith.addf %705, %704 : vector<2x32xf32>
    %707 = arith.divf %705, %706 : vector<2x32xf32>
    %708 = vector.extract_strided_slice %697 {offsets = [0, 32], sizes = [2, 32], strides = [1, 1]} : vector<2x96xf32> to vector<2x32xf32>
    %709 = vector.extract_strided_slice %699 {offsets = [0, 32], sizes = [2, 32], strides = [1, 1]} : vector<2x96xf32> to vector<2x32xf32>
    %710 = arith.addf %708, %709 : vector<2x32xf32>
    %711 = arith.negf %710 : vector<2x32xf32>
    %712 = math.exp %711 : vector<2x32xf32>
    %cst_227 = arith.constant 1.000000e+00 : f32
    %713 = vector.broadcast %cst_227 : f32 to vector<2x32xf32>
    %714 = arith.addf %713, %712 : vector<2x32xf32>
    %715 = arith.divf %713, %714 : vector<2x32xf32>
    %716 = vector.extract_strided_slice %697 {offsets = [0, 64], sizes = [2, 32], strides = [1, 1]} : vector<2x96xf32> to vector<2x32xf32>
    %717 = vector.extract_strided_slice %699 {offsets = [0, 64], sizes = [2, 32], strides = [1, 1]} : vector<2x96xf32> to vector<2x32xf32>
    %718 = vector.broadcast %166 : vector<1x32xf32> to vector<2x32xf32>
    %719 = arith.addf %717, %718 : vector<2x32xf32>
    %720 = arith.mulf %707, %719 : vector<2x32xf32>
    %721 = arith.addf %716, %720 : vector<2x32xf32>
    %722 = math.tanh %721 : vector<2x32xf32>
    %cst_228 = arith.constant 1.000000e+00 : f32
    %723 = vector.broadcast %cst_228 : f32 to vector<2x32xf32>
    %724 = arith.subf %723, %715 : vector<2x32xf32>
    %725 = arith.mulf %724, %722 : vector<2x32xf32>
    %726 = arith.mulf %715, %652 : vector<2x32xf32>
    %727 = arith.addf %725, %726 : vector<2x32xf32>
    %728 = arith.index_cast %694 : i32 to index
    %c0_229 = arith.constant 0 : index
    %c0_230 = arith.constant 0 : index
    %729 = vector.load %arg28[%728, %c0_229, %c0_230] : memref<8x2x96xf32, #tpu.memory_space<vmem>>, vector<1x2x96xf32>
    %730 = vector.shape_cast %729 : vector<1x2x96xf32> to vector<2x96xf32>
    %731 = arith.truncf %685 : vector<2x32xf32> to vector<2x32xbf16>
    %cst_231 = arith.constant dense<0.000000e+00> : vector<2x96xf32>
    %732 = tpu.matmul %731, %167, %cst_231 {dimension_numbers = #tpu.dot_dimension_numbers<[1], [0], [0], [1], [0, 0, 1, 1], [], []>} : vector<2x32xbf16>, vector<32x96xbf16>, vector<2x96xf32> -> vector<2x96xf32>
    %733 = vector.extract_strided_slice %730 {offsets = [0, 0], sizes = [2, 32], strides = [1, 1]} : vector<2x96xf32> to vector<2x32xf32>
    %734 = vector.extract_strided_slice %732 {offsets = [0, 0], sizes = [2, 32], strides = [1, 1]} : vector<2x96xf32> to vector<2x32xf32>
    %735 = arith.addf %733, %734 : vector<2x32xf32>
    %736 = arith.negf %735 : vector<2x32xf32>
    %737 = math.exp %736 : vector<2x32xf32>
    %cst_232 = arith.constant 1.000000e+00 : f32
    %738 = vector.broadcast %cst_232 : f32 to vector<2x32xf32>
    %739 = arith.addf %738, %737 : vector<2x32xf32>
    %740 = arith.divf %738, %739 : vector<2x32xf32>
    %741 = vector.extract_strided_slice %730 {offsets = [0, 32], sizes = [2, 32], strides = [1, 1]} : vector<2x96xf32> to vector<2x32xf32>
    %742 = vector.extract_strided_slice %732 {offsets = [0, 32], sizes = [2, 32], strides = [1, 1]} : vector<2x96xf32> to vector<2x32xf32>
    %743 = arith.addf %741, %742 : vector<2x32xf32>
    %744 = arith.negf %743 : vector<2x32xf32>
    %745 = math.exp %744 : vector<2x32xf32>
    %cst_233 = arith.constant 1.000000e+00 : f32
    %746 = vector.broadcast %cst_233 : f32 to vector<2x32xf32>
    %747 = arith.addf %746, %745 : vector<2x32xf32>
    %748 = arith.divf %746, %747 : vector<2x32xf32>
    %749 = vector.extract_strided_slice %730 {offsets = [0, 64], sizes = [2, 32], strides = [1, 1]} : vector<2x96xf32> to vector<2x32xf32>
    %750 = vector.extract_strided_slice %732 {offsets = [0, 64], sizes = [2, 32], strides = [1, 1]} : vector<2x96xf32> to vector<2x32xf32>
    %751 = vector.broadcast %168 : vector<1x32xf32> to vector<2x32xf32>
    %752 = arith.addf %750, %751 : vector<2x32xf32>
    %753 = arith.mulf %740, %752 : vector<2x32xf32>
    %754 = arith.addf %749, %753 : vector<2x32xf32>
    %755 = math.tanh %754 : vector<2x32xf32>
    %cst_234 = arith.constant 1.000000e+00 : f32
    %756 = vector.broadcast %cst_234 : f32 to vector<2x32xf32>
    %757 = arith.subf %756, %748 : vector<2x32xf32>
    %758 = arith.mulf %757, %755 : vector<2x32xf32>
    %759 = arith.mulf %748, %685 : vector<2x32xf32>
    %760 = arith.addf %758, %759 : vector<2x32xf32>
    %761 = arith.index_cast %c7_i32_221 : i32 to index
    %c0_235 = arith.constant 0 : index
    %c0_236 = arith.constant 0 : index
    %762 = vector.load %arg25[%761, %c0_235, %c0_236] : memref<8x2x32xf32, #tpu.memory_space<vmem>>, vector<1x2x32xf32>
    %763 = vector.shape_cast %762 : vector<1x2x32xf32> to vector<2x32xf32>
    %764 = vector.shape_cast %727 : vector<2x32xf32> to vector<1x2x32xf32>
    tpu.vector_store %arg25[%761, %c0_235, %c0_236], %764 {strides = array<i32>} : memref<8x2x32xf32, #tpu.memory_space<vmem>>, vector<1x2x32xf32>,
    %765 = arith.index_cast %694 : i32 to index
    %c0_237 = arith.constant 0 : index
    %c0_238 = arith.constant 0 : index
    %766 = vector.load %arg26[%765, %c0_237, %c0_238] : memref<8x2x32xf32, #tpu.memory_space<vmem>>, vector<1x2x32xf32>
    %767 = vector.shape_cast %766 : vector<1x2x32xf32> to vector<2x32xf32>
    %768 = vector.shape_cast %760 : vector<2x32xf32> to vector<1x2x32xf32>
    tpu.vector_store %arg26[%765, %c0_237, %c0_238], %768 {strides = array<i32>} : memref<8x2x32xf32, #tpu.memory_space<vmem>>, vector<1x2x32xf32>,
    %c8_i32_239 = arith.constant 8 : i32
    %c0_240 = arith.constant 0 : index
    %c0_241 = arith.constant 0 : index
    %769 = vector.load %arg10[%c0_240, %c0_241] : memref<32x96xbf16, #tpu.memory_space<vmem>>, vector<32x96xbf16>
    %c0_242 = arith.constant 0 : index
    %c0_243 = arith.constant 0 : index
    %770 = vector.load %arg11[%c0_242, %c0_243] : memref<32x96xbf16, #tpu.memory_space<vmem>>, vector<32x96xbf16>
    %c0_244 = arith.constant 0 : index
    %c0_245 = arith.constant 0 : index
    %771 = vector.load %arg12[%c0_244, %c0_245] : memref<1x96xf32, #tpu.memory_space<vmem>>, vector<1x96xf32>
    %c0_246 = arith.constant 0 : index
    %c0_247 = arith.constant 0 : index
    %772 = vector.load %arg15[%c0_246, %c0_247] : memref<32x96xbf16, #tpu.memory_space<vmem>>, vector<32x96xbf16>
    %c0_248 = arith.constant 0 : index
    %c0_249 = arith.constant 0 : index
    %773 = vector.load %arg16[%c0_248, %c0_249] : memref<32x96xbf16, #tpu.memory_space<vmem>>, vector<32x96xbf16>
    %c0_250 = arith.constant 0 : index
    %c0_251 = arith.constant 0 : index
    %774 = vector.load %arg17[%c0_250, %c0_251] : memref<1x96xf32, #tpu.memory_space<vmem>>, vector<1x96xf32>
    %c0_i32_252 = arith.constant 0 : i32
    %c1_i32_253 = arith.constant 1 : i32
    %775 = arith.muli %c0_i32_252, %c1_i32_253 : i32
    %c0_i32_254 = arith.constant 0 : i32
    %776 = arith.addi %c0_i32_254, %775 : i32
    %777 = arith.index_cast %776 : i32 to index
    %c0_255 = arith.constant 0 : index
    %c0_256 = arith.constant 0 : index
    %778 = vector.load %arg25[%777, %c0_255, %c0_256] : memref<8x2x32xf32, #tpu.memory_space<vmem>>, vector<1x2x32xf32>
    %779 = vector.shape_cast %778 : vector<1x2x32xf32> to vector<2x32xf32>
    %780 = arith.truncf %779 : vector<2x32xf32> to vector<2x32xbf16>
    %781 = arith.index_cast %776 : i32 to index
    %c0_257 = arith.constant 0 : index
    %c0_258 = arith.constant 0 : index
    %782 = vector.load %arg26[%781, %c0_257, %c0_258] : memref<8x2x32xf32, #tpu.memory_space<vmem>>, vector<1x2x32xf32>
    %783 = vector.shape_cast %782 : vector<1x2x32xf32> to vector<2x32xf32>
    %784 = arith.truncf %783 : vector<2x32xf32> to vector<2x32xbf16>
    %cst_259 = arith.constant dense<0.000000e+00> : vector<2x96xf32>
    %785 = tpu.matmul %780, %769, %cst_259 {dimension_numbers = #tpu.dot_dimension_numbers<[1], [0], [0], [1], [0, 0, 1, 1], [], []>} : vector<2x32xbf16>, vector<32x96xbf16>, vector<2x96xf32> -> vector<2x96xf32>
    %cst_260 = arith.constant dense<0.000000e+00> : vector<2x96xf32>
    %786 = tpu.matmul %784, %770, %cst_260 {dimension_numbers = #tpu.dot_dimension_numbers<[1], [0], [0], [1], [0, 0, 1, 1], [], []>} : vector<2x32xbf16>, vector<32x96xbf16>, vector<2x96xf32> -> vector<2x96xf32>
    %787 = arith.addf %785, %786 : vector<2x96xf32>
    %788 = vector.broadcast %771 : vector<1x96xf32> to vector<2x96xf32>
    %789 = arith.addf %787, %788 : vector<2x96xf32>
    %790 = arith.index_cast %776 : i32 to index
    %c0_261 = arith.constant 0 : index
    %c0_262 = arith.constant 0 : index
    %791 = vector.load %arg27[%790, %c0_261, %c0_262] : memref<8x2x96xf32, #tpu.memory_space<vmem>>, vector<1x2x96xf32>
    %792 = vector.shape_cast %791 : vector<1x2x96xf32> to vector<2x96xf32>
    %793 = vector.shape_cast %789 : vector<2x96xf32> to vector<1x2x96xf32>
    tpu.vector_store %arg27[%790, %c0_261, %c0_262], %793 {strides = array<i32>} : memref<8x2x96xf32, #tpu.memory_space<vmem>>, vector<1x2x96xf32>,
    %cst_263 = arith.constant dense<0.000000e+00> : vector<2x96xf32>
    %794 = tpu.matmul %780, %772, %cst_263 {dimension_numbers = #tpu.dot_dimension_numbers<[1], [0], [0], [1], [0, 0, 1, 1], [], []>} : vector<2x32xbf16>, vector<32x96xbf16>, vector<2x96xf32> -> vector<2x96xf32>
    %cst_264 = arith.constant dense<0.000000e+00> : vector<2x96xf32>
    %795 = tpu.matmul %784, %773, %cst_264 {dimension_numbers = #tpu.dot_dimension_numbers<[1], [0], [0], [1], [0, 0, 1, 1], [], []>} : vector<2x32xbf16>, vector<32x96xbf16>, vector<2x96xf32> -> vector<2x96xf32>
    %796 = arith.addf %794, %795 : vector<2x96xf32>
    %797 = vector.broadcast %774 : vector<1x96xf32> to vector<2x96xf32>
    %798 = arith.addf %796, %797 : vector<2x96xf32>
    %799 = arith.index_cast %776 : i32 to index
    %c0_265 = arith.constant 0 : index
    %c0_266 = arith.constant 0 : index
    %800 = vector.load %arg28[%799, %c0_265, %c0_266] : memref<8x2x96xf32, #tpu.memory_space<vmem>>, vector<1x2x96xf32>
    %801 = vector.shape_cast %800 : vector<1x2x96xf32> to vector<2x96xf32>
    %802 = vector.shape_cast %798 : vector<2x96xf32> to vector<1x2x96xf32>
    tpu.vector_store %arg28[%799, %c0_265, %c0_266], %802 {strides = array<i32>} : memref<8x2x96xf32, #tpu.memory_space<vmem>>, vector<1x2x96xf32>,
    %c1_i32_267 = arith.constant 1 : i32
    %c1_i32_268 = arith.constant 1 : i32
    %803 = arith.muli %c1_i32_267, %c1_i32_268 : i32
    %c0_i32_269 = arith.constant 0 : i32
    %804 = arith.addi %c0_i32_269, %803 : i32
    %805 = arith.index_cast %804 : i32 to index
    %c0_270 = arith.constant 0 : index
    %c0_271 = arith.constant 0 : index
    %806 = vector.load %arg25[%805, %c0_270, %c0_271] : memref<8x2x32xf32, #tpu.memory_space<vmem>>, vector<1x2x32xf32>
    %807 = vector.shape_cast %806 : vector<1x2x32xf32> to vector<2x32xf32>
    %808 = arith.truncf %807 : vector<2x32xf32> to vector<2x32xbf16>
    %809 = arith.index_cast %804 : i32 to index
    %c0_272 = arith.constant 0 : index
    %c0_273 = arith.constant 0 : index
    %810 = vector.load %arg26[%809, %c0_272, %c0_273] : memref<8x2x32xf32, #tpu.memory_space<vmem>>, vector<1x2x32xf32>
    %811 = vector.shape_cast %810 : vector<1x2x32xf32> to vector<2x32xf32>
    %812 = arith.truncf %811 : vector<2x32xf32> to vector<2x32xbf16>
    %cst_274 = arith.constant dense<0.000000e+00> : vector<2x96xf32>
    %813 = tpu.matmul %808, %769, %cst_274 {dimension_numbers = #tpu.dot_dimension_numbers<[1], [0], [0], [1], [0, 0, 1, 1], [], []>} : vector<2x32xbf16>, vector<32x96xbf16>, vector<2x96xf32> -> vector<2x96xf32>
    %cst_275 = arith.constant dense<0.000000e+00> : vector<2x96xf32>
    %814 = tpu.matmul %812, %770, %cst_275 {dimension_numbers = #tpu.dot_dimension_numbers<[1], [0], [0], [1], [0, 0, 1, 1], [], []>} : vector<2x32xbf16>, vector<32x96xbf16>, vector<2x96xf32> -> vector<2x96xf32>
    %815 = arith.addf %813, %814 : vector<2x96xf32>
    %816 = vector.broadcast %771 : vector<1x96xf32> to vector<2x96xf32>
    %817 = arith.addf %815, %816 : vector<2x96xf32>
    %818 = arith.index_cast %804 : i32 to index
    %c0_276 = arith.constant 0 : index
    %c0_277 = arith.constant 0 : index
    %819 = vector.load %arg27[%818, %c0_276, %c0_277] : memref<8x2x96xf32, #tpu.memory_space<vmem>>, vector<1x2x96xf32>
    %820 = vector.shape_cast %819 : vector<1x2x96xf32> to vector<2x96xf32>
    %821 = vector.shape_cast %817 : vector<2x96xf32> to vector<1x2x96xf32>
    tpu.vector_store %arg27[%818, %c0_276, %c0_277], %821 {strides = array<i32>} : memref<8x2x96xf32, #tpu.memory_space<vmem>>, vector<1x2x96xf32>,
    %cst_278 = arith.constant dense<0.000000e+00> : vector<2x96xf32>
    %822 = tpu.matmul %808, %772, %cst_278 {dimension_numbers = #tpu.dot_dimension_numbers<[1], [0], [0], [1], [0, 0, 1, 1], [], []>} : vector<2x32xbf16>, vector<32x96xbf16>, vector<2x96xf32> -> vector<2x96xf32>
    %cst_279 = arith.constant dense<0.000000e+00> : vector<2x96xf32>
    %823 = tpu.matmul %812, %773, %cst_279 {dimension_numbers = #tpu.dot_dimension_numbers<[1], [0], [0], [1], [0, 0, 1, 1], [], []>} : vector<2x32xbf16>, vector<32x96xbf16>, vector<2x96xf32> -> vector<2x96xf32>
    %824 = arith.addf %822, %823 : vector<2x96xf32>
    %825 = vector.broadcast %774 : vector<1x96xf32> to vector<2x96xf32>
    %826 = arith.addf %824, %825 : vector<2x96xf32>
    %827 = arith.index_cast %804 : i32 to index
    %c0_280 = arith.constant 0 : index
    %c0_281 = arith.constant 0 : index
    %828 = vector.load %arg28[%827, %c0_280, %c0_281] : memref<8x2x96xf32, #tpu.memory_space<vmem>>, vector<1x2x96xf32>
    %829 = vector.shape_cast %828 : vector<1x2x96xf32> to vector<2x96xf32>
    %830 = vector.shape_cast %826 : vector<2x96xf32> to vector<1x2x96xf32>
    tpu.vector_store %arg28[%827, %c0_280, %c0_281], %830 {strides = array<i32>} : memref<8x2x96xf32, #tpu.memory_space<vmem>>, vector<1x2x96xf32>,
    %c2_i32_282 = arith.constant 2 : i32
    %c1_i32_283 = arith.constant 1 : i32
    %831 = arith.muli %c2_i32_282, %c1_i32_283 : i32
    %c0_i32_284 = arith.constant 0 : i32
    %832 = arith.addi %c0_i32_284, %831 : i32
    %833 = arith.index_cast %832 : i32 to index
    %c0_285 = arith.constant 0 : index
    %c0_286 = arith.constant 0 : index
    %834 = vector.load %arg25[%833, %c0_285, %c0_286] : memref<8x2x32xf32, #tpu.memory_space<vmem>>, vector<1x2x32xf32>
    %835 = vector.shape_cast %834 : vector<1x2x32xf32> to vector<2x32xf32>
    %836 = arith.truncf %835 : vector<2x32xf32> to vector<2x32xbf16>
    %837 = arith.index_cast %832 : i32 to index
    %c0_287 = arith.constant 0 : index
    %c0_288 = arith.constant 0 : index
    %838 = vector.load %arg26[%837, %c0_287, %c0_288] : memref<8x2x32xf32, #tpu.memory_space<vmem>>, vector<1x2x32xf32>
    %839 = vector.shape_cast %838 : vector<1x2x32xf32> to vector<2x32xf32>
    %840 = arith.truncf %839 : vector<2x32xf32> to vector<2x32xbf16>
    %cst_289 = arith.constant dense<0.000000e+00> : vector<2x96xf32>
    %841 = tpu.matmul %836, %769, %cst_289 {dimension_numbers = #tpu.dot_dimension_numbers<[1], [0], [0], [1], [0, 0, 1, 1], [], []>} : vector<2x32xbf16>, vector<32x96xbf16>, vector<2x96xf32> -> vector<2x96xf32>
    %cst_290 = arith.constant dense<0.000000e+00> : vector<2x96xf32>
    %842 = tpu.matmul %840, %770, %cst_290 {dimension_numbers = #tpu.dot_dimension_numbers<[1], [0], [0], [1], [0, 0, 1, 1], [], []>} : vector<2x32xbf16>, vector<32x96xbf16>, vector<2x96xf32> -> vector<2x96xf32>
    %843 = arith.addf %841, %842 : vector<2x96xf32>
    %844 = vector.broadcast %771 : vector<1x96xf32> to vector<2x96xf32>
    %845 = arith.addf %843, %844 : vector<2x96xf32>
    %846 = arith.index_cast %832 : i32 to index
    %c0_291 = arith.constant 0 : index
    %c0_292 = arith.constant 0 : index
    %847 = vector.load %arg27[%846, %c0_291, %c0_292] : memref<8x2x96xf32, #tpu.memory_space<vmem>>, vector<1x2x96xf32>
    %848 = vector.shape_cast %847 : vector<1x2x96xf32> to vector<2x96xf32>
    %849 = vector.shape_cast %845 : vector<2x96xf32> to vector<1x2x96xf32>
    tpu.vector_store %arg27[%846, %c0_291, %c0_292], %849 {strides = array<i32>} : memref<8x2x96xf32, #tpu.memory_space<vmem>>, vector<1x2x96xf32>,
    %cst_293 = arith.constant dense<0.000000e+00> : vector<2x96xf32>
    %850 = tpu.matmul %836, %772, %cst_293 {dimension_numbers = #tpu.dot_dimension_numbers<[1], [0], [0], [1], [0, 0, 1, 1], [], []>} : vector<2x32xbf16>, vector<32x96xbf16>, vector<2x96xf32> -> vector<2x96xf32>
    %cst_294 = arith.constant dense<0.000000e+00> : vector<2x96xf32>
    %851 = tpu.matmul %840, %773, %cst_294 {dimension_numbers = #tpu.dot_dimension_numbers<[1], [0], [0], [1], [0, 0, 1, 1], [], []>} : vector<2x32xbf16>, vector<32x96xbf16>, vector<2x96xf32> -> vector<2x96xf32>
    %852 = arith.addf %850, %851 : vector<2x96xf32>
    %853 = vector.broadcast %774 : vector<1x96xf32> to vector<2x96xf32>
    %854 = arith.addf %852, %853 : vector<2x96xf32>
    %855 = arith.index_cast %832 : i32 to index
    %c0_295 = arith.constant 0 : index
    %c0_296 = arith.constant 0 : index
    %856 = vector.load %arg28[%855, %c0_295, %c0_296] : memref<8x2x96xf32, #tpu.memory_space<vmem>>, vector<1x2x96xf32>
    %857 = vector.shape_cast %856 : vector<1x2x96xf32> to vector<2x96xf32>
    %858 = vector.shape_cast %854 : vector<2x96xf32> to vector<1x2x96xf32>
    tpu.vector_store %arg28[%855, %c0_295, %c0_296], %858 {strides = array<i32>} : memref<8x2x96xf32, #tpu.memory_space<vmem>>, vector<1x2x96xf32>,
    %c3_i32_297 = arith.constant 3 : i32
    %c1_i32_298 = arith.constant 1 : i32
    %859 = arith.muli %c3_i32_297, %c1_i32_298 : i32
    %c0_i32_299 = arith.constant 0 : i32
    %860 = arith.addi %c0_i32_299, %859 : i32
    %861 = arith.index_cast %860 : i32 to index
    %c0_300 = arith.constant 0 : index
    %c0_301 = arith.constant 0 : index
    %862 = vector.load %arg25[%861, %c0_300, %c0_301] : memref<8x2x32xf32, #tpu.memory_space<vmem>>, vector<1x2x32xf32>
    %863 = vector.shape_cast %862 : vector<1x2x32xf32> to vector<2x32xf32>
    %864 = arith.truncf %863 : vector<2x32xf32> to vector<2x32xbf16>
    %865 = arith.index_cast %860 : i32 to index
    %c0_302 = arith.constant 0 : index
    %c0_303 = arith.constant 0 : index
    %866 = vector.load %arg26[%865, %c0_302, %c0_303] : memref<8x2x32xf32, #tpu.memory_space<vmem>>, vector<1x2x32xf32>
    %867 = vector.shape_cast %866 : vector<1x2x32xf32> to vector<2x32xf32>
    %868 = arith.truncf %867 : vector<2x32xf32> to vector<2x32xbf16>
    %cst_304 = arith.constant dense<0.000000e+00> : vector<2x96xf32>
    %869 = tpu.matmul %864, %769, %cst_304 {dimension_numbers = #tpu.dot_dimension_numbers<[1], [0], [0], [1], [0, 0, 1, 1], [], []>} : vector<2x32xbf16>, vector<32x96xbf16>, vector<2x96xf32> -> vector<2x96xf32>
    %cst_305 = arith.constant dense<0.000000e+00> : vector<2x96xf32>
    %870 = tpu.matmul %868, %770, %cst_305 {dimension_numbers = #tpu.dot_dimension_numbers<[1], [0], [0], [1], [0, 0, 1, 1], [], []>} : vector<2x32xbf16>, vector<32x96xbf16>, vector<2x96xf32> -> vector<2x96xf32>
    %871 = arith.addf %869, %870 : vector<2x96xf32>
    %872 = vector.broadcast %771 : vector<1x96xf32> to vector<2x96xf32>
    %873 = arith.addf %871, %872 : vector<2x96xf32>
    %874 = arith.index_cast %860 : i32 to index
    %c0_306 = arith.constant 0 : index
    %c0_307 = arith.constant 0 : index
    %875 = vector.load %arg27[%874, %c0_306, %c0_307] : memref<8x2x96xf32, #tpu.memory_space<vmem>>, vector<1x2x96xf32>
    %876 = vector.shape_cast %875 : vector<1x2x96xf32> to vector<2x96xf32>
    %877 = vector.shape_cast %873 : vector<2x96xf32> to vector<1x2x96xf32>
    tpu.vector_store %arg27[%874, %c0_306, %c0_307], %877 {strides = array<i32>} : memref<8x2x96xf32, #tpu.memory_space<vmem>>, vector<1x2x96xf32>,
    %cst_308 = arith.constant dense<0.000000e+00> : vector<2x96xf32>
    %878 = tpu.matmul %864, %772, %cst_308 {dimension_numbers = #tpu.dot_dimension_numbers<[1], [0], [0], [1], [0, 0, 1, 1], [], []>} : vector<2x32xbf16>, vector<32x96xbf16>, vector<2x96xf32> -> vector<2x96xf32>
    %cst_309 = arith.constant dense<0.000000e+00> : vector<2x96xf32>
    %879 = tpu.matmul %868, %773, %cst_309 {dimension_numbers = #tpu.dot_dimension_numbers<[1], [0], [0], [1], [0, 0, 1, 1], [], []>} : vector<2x32xbf16>, vector<32x96xbf16>, vector<2x96xf32> -> vector<2x96xf32>
    %880 = arith.addf %878, %879 : vector<2x96xf32>
    %881 = vector.broadcast %774 : vector<1x96xf32> to vector<2x96xf32>
    %882 = arith.addf %880, %881 : vector<2x96xf32>
    %883 = arith.index_cast %860 : i32 to index
    %c0_310 = arith.constant 0 : index
    %c0_311 = arith.constant 0 : index
    %884 = vector.load %arg28[%883, %c0_310, %c0_311] : memref<8x2x96xf32, #tpu.memory_space<vmem>>, vector<1x2x96xf32>
    %885 = vector.shape_cast %884 : vector<1x2x96xf32> to vector<2x96xf32>
    %886 = vector.shape_cast %882 : vector<2x96xf32> to vector<1x2x96xf32>
    tpu.vector_store %arg28[%883, %c0_310, %c0_311], %886 {strides = array<i32>} : memref<8x2x96xf32, #tpu.memory_space<vmem>>, vector<1x2x96xf32>,
    %c4_i32_312 = arith.constant 4 : i32
    %c1_i32_313 = arith.constant 1 : i32
    %887 = arith.muli %c4_i32_312, %c1_i32_313 : i32
    %c0_i32_314 = arith.constant 0 : i32
    %888 = arith.addi %c0_i32_314, %887 : i32
    %889 = arith.index_cast %888 : i32 to index
    %c0_315 = arith.constant 0 : index
    %c0_316 = arith.constant 0 : index
    %890 = vector.load %arg25[%889, %c0_315, %c0_316] : memref<8x2x32xf32, #tpu.memory_space<vmem>>, vector<1x2x32xf32>
    %891 = vector.shape_cast %890 : vector<1x2x32xf32> to vector<2x32xf32>
    %892 = arith.truncf %891 : vector<2x32xf32> to vector<2x32xbf16>
    %893 = arith.index_cast %888 : i32 to index
    %c0_317 = arith.constant 0 : index
    %c0_318 = arith.constant 0 : index
    %894 = vector.load %arg26[%893, %c0_317, %c0_318] : memref<8x2x32xf32, #tpu.memory_space<vmem>>, vector<1x2x32xf32>
    %895 = vector.shape_cast %894 : vector<1x2x32xf32> to vector<2x32xf32>
    %896 = arith.truncf %895 : vector<2x32xf32> to vector<2x32xbf16>
    %cst_319 = arith.constant dense<0.000000e+00> : vector<2x96xf32>
    %897 = tpu.matmul %892, %769, %cst_319 {dimension_numbers = #tpu.dot_dimension_numbers<[1], [0], [0], [1], [0, 0, 1, 1], [], []>} : vector<2x32xbf16>, vector<32x96xbf16>, vector<2x96xf32> -> vector<2x96xf32>
    %cst_320 = arith.constant dense<0.000000e+00> : vector<2x96xf32>
    %898 = tpu.matmul %896, %770, %cst_320 {dimension_numbers = #tpu.dot_dimension_numbers<[1], [0], [0], [1], [0, 0, 1, 1], [], []>} : vector<2x32xbf16>, vector<32x96xbf16>, vector<2x96xf32> -> vector<2x96xf32>
    %899 = arith.addf %897, %898 : vector<2x96xf32>
    %900 = vector.broadcast %771 : vector<1x96xf32> to vector<2x96xf32>
    %901 = arith.addf %899, %900 : vector<2x96xf32>
    %902 = arith.index_cast %888 : i32 to index
    %c0_321 = arith.constant 0 : index
    %c0_322 = arith.constant 0 : index
    %903 = vector.load %arg27[%902, %c0_321, %c0_322] : memref<8x2x96xf32, #tpu.memory_space<vmem>>, vector<1x2x96xf32>
    %904 = vector.shape_cast %903 : vector<1x2x96xf32> to vector<2x96xf32>
    %905 = vector.shape_cast %901 : vector<2x96xf32> to vector<1x2x96xf32>
    tpu.vector_store %arg27[%902, %c0_321, %c0_322], %905 {strides = array<i32>} : memref<8x2x96xf32, #tpu.memory_space<vmem>>, vector<1x2x96xf32>,
    %cst_323 = arith.constant dense<0.000000e+00> : vector<2x96xf32>
    %906 = tpu.matmul %892, %772, %cst_323 {dimension_numbers = #tpu.dot_dimension_numbers<[1], [0], [0], [1], [0, 0, 1, 1], [], []>} : vector<2x32xbf16>, vector<32x96xbf16>, vector<2x96xf32> -> vector<2x96xf32>
    %cst_324 = arith.constant dense<0.000000e+00> : vector<2x96xf32>
    %907 = tpu.matmul %896, %773, %cst_324 {dimension_numbers = #tpu.dot_dimension_numbers<[1], [0], [0], [1], [0, 0, 1, 1], [], []>} : vector<2x32xbf16>, vector<32x96xbf16>, vector<2x96xf32> -> vector<2x96xf32>
    %908 = arith.addf %906, %907 : vector<2x96xf32>
    %909 = vector.broadcast %774 : vector<1x96xf32> to vector<2x96xf32>
    %910 = arith.addf %908, %909 : vector<2x96xf32>
    %911 = arith.index_cast %888 : i32 to index
    %c0_325 = arith.constant 0 : index
    %c0_326 = arith.constant 0 : index
    %912 = vector.load %arg28[%911, %c0_325, %c0_326] : memref<8x2x96xf32, #tpu.memory_space<vmem>>, vector<1x2x96xf32>
    %913 = vector.shape_cast %912 : vector<1x2x96xf32> to vector<2x96xf32>
    %914 = vector.shape_cast %910 : vector<2x96xf32> to vector<1x2x96xf32>
    tpu.vector_store %arg28[%911, %c0_325, %c0_326], %914 {strides = array<i32>} : memref<8x2x96xf32, #tpu.memory_space<vmem>>, vector<1x2x96xf32>,
    %c5_i32_327 = arith.constant 5 : i32
    %c1_i32_328 = arith.constant 1 : i32
    %915 = arith.muli %c5_i32_327, %c1_i32_328 : i32
    %c0_i32_329 = arith.constant 0 : i32
    %916 = arith.addi %c0_i32_329, %915 : i32
    %917 = arith.index_cast %916 : i32 to index
    %c0_330 = arith.constant 0 : index
    %c0_331 = arith.constant 0 : index
    %918 = vector.load %arg25[%917, %c0_330, %c0_331] : memref<8x2x32xf32, #tpu.memory_space<vmem>>, vector<1x2x32xf32>
    %919 = vector.shape_cast %918 : vector<1x2x32xf32> to vector<2x32xf32>
    %920 = arith.truncf %919 : vector<2x32xf32> to vector<2x32xbf16>
    %921 = arith.index_cast %916 : i32 to index
    %c0_332 = arith.constant 0 : index
    %c0_333 = arith.constant 0 : index
    %922 = vector.load %arg26[%921, %c0_332, %c0_333] : memref<8x2x32xf32, #tpu.memory_space<vmem>>, vector<1x2x32xf32>
    %923 = vector.shape_cast %922 : vector<1x2x32xf32> to vector<2x32xf32>
    %924 = arith.truncf %923 : vector<2x32xf32> to vector<2x32xbf16>
    %cst_334 = arith.constant dense<0.000000e+00> : vector<2x96xf32>
    %925 = tpu.matmul %920, %769, %cst_334 {dimension_numbers = #tpu.dot_dimension_numbers<[1], [0], [0], [1], [0, 0, 1, 1], [], []>} : vector<2x32xbf16>, vector<32x96xbf16>, vector<2x96xf32> -> vector<2x96xf32>
    %cst_335 = arith.constant dense<0.000000e+00> : vector<2x96xf32>
    %926 = tpu.matmul %924, %770, %cst_335 {dimension_numbers = #tpu.dot_dimension_numbers<[1], [0], [0], [1], [0, 0, 1, 1], [], []>} : vector<2x32xbf16>, vector<32x96xbf16>, vector<2x96xf32> -> vector<2x96xf32>
    %927 = arith.addf %925, %926 : vector<2x96xf32>
    %928 = vector.broadcast %771 : vector<1x96xf32> to vector<2x96xf32>
    %929 = arith.addf %927, %928 : vector<2x96xf32>
    %930 = arith.index_cast %916 : i32 to index
    %c0_336 = arith.constant 0 : index
    %c0_337 = arith.constant 0 : index
    %931 = vector.load %arg27[%930, %c0_336, %c0_337] : memref<8x2x96xf32, #tpu.memory_space<vmem>>, vector<1x2x96xf32>
    %932 = vector.shape_cast %931 : vector<1x2x96xf32> to vector<2x96xf32>
    %933 = vector.shape_cast %929 : vector<2x96xf32> to vector<1x2x96xf32>
    tpu.vector_store %arg27[%930, %c0_336, %c0_337], %933 {strides = array<i32>} : memref<8x2x96xf32, #tpu.memory_space<vmem>>, vector<1x2x96xf32>,
    %cst_338 = arith.constant dense<0.000000e+00> : vector<2x96xf32>
    %934 = tpu.matmul %920, %772, %cst_338 {dimension_numbers = #tpu.dot_dimension_numbers<[1], [0], [0], [1], [0, 0, 1, 1], [], []>} : vector<2x32xbf16>, vector<32x96xbf16>, vector<2x96xf32> -> vector<2x96xf32>
    %cst_339 = arith.constant dense<0.000000e+00> : vector<2x96xf32>
    %935 = tpu.matmul %924, %773, %cst_339 {dimension_numbers = #tpu.dot_dimension_numbers<[1], [0], [0], [1], [0, 0, 1, 1], [], []>} : vector<2x32xbf16>, vector<32x96xbf16>, vector<2x96xf32> -> vector<2x96xf32>
    %936 = arith.addf %934, %935 : vector<2x96xf32>
    %937 = vector.broadcast %774 : vector<1x96xf32> to vector<2x96xf32>
    %938 = arith.addf %936, %937 : vector<2x96xf32>
    %939 = arith.index_cast %916 : i32 to index
    %c0_340 = arith.constant 0 : index
    %c0_341 = arith.constant 0 : index
    %940 = vector.load %arg28[%939, %c0_340, %c0_341] : memref<8x2x96xf32, #tpu.memory_space<vmem>>, vector<1x2x96xf32>
    %941 = vector.shape_cast %940 : vector<1x2x96xf32> to vector<2x96xf32>
    %942 = vector.shape_cast %938 : vector<2x96xf32> to vector<1x2x96xf32>
    tpu.vector_store %arg28[%939, %c0_340, %c0_341], %942 {strides = array<i32>} : memref<8x2x96xf32, #tpu.memory_space<vmem>>, vector<1x2x96xf32>,
    %c6_i32_342 = arith.constant 6 : i32
    %c1_i32_343 = arith.constant 1 : i32
    %943 = arith.muli %c6_i32_342, %c1_i32_343 : i32
    %c0_i32_344 = arith.constant 0 : i32
    %944 = arith.addi %c0_i32_344, %943 : i32
    %945 = arith.index_cast %944 : i32 to index
    %c0_345 = arith.constant 0 : index
    %c0_346 = arith.constant 0 : index
    %946 = vector.load %arg25[%945, %c0_345, %c0_346] : memref<8x2x32xf32, #tpu.memory_space<vmem>>, vector<1x2x32xf32>
    %947 = vector.shape_cast %946 : vector<1x2x32xf32> to vector<2x32xf32>
    %948 = arith.truncf %947 : vector<2x32xf32> to vector<2x32xbf16>
    %949 = arith.index_cast %944 : i32 to index
    %c0_347 = arith.constant 0 : index
    %c0_348 = arith.constant 0 : index
    %950 = vector.load %arg26[%949, %c0_347, %c0_348] : memref<8x2x32xf32, #tpu.memory_space<vmem>>, vector<1x2x32xf32>
    %951 = vector.shape_cast %950 : vector<1x2x32xf32> to vector<2x32xf32>
    %952 = arith.truncf %951 : vector<2x32xf32> to vector<2x32xbf16>
    %cst_349 = arith.constant dense<0.000000e+00> : vector<2x96xf32>
    %953 = tpu.matmul %948, %769, %cst_349 {dimension_numbers = #tpu.dot_dimension_numbers<[1], [0], [0], [1], [0, 0, 1, 1], [], []>} : vector<2x32xbf16>, vector<32x96xbf16>, vector<2x96xf32> -> vector<2x96xf32>
    %cst_350 = arith.constant dense<0.000000e+00> : vector<2x96xf32>
    %954 = tpu.matmul %952, %770, %cst_350 {dimension_numbers = #tpu.dot_dimension_numbers<[1], [0], [0], [1], [0, 0, 1, 1], [], []>} : vector<2x32xbf16>, vector<32x96xbf16>, vector<2x96xf32> -> vector<2x96xf32>
    %955 = arith.addf %953, %954 : vector<2x96xf32>
    %956 = vector.broadcast %771 : vector<1x96xf32> to vector<2x96xf32>
    %957 = arith.addf %955, %956 : vector<2x96xf32>
    %958 = arith.index_cast %944 : i32 to index
    %c0_351 = arith.constant 0 : index
    %c0_352 = arith.constant 0 : index
    %959 = vector.load %arg27[%958, %c0_351, %c0_352] : memref<8x2x96xf32, #tpu.memory_space<vmem>>, vector<1x2x96xf32>
    %960 = vector.shape_cast %959 : vector<1x2x96xf32> to vector<2x96xf32>
    %961 = vector.shape_cast %957 : vector<2x96xf32> to vector<1x2x96xf32>
    tpu.vector_store %arg27[%958, %c0_351, %c0_352], %961 {strides = array<i32>} : memref<8x2x96xf32, #tpu.memory_space<vmem>>, vector<1x2x96xf32>,
    %cst_353 = arith.constant dense<0.000000e+00> : vector<2x96xf32>
    %962 = tpu.matmul %948, %772, %cst_353 {dimension_numbers = #tpu.dot_dimension_numbers<[1], [0], [0], [1], [0, 0, 1, 1], [], []>} : vector<2x32xbf16>, vector<32x96xbf16>, vector<2x96xf32> -> vector<2x96xf32>
    %cst_354 = arith.constant dense<0.000000e+00> : vector<2x96xf32>
    %963 = tpu.matmul %952, %773, %cst_354 {dimension_numbers = #tpu.dot_dimension_numbers<[1], [0], [0], [1], [0, 0, 1, 1], [], []>} : vector<2x32xbf16>, vector<32x96xbf16>, vector<2x96xf32> -> vector<2x96xf32>
    %964 = arith.addf %962, %963 : vector<2x96xf32>
    %965 = vector.broadcast %774 : vector<1x96xf32> to vector<2x96xf32>
    %966 = arith.addf %964, %965 : vector<2x96xf32>
    %967 = arith.index_cast %944 : i32 to index
    %c0_355 = arith.constant 0 : index
    %c0_356 = arith.constant 0 : index
    %968 = vector.load %arg28[%967, %c0_355, %c0_356] : memref<8x2x96xf32, #tpu.memory_space<vmem>>, vector<1x2x96xf32>
    %969 = vector.shape_cast %968 : vector<1x2x96xf32> to vector<2x96xf32>
    %970 = vector.shape_cast %966 : vector<2x96xf32> to vector<1x2x96xf32>
    tpu.vector_store %arg28[%967, %c0_355, %c0_356], %970 {strides = array<i32>} : memref<8x2x96xf32, #tpu.memory_space<vmem>>, vector<1x2x96xf32>,
    %c7_i32_357 = arith.constant 7 : i32
    %c1_i32_358 = arith.constant 1 : i32
    %971 = arith.muli %c7_i32_357, %c1_i32_358 : i32
    %c0_i32_359 = arith.constant 0 : i32
    %972 = arith.addi %c0_i32_359, %971 : i32
    %973 = arith.index_cast %972 : i32 to index
    %c0_360 = arith.constant 0 : index
    %c0_361 = arith.constant 0 : index
    %974 = vector.load %arg25[%973, %c0_360, %c0_361] : memref<8x2x32xf32, #tpu.memory_space<vmem>>, vector<1x2x32xf32>
    %975 = vector.shape_cast %974 : vector<1x2x32xf32> to vector<2x32xf32>
    %976 = arith.truncf %975 : vector<2x32xf32> to vector<2x32xbf16>
    %977 = arith.index_cast %972 : i32 to index
    %c0_362 = arith.constant 0 : index
    %c0_363 = arith.constant 0 : index
    %978 = vector.load %arg26[%977, %c0_362, %c0_363] : memref<8x2x32xf32, #tpu.memory_space<vmem>>, vector<1x2x32xf32>
    %979 = vector.shape_cast %978 : vector<1x2x32xf32> to vector<2x32xf32>
    %980 = arith.truncf %979 : vector<2x32xf32> to vector<2x32xbf16>
    %cst_364 = arith.constant dense<0.000000e+00> : vector<2x96xf32>
    %981 = tpu.matmul %976, %769, %cst_364 {dimension_numbers = #tpu.dot_dimension_numbers<[1], [0], [0], [1], [0, 0, 1, 1], [], []>} : vector<2x32xbf16>, vector<32x96xbf16>, vector<2x96xf32> -> vector<2x96xf32>
    %cst_365 = arith.constant dense<0.000000e+00> : vector<2x96xf32>
    %982 = tpu.matmul %980, %770, %cst_365 {dimension_numbers = #tpu.dot_dimension_numbers<[1], [0], [0], [1], [0, 0, 1, 1], [], []>} : vector<2x32xbf16>, vector<32x96xbf16>, vector<2x96xf32> -> vector<2x96xf32>
    %983 = arith.addf %981, %982 : vector<2x96xf32>
    %984 = vector.broadcast %771 : vector<1x96xf32> to vector<2x96xf32>
    %985 = arith.addf %983, %984 : vector<2x96xf32>
    %986 = arith.index_cast %972 : i32 to index
    %c0_366 = arith.constant 0 : index
    %c0_367 = arith.constant 0 : index
    %987 = vector.load %arg27[%986, %c0_366, %c0_367] : memref<8x2x96xf32, #tpu.memory_space<vmem>>, vector<1x2x96xf32>
    %988 = vector.shape_cast %987 : vector<1x2x96xf32> to vector<2x96xf32>
    %989 = vector.shape_cast %985 : vector<2x96xf32> to vector<1x2x96xf32>
    tpu.vector_store %arg27[%986, %c0_366, %c0_367], %989 {strides = array<i32>} : memref<8x2x96xf32, #tpu.memory_space<vmem>>, vector<1x2x96xf32>,
    %cst_368 = arith.constant dense<0.000000e+00> : vector<2x96xf32>
    %990 = tpu.matmul %976, %772, %cst_368 {dimension_numbers = #tpu.dot_dimension_numbers<[1], [0], [0], [1], [0, 0, 1, 1], [], []>} : vector<2x32xbf16>, vector<32x96xbf16>, vector<2x96xf32> -> vector<2x96xf32>
    %cst_369 = arith.constant dense<0.000000e+00> : vector<2x96xf32>
    %991 = tpu.matmul %980, %773, %cst_369 {dimension_numbers = #tpu.dot_dimension_numbers<[1], [0], [0], [1], [0, 0, 1, 1], [], []>} : vector<2x32xbf16>, vector<32x96xbf16>, vector<2x96xf32> -> vector<2x96xf32>
    %992 = arith.addf %990, %991 : vector<2x96xf32>
    %993 = vector.broadcast %774 : vector<1x96xf32> to vector<2x96xf32>
    %994 = arith.addf %992, %993 : vector<2x96xf32>
    %995 = arith.index_cast %972 : i32 to index
    %c0_370 = arith.constant 0 : index
    %c0_371 = arith.constant 0 : index
    %996 = vector.load %arg28[%995, %c0_370, %c0_371] : memref<8x2x96xf32, #tpu.memory_space<vmem>>, vector<1x2x96xf32>
    %997 = vector.shape_cast %996 : vector<1x2x96xf32> to vector<2x96xf32>
    %998 = vector.shape_cast %994 : vector<2x96xf32> to vector<1x2x96xf32>
    tpu.vector_store %arg28[%995, %c0_370, %c0_371], %998 {strides = array<i32>} : memref<8x2x96xf32, #tpu.memory_space<vmem>>, vector<1x2x96xf32>,
    %c8_i32_372 = arith.constant 8 : i32
    %c0_373 = arith.constant 0 : index
    %c0_374 = arith.constant 0 : index
    %999 = vector.load %arg13[%c0_373, %c0_374] : memref<32x96xbf16, #tpu.memory_space<vmem>>, vector<32x96xbf16>
    %c0_375 = arith.constant 0 : index
    %c0_376 = arith.constant 0 : index
    %1000 = vector.load %arg14[%c0_375, %c0_376] : memref<1x32xf32, #tpu.memory_space<vmem>>, vector<1x32xf32>
    %c0_377 = arith.constant 0 : index
    %c0_378 = arith.constant 0 : index
    %1001 = vector.load %arg18[%c0_377, %c0_378] : memref<32x96xbf16, #tpu.memory_space<vmem>>, vector<32x96xbf16>
    %c0_379 = arith.constant 0 : index
    %c0_380 = arith.constant 0 : index
    %1002 = vector.load %arg19[%c0_379, %c0_380] : memref<1x32xf32, #tpu.memory_space<vmem>>, vector<1x32xf32>
    %c0_i32_381 = arith.constant 0 : i32
    %c7_i32_382 = arith.constant 7 : i32
    %1003 = arith.subi %c7_i32_382, %c0_i32_381 : i32
    %1004 = arith.index_cast %c0_i32_381 : i32 to index
    %c0_383 = arith.constant 0 : index
    %c0_384 = arith.constant 0 : index
    %1005 = vector.load %arg27[%1004, %c0_383, %c0_384] : memref<8x2x96xf32, #tpu.memory_space<vmem>>, vector<1x2x96xf32>
    %1006 = vector.shape_cast %1005 : vector<1x2x96xf32> to vector<2x96xf32>
    %1007 = arith.truncf %164 : vector<2x32xf32> to vector<2x32xbf16>
    %cst_385 = arith.constant dense<0.000000e+00> : vector<2x96xf32>
    %1008 = tpu.matmul %1007, %999, %cst_385 {dimension_numbers = #tpu.dot_dimension_numbers<[1], [0], [0], [1], [0, 0, 1, 1], [], []>} : vector<2x32xbf16>, vector<32x96xbf16>, vector<2x96xf32> -> vector<2x96xf32>
    %1009 = vector.extract_strided_slice %1006 {offsets = [0, 0], sizes = [2, 32], strides = [1, 1]} : vector<2x96xf32> to vector<2x32xf32>
    %1010 = vector.extract_strided_slice %1008 {offsets = [0, 0], sizes = [2, 32], strides = [1, 1]} : vector<2x96xf32> to vector<2x32xf32>
    %1011 = arith.addf %1009, %1010 : vector<2x32xf32>
    %1012 = arith.negf %1011 : vector<2x32xf32>
    %1013 = math.exp %1012 : vector<2x32xf32>
    %cst_386 = arith.constant 1.000000e+00 : f32
    %1014 = vector.broadcast %cst_386 : f32 to vector<2x32xf32>
    %1015 = arith.addf %1014, %1013 : vector<2x32xf32>
    %1016 = arith.divf %1014, %1015 : vector<2x32xf32>
    %1017 = vector.extract_strided_slice %1006 {offsets = [0, 32], sizes = [2, 32], strides = [1, 1]} : vector<2x96xf32> to vector<2x32xf32>
    %1018 = vector.extract_strided_slice %1008 {offsets = [0, 32], sizes = [2, 32], strides = [1, 1]} : vector<2x96xf32> to vector<2x32xf32>
    %1019 = arith.addf %1017, %1018 : vector<2x32xf32>
    %1020 = arith.negf %1019 : vector<2x32xf32>
    %1021 = math.exp %1020 : vector<2x32xf32>
    %cst_387 = arith.constant 1.000000e+00 : f32
    %1022 = vector.broadcast %cst_387 : f32 to vector<2x32xf32>
    %1023 = arith.addf %1022, %1021 : vector<2x32xf32>
    %1024 = arith.divf %1022, %1023 : vector<2x32xf32>
    %1025 = vector.extract_strided_slice %1006 {offsets = [0, 64], sizes = [2, 32], strides = [1, 1]} : vector<2x96xf32> to vector<2x32xf32>
    %1026 = vector.extract_strided_slice %1008 {offsets = [0, 64], sizes = [2, 32], strides = [1, 1]} : vector<2x96xf32> to vector<2x32xf32>
    %1027 = vector.broadcast %1000 : vector<1x32xf32> to vector<2x32xf32>
    %1028 = arith.addf %1026, %1027 : vector<2x32xf32>
    %1029 = arith.mulf %1016, %1028 : vector<2x32xf32>
    %1030 = arith.addf %1025, %1029 : vector<2x32xf32>
    %1031 = math.tanh %1030 : vector<2x32xf32>
    %cst_388 = arith.constant 1.000000e+00 : f32
    %1032 = vector.broadcast %cst_388 : f32 to vector<2x32xf32>
    %1033 = arith.subf %1032, %1024 : vector<2x32xf32>
    %1034 = arith.mulf %1033, %1031 : vector<2x32xf32>
    %1035 = arith.mulf %1024, %164 : vector<2x32xf32>
    %1036 = arith.addf %1034, %1035 : vector<2x32xf32>
    %1037 = arith.index_cast %1003 : i32 to index
    %c0_389 = arith.constant 0 : index
    %c0_390 = arith.constant 0 : index
    %1038 = vector.load %arg28[%1037, %c0_389, %c0_390] : memref<8x2x96xf32, #tpu.memory_space<vmem>>, vector<1x2x96xf32>
    %1039 = vector.shape_cast %1038 : vector<1x2x96xf32> to vector<2x96xf32>
    %1040 = arith.truncf %164 : vector<2x32xf32> to vector<2x32xbf16>
    %cst_391 = arith.constant dense<0.000000e+00> : vector<2x96xf32>
    %1041 = tpu.matmul %1040, %1001, %cst_391 {dimension_numbers = #tpu.dot_dimension_numbers<[1], [0], [0], [1], [0, 0, 1, 1], [], []>} : vector<2x32xbf16>, vector<32x96xbf16>, vector<2x96xf32> -> vector<2x96xf32>
    %1042 = vector.extract_strided_slice %1039 {offsets = [0, 0], sizes = [2, 32], strides = [1, 1]} : vector<2x96xf32> to vector<2x32xf32>
    %1043 = vector.extract_strided_slice %1041 {offsets = [0, 0], sizes = [2, 32], strides = [1, 1]} : vector<2x96xf32> to vector<2x32xf32>
    %1044 = arith.addf %1042, %1043 : vector<2x32xf32>
    %1045 = arith.negf %1044 : vector<2x32xf32>
    %1046 = math.exp %1045 : vector<2x32xf32>
    %cst_392 = arith.constant 1.000000e+00 : f32
    %1047 = vector.broadcast %cst_392 : f32 to vector<2x32xf32>
    %1048 = arith.addf %1047, %1046 : vector<2x32xf32>
    %1049 = arith.divf %1047, %1048 : vector<2x32xf32>
    %1050 = vector.extract_strided_slice %1039 {offsets = [0, 32], sizes = [2, 32], strides = [1, 1]} : vector<2x96xf32> to vector<2x32xf32>
    %1051 = vector.extract_strided_slice %1041 {offsets = [0, 32], sizes = [2, 32], strides = [1, 1]} : vector<2x96xf32> to vector<2x32xf32>
    %1052 = arith.addf %1050, %1051 : vector<2x32xf32>
    %1053 = arith.negf %1052 : vector<2x32xf32>
    %1054 = math.exp %1053 : vector<2x32xf32>
    %cst_393 = arith.constant 1.000000e+00 : f32
    %1055 = vector.broadcast %cst_393 : f32 to vector<2x32xf32>
    %1056 = arith.addf %1055, %1054 : vector<2x32xf32>
    %1057 = arith.divf %1055, %1056 : vector<2x32xf32>
    %1058 = vector.extract_strided_slice %1039 {offsets = [0, 64], sizes = [2, 32], strides = [1, 1]} : vector<2x96xf32> to vector<2x32xf32>
    %1059 = vector.extract_strided_slice %1041 {offsets = [0, 64], sizes = [2, 32], strides = [1, 1]} : vector<2x96xf32> to vector<2x32xf32>
    %1060 = vector.broadcast %1002 : vector<1x32xf32> to vector<2x32xf32>
    %1061 = arith.addf %1059, %1060 : vector<2x32xf32>
    %1062 = arith.mulf %1049, %1061 : vector<2x32xf32>
    %1063 = arith.addf %1058, %1062 : vector<2x32xf32>
    %1064 = math.tanh %1063 : vector<2x32xf32>
    %cst_394 = arith.constant 1.000000e+00 : f32
    %1065 = vector.broadcast %cst_394 : f32 to vector<2x32xf32>
    %1066 = arith.subf %1065, %1057 : vector<2x32xf32>
    %1067 = arith.mulf %1066, %1064 : vector<2x32xf32>
    %1068 = arith.mulf %1057, %164 : vector<2x32xf32>
    %1069 = arith.addf %1067, %1068 : vector<2x32xf32>
    %c1_i32_395 = arith.constant 1 : i32
    %c7_i32_396 = arith.constant 7 : i32
    %1070 = arith.subi %c7_i32_396, %c1_i32_395 : i32
    %1071 = arith.index_cast %c1_i32_395 : i32 to index
    %c0_397 = arith.constant 0 : index
    %c0_398 = arith.constant 0 : index
    %1072 = vector.load %arg27[%1071, %c0_397, %c0_398] : memref<8x2x96xf32, #tpu.memory_space<vmem>>, vector<1x2x96xf32>
    %1073 = vector.shape_cast %1072 : vector<1x2x96xf32> to vector<2x96xf32>
    %1074 = arith.truncf %1036 : vector<2x32xf32> to vector<2x32xbf16>
    %cst_399 = arith.constant dense<0.000000e+00> : vector<2x96xf32>
    %1075 = tpu.matmul %1074, %999, %cst_399 {dimension_numbers = #tpu.dot_dimension_numbers<[1], [0], [0], [1], [0, 0, 1, 1], [], []>} : vector<2x32xbf16>, vector<32x96xbf16>, vector<2x96xf32> -> vector<2x96xf32>
    %1076 = vector.extract_strided_slice %1073 {offsets = [0, 0], sizes = [2, 32], strides = [1, 1]} : vector<2x96xf32> to vector<2x32xf32>
    %1077 = vector.extract_strided_slice %1075 {offsets = [0, 0], sizes = [2, 32], strides = [1, 1]} : vector<2x96xf32> to vector<2x32xf32>
    %1078 = arith.addf %1076, %1077 : vector<2x32xf32>
    %1079 = arith.negf %1078 : vector<2x32xf32>
    %1080 = math.exp %1079 : vector<2x32xf32>
    %cst_400 = arith.constant 1.000000e+00 : f32
    %1081 = vector.broadcast %cst_400 : f32 to vector<2x32xf32>
    %1082 = arith.addf %1081, %1080 : vector<2x32xf32>
    %1083 = arith.divf %1081, %1082 : vector<2x32xf32>
    %1084 = vector.extract_strided_slice %1073 {offsets = [0, 32], sizes = [2, 32], strides = [1, 1]} : vector<2x96xf32> to vector<2x32xf32>
    %1085 = vector.extract_strided_slice %1075 {offsets = [0, 32], sizes = [2, 32], strides = [1, 1]} : vector<2x96xf32> to vector<2x32xf32>
    %1086 = arith.addf %1084, %1085 : vector<2x32xf32>
    %1087 = arith.negf %1086 : vector<2x32xf32>
    %1088 = math.exp %1087 : vector<2x32xf32>
    %cst_401 = arith.constant 1.000000e+00 : f32
    %1089 = vector.broadcast %cst_401 : f32 to vector<2x32xf32>
    %1090 = arith.addf %1089, %1088 : vector<2x32xf32>
    %1091 = arith.divf %1089, %1090 : vector<2x32xf32>
    %1092 = vector.extract_strided_slice %1073 {offsets = [0, 64], sizes = [2, 32], strides = [1, 1]} : vector<2x96xf32> to vector<2x32xf32>
    %1093 = vector.extract_strided_slice %1075 {offsets = [0, 64], sizes = [2, 32], strides = [1, 1]} : vector<2x96xf32> to vector<2x32xf32>
    %1094 = vector.broadcast %1000 : vector<1x32xf32> to vector<2x32xf32>
    %1095 = arith.addf %1093, %1094 : vector<2x32xf32>
    %1096 = arith.mulf %1083, %1095 : vector<2x32xf32>
    %1097 = arith.addf %1092, %1096 : vector<2x32xf32>
    %1098 = math.tanh %1097 : vector<2x32xf32>
    %cst_402 = arith.constant 1.000000e+00 : f32
    %1099 = vector.broadcast %cst_402 : f32 to vector<2x32xf32>
    %1100 = arith.subf %1099, %1091 : vector<2x32xf32>
    %1101 = arith.mulf %1100, %1098 : vector<2x32xf32>
    %1102 = arith.mulf %1091, %1036 : vector<2x32xf32>
    %1103 = arith.addf %1101, %1102 : vector<2x32xf32>
    %1104 = arith.index_cast %1070 : i32 to index
    %c0_403 = arith.constant 0 : index
    %c0_404 = arith.constant 0 : index
    %1105 = vector.load %arg28[%1104, %c0_403, %c0_404] : memref<8x2x96xf32, #tpu.memory_space<vmem>>, vector<1x2x96xf32>
    %1106 = vector.shape_cast %1105 : vector<1x2x96xf32> to vector<2x96xf32>
    %1107 = arith.truncf %1069 : vector<2x32xf32> to vector<2x32xbf16>
    %cst_405 = arith.constant dense<0.000000e+00> : vector<2x96xf32>
    %1108 = tpu.matmul %1107, %1001, %cst_405 {dimension_numbers = #tpu.dot_dimension_numbers<[1], [0], [0], [1], [0, 0, 1, 1], [], []>} : vector<2x32xbf16>, vector<32x96xbf16>, vector<2x96xf32> -> vector<2x96xf32>
    %1109 = vector.extract_strided_slice %1106 {offsets = [0, 0], sizes = [2, 32], strides = [1, 1]} : vector<2x96xf32> to vector<2x32xf32>
    %1110 = vector.extract_strided_slice %1108 {offsets = [0, 0], sizes = [2, 32], strides = [1, 1]} : vector<2x96xf32> to vector<2x32xf32>
    %1111 = arith.addf %1109, %1110 : vector<2x32xf32>
    %1112 = arith.negf %1111 : vector<2x32xf32>
    %1113 = math.exp %1112 : vector<2x32xf32>
    %cst_406 = arith.constant 1.000000e+00 : f32
    %1114 = vector.broadcast %cst_406 : f32 to vector<2x32xf32>
    %1115 = arith.addf %1114, %1113 : vector<2x32xf32>
    %1116 = arith.divf %1114, %1115 : vector<2x32xf32>
    %1117 = vector.extract_strided_slice %1106 {offsets = [0, 32], sizes = [2, 32], strides = [1, 1]} : vector<2x96xf32> to vector<2x32xf32>
    %1118 = vector.extract_strided_slice %1108 {offsets = [0, 32], sizes = [2, 32], strides = [1, 1]} : vector<2x96xf32> to vector<2x32xf32>
    %1119 = arith.addf %1117, %1118 : vector<2x32xf32>
    %1120 = arith.negf %1119 : vector<2x32xf32>
    %1121 = math.exp %1120 : vector<2x32xf32>
    %cst_407 = arith.constant 1.000000e+00 : f32
    %1122 = vector.broadcast %cst_407 : f32 to vector<2x32xf32>
    %1123 = arith.addf %1122, %1121 : vector<2x32xf32>
    %1124 = arith.divf %1122, %1123 : vector<2x32xf32>
    %1125 = vector.extract_strided_slice %1106 {offsets = [0, 64], sizes = [2, 32], strides = [1, 1]} : vector<2x96xf32> to vector<2x32xf32>
    %1126 = vector.extract_strided_slice %1108 {offsets = [0, 64], sizes = [2, 32], strides = [1, 1]} : vector<2x96xf32> to vector<2x32xf32>
    %1127 = vector.broadcast %1002 : vector<1x32xf32> to vector<2x32xf32>
    %1128 = arith.addf %1126, %1127 : vector<2x32xf32>
    %1129 = arith.mulf %1116, %1128 : vector<2x32xf32>
    %1130 = arith.addf %1125, %1129 : vector<2x32xf32>
    %1131 = math.tanh %1130 : vector<2x32xf32>
    %cst_408 = arith.constant 1.000000e+00 : f32
    %1132 = vector.broadcast %cst_408 : f32 to vector<2x32xf32>
    %1133 = arith.subf %1132, %1124 : vector<2x32xf32>
    %1134 = arith.mulf %1133, %1131 : vector<2x32xf32>
    %1135 = arith.mulf %1124, %1069 : vector<2x32xf32>
    %1136 = arith.addf %1134, %1135 : vector<2x32xf32>
    %c2_i32_409 = arith.constant 2 : i32
    %c7_i32_410 = arith.constant 7 : i32
    %1137 = arith.subi %c7_i32_410, %c2_i32_409 : i32
    %1138 = arith.index_cast %c2_i32_409 : i32 to index
    %c0_411 = arith.constant 0 : index
    %c0_412 = arith.constant 0 : index
    %1139 = vector.load %arg27[%1138, %c0_411, %c0_412] : memref<8x2x96xf32, #tpu.memory_space<vmem>>, vector<1x2x96xf32>
    %1140 = vector.shape_cast %1139 : vector<1x2x96xf32> to vector<2x96xf32>
    %1141 = arith.truncf %1103 : vector<2x32xf32> to vector<2x32xbf16>
    %cst_413 = arith.constant dense<0.000000e+00> : vector<2x96xf32>
    %1142 = tpu.matmul %1141, %999, %cst_413 {dimension_numbers = #tpu.dot_dimension_numbers<[1], [0], [0], [1], [0, 0, 1, 1], [], []>} : vector<2x32xbf16>, vector<32x96xbf16>, vector<2x96xf32> -> vector<2x96xf32>
    %1143 = vector.extract_strided_slice %1140 {offsets = [0, 0], sizes = [2, 32], strides = [1, 1]} : vector<2x96xf32> to vector<2x32xf32>
    %1144 = vector.extract_strided_slice %1142 {offsets = [0, 0], sizes = [2, 32], strides = [1, 1]} : vector<2x96xf32> to vector<2x32xf32>
    %1145 = arith.addf %1143, %1144 : vector<2x32xf32>
    %1146 = arith.negf %1145 : vector<2x32xf32>
    %1147 = math.exp %1146 : vector<2x32xf32>
    %cst_414 = arith.constant 1.000000e+00 : f32
    %1148 = vector.broadcast %cst_414 : f32 to vector<2x32xf32>
    %1149 = arith.addf %1148, %1147 : vector<2x32xf32>
    %1150 = arith.divf %1148, %1149 : vector<2x32xf32>
    %1151 = vector.extract_strided_slice %1140 {offsets = [0, 32], sizes = [2, 32], strides = [1, 1]} : vector<2x96xf32> to vector<2x32xf32>
    %1152 = vector.extract_strided_slice %1142 {offsets = [0, 32], sizes = [2, 32], strides = [1, 1]} : vector<2x96xf32> to vector<2x32xf32>
    %1153 = arith.addf %1151, %1152 : vector<2x32xf32>
    %1154 = arith.negf %1153 : vector<2x32xf32>
    %1155 = math.exp %1154 : vector<2x32xf32>
    %cst_415 = arith.constant 1.000000e+00 : f32
    %1156 = vector.broadcast %cst_415 : f32 to vector<2x32xf32>
    %1157 = arith.addf %1156, %1155 : vector<2x32xf32>
    %1158 = arith.divf %1156, %1157 : vector<2x32xf32>
    %1159 = vector.extract_strided_slice %1140 {offsets = [0, 64], sizes = [2, 32], strides = [1, 1]} : vector<2x96xf32> to vector<2x32xf32>
    %1160 = vector.extract_strided_slice %1142 {offsets = [0, 64], sizes = [2, 32], strides = [1, 1]} : vector<2x96xf32> to vector<2x32xf32>
    %1161 = vector.broadcast %1000 : vector<1x32xf32> to vector<2x32xf32>
    %1162 = arith.addf %1160, %1161 : vector<2x32xf32>
    %1163 = arith.mulf %1150, %1162 : vector<2x32xf32>
    %1164 = arith.addf %1159, %1163 : vector<2x32xf32>
    %1165 = math.tanh %1164 : vector<2x32xf32>
    %cst_416 = arith.constant 1.000000e+00 : f32
    %1166 = vector.broadcast %cst_416 : f32 to vector<2x32xf32>
    %1167 = arith.subf %1166, %1158 : vector<2x32xf32>
    %1168 = arith.mulf %1167, %1165 : vector<2x32xf32>
    %1169 = arith.mulf %1158, %1103 : vector<2x32xf32>
    %1170 = arith.addf %1168, %1169 : vector<2x32xf32>
    %1171 = arith.index_cast %1137 : i32 to index
    %c0_417 = arith.constant 0 : index
    %c0_418 = arith.constant 0 : index
    %1172 = vector.load %arg28[%1171, %c0_417, %c0_418] : memref<8x2x96xf32, #tpu.memory_space<vmem>>, vector<1x2x96xf32>
    %1173 = vector.shape_cast %1172 : vector<1x2x96xf32> to vector<2x96xf32>
    %1174 = arith.truncf %1136 : vector<2x32xf32> to vector<2x32xbf16>
    %cst_419 = arith.constant dense<0.000000e+00> : vector<2x96xf32>
    %1175 = tpu.matmul %1174, %1001, %cst_419 {dimension_numbers = #tpu.dot_dimension_numbers<[1], [0], [0], [1], [0, 0, 1, 1], [], []>} : vector<2x32xbf16>, vector<32x96xbf16>, vector<2x96xf32> -> vector<2x96xf32>
    %1176 = vector.extract_strided_slice %1173 {offsets = [0, 0], sizes = [2, 32], strides = [1, 1]} : vector<2x96xf32> to vector<2x32xf32>
    %1177 = vector.extract_strided_slice %1175 {offsets = [0, 0], sizes = [2, 32], strides = [1, 1]} : vector<2x96xf32> to vector<2x32xf32>
    %1178 = arith.addf %1176, %1177 : vector<2x32xf32>
    %1179 = arith.negf %1178 : vector<2x32xf32>
    %1180 = math.exp %1179 : vector<2x32xf32>
    %cst_420 = arith.constant 1.000000e+00 : f32
    %1181 = vector.broadcast %cst_420 : f32 to vector<2x32xf32>
    %1182 = arith.addf %1181, %1180 : vector<2x32xf32>
    %1183 = arith.divf %1181, %1182 : vector<2x32xf32>
    %1184 = vector.extract_strided_slice %1173 {offsets = [0, 32], sizes = [2, 32], strides = [1, 1]} : vector<2x96xf32> to vector<2x32xf32>
    %1185 = vector.extract_strided_slice %1175 {offsets = [0, 32], sizes = [2, 32], strides = [1, 1]} : vector<2x96xf32> to vector<2x32xf32>
    %1186 = arith.addf %1184, %1185 : vector<2x32xf32>
    %1187 = arith.negf %1186 : vector<2x32xf32>
    %1188 = math.exp %1187 : vector<2x32xf32>
    %cst_421 = arith.constant 1.000000e+00 : f32
    %1189 = vector.broadcast %cst_421 : f32 to vector<2x32xf32>
    %1190 = arith.addf %1189, %1188 : vector<2x32xf32>
    %1191 = arith.divf %1189, %1190 : vector<2x32xf32>
    %1192 = vector.extract_strided_slice %1173 {offsets = [0, 64], sizes = [2, 32], strides = [1, 1]} : vector<2x96xf32> to vector<2x32xf32>
    %1193 = vector.extract_strided_slice %1175 {offsets = [0, 64], sizes = [2, 32], strides = [1, 1]} : vector<2x96xf32> to vector<2x32xf32>
    %1194 = vector.broadcast %1002 : vector<1x32xf32> to vector<2x32xf32>
    %1195 = arith.addf %1193, %1194 : vector<2x32xf32>
    %1196 = arith.mulf %1183, %1195 : vector<2x32xf32>
    %1197 = arith.addf %1192, %1196 : vector<2x32xf32>
    %1198 = math.tanh %1197 : vector<2x32xf32>
    %cst_422 = arith.constant 1.000000e+00 : f32
    %1199 = vector.broadcast %cst_422 : f32 to vector<2x32xf32>
    %1200 = arith.subf %1199, %1191 : vector<2x32xf32>
    %1201 = arith.mulf %1200, %1198 : vector<2x32xf32>
    %1202 = arith.mulf %1191, %1136 : vector<2x32xf32>
    %1203 = arith.addf %1201, %1202 : vector<2x32xf32>
    %c3_i32_423 = arith.constant 3 : i32
    %c7_i32_424 = arith.constant 7 : i32
    %1204 = arith.subi %c7_i32_424, %c3_i32_423 : i32
    %1205 = arith.index_cast %c3_i32_423 : i32 to index
    %c0_425 = arith.constant 0 : index
    %c0_426 = arith.constant 0 : index
    %1206 = vector.load %arg27[%1205, %c0_425, %c0_426] : memref<8x2x96xf32, #tpu.memory_space<vmem>>, vector<1x2x96xf32>
    %1207 = vector.shape_cast %1206 : vector<1x2x96xf32> to vector<2x96xf32>
    %1208 = arith.truncf %1170 : vector<2x32xf32> to vector<2x32xbf16>
    %cst_427 = arith.constant dense<0.000000e+00> : vector<2x96xf32>
    %1209 = tpu.matmul %1208, %999, %cst_427 {dimension_numbers = #tpu.dot_dimension_numbers<[1], [0], [0], [1], [0, 0, 1, 1], [], []>} : vector<2x32xbf16>, vector<32x96xbf16>, vector<2x96xf32> -> vector<2x96xf32>
    %1210 = vector.extract_strided_slice %1207 {offsets = [0, 0], sizes = [2, 32], strides = [1, 1]} : vector<2x96xf32> to vector<2x32xf32>
    %1211 = vector.extract_strided_slice %1209 {offsets = [0, 0], sizes = [2, 32], strides = [1, 1]} : vector<2x96xf32> to vector<2x32xf32>
    %1212 = arith.addf %1210, %1211 : vector<2x32xf32>
    %1213 = arith.negf %1212 : vector<2x32xf32>
    %1214 = math.exp %1213 : vector<2x32xf32>
    %cst_428 = arith.constant 1.000000e+00 : f32
    %1215 = vector.broadcast %cst_428 : f32 to vector<2x32xf32>
    %1216 = arith.addf %1215, %1214 : vector<2x32xf32>
    %1217 = arith.divf %1215, %1216 : vector<2x32xf32>
    %1218 = vector.extract_strided_slice %1207 {offsets = [0, 32], sizes = [2, 32], strides = [1, 1]} : vector<2x96xf32> to vector<2x32xf32>
    %1219 = vector.extract_strided_slice %1209 {offsets = [0, 32], sizes = [2, 32], strides = [1, 1]} : vector<2x96xf32> to vector<2x32xf32>
    %1220 = arith.addf %1218, %1219 : vector<2x32xf32>
    %1221 = arith.negf %1220 : vector<2x32xf32>
    %1222 = math.exp %1221 : vector<2x32xf32>
    %cst_429 = arith.constant 1.000000e+00 : f32
    %1223 = vector.broadcast %cst_429 : f32 to vector<2x32xf32>
    %1224 = arith.addf %1223, %1222 : vector<2x32xf32>
    %1225 = arith.divf %1223, %1224 : vector<2x32xf32>
    %1226 = vector.extract_strided_slice %1207 {offsets = [0, 64], sizes = [2, 32], strides = [1, 1]} : vector<2x96xf32> to vector<2x32xf32>
    %1227 = vector.extract_strided_slice %1209 {offsets = [0, 64], sizes = [2, 32], strides = [1, 1]} : vector<2x96xf32> to vector<2x32xf32>
    %1228 = vector.broadcast %1000 : vector<1x32xf32> to vector<2x32xf32>
    %1229 = arith.addf %1227, %1228 : vector<2x32xf32>
    %1230 = arith.mulf %1217, %1229 : vector<2x32xf32>
    %1231 = arith.addf %1226, %1230 : vector<2x32xf32>
    %1232 = math.tanh %1231 : vector<2x32xf32>
    %cst_430 = arith.constant 1.000000e+00 : f32
    %1233 = vector.broadcast %cst_430 : f32 to vector<2x32xf32>
    %1234 = arith.subf %1233, %1225 : vector<2x32xf32>
    %1235 = arith.mulf %1234, %1232 : vector<2x32xf32>
    %1236 = arith.mulf %1225, %1170 : vector<2x32xf32>
    %1237 = arith.addf %1235, %1236 : vector<2x32xf32>
    %1238 = arith.index_cast %1204 : i32 to index
    %c0_431 = arith.constant 0 : index
    %c0_432 = arith.constant 0 : index
    %1239 = vector.load %arg28[%1238, %c0_431, %c0_432] : memref<8x2x96xf32, #tpu.memory_space<vmem>>, vector<1x2x96xf32>
    %1240 = vector.shape_cast %1239 : vector<1x2x96xf32> to vector<2x96xf32>
    %1241 = arith.truncf %1203 : vector<2x32xf32> to vector<2x32xbf16>
    %cst_433 = arith.constant dense<0.000000e+00> : vector<2x96xf32>
    %1242 = tpu.matmul %1241, %1001, %cst_433 {dimension_numbers = #tpu.dot_dimension_numbers<[1], [0], [0], [1], [0, 0, 1, 1], [], []>} : vector<2x32xbf16>, vector<32x96xbf16>, vector<2x96xf32> -> vector<2x96xf32>
    %1243 = vector.extract_strided_slice %1240 {offsets = [0, 0], sizes = [2, 32], strides = [1, 1]} : vector<2x96xf32> to vector<2x32xf32>
    %1244 = vector.extract_strided_slice %1242 {offsets = [0, 0], sizes = [2, 32], strides = [1, 1]} : vector<2x96xf32> to vector<2x32xf32>
    %1245 = arith.addf %1243, %1244 : vector<2x32xf32>
    %1246 = arith.negf %1245 : vector<2x32xf32>
    %1247 = math.exp %1246 : vector<2x32xf32>
    %cst_434 = arith.constant 1.000000e+00 : f32
    %1248 = vector.broadcast %cst_434 : f32 to vector<2x32xf32>
    %1249 = arith.addf %1248, %1247 : vector<2x32xf32>
    %1250 = arith.divf %1248, %1249 : vector<2x32xf32>
    %1251 = vector.extract_strided_slice %1240 {offsets = [0, 32], sizes = [2, 32], strides = [1, 1]} : vector<2x96xf32> to vector<2x32xf32>
    %1252 = vector.extract_strided_slice %1242 {offsets = [0, 32], sizes = [2, 32], strides = [1, 1]} : vector<2x96xf32> to vector<2x32xf32>
    %1253 = arith.addf %1251, %1252 : vector<2x32xf32>
    %1254 = arith.negf %1253 : vector<2x32xf32>
    %1255 = math.exp %1254 : vector<2x32xf32>
    %cst_435 = arith.constant 1.000000e+00 : f32
    %1256 = vector.broadcast %cst_435 : f32 to vector<2x32xf32>
    %1257 = arith.addf %1256, %1255 : vector<2x32xf32>
    %1258 = arith.divf %1256, %1257 : vector<2x32xf32>
    %1259 = vector.extract_strided_slice %1240 {offsets = [0, 64], sizes = [2, 32], strides = [1, 1]} : vector<2x96xf32> to vector<2x32xf32>
    %1260 = vector.extract_strided_slice %1242 {offsets = [0, 64], sizes = [2, 32], strides = [1, 1]} : vector<2x96xf32> to vector<2x32xf32>
    %1261 = vector.broadcast %1002 : vector<1x32xf32> to vector<2x32xf32>
    %1262 = arith.addf %1260, %1261 : vector<2x32xf32>
    %1263 = arith.mulf %1250, %1262 : vector<2x32xf32>
    %1264 = arith.addf %1259, %1263 : vector<2x32xf32>
    %1265 = math.tanh %1264 : vector<2x32xf32>
    %cst_436 = arith.constant 1.000000e+00 : f32
    %1266 = vector.broadcast %cst_436 : f32 to vector<2x32xf32>
    %1267 = arith.subf %1266, %1258 : vector<2x32xf32>
    %1268 = arith.mulf %1267, %1265 : vector<2x32xf32>
    %1269 = arith.mulf %1258, %1203 : vector<2x32xf32>
    %1270 = arith.addf %1268, %1269 : vector<2x32xf32>
    %c4_i32_437 = arith.constant 4 : i32
    %c7_i32_438 = arith.constant 7 : i32
    %1271 = arith.subi %c7_i32_438, %c4_i32_437 : i32
    %1272 = arith.index_cast %c4_i32_437 : i32 to index
    %c0_439 = arith.constant 0 : index
    %c0_440 = arith.constant 0 : index
    %1273 = vector.load %arg27[%1272, %c0_439, %c0_440] : memref<8x2x96xf32, #tpu.memory_space<vmem>>, vector<1x2x96xf32>
    %1274 = vector.shape_cast %1273 : vector<1x2x96xf32> to vector<2x96xf32>
    %1275 = arith.truncf %1237 : vector<2x32xf32> to vector<2x32xbf16>
    %cst_441 = arith.constant dense<0.000000e+00> : vector<2x96xf32>
    %1276 = tpu.matmul %1275, %999, %cst_441 {dimension_numbers = #tpu.dot_dimension_numbers<[1], [0], [0], [1], [0, 0, 1, 1], [], []>} : vector<2x32xbf16>, vector<32x96xbf16>, vector<2x96xf32> -> vector<2x96xf32>
    %1277 = vector.extract_strided_slice %1274 {offsets = [0, 0], sizes = [2, 32], strides = [1, 1]} : vector<2x96xf32> to vector<2x32xf32>
    %1278 = vector.extract_strided_slice %1276 {offsets = [0, 0], sizes = [2, 32], strides = [1, 1]} : vector<2x96xf32> to vector<2x32xf32>
    %1279 = arith.addf %1277, %1278 : vector<2x32xf32>
    %1280 = arith.negf %1279 : vector<2x32xf32>
    %1281 = math.exp %1280 : vector<2x32xf32>
    %cst_442 = arith.constant 1.000000e+00 : f32
    %1282 = vector.broadcast %cst_442 : f32 to vector<2x32xf32>
    %1283 = arith.addf %1282, %1281 : vector<2x32xf32>
    %1284 = arith.divf %1282, %1283 : vector<2x32xf32>
    %1285 = vector.extract_strided_slice %1274 {offsets = [0, 32], sizes = [2, 32], strides = [1, 1]} : vector<2x96xf32> to vector<2x32xf32>
    %1286 = vector.extract_strided_slice %1276 {offsets = [0, 32], sizes = [2, 32], strides = [1, 1]} : vector<2x96xf32> to vector<2x32xf32>
    %1287 = arith.addf %1285, %1286 : vector<2x32xf32>
    %1288 = arith.negf %1287 : vector<2x32xf32>
    %1289 = math.exp %1288 : vector<2x32xf32>
    %cst_443 = arith.constant 1.000000e+00 : f32
    %1290 = vector.broadcast %cst_443 : f32 to vector<2x32xf32>
    %1291 = arith.addf %1290, %1289 : vector<2x32xf32>
    %1292 = arith.divf %1290, %1291 : vector<2x32xf32>
    %1293 = vector.extract_strided_slice %1274 {offsets = [0, 64], sizes = [2, 32], strides = [1, 1]} : vector<2x96xf32> to vector<2x32xf32>
    %1294 = vector.extract_strided_slice %1276 {offsets = [0, 64], sizes = [2, 32], strides = [1, 1]} : vector<2x96xf32> to vector<2x32xf32>
    %1295 = vector.broadcast %1000 : vector<1x32xf32> to vector<2x32xf32>
    %1296 = arith.addf %1294, %1295 : vector<2x32xf32>
    %1297 = arith.mulf %1284, %1296 : vector<2x32xf32>
    %1298 = arith.addf %1293, %1297 : vector<2x32xf32>
    %1299 = math.tanh %1298 : vector<2x32xf32>
    %cst_444 = arith.constant 1.000000e+00 : f32
    %1300 = vector.broadcast %cst_444 : f32 to vector<2x32xf32>
    %1301 = arith.subf %1300, %1292 : vector<2x32xf32>
    %1302 = arith.mulf %1301, %1299 : vector<2x32xf32>
    %1303 = arith.mulf %1292, %1237 : vector<2x32xf32>
    %1304 = arith.addf %1302, %1303 : vector<2x32xf32>
    %1305 = arith.index_cast %1271 : i32 to index
    %c0_445 = arith.constant 0 : index
    %c0_446 = arith.constant 0 : index
    %1306 = vector.load %arg28[%1305, %c0_445, %c0_446] : memref<8x2x96xf32, #tpu.memory_space<vmem>>, vector<1x2x96xf32>
    %1307 = vector.shape_cast %1306 : vector<1x2x96xf32> to vector<2x96xf32>
    %1308 = arith.truncf %1270 : vector<2x32xf32> to vector<2x32xbf16>
    %cst_447 = arith.constant dense<0.000000e+00> : vector<2x96xf32>
    %1309 = tpu.matmul %1308, %1001, %cst_447 {dimension_numbers = #tpu.dot_dimension_numbers<[1], [0], [0], [1], [0, 0, 1, 1], [], []>} : vector<2x32xbf16>, vector<32x96xbf16>, vector<2x96xf32> -> vector<2x96xf32>
    %1310 = vector.extract_strided_slice %1307 {offsets = [0, 0], sizes = [2, 32], strides = [1, 1]} : vector<2x96xf32> to vector<2x32xf32>
    %1311 = vector.extract_strided_slice %1309 {offsets = [0, 0], sizes = [2, 32], strides = [1, 1]} : vector<2x96xf32> to vector<2x32xf32>
    %1312 = arith.addf %1310, %1311 : vector<2x32xf32>
    %1313 = arith.negf %1312 : vector<2x32xf32>
    %1314 = math.exp %1313 : vector<2x32xf32>
    %cst_448 = arith.constant 1.000000e+00 : f32
    %1315 = vector.broadcast %cst_448 : f32 to vector<2x32xf32>
    %1316 = arith.addf %1315, %1314 : vector<2x32xf32>
    %1317 = arith.divf %1315, %1316 : vector<2x32xf32>
    %1318 = vector.extract_strided_slice %1307 {offsets = [0, 32], sizes = [2, 32], strides = [1, 1]} : vector<2x96xf32> to vector<2x32xf32>
    %1319 = vector.extract_strided_slice %1309 {offsets = [0, 32], sizes = [2, 32], strides = [1, 1]} : vector<2x96xf32> to vector<2x32xf32>
    %1320 = arith.addf %1318, %1319 : vector<2x32xf32>
    %1321 = arith.negf %1320 : vector<2x32xf32>
    %1322 = math.exp %1321 : vector<2x32xf32>
    %cst_449 = arith.constant 1.000000e+00 : f32
    %1323 = vector.broadcast %cst_449 : f32 to vector<2x32xf32>
    %1324 = arith.addf %1323, %1322 : vector<2x32xf32>
    %1325 = arith.divf %1323, %1324 : vector<2x32xf32>
    %1326 = vector.extract_strided_slice %1307 {offsets = [0, 64], sizes = [2, 32], strides = [1, 1]} : vector<2x96xf32> to vector<2x32xf32>
    %1327 = vector.extract_strided_slice %1309 {offsets = [0, 64], sizes = [2, 32], strides = [1, 1]} : vector<2x96xf32> to vector<2x32xf32>
    %1328 = vector.broadcast %1002 : vector<1x32xf32> to vector<2x32xf32>
    %1329 = arith.addf %1327, %1328 : vector<2x32xf32>
    %1330 = arith.mulf %1317, %1329 : vector<2x32xf32>
    %1331 = arith.addf %1326, %1330 : vector<2x32xf32>
    %1332 = math.tanh %1331 : vector<2x32xf32>
    %cst_450 = arith.constant 1.000000e+00 : f32
    %1333 = vector.broadcast %cst_450 : f32 to vector<2x32xf32>
    %1334 = arith.subf %1333, %1325 : vector<2x32xf32>
    %1335 = arith.mulf %1334, %1332 : vector<2x32xf32>
    %1336 = arith.mulf %1325, %1270 : vector<2x32xf32>
    %1337 = arith.addf %1335, %1336 : vector<2x32xf32>
    %c5_i32_451 = arith.constant 5 : i32
    %c7_i32_452 = arith.constant 7 : i32
    %1338 = arith.subi %c7_i32_452, %c5_i32_451 : i32
    %1339 = arith.index_cast %c5_i32_451 : i32 to index
    %c0_453 = arith.constant 0 : index
    %c0_454 = arith.constant 0 : index
    %1340 = vector.load %arg27[%1339, %c0_453, %c0_454] : memref<8x2x96xf32, #tpu.memory_space<vmem>>, vector<1x2x96xf32>
    %1341 = vector.shape_cast %1340 : vector<1x2x96xf32> to vector<2x96xf32>
    %1342 = arith.truncf %1304 : vector<2x32xf32> to vector<2x32xbf16>
    %cst_455 = arith.constant dense<0.000000e+00> : vector<2x96xf32>
    %1343 = tpu.matmul %1342, %999, %cst_455 {dimension_numbers = #tpu.dot_dimension_numbers<[1], [0], [0], [1], [0, 0, 1, 1], [], []>} : vector<2x32xbf16>, vector<32x96xbf16>, vector<2x96xf32> -> vector<2x96xf32>
    %1344 = vector.extract_strided_slice %1341 {offsets = [0, 0], sizes = [2, 32], strides = [1, 1]} : vector<2x96xf32> to vector<2x32xf32>
    %1345 = vector.extract_strided_slice %1343 {offsets = [0, 0], sizes = [2, 32], strides = [1, 1]} : vector<2x96xf32> to vector<2x32xf32>
    %1346 = arith.addf %1344, %1345 : vector<2x32xf32>
    %1347 = arith.negf %1346 : vector<2x32xf32>
    %1348 = math.exp %1347 : vector<2x32xf32>
    %cst_456 = arith.constant 1.000000e+00 : f32
    %1349 = vector.broadcast %cst_456 : f32 to vector<2x32xf32>
    %1350 = arith.addf %1349, %1348 : vector<2x32xf32>
    %1351 = arith.divf %1349, %1350 : vector<2x32xf32>
    %1352 = vector.extract_strided_slice %1341 {offsets = [0, 32], sizes = [2, 32], strides = [1, 1]} : vector<2x96xf32> to vector<2x32xf32>
    %1353 = vector.extract_strided_slice %1343 {offsets = [0, 32], sizes = [2, 32], strides = [1, 1]} : vector<2x96xf32> to vector<2x32xf32>
    %1354 = arith.addf %1352, %1353 : vector<2x32xf32>
    %1355 = arith.negf %1354 : vector<2x32xf32>
    %1356 = math.exp %1355 : vector<2x32xf32>
    %cst_457 = arith.constant 1.000000e+00 : f32
    %1357 = vector.broadcast %cst_457 : f32 to vector<2x32xf32>
    %1358 = arith.addf %1357, %1356 : vector<2x32xf32>
    %1359 = arith.divf %1357, %1358 : vector<2x32xf32>
    %1360 = vector.extract_strided_slice %1341 {offsets = [0, 64], sizes = [2, 32], strides = [1, 1]} : vector<2x96xf32> to vector<2x32xf32>
    %1361 = vector.extract_strided_slice %1343 {offsets = [0, 64], sizes = [2, 32], strides = [1, 1]} : vector<2x96xf32> to vector<2x32xf32>
    %1362 = vector.broadcast %1000 : vector<1x32xf32> to vector<2x32xf32>
    %1363 = arith.addf %1361, %1362 : vector<2x32xf32>
    %1364 = arith.mulf %1351, %1363 : vector<2x32xf32>
    %1365 = arith.addf %1360, %1364 : vector<2x32xf32>
    %1366 = math.tanh %1365 : vector<2x32xf32>
    %cst_458 = arith.constant 1.000000e+00 : f32
    %1367 = vector.broadcast %cst_458 : f32 to vector<2x32xf32>
    %1368 = arith.subf %1367, %1359 : vector<2x32xf32>
    %1369 = arith.mulf %1368, %1366 : vector<2x32xf32>
    %1370 = arith.mulf %1359, %1304 : vector<2x32xf32>
    %1371 = arith.addf %1369, %1370 : vector<2x32xf32>
    %1372 = arith.index_cast %1338 : i32 to index
    %c0_459 = arith.constant 0 : index
    %c0_460 = arith.constant 0 : index
    %1373 = vector.load %arg28[%1372, %c0_459, %c0_460] : memref<8x2x96xf32, #tpu.memory_space<vmem>>, vector<1x2x96xf32>
    %1374 = vector.shape_cast %1373 : vector<1x2x96xf32> to vector<2x96xf32>
    %1375 = arith.truncf %1337 : vector<2x32xf32> to vector<2x32xbf16>
    %cst_461 = arith.constant dense<0.000000e+00> : vector<2x96xf32>
    %1376 = tpu.matmul %1375, %1001, %cst_461 {dimension_numbers = #tpu.dot_dimension_numbers<[1], [0], [0], [1], [0, 0, 1, 1], [], []>} : vector<2x32xbf16>, vector<32x96xbf16>, vector<2x96xf32> -> vector<2x96xf32>
    %1377 = vector.extract_strided_slice %1374 {offsets = [0, 0], sizes = [2, 32], strides = [1, 1]} : vector<2x96xf32> to vector<2x32xf32>
    %1378 = vector.extract_strided_slice %1376 {offsets = [0, 0], sizes = [2, 32], strides = [1, 1]} : vector<2x96xf32> to vector<2x32xf32>
    %1379 = arith.addf %1377, %1378 : vector<2x32xf32>
    %1380 = arith.negf %1379 : vector<2x32xf32>
    %1381 = math.exp %1380 : vector<2x32xf32>
    %cst_462 = arith.constant 1.000000e+00 : f32
    %1382 = vector.broadcast %cst_462 : f32 to vector<2x32xf32>
    %1383 = arith.addf %1382, %1381 : vector<2x32xf32>
    %1384 = arith.divf %1382, %1383 : vector<2x32xf32>
    %1385 = vector.extract_strided_slice %1374 {offsets = [0, 32], sizes = [2, 32], strides = [1, 1]} : vector<2x96xf32> to vector<2x32xf32>
    %1386 = vector.extract_strided_slice %1376 {offsets = [0, 32], sizes = [2, 32], strides = [1, 1]} : vector<2x96xf32> to vector<2x32xf32>
    %1387 = arith.addf %1385, %1386 : vector<2x32xf32>
    %1388 = arith.negf %1387 : vector<2x32xf32>
    %1389 = math.exp %1388 : vector<2x32xf32>
    %cst_463 = arith.constant 1.000000e+00 : f32
    %1390 = vector.broadcast %cst_463 : f32 to vector<2x32xf32>
    %1391 = arith.addf %1390, %1389 : vector<2x32xf32>
    %1392 = arith.divf %1390, %1391 : vector<2x32xf32>
    %1393 = vector.extract_strided_slice %1374 {offsets = [0, 64], sizes = [2, 32], strides = [1, 1]} : vector<2x96xf32> to vector<2x32xf32>
    %1394 = vector.extract_strided_slice %1376 {offsets = [0, 64], sizes = [2, 32], strides = [1, 1]} : vector<2x96xf32> to vector<2x32xf32>
    %1395 = vector.broadcast %1002 : vector<1x32xf32> to vector<2x32xf32>
    %1396 = arith.addf %1394, %1395 : vector<2x32xf32>
    %1397 = arith.mulf %1384, %1396 : vector<2x32xf32>
    %1398 = arith.addf %1393, %1397 : vector<2x32xf32>
    %1399 = math.tanh %1398 : vector<2x32xf32>
    %cst_464 = arith.constant 1.000000e+00 : f32
    %1400 = vector.broadcast %cst_464 : f32 to vector<2x32xf32>
    %1401 = arith.subf %1400, %1392 : vector<2x32xf32>
    %1402 = arith.mulf %1401, %1399 : vector<2x32xf32>
    %1403 = arith.mulf %1392, %1337 : vector<2x32xf32>
    %1404 = arith.addf %1402, %1403 : vector<2x32xf32>
    %c6_i32_465 = arith.constant 6 : i32
    %c7_i32_466 = arith.constant 7 : i32
    %1405 = arith.subi %c7_i32_466, %c6_i32_465 : i32
    %1406 = arith.index_cast %c6_i32_465 : i32 to index
    %c0_467 = arith.constant 0 : index
    %c0_468 = arith.constant 0 : index
    %1407 = vector.load %arg27[%1406, %c0_467, %c0_468] : memref<8x2x96xf32, #tpu.memory_space<vmem>>, vector<1x2x96xf32>
    %1408 = vector.shape_cast %1407 : vector<1x2x96xf32> to vector<2x96xf32>
    %1409 = arith.truncf %1371 : vector<2x32xf32> to vector<2x32xbf16>
    %cst_469 = arith.constant dense<0.000000e+00> : vector<2x96xf32>
    %1410 = tpu.matmul %1409, %999, %cst_469 {dimension_numbers = #tpu.dot_dimension_numbers<[1], [0], [0], [1], [0, 0, 1, 1], [], []>} : vector<2x32xbf16>, vector<32x96xbf16>, vector<2x96xf32> -> vector<2x96xf32>
    %1411 = vector.extract_strided_slice %1408 {offsets = [0, 0], sizes = [2, 32], strides = [1, 1]} : vector<2x96xf32> to vector<2x32xf32>
    %1412 = vector.extract_strided_slice %1410 {offsets = [0, 0], sizes = [2, 32], strides = [1, 1]} : vector<2x96xf32> to vector<2x32xf32>
    %1413 = arith.addf %1411, %1412 : vector<2x32xf32>
    %1414 = arith.negf %1413 : vector<2x32xf32>
    %1415 = math.exp %1414 : vector<2x32xf32>
    %cst_470 = arith.constant 1.000000e+00 : f32
    %1416 = vector.broadcast %cst_470 : f32 to vector<2x32xf32>
    %1417 = arith.addf %1416, %1415 : vector<2x32xf32>
    %1418 = arith.divf %1416, %1417 : vector<2x32xf32>
    %1419 = vector.extract_strided_slice %1408 {offsets = [0, 32], sizes = [2, 32], strides = [1, 1]} : vector<2x96xf32> to vector<2x32xf32>
    %1420 = vector.extract_strided_slice %1410 {offsets = [0, 32], sizes = [2, 32], strides = [1, 1]} : vector<2x96xf32> to vector<2x32xf32>
    %1421 = arith.addf %1419, %1420 : vector<2x32xf32>
    %1422 = arith.negf %1421 : vector<2x32xf32>
    %1423 = math.exp %1422 : vector<2x32xf32>
    %cst_471 = arith.constant 1.000000e+00 : f32
    %1424 = vector.broadcast %cst_471 : f32 to vector<2x32xf32>
    %1425 = arith.addf %1424, %1423 : vector<2x32xf32>
    %1426 = arith.divf %1424, %1425 : vector<2x32xf32>
    %1427 = vector.extract_strided_slice %1408 {offsets = [0, 64], sizes = [2, 32], strides = [1, 1]} : vector<2x96xf32> to vector<2x32xf32>
    %1428 = vector.extract_strided_slice %1410 {offsets = [0, 64], sizes = [2, 32], strides = [1, 1]} : vector<2x96xf32> to vector<2x32xf32>
    %1429 = vector.broadcast %1000 : vector<1x32xf32> to vector<2x32xf32>
    %1430 = arith.addf %1428, %1429 : vector<2x32xf32>
    %1431 = arith.mulf %1418, %1430 : vector<2x32xf32>
    %1432 = arith.addf %1427, %1431 : vector<2x32xf32>
    %1433 = math.tanh %1432 : vector<2x32xf32>
    %cst_472 = arith.constant 1.000000e+00 : f32
    %1434 = vector.broadcast %cst_472 : f32 to vector<2x32xf32>
    %1435 = arith.subf %1434, %1426 : vector<2x32xf32>
    %1436 = arith.mulf %1435, %1433 : vector<2x32xf32>
    %1437 = arith.mulf %1426, %1371 : vector<2x32xf32>
    %1438 = arith.addf %1436, %1437 : vector<2x32xf32>
    %1439 = arith.index_cast %1405 : i32 to index
    %c0_473 = arith.constant 0 : index
    %c0_474 = arith.constant 0 : index
    %1440 = vector.load %arg28[%1439, %c0_473, %c0_474] : memref<8x2x96xf32, #tpu.memory_space<vmem>>, vector<1x2x96xf32>
    %1441 = vector.shape_cast %1440 : vector<1x2x96xf32> to vector<2x96xf32>
    %1442 = arith.truncf %1404 : vector<2x32xf32> to vector<2x32xbf16>
    %cst_475 = arith.constant dense<0.000000e+00> : vector<2x96xf32>
    %1443 = tpu.matmul %1442, %1001, %cst_475 {dimension_numbers = #tpu.dot_dimension_numbers<[1], [0], [0], [1], [0, 0, 1, 1], [], []>} : vector<2x32xbf16>, vector<32x96xbf16>, vector<2x96xf32> -> vector<2x96xf32>
    %1444 = vector.extract_strided_slice %1441 {offsets = [0, 0], sizes = [2, 32], strides = [1, 1]} : vector<2x96xf32> to vector<2x32xf32>
    %1445 = vector.extract_strided_slice %1443 {offsets = [0, 0], sizes = [2, 32], strides = [1, 1]} : vector<2x96xf32> to vector<2x32xf32>
    %1446 = arith.addf %1444, %1445 : vector<2x32xf32>
    %1447 = arith.negf %1446 : vector<2x32xf32>
    %1448 = math.exp %1447 : vector<2x32xf32>
    %cst_476 = arith.constant 1.000000e+00 : f32
    %1449 = vector.broadcast %cst_476 : f32 to vector<2x32xf32>
    %1450 = arith.addf %1449, %1448 : vector<2x32xf32>
    %1451 = arith.divf %1449, %1450 : vector<2x32xf32>
    %1452 = vector.extract_strided_slice %1441 {offsets = [0, 32], sizes = [2, 32], strides = [1, 1]} : vector<2x96xf32> to vector<2x32xf32>
    %1453 = vector.extract_strided_slice %1443 {offsets = [0, 32], sizes = [2, 32], strides = [1, 1]} : vector<2x96xf32> to vector<2x32xf32>
    %1454 = arith.addf %1452, %1453 : vector<2x32xf32>
    %1455 = arith.negf %1454 : vector<2x32xf32>
    %1456 = math.exp %1455 : vector<2x32xf32>
    %cst_477 = arith.constant 1.000000e+00 : f32
    %1457 = vector.broadcast %cst_477 : f32 to vector<2x32xf32>
    %1458 = arith.addf %1457, %1456 : vector<2x32xf32>
    %1459 = arith.divf %1457, %1458 : vector<2x32xf32>
    %1460 = vector.extract_strided_slice %1441 {offsets = [0, 64], sizes = [2, 32], strides = [1, 1]} : vector<2x96xf32> to vector<2x32xf32>
    %1461 = vector.extract_strided_slice %1443 {offsets = [0, 64], sizes = [2, 32], strides = [1, 1]} : vector<2x96xf32> to vector<2x32xf32>
    %1462 = vector.broadcast %1002 : vector<1x32xf32> to vector<2x32xf32>
    %1463 = arith.addf %1461, %1462 : vector<2x32xf32>
    %1464 = arith.mulf %1451, %1463 : vector<2x32xf32>
    %1465 = arith.addf %1460, %1464 : vector<2x32xf32>
    %1466 = math.tanh %1465 : vector<2x32xf32>
    %cst_478 = arith.constant 1.000000e+00 : f32
    %1467 = vector.broadcast %cst_478 : f32 to vector<2x32xf32>
    %1468 = arith.subf %1467, %1459 : vector<2x32xf32>
    %1469 = arith.mulf %1468, %1466 : vector<2x32xf32>
    %1470 = arith.mulf %1459, %1404 : vector<2x32xf32>
    %1471 = arith.addf %1469, %1470 : vector<2x32xf32>
    %c7_i32_479 = arith.constant 7 : i32
    %c7_i32_480 = arith.constant 7 : i32
    %1472 = arith.subi %c7_i32_480, %c7_i32_479 : i32
    %1473 = arith.index_cast %c7_i32_479 : i32 to index
    %c0_481 = arith.constant 0 : index
    %c0_482 = arith.constant 0 : index
    %1474 = vector.load %arg27[%1473, %c0_481, %c0_482] : memref<8x2x96xf32, #tpu.memory_space<vmem>>, vector<1x2x96xf32>
    %1475 = vector.shape_cast %1474 : vector<1x2x96xf32> to vector<2x96xf32>
    %1476 = arith.truncf %1438 : vector<2x32xf32> to vector<2x32xbf16>
    %cst_483 = arith.constant dense<0.000000e+00> : vector<2x96xf32>
    %1477 = tpu.matmul %1476, %999, %cst_483 {dimension_numbers = #tpu.dot_dimension_numbers<[1], [0], [0], [1], [0, 0, 1, 1], [], []>} : vector<2x32xbf16>, vector<32x96xbf16>, vector<2x96xf32> -> vector<2x96xf32>
    %1478 = vector.extract_strided_slice %1475 {offsets = [0, 0], sizes = [2, 32], strides = [1, 1]} : vector<2x96xf32> to vector<2x32xf32>
    %1479 = vector.extract_strided_slice %1477 {offsets = [0, 0], sizes = [2, 32], strides = [1, 1]} : vector<2x96xf32> to vector<2x32xf32>
    %1480 = arith.addf %1478, %1479 : vector<2x32xf32>
    %1481 = arith.negf %1480 : vector<2x32xf32>
    %1482 = math.exp %1481 : vector<2x32xf32>
    %cst_484 = arith.constant 1.000000e+00 : f32
    %1483 = vector.broadcast %cst_484 : f32 to vector<2x32xf32>
    %1484 = arith.addf %1483, %1482 : vector<2x32xf32>
    %1485 = arith.divf %1483, %1484 : vector<2x32xf32>
    %1486 = vector.extract_strided_slice %1475 {offsets = [0, 32], sizes = [2, 32], strides = [1, 1]} : vector<2x96xf32> to vector<2x32xf32>
    %1487 = vector.extract_strided_slice %1477 {offsets = [0, 32], sizes = [2, 32], strides = [1, 1]} : vector<2x96xf32> to vector<2x32xf32>
    %1488 = arith.addf %1486, %1487 : vector<2x32xf32>
    %1489 = arith.negf %1488 : vector<2x32xf32>
    %1490 = math.exp %1489 : vector<2x32xf32>
    %cst_485 = arith.constant 1.000000e+00 : f32
    %1491 = vector.broadcast %cst_485 : f32 to vector<2x32xf32>
    %1492 = arith.addf %1491, %1490 : vector<2x32xf32>
    %1493 = arith.divf %1491, %1492 : vector<2x32xf32>
    %1494 = vector.extract_strided_slice %1475 {offsets = [0, 64], sizes = [2, 32], strides = [1, 1]} : vector<2x96xf32> to vector<2x32xf32>
    %1495 = vector.extract_strided_slice %1477 {offsets = [0, 64], sizes = [2, 32], strides = [1, 1]} : vector<2x96xf32> to vector<2x32xf32>
    %1496 = vector.broadcast %1000 : vector<1x32xf32> to vector<2x32xf32>
    %1497 = arith.addf %1495, %1496 : vector<2x32xf32>
    %1498 = arith.mulf %1485, %1497 : vector<2x32xf32>
    %1499 = arith.addf %1494, %1498 : vector<2x32xf32>
    %1500 = math.tanh %1499 : vector<2x32xf32>
    %cst_486 = arith.constant 1.000000e+00 : f32
    %1501 = vector.broadcast %cst_486 : f32 to vector<2x32xf32>
    %1502 = arith.subf %1501, %1493 : vector<2x32xf32>
    %1503 = arith.mulf %1502, %1500 : vector<2x32xf32>
    %1504 = arith.mulf %1493, %1438 : vector<2x32xf32>
    %1505 = arith.addf %1503, %1504 : vector<2x32xf32>
    %1506 = arith.index_cast %1472 : i32 to index
    %c0_487 = arith.constant 0 : index
    %c0_488 = arith.constant 0 : index
    %1507 = vector.load %arg28[%1506, %c0_487, %c0_488] : memref<8x2x96xf32, #tpu.memory_space<vmem>>, vector<1x2x96xf32>
    %1508 = vector.shape_cast %1507 : vector<1x2x96xf32> to vector<2x96xf32>
    %1509 = arith.truncf %1471 : vector<2x32xf32> to vector<2x32xbf16>
    %cst_489 = arith.constant dense<0.000000e+00> : vector<2x96xf32>
    %1510 = tpu.matmul %1509, %1001, %cst_489 {dimension_numbers = #tpu.dot_dimension_numbers<[1], [0], [0], [1], [0, 0, 1, 1], [], []>} : vector<2x32xbf16>, vector<32x96xbf16>, vector<2x96xf32> -> vector<2x96xf32>
    %1511 = vector.extract_strided_slice %1508 {offsets = [0, 0], sizes = [2, 32], strides = [1, 1]} : vector<2x96xf32> to vector<2x32xf32>
    %1512 = vector.extract_strided_slice %1510 {offsets = [0, 0], sizes = [2, 32], strides = [1, 1]} : vector<2x96xf32> to vector<2x32xf32>
    %1513 = arith.addf %1511, %1512 : vector<2x32xf32>
    %1514 = arith.negf %1513 : vector<2x32xf32>
    %1515 = math.exp %1514 : vector<2x32xf32>
    %cst_490 = arith.constant 1.000000e+00 : f32
    %1516 = vector.broadcast %cst_490 : f32 to vector<2x32xf32>
    %1517 = arith.addf %1516, %1515 : vector<2x32xf32>
    %1518 = arith.divf %1516, %1517 : vector<2x32xf32>
    %1519 = vector.extract_strided_slice %1508 {offsets = [0, 32], sizes = [2, 32], strides = [1, 1]} : vector<2x96xf32> to vector<2x32xf32>
    %1520 = vector.extract_strided_slice %1510 {offsets = [0, 32], sizes = [2, 32], strides = [1, 1]} : vector<2x96xf32> to vector<2x32xf32>
    %1521 = arith.addf %1519, %1520 : vector<2x32xf32>
    %1522 = arith.negf %1521 : vector<2x32xf32>
    %1523 = math.exp %1522 : vector<2x32xf32>
    %cst_491 = arith.constant 1.000000e+00 : f32
    %1524 = vector.broadcast %cst_491 : f32 to vector<2x32xf32>
    %1525 = arith.addf %1524, %1523 : vector<2x32xf32>
    %1526 = arith.divf %1524, %1525 : vector<2x32xf32>
    %1527 = vector.extract_strided_slice %1508 {offsets = [0, 64], sizes = [2, 32], strides = [1, 1]} : vector<2x96xf32> to vector<2x32xf32>
    %1528 = vector.extract_strided_slice %1510 {offsets = [0, 64], sizes = [2, 32], strides = [1, 1]} : vector<2x96xf32> to vector<2x32xf32>
    %1529 = vector.broadcast %1002 : vector<1x32xf32> to vector<2x32xf32>
    %1530 = arith.addf %1528, %1529 : vector<2x32xf32>
    %1531 = arith.mulf %1518, %1530 : vector<2x32xf32>
    %1532 = arith.addf %1527, %1531 : vector<2x32xf32>
    %1533 = math.tanh %1532 : vector<2x32xf32>
    %cst_492 = arith.constant 1.000000e+00 : f32
    %1534 = vector.broadcast %cst_492 : f32 to vector<2x32xf32>
    %1535 = arith.subf %1534, %1526 : vector<2x32xf32>
    %1536 = arith.mulf %1535, %1533 : vector<2x32xf32>
    %1537 = arith.mulf %1526, %1471 : vector<2x32xf32>
    %1538 = arith.addf %1536, %1537 : vector<2x32xf32>
    %c8_i32_493 = arith.constant 8 : i32
    %1539 = tpu.concatenate %727, %760, %1505, %1538 in 1 : vector<2x32xf32>, vector<2x32xf32>, vector<2x32xf32>, vector<2x32xf32> -> vector<2x128xf32>
    %c0_494 = arith.constant 0 : index
    %c0_495 = arith.constant 0 : index
    %1540 = vector.load %arg20[%c0_494, %c0_495] : memref<128x32xf32, #tpu.memory_space<vmem>>, vector<128x32xf32>
    %cst_496 = arith.constant dense<0.000000e+00> : vector<2x32xf32>
    %1541 = tpu.matmul %1539, %1540, %cst_496 {dimension_numbers = #tpu.dot_dimension_numbers<[1], [0], [0], [1], [0, 0, 1, 1], [], []>} : vector<2x128xf32>, vector<128x32xf32>, vector<2x32xf32> -> vector<2x32xf32>
    %c0_497 = arith.constant 0 : index
    %c0_498 = arith.constant 0 : index
    %1542 = vector.load %arg21[%c0_497, %c0_498] : memref<1x32xf32, #tpu.memory_space<vmem>>, vector<1x32xf32>
    %1543 = vector.broadcast %1542 : vector<1x32xf32> to vector<2x32xf32>
    %1544 = arith.addf %1541, %1543 : vector<2x32xf32>
    %1545 = math.tanh %1544 : vector<2x32xf32>
    %c0_499 = arith.constant 0 : index
    %c0_500 = arith.constant 0 : index
    %1546 = vector.load %arg22[%c0_499, %c0_500] : memref<1x32xf32, #tpu.memory_space<vmem>>, vector<1x32xf32>
    %1547 = vector.broadcast %1546 : vector<1x32xf32> to vector<2x32xf32>
    %1548 = arith.mulf %1545, %1547 : vector<2x32xf32>
    %cst_501 = arith.constant dense<0.000000e+00> : vector<2xf32>
    %1549 = vector.multi_reduction <add>, %1548, %cst_501 [1] : vector<2x32xf32> to vector<2xf32>
    %1550 = vector.shape_cast %1549 : vector<2xf32> to vector<2x1xf32>
    %c0_502 = arith.constant 0 : index
    %c0_503 = arith.constant 0 : index
    %1551 = vector.load %arg23[%c0_502, %c0_503] : memref<1x1xf32, #tpu.memory_space<vmem>>, vector<1x1xf32>
    %1552 = vector.broadcast %1551 : vector<1x1xf32> to vector<2x1xf32>
    %1553 = arith.addf %1550, %1552 : vector<2x1xf32>
    %1554 = arith.negf %1553 : vector<2x1xf32>
    %1555 = math.exp %1554 : vector<2x1xf32>
    %cst_504 = arith.constant 1.000000e+00 : f32
    %1556 = vector.broadcast %cst_504 : f32 to vector<2x1xf32>
    %1557 = arith.addf %1556, %1555 : vector<2x1xf32>
    %1558 = arith.divf %1556, %1557 : vector<2x1xf32>
    %c0_505 = arith.constant 0 : index
    %c0_506 = arith.constant 0 : index
    %1559 = vector.load %arg24[%c0_505, %c0_506] : memref<2x1xf32, #tpu.memory_space<vmem>>, vector<2x1xf32>
    tpu.vector_store %arg24[%c0_505, %c0_506], %1558 {strides = array<i32>} : memref<2x1xf32, #tpu.memory_space<vmem>>, vector<2x1xf32>,
    return
  }
  func.func @transform_0(%arg0: i32) -> (i32, i32, i32) {
    %c0_i32 = arith.constant 0 : i32
    %c0_i32_0 = arith.constant 0 : i32
    %c0_i32_1 = arith.constant 0 : i32
    return %c0_i32, %arg0, %c0_i32_0 : i32, i32, i32
  }
  func.func @transform_1(%arg0: i32) -> (i32, i32) {
    %c0_i32 = arith.constant 0 : i32
    %c0_i32_0 = arith.constant 0 : i32
    %c0_i32_1 = arith.constant 0 : i32
    return %c0_i32, %c0_i32_0 : i32, i32
  }
  func.func @transform_2(%arg0: i32) -> (i32, i32) {
    %c0_i32 = arith.constant 0 : i32
    %c0_i32_0 = arith.constant 0 : i32
    %c0_i32_1 = arith.constant 0 : i32
    return %c0_i32, %c0_i32_0 : i32, i32
  }
  func.func @transform_3(%arg0: i32) -> (i32, i32) {
    %c0_i32 = arith.constant 0 : i32
    %c0_i32_0 = arith.constant 0 : i32
    %c0_i32_1 = arith.constant 0 : i32
    return %c0_i32, %c0_i32_0 : i32, i32
  }
  func.func @transform_4(%arg0: i32) -> (i32, i32) {
    %c0_i32 = arith.constant 0 : i32
    %c0_i32_0 = arith.constant 0 : i32
    %c0_i32_1 = arith.constant 0 : i32
    return %c0_i32, %c0_i32_0 : i32, i32
  }
  func.func @transform_5(%arg0: i32) -> (i32, i32) {
    %c0_i32 = arith.constant 0 : i32
    %c0_i32_0 = arith.constant 0 : i32
    %c0_i32_1 = arith.constant 0 : i32
    return %c0_i32, %c0_i32_0 : i32, i32
  }
  func.func @transform_6(%arg0: i32) -> (i32, i32) {
    %c0_i32 = arith.constant 0 : i32
    %c0_i32_0 = arith.constant 0 : i32
    %c0_i32_1 = arith.constant 0 : i32
    return %c0_i32, %c0_i32_0 : i32, i32
  }
  func.func @transform_7(%arg0: i32) -> (i32, i32) {
    %c0_i32 = arith.constant 0 : i32
    %c0_i32_0 = arith.constant 0 : i32
    %c0_i32_1 = arith.constant 0 : i32
    return %c0_i32, %c0_i32_0 : i32, i32
  }
  func.func @transform_8(%arg0: i32) -> (i32, i32) {
    %c0_i32 = arith.constant 0 : i32
    %c0_i32_0 = arith.constant 0 : i32
    %c0_i32_1 = arith.constant 0 : i32
    return %c0_i32, %c0_i32_0 : i32, i32
  }
  func.func @transform_9(%arg0: i32) -> (i32, i32) {
    %c0_i32 = arith.constant 0 : i32
    %c0_i32_0 = arith.constant 0 : i32
    %c0_i32_1 = arith.constant 0 : i32
    return %c0_i32, %c0_i32_0 : i32, i32
  }
  func.func @transform_10(%arg0: i32) -> (i32, i32) {
    %c0_i32 = arith.constant 0 : i32
    %c0_i32_0 = arith.constant 0 : i32
    %c0_i32_1 = arith.constant 0 : i32
    return %c0_i32, %c0_i32_0 : i32, i32
  }
  func.func @transform_11(%arg0: i32) -> (i32, i32) {
    %c0_i32 = arith.constant 0 : i32
    %c0_i32_0 = arith.constant 0 : i32
    %c0_i32_1 = arith.constant 0 : i32
    return %c0_i32, %c0_i32_0 : i32, i32
  }
  func.func @transform_12(%arg0: i32) -> (i32, i32) {
    %c0_i32 = arith.constant 0 : i32
    %c0_i32_0 = arith.constant 0 : i32
    %c0_i32_1 = arith.constant 0 : i32
    return %c0_i32, %c0_i32_0 : i32, i32
  }
  func.func @transform_13(%arg0: i32) -> (i32, i32) {
    %c0_i32 = arith.constant 0 : i32
    %c0_i32_0 = arith.constant 0 : i32
    %c0_i32_1 = arith.constant 0 : i32
    return %c0_i32, %c0_i32_0 : i32, i32
  }
  func.func @transform_14(%arg0: i32) -> (i32, i32) {
    %c0_i32 = arith.constant 0 : i32
    %c0_i32_0 = arith.constant 0 : i32
    %c0_i32_1 = arith.constant 0 : i32
    return %c0_i32, %c0_i32_0 : i32, i32
  }
  func.func @transform_15(%arg0: i32) -> (i32, i32) {
    %c0_i32 = arith.constant 0 : i32
    %c0_i32_0 = arith.constant 0 : i32
    %c0_i32_1 = arith.constant 0 : i32
    return %c0_i32, %c0_i32_0 : i32, i32
  }
  func.func @transform_16(%arg0: i32) -> (i32, i32) {
    %c0_i32 = arith.constant 0 : i32
    %c0_i32_0 = arith.constant 0 : i32
    %c0_i32_1 = arith.constant 0 : i32
    return %c0_i32, %c0_i32_0 : i32, i32
  }
  func.func @transform_17(%arg0: i32) -> (i32, i32) {
    %c0_i32 = arith.constant 0 : i32
    %c0_i32_0 = arith.constant 0 : i32
    %c0_i32_1 = arith.constant 0 : i32
    return %c0_i32, %c0_i32_0 : i32, i32
  }
  func.func @transform_18(%arg0: i32) -> (i32, i32) {
    %c0_i32 = arith.constant 0 : i32
    %c0_i32_0 = arith.constant 0 : i32
    %c0_i32_1 = arith.constant 0 : i32
    return %c0_i32, %c0_i32_0 : i32, i32
  }
  func.func @transform_19(%arg0: i32) -> (i32, i32) {
    %c0_i32 = arith.constant 0 : i32
    %c0_i32_0 = arith.constant 0 : i32
    %c0_i32_1 = arith.constant 0 : i32
    return %c0_i32, %c0_i32_0 : i32, i32
  }
  func.func @transform_20(%arg0: i32) -> (i32, i32) {
    %c0_i32 = arith.constant 0 : i32
    %c0_i32_0 = arith.constant 0 : i32
    %c0_i32_1 = arith.constant 0 : i32
    return %c0_i32, %c0_i32_0 : i32, i32
  }
  func.func @transform_21(%arg0: i32) -> (i32, i32) {
    %c0_i32 = arith.constant 0 : i32
    %c0_i32_0 = arith.constant 0 : i32
    %c0_i32_1 = arith.constant 0 : i32
    return %c0_i32, %c0_i32_0 : i32, i32
  }
  func.func @transform_22(%arg0: i32) -> (i32, i32) {
    %c0_i32 = arith.constant 0 : i32
    %c0_i32_0 = arith.constant 0 : i32
    %c0_i32_1 = arith.constant 0 : i32
    return %c0_i32, %c0_i32_0 : i32, i32
  }
  func.func @transform_23(%arg0: i32) -> (i32, i32) {
    %c0_i32 = arith.constant 0 : i32
    %c0_i32_0 = arith.constant 0 : i32
    return %arg0, %c0_i32 : i32, i32
  }
}

</mosaic_0001>

<bundles_post_ra>
// kernel: tpu_custom_call.1
= control target key start
LH: loop header
LB: loop body
LE: loop exit
PB: predicated region body
PF: predicated region fallthrough
CT: control target
= control target key end

     0   :  { %s7936_s0 = inlined_call_operand.vmem [shape: f32[8,2,32], index: 0, kind: input, shape index: {}]   ;;  %s7937_s1 = inlined_call_operand.vmem [shape: bf16[32,96], index: 1, kind: input, shape index: {}]   ;;  %s7938_s2 = inlined_call_operand.vmem [shape: f32[1,96], index: 2, kind: input, shape index: {}]   ;;  %s7939_s3 = inlined_call_operand.vmem [shape: bf16[32,96], index: 3, kind: input, shape index: {}]   ;;  %s7940_s4 = inlined_call_operand.vmem [shape: f32[1,32], index: 4, kind: input, shape index: {}]   ;;  %s7941_s5 = inlined_call_operand.vmem [shape: bf16[32,96], index: 5, kind: input, shape index: {}]   ;;  %s7942_s6 = inlined_call_operand.vmem [shape: f32[1,96], index: 6, kind: input, shape index: {}]   ;;  %s7943_s7 = inlined_call_operand.vmem [shape: bf16[32,96], index: 7, kind: input, shape index: {}]   ;;  %s7944_s8 = inlined_call_operand.vmem [shape: f32[1,32], index: 8, kind: input, shape index: {}]   ;;  %s7945_s9 = inlined_call_operand.vmem [shape: bf16[32,96], index: 9, kind: input, shape index: {}]   ;;  %s7946_s10 = inlined_call_operand.vmem [shape: bf16[32,96], index: 10, kind: input, shape index: {}]   ;;  %s7947_s11 = inlined_call_operand.hbm [shape: f32[1,96], index: 11, kind: input, shape index: {}]   ;;  %s7948_s12 = inlined_call_operand.vmem [shape: bf16[32,96], index: 12, kind: input, shape index: {}]   ;;  %s7949_s13 = inlined_call_operand.hbm [shape: f32[1,32], index: 13, kind: input, shape index: {}]   ;;  %s7950_s14 = inlined_call_operand.vmem [shape: bf16[32,96], index: 14, kind: input, shape index: {}]   ;;  %s7951_s15 = inlined_call_operand.vmem [shape: bf16[32,96], index: 15, kind: input, shape index: {}]   ;;  %s7952_s16 = inlined_call_operand.hbm [shape: f32[1,96], index: 16, kind: input, shape index: {}]   ;;  %s7953_s17 = inlined_call_operand.hbm [shape: bf16[32,96], index: 17, kind: input, shape index: {}]   ;;  %s7954_s18 = inlined_call_operand.hbm [shape: f32[1,32], index: 18, kind: input, shape index: {}]   ;;  %s7955_s19 = inlined_call_operand.vmem [shape: f32[128,32], index: 19, kind: input, shape index: {}]   ;;  %s7956_s20 = inlined_call_operand.vmem [shape: f32[1,32], index: 20, kind: input, shape index: {}]   ;;  %s7957_s21 = inlined_call_operand.vmem [shape: f32[1,32], index: 21, kind: input, shape index: {}]   ;;  %s7958_s22 = inlined_call_operand.<no memory space> [shape: f32[1,1], index: 22, kind: input, shape index: {}]   ;;  %s7959_s23 = inlined_call_operand.vmem [shape: f32[2,1], index: 23, kind: output, shape index: {}]  }
   0x1   :  { %7965 = sst [smem:[#allocation18_spill]] %s7936_s0  ;;  %v28_v0 = vstv %s7958_s22 }
   0x2   :  { %7966 = sst [smem:[#allocation19_spill]] %s7937_s1  ;;  %29 = vst [vmem:[#allocation6] sm:$0x1] %v28_v0 }
   0x3   :  { %7967 = sst [smem:[#allocation20_spill]] %s7938_s2 }
   0x4   :  { %7968 = sst [smem:[#allocation21_spill]] %s7939_s3 }
   0x5   :  { %7969 = sst [smem:[#allocation22_spill]] %s7940_s4 }
   0x6   :  { %7970 = sst [smem:[#allocation23_spill]] %s7941_s5 }
   0x7   :  { %7971 = sst [smem:[#allocation24_spill]] %s7942_s6 }
   0x8   :  { %7972 = sst [smem:[#allocation25_spill]] %s7943_s7 }
   0x9   :  { %30 = vsyncpa [#allocation8], 0 }
   0xa   :  { %31 = vsyncpa [#allocation10], 0 }
   0xb   :  { %32 = vsyncpa [#allocation13], 0  ;;  %s6506_s24 = smov [#allocation9]   ;;  %s6507_s5 = smov [#allocation12]  }
   0xc   :  { %s73_s25 = sshll.u32 %s6506_s24, 4  ;;  %s96_s1 = sshll.u32 %s6507_s5, 4  ;;  %s74_s25 = int_to_ptr.vmem [resolvable:$true] %s73_s25  ;;  %s97_s1 = int_to_ptr.vmem [resolvable:$true] %s96_s1 }
   0xd   :  { %s6408_s26 = scalar_lea.vmem %s74_s25, 16  ;;  %s6412_s2 = scalar_lea.vmem %s74_s25, 32 }
   0xe   :  { %p6409_p0 = scmp.ne.s32.totalorder %s74_s25, %s6408_s26  ;;  %p6413_p1 = scmp.lt.s32.totalorder %s74_s25, %s74_s25 }
   0xf   :  { %p6414_p2 = scmp.lt.s32.totalorder %s6412_s2, %s6408_s26 }
  0x11   :  { %p6415_p3 = por %p6414_p2, %p6413_p1 }
  0x13   :  { %p6416_p4 = pnand %p6415_p3, %p6409_p0 }
  0x15   :  { %6419 = shalt.err (!%p6416_p4)
}
  0x16   :  { %76 = dma.hbm_to_vmem [thread:$0]  %s7949_s13, 16, %s74_s25, [#allocation10]  }
  0x17   :  { %s6428_s27 = scalar_lea.vmem %s97_s1, 256  ;;  %p6433_p6 = scmp.lt.s32.totalorder %s97_s1, %s97_s1 }
  0x18   :  { %p6429_p5 = scmp.ne.s32.totalorder %s97_s1, %s6428_s27  ;;  %p6434_p7 = scmp.lt.s32.totalorder %s6428_s27, %s6428_s27 }
  0x1a   :  { %p6435_p8 = por %p6434_p7, %p6433_p6 }
  0x1c   :  { %p6436_p9 = pnand %p6435_p8, %p6429_p5 }
  0x1e   :  { %6439 = shalt.err (!%p6436_p9)
}
  0x1f   :  { %s6508_s7 = smov 64   ;;  %s6509_s28 = smov 4  }
  0x20   :  { %102 = dma.hbm_to_vmem [thread:$0]  %s7953_s17, 256, %s97_s1, [#allocation13], %s6508_s7, %s6508_s7, %s6509_s28  }
  0x21   :  { %s6510_s0 = smov [#allocation7]   ;;  %s6511_s30 = smov [#allocation11]  }
  0x22   :  { %s61_s4 = sshll.u32 %s6510_s0, 4  ;;  %s87_s24 = sshll.u32 %s6511_s30, 4  ;;  %s62_s4 = int_to_ptr.vmem [resolvable:$true] %s61_s4  ;;  %s88_s24 = int_to_ptr.vmem [resolvable:$true] %s87_s24 }
  0x23   :  { %s6448_s13 = scalar_lea.vmem %s62_s4, 16  ;;  %s6452_s25 = scalar_lea.vmem %s62_s4, 32 }
  0x24   :  { %p6449_p10 = scmp.ne.s32.totalorder %s62_s4, %s6448_s13  ;;  %p6453_p11 = scmp.lt.s32.totalorder %s62_s4, %s62_s4 }
  0x25   :  { %p6454_p12 = scmp.lt.s32.totalorder %s6452_s25, %s6448_s13 }
  0x27   :  { %p6455_p13 = por %p6454_p12, %p6453_p11 }
  0x29   :  { %p6456_p0 = pnand %p6455_p13, %p6449_p10 }
  0x2b   :  { %6459 = shalt.err (!%p6456_p0)
}
  0x2c   :  { %64 = dma.hbm_to_vmem [thread:$0]  %s7947_s11, 16, %s62_s4, [#allocation8]  }
  0x2d   :  { %s6468_s2 = scalar_lea.vmem %s88_s24, 16  ;;  %s6472_s17 = scalar_lea.vmem %s88_s24, 32 }
  0x2e   :  { %p6469_p1 = scmp.ne.s32.totalorder %s88_s24, %s6468_s2  ;;  %p6473_p2 = scmp.lt.s32.totalorder %s88_s24, %s88_s24 }
  0x2f   :  { %p6474_p3 = scmp.lt.s32.totalorder %s6472_s17, %s6468_s2 }
  0x31   :  { %p6475_p4 = por %p6474_p3, %p6473_p2 }
  0x33   :  { %p6476_p5 = pnand %p6475_p4, %p6469_p1 }
  0x35   :  { %6479 = shalt.err (!%p6476_p5)
}
  0x36   :  { %90 = dma.hbm_to_vmem [thread:$0]  %s7952_s16, 16, %s88_s24, [#allocation10]  }
  0x37   :  { %s6512_s22 = smov [#allocation14]  }
  0x38   :  { %s109_s27 = sshll.u32 %s6512_s22, 4  ;;  %s110_s27 = int_to_ptr.vmem [resolvable:$true] %s109_s27 }
  0x39   :  { %s6488_s28 = scalar_lea.vmem %s110_s27, 16  ;;  %s6492_s29 = scalar_lea.vmem %s110_s27, 32 }
  0x3a   :  { %p6489_p6 = scmp.ne.s32.totalorder %s110_s27, %s6488_s28  ;;  %p6493_p7 = scmp.lt.s32.totalorder %s110_s27, %s110_s27 }
  0x3b   :  { %p6494_p8 = scmp.lt.s32.totalorder %s6492_s29, %s6488_s28 }
  0x3d   :  { %p6495_p9 = por %p6494_p8, %p6493_p7 }
  0x3f   :  { %p6496_p10 = pnand %p6495_p9, %p6489_p6 }
  0x41   :  { %6499 = shalt.err (!%p6496_p10)
}
  0x42   :  { %112 = dma.hbm_to_vmem [thread:$0]  %s7954_s18, 16, %s110_s27, [#allocation13]  }
  0x43   :  { %6500 = dma.done.wait [#allocation8], 16  }
  0x44   :  { %6501 = vsyncadd [#allocation8], 4294967280 }
  0x45   :  { %6502 = dma.done.wait [#allocation10], 32  }
  0x46   :  { %6503 = vsyncadd [#allocation10], 4294967264 }
  0x47   :  { %6504 = dma.done.wait [#allocation13], 272  }
  0x48   :  { %6505 = vsyncadd [#allocation13], 4294967024  ;;  %v6513_v1 = vmov 0.0   ;;  %vm6514_vm0 = vmmov 0   ;;  %s7973_s0 = sld [smem:[#allocation19_spill]]  ;;  %vm167_vm1 = vcmask 261120  }
  0x49   :  { %5487 = vmatprep.subr.bf16.mxu1 %v6513_v1  ;;  %5519 = vmatprep.subr.bf16.mxu0 %v6513_v1  ;;  %s7974_s25 = sld [smem:[#allocation18_spill]]  ;;  %v5119_v11 = vld [vmem:[%s7944_s8] ss:$0 sm:$0xff]  ;;  %v6515_v26 = vmov 0   ;;  %vm211_vm2 = vcmask 779264   ;;  %s6516_s13 = smov 96  }
  0x4a   :  { %5491 = vmatprep.mubr.msk.bf16.mxu1 %vm6514_vm0, %v6513_v1  ;;  %5523 = vmatprep.mubr.msk.bf16.mxu0 %vm6514_vm0, %v6513_v1  ;;  %s7975_s1 = sld [smem:[#allocation23_spill]]  ;;  %vm1095_vm3 = vcmask 254976   ;;  %vm4951_vm4 = vcmask 523264   ;;  %vm4953_vm5 = vcmask 785408   ;;  %vm5074_vm6 = vcmask 1024  }
  0x4b   :  { %s7976_s18 = sld [smem:[#allocation22_spill]]  ;;  %1068 = vrot.lane.b32.xlu0 %v5119_v11, %s6508_s7 }
  0x4c   :  { %s7977_s22 = sld [smem:[#allocation21_spill]] }
  0x4d   :  { %s7978_s11 = sld [smem:[#allocation25_spill]] }
  0x4e   :  { %v6667_v2 = vld [vmem:[%s7973_s0 + $0x8] sm:$0xff]   ;;  %v6672_v3 = vld [vmem:[%s7973_s0] sm:$0xff]   ;;  %s7979_s0 = sld [smem:[#allocation20_spill]] }
  0x4f   :  { %5488 = vmatpush3.bf16.msra.mxu1 %v6667_v2  ;;  %5520 = vmatpush3.bf16.msra.mxu0 %v6667_v2  ;;  %v147_v4 = vld [vmem:[%s7974_s25] sm:$0x3]  ;;  %v5094_v5 = vld [vmem:[%s7974_s25 + $0x4] sm:$0x3]  ;;  %v5097_v10 = vld [vmem:[%s7974_s25 + $0x6] sm:$0x3] }
  0x50   :  { %5489 = vmatprep.subr.bf16.mxu1 %v6513_v1  ;;  %5521 = vmatprep.subr.bf16.mxu0 %v6513_v1  ;;  %v148_v6 = vpack.c.bf16 %v147_v4, %v147_v4  ;;  %v6684_v7 = vpack.c.bf16 %v5094_v5, %v5094_v5  ;;  %v6691_v8 = vld [vmem:[%s7975_s1 + $0x8] sm:$0xff]   ;;  %v6701_v9 = vld [vmem:[%s7975_s1] sm:$0xff]   ;;  %v6720_v13 = vpack.c.bf16 %v5097_v10, %v5097_v10  ;;  %s7980_s24 = sld [smem:[#allocation24_spill]] }
  0x51   :  { %v5115_v12 = vld [vmem:[%s7976_s18] ss:$0 sm:$0xff]  ;;  %v5091_v14 = vld [vmem:[%s7974_s25 + $0x2] sm:$0x3]  ;;  %v5100_v15 = vld [vmem:[%s7974_s25 + $0x8] sm:$0x3] }
  0x52   :  { %980 = vrot.lane.b32.xlu1 %v5115_v12, %s6508_s7  ;;  %v274_v16 = vpack.c.bf16 %v5091_v14, %v5091_v14  ;;  %v544_v17 = vpack.c.bf16 %v5100_v15, %v5100_v15  ;;  %v5103_v18 = vld [vmem:[%s7974_s25 + $0xa] sm:$0x3]  ;;  %v5106_v20 = vld [vmem:[%s7974_s25 + $0xc] sm:$0x3]  ;;  %v5109_v22 = vld [vmem:[%s7974_s25 + $0xe] sm:$0x3] }
  0x53   :  { %5490 = vmatpush3.bf16.msra.mxu1 %v6672_v3  ;;  %5522 = vmatpush3.bf16.msra.mxu0 %v6672_v3  ;;  %v634_v19 = vpack.c.bf16 %v5103_v18, %v5103_v18  ;;  %v724_v21 = vpack.c.bf16 %v5106_v20, %v5106_v20  ;;  %v814_v23 = vpack.c.bf16 %v5109_v22, %v5109_v22  ;;  %v6802_v24 = vld [vmem:[%s7977_s22 + $0x8] sm:$0xff]   ;;  %v6814_v25 = vld [vmem:[%s7977_s22] sm:$0xff]   ;;  %s6517_s25 = smov 32  }
  0x54   :  { %5495 = vmatprep.subr.bf16.mxu1 %v6513_v1  ;;  %5535 = vmatprep.subr.bf16.mxu0 %v6513_v1  ;;  %v6856_v27 = vld [vmem:[%s7978_s11 + $0x8] sm:$0xff]   ;;  %v6864_v28 = vld [vmem:[%s7978_s11] sm:$0xff]  }
  0x55   :  { %v6881_v29 = vld [vmem:[%s7979_s0] ss:$0 sm:$0xff] }
  0x56   :  { %5492 = vmatmul.mubr.msk.bf16.vlgmr.msra.gmra.mxu1 %vm167_vm1, %v148_v6  ;;  %5524 = vmatmul.mubr.msk.bf16.vlgmr.msra.gmra.mxu0 %vm167_vm1, %v6684_v7  ;;  %v6890_v40 = vld [vmem:[%s7980_s24] ss:$0 sm:$0xff] }
  0x57   :  { %5496 = vmatpush3.bf16.msra.mxu1 %v6691_v8  ;;  %5536 = vmatpush3.bf16.msra.mxu0 %v6667_v2 }
  0x58   :  { %5497 = vmatprep.subr.bf16.mxu1 %v6513_v1  ;;  %5537 = vmatprep.subr.bf16.mxu0 %v6513_v1 }
  0x59   :  { %5499 = vmatprep.mubr.msk.bf16.mxu1 %vm6514_vm0, %v6513_v1  ;;  %5539 = vmatprep.mubr.msk.bf16.mxu0 %vm6514_vm0, %v6513_v1 }
  0x5b   :  { %5498 = vmatpush3.bf16.msra.mxu1 %v6701_v9  ;;  %5538 = vmatpush3.bf16.msra.mxu0 %v6672_v3 }
  0x5c   :  { %5503 = vmatprep.subr.bf16.mxu1 %v6513_v1  ;;  %5551 = vmatprep.subr.bf16.mxu0 %v6513_v1 }
  0x5e   :  { %5500 = vmatmul.mubr.msk.bf16.vlgmr.msra.gmra.mxu1 %vm167_vm1, %v148_v6  ;;  %5540 = vmatmul.mubr.msk.bf16.vlgmr.msra.gmra.mxu0 %vm167_vm1, %v6720_v13 }
  0x5f   :  { %5504 = vmatpush3.bf16.msra.mxu1 %v6667_v2  ;;  %5552 = vmatpush3.bf16.msra.mxu0 %v6667_v2 }
  0x60   :  { %5505 = vmatprep.subr.bf16.mxu1 %v6513_v1  ;;  %5553 = vmatprep.subr.bf16.mxu0 %v6513_v1 }
  0x61   :  { %5507 = vmatprep.mubr.msk.bf16.mxu1 %vm6514_vm0, %v6513_v1  ;;  %5555 = vmatprep.mubr.msk.bf16.mxu0 %vm6514_vm0, %v6513_v1 }
  0x63   :  { %5506 = vmatpush3.bf16.msra.mxu1 %v6672_v3  ;;  %5554 = vmatpush3.bf16.msra.mxu0 %v6672_v3 }
  0x64   :  { %5511 = vmatprep.subr.bf16.mxu1 %v6513_v1  ;;  %5567 = vmatprep.subr.bf16.mxu0 %v6513_v1 }
  0x66   :  { %5508 = vmatmul.mubr.msk.bf16.vlgmr.msra.gmra.mxu1 %vm167_vm1, %v274_v16  ;;  %5556 = vmatmul.mubr.msk.bf16.vlgmr.msra.gmra.mxu0 %vm167_vm1, %v544_v17 }
  0x67   :  { %5512 = vmatpush3.bf16.msra.mxu1 %v6691_v8  ;;  %5568 = vmatpush3.bf16.msra.mxu0 %v6667_v2 }
  0x68   :  { %5513 = vmatprep.subr.bf16.mxu1 %v6513_v1  ;;  %5569 = vmatprep.subr.bf16.mxu0 %v6513_v1 }
  0x69   :  { %5515 = vmatprep.mubr.msk.bf16.mxu1 %vm6514_vm0, %v6513_v1  ;;  %5571 = vmatprep.mubr.msk.bf16.mxu0 %vm6514_vm0, %v6513_v1 }
  0x6b   :  { %5514 = vmatpush3.bf16.msra.mxu1 %v6701_v9  ;;  %5570 = vmatpush3.bf16.msra.mxu0 %v6672_v3 }
  0x6c   :  { %5527 = vmatprep.subr.bf16.mxu1 %v6513_v1  ;;  %5583 = vmatprep.subr.bf16.mxu0 %v6513_v1 }
  0x6e   :  { %5516 = vmatmul.mubr.msk.bf16.vlgmr.msra.gmra.mxu1 %vm167_vm1, %v274_v16  ;;  %5572 = vmatmul.mubr.msk.bf16.vlgmr.msra.gmra.mxu0 %vm167_vm1, %v634_v19 }
  0x6f   :  { %5528 = vmatpush3.bf16.msra.mxu1 %v6691_v8  ;;  %5584 = vmatpush3.bf16.msra.mxu0 %v6667_v2 }
  0x70   :  { %5529 = vmatprep.subr.bf16.mxu1 %v6513_v1  ;;  %5585 = vmatprep.subr.bf16.mxu0 %v6513_v1 }
  0x71   :  { %5531 = vmatprep.mubr.msk.bf16.mxu1 %vm6514_vm0, %v6513_v1  ;;  %5587 = vmatprep.mubr.msk.bf16.mxu0 %vm6514_vm0, %v6513_v1 }
  0x73   :  { %5530 = vmatpush3.bf16.msra.mxu1 %v6701_v9  ;;  %5586 = vmatpush3.bf16.msra.mxu0 %v6672_v3 }
  0x74   :  { %5543 = vmatprep.subr.bf16.mxu1 %v6513_v1  ;;  %5599 = vmatprep.subr.bf16.mxu0 %v6513_v1 }
  0x76   :  { %5532 = vmatmul.mubr.msk.bf16.vlgmr.msra.gmra.mxu1 %vm167_vm1, %v6684_v7  ;;  %5588 = vmatmul.mubr.msk.bf16.vlgmr.msra.gmra.mxu0 %vm167_vm1, %v724_v21 }
  0x77   :  { %5544 = vmatpush3.bf16.msra.mxu1 %v6691_v8  ;;  %5600 = vmatpush3.bf16.msra.mxu0 %v6667_v2 }
  0x78   :  { %5545 = vmatprep.subr.bf16.mxu1 %v6513_v1  ;;  %5601 = vmatprep.subr.bf16.mxu0 %v6513_v1 }
  0x79   :  { %5547 = vmatprep.mubr.msk.bf16.mxu1 %vm6514_vm0, %v6513_v1  ;;  %5603 = vmatprep.mubr.msk.bf16.mxu0 %vm6514_vm0, %v6513_v1 }
  0x7b   :  { %5546 = vmatpush3.bf16.msra.mxu1 %v6701_v9  ;;  %5602 = vmatpush3.bf16.msra.mxu0 %v6672_v3 }
  0x7c   :  { %5559 = vmatprep.subr.bf16.mxu1 %v6513_v1  ;;  %5615 = vmatprep.subr.bf16.mxu0 %v6513_v1 }
  0x7e   :  { %5548 = vmatmul.mubr.msk.bf16.vlgmr.msra.gmra.mxu1 %vm167_vm1, %v6720_v13  ;;  %5604 = vmatmul.mubr.msk.bf16.vlgmr.msra.gmra.mxu0 %vm167_vm1, %v814_v23 }
  0x7f   :  { %5560 = vmatpush3.bf16.msra.mxu1 %v6691_v8  ;;  %5616 = vmatpush3.bf16.msra.mxu0 %v6802_v24 }
  0x80   :  { %5561 = vmatprep.subr.bf16.mxu1 %v6513_v1  ;;  %5617 = vmatprep.subr.bf16.mxu0 %v6513_v1 }
  0x81   :  { %5563 = vmatprep.mubr.msk.bf16.mxu1 %vm6514_vm0, %v6513_v1  ;;  %5619 = vmatprep.mubr.msk.bf16.mxu0 %vm6514_vm0, %v6513_v1 }
  0x83   :  { %5562 = vmatpush3.bf16.msra.mxu1 %v6701_v9  ;;  %5618 = vmatpush3.bf16.msra.mxu0 %v6814_v25 }
  0x84   :  { %5575 = vmatprep.subr.bf16.mxu1 %v6513_v1  ;;  %5631 = vmatprep.subr.bf16.mxu0 %v6513_v1 }
  0x86   :  { %5564 = vmatmul.mubr.msk.bf16.vlgmr.msra.gmra.mxu1 %vm167_vm1, %v544_v17  ;;  %5620 = vmatmul.mubr.bf16.vlgmr.msra.gmra.mxu0 %v6515_v26 }
  0x87   :  { %5576 = vmatpush3.bf16.msra.mxu1 %v6691_v8  ;;  %5579 = vmatprep.mubr.msk.bf16.mxu1 %vm6514_vm0, %v6513_v1 }
  0x88   :  { %5577 = vmatprep.subr.bf16.mxu1 %v6513_v1  ;;  %5632 = vmatpush3.bf16.msra.mxu0 %v6802_v24 }
  0x89   :  { %5633 = vmatprep.subr.bf16.mxu0 %v6513_v1  ;;  %5635 = vmatprep.mubr.msk.bf16.mxu0 %vm6514_vm0, %v6513_v1 }
  0x8b   :  { %5578 = vmatpush3.bf16.msra.mxu1 %v6701_v9 }
  0x8c   :  { %5591 = vmatprep.subr.bf16.mxu1 %v6513_v1  ;;  %5634 = vmatpush3.bf16.msra.mxu0 %v6814_v25 }
  0x8d   :  { %5647 = vmatprep.subr.bf16.mxu0 %v6513_v1 }
  0x8e   :  { %5580 = vmatmul.mubr.msk.bf16.vlgmr.msra.gmra.mxu1 %vm167_vm1, %v634_v19 }
  0x8f   :  { %5592 = vmatpush3.bf16.msra.mxu1 %v6691_v8  ;;  %5595 = vmatprep.mubr.msk.bf16.mxu1 %vm6514_vm0, %v6513_v1 }
  0x90   :  { %5593 = vmatprep.subr.bf16.mxu1 %v6513_v1 }
  0x93   :  { %5594 = vmatpush3.bf16.msra.mxu1 %v6701_v9 }
  0x94   :  { %5607 = vmatprep.subr.bf16.mxu1 %v6513_v1 }
  0x96   :  { %5596 = vmatmul.mubr.msk.bf16.vlgmr.msra.gmra.mxu1 %vm167_vm1, %v724_v21 }
  0x97   :  { %5608 = vmatpush3.bf16.msra.mxu1 %v6691_v8  ;;  %5611 = vmatprep.mubr.msk.bf16.mxu1 %vm6514_vm0, %v6513_v1 }
  0x98   :  { %5609 = vmatprep.subr.bf16.mxu1 %v6513_v1 }
  0x9b   :  { %5610 = vmatpush3.bf16.msra.mxu1 %v6701_v9 }
  0x9c   :  { %5623 = vmatprep.subr.bf16.mxu1 %v6513_v1 }
  0x9e   :  { %5612 = vmatmul.mubr.msk.bf16.vlgmr.msra.gmra.mxu1 %vm167_vm1, %v814_v23 }
  0x9f   :  { %5624 = vmatpush3.bf16.msra.mxu1 %v6856_v27  ;;  %5627 = vmatprep.mubr.msk.bf16.mxu1 %vm6514_vm0, %v6513_v1 }
  0xa0   :  { %5625 = vmatprep.subr.bf16.mxu1 %v6513_v1 }
  0xa3   :  { %5626 = vmatpush3.bf16.msra.mxu1 %v6864_v28 }
  0xa4   :  { %5639 = vmatprep.subr.bf16.mxu1 %v6513_v1 }
  0xa6   :  { %5628 = vmatmul.mubr.bf16.vlgmr.msra.gmra.mxu1 %v6515_v26 }
  0xa7   :  { %5640 = vmatpush3.bf16.msra.mxu1 %v6856_v27  ;;  %5643 = vmatprep.mubr.msk.bf16.mxu1 %vm6514_vm0, %v6513_v1 }
  0xa8   :  { %5641 = vmatprep.subr.bf16.mxu1 %v6513_v1 }
  0xab   :  { %5642 = vmatpush3.bf16.msra.mxu1 %v6864_v28 }
  0xac   :  { %5655 = vmatprep.subr.bf16.mxu1 %v6513_v1 }
 0x116   :  { %v205_v30 = vpop.f32.mrf.mxu1  ;;  %v402_v31 = vpop.f32.mrf.mxu0 }
 0x117   :  { %v206_v32 = vadd.f32 %v6881_v29, %v205_v30  ;;  %v403_v33 = vadd.f32 %v6881_v29, %v402_v31 }
 0x118   :  { %v5493_v34 = vpop.f32.mrf.mxu1  ;;  %v5525_v35 = vpop.f32.mrf.mxu0 }
 0x119   :  { %212 = vst.msk [vmem:[#allocation4] sm:$0x3] %vm211_vm2, %v206_v32  ;;  %409 = vst.msk [vmem:[#allocation4 + $0x4] sm:$0x3] %vm211_vm2, %v403_v33 }
 0x11a   :  { %v208_v36 = vpop.f32.mrf.mxu1  ;;  %v405_v37 = vpop.f32.mrf.mxu0 }
 0x11c   :  { %v5494_v38 = vpop.f32.mrf.mxu1  ;;  %v5526_v39 = vpop.f32.mrf.mxu0 }
 0x11e   :  { %v265_v41 = vpop.f32.mrf.mxu1  ;;  %v492_v42 = vpop.f32.mrf.mxu0 }
 0x11f   :  { %v266_v43 = vadd.f32 %v6890_v40, %v265_v41  ;;  %v493_v44 = vadd.f32 %v6881_v29, %v492_v42 }
 0x120   :  { %v5501_v45 = vpop.f32.mrf.mxu1  ;;  %v5541_v46 = vpop.f32.mrf.mxu0 }
 0x121   :  { %271 = vst.msk [vmem:[#allocation5] sm:$0x3] %vm211_vm2, %v266_v43  ;;  %499 = vst.msk [vmem:[#allocation4 + $0x6] sm:$0x3] %vm211_vm2, %v493_v44 }
 0x122   :  { %v268_v47 = vpop.f32.mrf.mxu1  ;;  %v495_v48 = vpop.f32.mrf.mxu0 }
 0x124   :  { %v5502_v49 = vpop.f32.mrf.mxu1  ;;  %v5542_v50 = vpop.f32.mrf.mxu0 }
 0x126   :  { %v312_v51 = vpop.f32.mrf.mxu1  ;;  %v582_v52 = vpop.f32.mrf.mxu0 }
 0x127   :  { %v313_v53 = vadd.f32 %v6881_v29, %v312_v51  ;;  %v583_v54 = vadd.f32 %v6881_v29, %v582_v52 }
 0x128   :  { %v5509_v55 = vpop.f32.mrf.mxu1  ;;  %v5557_v56 = vpop.f32.mrf.mxu0 }
 0x129   :  { %319 = vst.msk [vmem:[#allocation4 + $0x2] sm:$0x3] %vm211_vm2, %v313_v53  ;;  %589 = vst.msk [vmem:[#allocation4 + $0x8] sm:$0x3] %vm211_vm2, %v583_v54 }
 0x12a   :  { %v315_v57 = vpop.f32.mrf.mxu1  ;;  %v585_v58 = vpop.f32.mrf.mxu0 }
 0x12b   :  { %v6920_v58 = vpop.permute.xlu0 %1068 }
 0x12c   :  { %v5510_v59 = vpop.f32.mrf.mxu1  ;;  %v5558_v60 = vpop.f32.mrf.mxu0 }
 0x12d   :  { %v6922_v60 = vpop.permute.xlu1 %980 }
 0x12e   :  { %v354_v61 = vpop.f32.mrf.mxu1  ;;  %v672_v62 = vpop.f32.mrf.mxu0 }
 0x12f   :  { %v355_v63 = vadd.f32 %v6890_v40, %v354_v61  ;;  %v673_v0 = vadd.f32 %v6881_v29, %v672_v62 }
 0x130   :  { %v5517_v2 = vpop.f32.mrf.mxu1  ;;  %v5573_v3 = vpop.f32.mrf.mxu0 }
 0x131   :  { %361 = vst.msk [vmem:[#allocation5 + $0x2] sm:$0x3] %vm211_vm2, %v355_v63  ;;  %679 = vst.msk [vmem:[#allocation4 + $0xa] sm:$0x3] %vm211_vm2, %v673_v0 }
 0x132   :  { %v357_v4 = vpop.f32.mrf.mxu1  ;;  %v675_v5 = vpop.f32.mrf.mxu0 }
 0x133   :  { %v912_v4 = vld [vmem:[#allocation4] sm:$0x3] }
 0x134   :  { %v5518_v6 = vpop.f32.mrf.mxu1  ;;  %v5574_v7 = vpop.f32.mrf.mxu0 }
 0x136   :  { %v444_v8 = vpop.f32.mrf.mxu1  ;;  %v762_v9 = vpop.f32.mrf.mxu0 }
 0x137   :  { %v445_v10 = vadd.f32 %v6890_v40, %v444_v8  ;;  %v763_v11 = vadd.f32 %v6881_v29, %v762_v9 }
 0x138   :  { %v5533_v12 = vpop.f32.mrf.mxu1  ;;  %v5589_v13 = vpop.f32.mrf.mxu0 }
 0x139   :  { %451 = vst.msk [vmem:[#allocation5 + $0x4] sm:$0x3] %vm211_vm2, %v445_v10  ;;  %769 = vst.msk [vmem:[#allocation4 + $0xc] sm:$0x3] %vm211_vm2, %v763_v11 }
 0x13a   :  { %v447_v14 = vpop.f32.mrf.mxu1  ;;  %v765_v15 = vpop.f32.mrf.mxu0 }
 0x13c   :  { %v5534_v16 = vpop.f32.mrf.mxu1  ;;  %v5590_v17 = vpop.f32.mrf.mxu0 }
 0x13e   :  { %v534_v18 = vpop.f32.mrf.mxu1  ;;  %v852_v19 = vpop.f32.mrf.mxu0 }
 0x13f   :  { %v535_v20 = vadd.f32 %v6890_v40, %v534_v18  ;;  %v853_v21 = vadd.f32 %v6881_v29, %v852_v19 }
 0x140   :  { %v5549_v22 = vpop.f32.mrf.mxu1  ;;  %v5605_v23 = vpop.f32.mrf.mxu0 }
 0x141   :  { %541 = vst.msk [vmem:[#allocation5 + $0x6] sm:$0x3] %vm211_vm2, %v535_v20  ;;  %859 = vst.msk [vmem:[#allocation4 + $0xe] sm:$0x3] %vm211_vm2, %v853_v21 }
 0x142   :  { %v537_v30 = vpop.f32.mrf.mxu1  ;;  %v855_v31 = vpop.f32.mrf.mxu0 }
 0x144   :  { %v5550_v32 = vpop.f32.mrf.mxu1  ;;  %v5606_v33 = vpop.f32.mrf.mxu0 }
 0x146   :  { %v624_v34 = vpop.f32.mrf.mxu1  ;;  %v962_v35 = vpop.f32.mrf.mxu0 }
 0x147   :  { %v625_v36 = vadd.f32 %v6890_v40, %v624_v34  ;;  %v983_v63 = vadd.f32 %v6922_v60, %v962_v35  ;;  %v968_v5 = vadd.f32 %v962_v35, %v912_v4 }
 0x148   :  { %v5565_v37 = vpop.f32.mrf.mxu1  ;;  %v5621_v38 = vpop.f32.mrf.mxu0 }
 0x149   :  { %631 = vst.msk [vmem:[#allocation5 + $0x8] sm:$0x3] %vm211_vm2, %v625_v36  ;;  %v5114_v7 = vmul.f32 -1.442695, %v968_v5 }
 0x14a   :  { %v627_v39 = vpop.f32.mrf.mxu1  ;;  %v965_v29 = vpop.f32.mrf.mxu0 }
 0x14c   :  { %v5566_v41 = vpop.f32.mrf.mxu1  ;;  %v5622_v42 = vpop.f32.mrf.mxu0 }
 0x14e   :  { %v714_v43 = vpop.f32.mrf.mxu1 }
 0x14f   :  { %v715_v44 = vadd.f32 %v6890_v40, %v714_v43 }
 0x150   :  { %v5581_v45 = vpop.f32.mrf.mxu1 }
 0x151   :  { %721 = vst.msk [vmem:[#allocation5 + $0xa] sm:$0x3] %vm211_vm2, %v715_v44 }
 0x152   :  { %v717_v46 = vpop.f32.mrf.mxu1 }
 0x154   :  { %v5582_v47 = vpop.f32.mrf.mxu1 }
 0x156   :  { %v804_v48 = vpop.f32.mrf.mxu1 }
 0x157   :  { %v805_v49 = vadd.f32 %v6890_v40, %v804_v48 }
 0x158   :  { %v5597_v50 = vpop.f32.mrf.mxu1 }
 0x159   :  { %811 = vst.msk [vmem:[#allocation5 + $0xc] sm:$0x3] %vm211_vm2, %v805_v49 }
 0x15a   :  { %v807_v51 = vpop.f32.mrf.mxu1 }
 0x15c   :  { %v5598_v52 = vpop.f32.mrf.mxu1 }
 0x15e   :  { %v894_v53 = vpop.f32.mrf.mxu1 }
 0x15f   :  { %v895_v54 = vadd.f32 %v6890_v40, %v894_v53 }
 0x160   :  { %v5613_v55 = vpop.f32.mrf.mxu1 }
 0x161   :  { %901 = vst.msk [vmem:[#allocation5 + $0xe] sm:$0x3] %vm211_vm2, %v895_v54  ;;  %v1178_v54 = vld [vmem:[#allocation5 + $0xc] sm:$0x3] }
 0x162   :  { %v897_v56 = vpop.f32.mrf.mxu1 }
 0x163   :  { %v1103_v56 = vld [vmem:[#allocation4 + $0x2] sm:$0x3] }
 0x164   :  { %v5614_v57 = vpop.f32.mrf.mxu1 }
 0x166   :  { %v1050_v59 = vpop.f32.mrf.mxu1 }
 0x167   :  { %v1071_v61 = vadd.f32 %v6920_v58, %v1050_v59 }
 0x168   :  { %v5629_v62 = vpop.f32.mrf.mxu1  ;;  %v1003_v40 = vld [vmem:[#allocation5 + $0xe] sm:$0x3] }
 0x169   :  { %1073 = vrot.lane.b32.xlu0 %v1071_v61, %s6508_s7  ;;  %v1056_v3 = vadd.f32 %v1050_v59, %v1003_v40 }
 0x16a   :  { %v1053_v0 = vpop.f32.mrf.mxu1 }
 0x16b   :  { %v5118_v6 = vmul.f32 -1.442695, %v1056_v3 }
 0x16c   :  { %v5630_v2 = vpop.f32.mrf.mxu1 }
 0x16d   :  { %985 = vrot.lane.b32.xlu0 %v983_v63, %s6508_s7  ;;  %6194 = vpow2.f32 %v5118_v6 }
 0x16e   :  { %6196 = vpow2.f32 %v5114_v7 }
 0x17a   :  { %v6195_v8 = vpop.eup %6194 }
 0x17b   :  { %v1060_v9 = vadd.f32 1.0, %v6195_v8  ;;  %v6197_v10 = vpop.eup %6196 }
 0x17c   :  { %v972_v11 = vadd.f32 1.0, %v6197_v10 }
 0x17d   :  { %6198 = vrcp.f32 %v1060_v9 }
 0x17e   :  { %6200 = vrcp.f32 %v972_v11 }
 0x18a   :  { %v6199_v12 = vpop.eup %6198 }
 0x18b   :  { %v6201_v15 = vpop.eup %6200  ;;  %v1083_v30 = vsub.f32 1.0, %v6199_v12  ;;  %v1089_v32 = vmul.f32 0.0, %v6199_v12 }
 0x18c   :  { %v995_v35 = vsub.f32 1.0, %v6201_v15  ;;  %v1001_v37 = vmul.f32 0.0, %v6201_v15 }
 0x1db   :  { %v1074_v13 = vpop.permute.xlu0 %1073 }
 0x1dc   :  { %v1076_v14 = vmul.f32 %v6199_v12, %v1074_v13 }
 0x1de   :  { %1078 = vrot.lane.b32.xlu1 %v1076_v14, %s6508_s7 }
 0x1df   :  { %v986_v16 = vpop.permute.xlu0 %985 }
 0x1e0   :  { %v988_v17 = vmul.f32 %v6201_v15, %v986_v16 }
 0x1e2   :  { %990 = vrot.lane.b32.xlu0 %v988_v17, %s6508_s7 }
 0x250   :  { %v1079_v18 = vpop.permute.xlu1 %1078 }
 0x251   :  { %v1081_v19 = vadd.f32 %v1079_v18, %v1003_v40 }
 0x253   :  { %6202 = vtanh.f32 %v1081_v19 }
 0x254   :  { %v991_v20 = vpop.permute.xlu0 %990 }
 0x255   :  { %v993_v21 = vadd.f32 %v991_v20, %v912_v4 }
 0x257   :  { %6204 = vtanh.f32 %v993_v21 }
 0x260   :  { %v6203_v22 = vpop.eup %6202 }
 0x261   :  { %1085 = vrot.lane.b32.xlu1 %v6203_v22, %s6516_s13 }
 0x264   :  { %v6205_v23 = vpop.eup %6204 }
 0x265   :  { %997 = vrot.lane.b32.xlu0 %v6205_v23, %s6516_s13 }
 0x2d3   :  { %v1086_v31 = vpop.permute.xlu1 %1085 }
 0x2d4   :  { %v1088_v33 = vmul.f32 %v1086_v31, %v1083_v30 }
 0x2d6   :  { %v6932_v34 = vadd.f32 %v1089_v32, %v1088_v33 }
 0x2d7   :  { %v998_v36 = vpop.permute.xlu0 %997 }
 0x2d8   :  { %v1000_v38 = vmul.f32 %v998_v36, %v995_v35  ;;  %v1179_v39 = vpack.c.bf16 %v6932_v34, %v6932_v34 }
 0x2da   :  { %v6936_v29 = vadd.f32 %v1001_v37, %v1000_v38  ;;  %1181 = vrot.lane.b32.xlu1 %v1179_v39, %s6516_s13 }
 0x2dc   :  { %v1104_v41 = vpack.c.bf16 %v6936_v29, %v6936_v29 }
 0x2de   :  { %1106 = vrot.lane.b32.xlu1 %v1104_v41, %s6516_s13 }
 0x34c   :  { %v1182_v42 = vpop.permute.xlu1 %1181 }
 0x34d   :  { %5644 = vmatmul.mubr.msk.bf16.vlgmr.msra.gmra.mxu1 %vm167_vm1, %v1182_v42 }
 0x34e   :  { %5656 = vmatpush3.bf16.msra.mxu1 %v6856_v27  ;;  %5659 = vmatprep.mubr.msk.bf16.mxu1 %vm6514_vm0, %v6513_v1 }
 0x34f   :  { %5657 = vmatprep.subr.bf16.mxu1 %v6513_v1 }
 0x350   :  { %v1107_v43 = vpop.permute.xlu1 %1106 }
 0x351   :  { %5636 = vmatmul.mubr.msk.bf16.vlgmr.msra.gmra.mxu0 %vm167_vm1, %v1107_v43 }
 0x352   :  { %5648 = vmatpush3.bf16.msra.mxu0 %v6802_v24  ;;  %5658 = vmatpush3.bf16.msra.mxu1 %v6864_v28 }
 0x353   :  { %5649 = vmatprep.subr.bf16.mxu0 %v6513_v1  ;;  %5651 = vmatprep.mubr.msk.bf16.mxu0 %vm6514_vm0, %v6513_v1 }
 0x354   :  { %5671 = vmatprep.subr.bf16.mxu1 %v6513_v1 }
 0x356   :  { %5650 = vmatpush3.bf16.msra.mxu0 %v6814_v25 }
 0x357   :  { %5663 = vmatprep.subr.bf16.mxu0 %v6513_v1 }
 0x40d   :  { %v1220_v44 = vpop.f32.mrf.mxu1 }
 0x40e   :  { %v1233_v45 = vadd.f32 %v1220_v44, %v6920_v58  ;;  %v1226_v55 = vadd.f32 %v1220_v44, %v1178_v54 }
 0x40f   :  { %v5645_v46 = vpop.f32.mrf.mxu1 }
 0x410   :  { %1235 = vrot.lane.b32.xlu0 %v1233_v45, %s6508_s7  ;;  %v5123_v57 = vmul.f32 -1.442695, %v1226_v55  ;;  %v1340_v46 = vld [vmem:[#allocation5 + $0xa] sm:$0x3] }
 0x411   :  { %v1145_v47 = vpop.f32.mrf.mxu0  ;;  %v1223_v48 = vpop.f32.mrf.mxu1 }
 0x412   :  { %v1158_v49 = vadd.f32 %v1145_v47, %v6922_v60  ;;  %v1151_v59 = vadd.f32 %v1145_v47, %v1103_v56  ;;  %6206 = vpow2.f32 %v5123_v57  ;;  %v1265_v48 = vld [vmem:[#allocation4 + $0x4] sm:$0x3] }
 0x413   :  { %v5637_v50 = vpop.f32.mrf.mxu0  ;;  %v5646_v51 = vpop.f32.mrf.mxu1 }
 0x414   :  { %1160 = vrot.lane.b32.xlu0 %v1158_v49, %s6508_s7  ;;  %v5121_v61 = vmul.f32 -1.442695, %v1151_v59 }
 0x415   :  { %v1148_v52 = vpop.f32.mrf.mxu0 }
 0x416   :  { %6208 = vpow2.f32 %v5121_v61 }
 0x417   :  { %v5638_v53 = vpop.f32.mrf.mxu0 }
 0x41f   :  { %v6207_v62 = vpop.eup %6206 }
 0x420   :  { %v1230_v63 = vadd.f32 1.0, %v6207_v62 }
 0x422   :  { %6210 = vrcp.f32 %v1230_v63 }
 0x423   :  { %v6209_v0 = vpop.eup %6208 }
 0x424   :  { %v1155_v2 = vadd.f32 1.0, %v6209_v0 }
 0x426   :  { %6212 = vrcp.f32 %v1155_v2 }
 0x42f   :  { %v6211_v40 = vpop.eup %6210 }
 0x430   :  { %v1245_v14 = vsub.f32 1.0, %v6211_v40  ;;  %v1251_v16 = vmul.f32 %v6211_v40, %v6932_v34 }
 0x433   :  { %v6213_v5 = vpop.eup %6212 }
 0x434   :  { %v1170_v19 = vsub.f32 1.0, %v6213_v5  ;;  %v1176_v21 = vmul.f32 %v6213_v5, %v6936_v29 }
 0x482   :  { %v1236_v3 = vpop.permute.xlu0 %1235 }
 0x483   :  { %v1238_v4 = vmul.f32 %v6211_v40, %v1236_v3 }
 0x485   :  { %1240 = vrot.lane.b32.xlu1 %v1238_v4, %s6508_s7 }
 0x486   :  { %v1161_v6 = vpop.permute.xlu0 %1160 }
 0x487   :  { %v1163_v7 = vmul.f32 %v6213_v5, %v1161_v6 }
 0x489   :  { %1165 = vrot.lane.b32.xlu0 %v1163_v7, %s6508_s7 }
 0x4f7   :  { %v1241_v8 = vpop.permute.xlu1 %1240 }
 0x4f8   :  { %v1243_v9 = vadd.f32 %v1241_v8, %v1178_v54 }
 0x4fa   :  { %6214 = vtanh.f32 %v1243_v9 }
 0x4fb   :  { %v1166_v10 = vpop.permute.xlu0 %1165 }
 0x4fc   :  { %v1168_v11 = vadd.f32 %v1166_v10, %v1103_v56 }
 0x4fe   :  { %6216 = vtanh.f32 %v1168_v11 }
 0x507   :  { %v6215_v12 = vpop.eup %6214 }
 0x508   :  { %1247 = vrot.lane.b32.xlu1 %v6215_v12, %s6516_s13 }
 0x50b   :  { %v6217_v13 = vpop.eup %6216 }
 0x50c   :  { %1172 = vrot.lane.b32.xlu0 %v6217_v13, %s6516_s13 }
 0x57a   :  { %v1248_v15 = vpop.permute.xlu1 %1247 }
 0x57b   :  { %v1250_v17 = vmul.f32 %v1248_v15, %v1245_v14 }
 0x57d   :  { %v6965_v18 = vadd.f32 %v1251_v16, %v1250_v17 }
 0x57e   :  { %v1173_v20 = vpop.permute.xlu0 %1172 }
 0x57f   :  { %v1175_v22 = vmul.f32 %v1173_v20, %v1170_v19  ;;  %v1341_v23 = vpack.c.bf16 %v6965_v18, %v6965_v18 }
 0x581   :  { %v6970_v30 = vadd.f32 %v1176_v21, %v1175_v22  ;;  %1343 = vrot.lane.b32.xlu1 %v1341_v23, %s6516_s13 }
 0x583   :  { %v1266_v31 = vpack.c.bf16 %v6970_v30, %v6970_v30 }
 0x585   :  { %1268 = vrot.lane.b32.xlu1 %v1266_v31, %s6516_s13 }
 0x5f3   :  { %v1344_v32 = vpop.permute.xlu1 %1343 }
 0x5f4   :  { %5660 = vmatmul.mubr.msk.bf16.vlgmr.msra.gmra.mxu1 %vm167_vm1, %v1344_v32 }
 0x5f5   :  { %5672 = vmatpush3.bf16.msra.mxu1 %v6856_v27  ;;  %5675 = vmatprep.mubr.msk.bf16.mxu1 %vm6514_vm0, %v6513_v1 }
 0x5f6   :  { %5673 = vmatprep.subr.bf16.mxu1 %v6513_v1 }
 0x5f7   :  { %v1269_v33 = vpop.permute.xlu1 %1268 }
 0x5f8   :  { %5652 = vmatmul.mubr.msk.bf16.vlgmr.msra.gmra.mxu0 %vm167_vm1, %v1269_v33 }
 0x5f9   :  { %5664 = vmatpush3.bf16.msra.mxu0 %v6802_v24  ;;  %5674 = vmatpush3.bf16.msra.mxu1 %v6864_v28 }
 0x5fa   :  { %5665 = vmatprep.subr.bf16.mxu0 %v6513_v1  ;;  %5667 = vmatprep.mubr.msk.bf16.mxu0 %vm6514_vm0, %v6513_v1 }
 0x5fb   :  { %5687 = vmatprep.subr.bf16.mxu1 %v6513_v1 }
 0x5fd   :  { %5666 = vmatpush3.bf16.msra.mxu0 %v6814_v25 }
 0x5fe   :  { %5679 = vmatprep.subr.bf16.mxu0 %v6513_v1 }
 0x6b4   :  { %v1382_v35 = vpop.f32.mrf.mxu1 }
 0x6b5   :  { %v1395_v36 = vadd.f32 %v1382_v35, %v6920_v58  ;;  %v1388_v47 = vadd.f32 %v1382_v35, %v1340_v46 }
 0x6b6   :  { %v5661_v37 = vpop.f32.mrf.mxu1 }
 0x6b7   :  { %1397 = vrot.lane.b32.xlu0 %v1395_v36, %s6508_s7  ;;  %v5127_v49 = vmul.f32 -1.442695, %v1388_v47 }
 0x6b8   :  { %v1307_v38 = vpop.f32.mrf.mxu0  ;;  %v1385_v39 = vpop.f32.mrf.mxu1 }
 0x6b9   :  { %v1320_v41 = vadd.f32 %v1307_v38, %v6922_v60  ;;  %v1313_v50 = vadd.f32 %v1307_v38, %v1265_v48  ;;  %6218 = vpow2.f32 %v5127_v49  ;;  %v1502_v39 = vld [vmem:[#allocation5 + $0x8] sm:$0x3] }
 0x6ba   :  { %v5653_v42 = vpop.f32.mrf.mxu0  ;;  %v5662_v43 = vpop.f32.mrf.mxu1 }
 0x6bb   :  { %1322 = vrot.lane.b32.xlu0 %v1320_v41, %s6508_s7  ;;  %v5125_v51 = vmul.f32 -1.442695, %v1313_v50  ;;  %v1427_v42 = vld [vmem:[#allocation4 + $0x6] sm:$0x3] }
 0x6bc   :  { %v1310_v44 = vpop.f32.mrf.mxu0 }
 0x6bd   :  { %6220 = vpow2.f32 %v5125_v51 }
 0x6be   :  { %v5654_v45 = vpop.f32.mrf.mxu0 }
 0x6c6   :  { %v6219_v52 = vpop.eup %6218 }
 0x6c7   :  { %v1392_v53 = vadd.f32 1.0, %v6219_v52 }
 0x6c9   :  { %6222 = vrcp.f32 %v1392_v53 }
 0x6ca   :  { %v6221_v54 = vpop.eup %6220 }
 0x6cb   :  { %v1317_v55 = vadd.f32 1.0, %v6221_v54 }
 0x6cd   :  { %6224 = vrcp.f32 %v1317_v55 }
 0x6d6   :  { %v6223_v56 = vpop.eup %6222 }
 0x6d7   :  { %v1407_v6 = vsub.f32 1.0, %v6223_v56  ;;  %v1413_v8 = vmul.f32 %v6223_v56, %v6965_v18 }
 0x6da   :  { %v6225_v61 = vpop.eup %6224 }
 0x6db   :  { %v1332_v11 = vsub.f32 1.0, %v6225_v61  ;;  %v1338_v13 = vmul.f32 %v6225_v61, %v6970_v30 }
 0x729   :  { %v1398_v57 = vpop.permute.xlu0 %1397 }
 0x72a   :  { %v1400_v59 = vmul.f32 %v6223_v56, %v1398_v57 }
 0x72c   :  { %1402 = vrot.lane.b32.xlu1 %v1400_v59, %s6508_s7 }
 0x72d   :  { %v1323_v62 = vpop.permute.xlu0 %1322 }
 0x72e   :  { %v1325_v63 = vmul.f32 %v6225_v61, %v1323_v62 }
 0x730   :  { %1327 = vrot.lane.b32.xlu0 %v1325_v63, %s6508_s7 }
 0x79e   :  { %v1403_v0 = vpop.permute.xlu1 %1402 }
 0x79f   :  { %v1405_v2 = vadd.f32 %v1403_v0, %v1340_v46 }
 0x7a1   :  { %6226 = vtanh.f32 %v1405_v2 }
 0x7a2   :  { %v1328_v40 = vpop.permute.xlu0 %1327 }
 0x7a3   :  { %v1330_v3 = vadd.f32 %v1328_v40, %v1265_v48 }
 0x7a5   :  { %6228 = vtanh.f32 %v1330_v3 }
 0x7ae   :  { %v6227_v4 = vpop.eup %6226 }
 0x7af   :  { %1409 = vrot.lane.b32.xlu1 %v6227_v4, %s6516_s13 }
 0x7b2   :  { %v6229_v5 = vpop.eup %6228 }
 0x7b3   :  { %1334 = vrot.lane.b32.xlu0 %v6229_v5, %s6516_s13 }
 0x821   :  { %v1410_v7 = vpop.permute.xlu1 %1409 }
 0x822   :  { %v1412_v9 = vmul.f32 %v1410_v7, %v1407_v6 }
 0x824   :  { %v6999_v10 = vadd.f32 %v1413_v8, %v1412_v9 }
 0x825   :  { %v1335_v12 = vpop.permute.xlu0 %1334 }
 0x826   :  { %v1337_v14 = vmul.f32 %v1335_v12, %v1332_v11  ;;  %v1503_v15 = vpack.c.bf16 %v6999_v10, %v6999_v10 }
 0x828   :  { %v7004_v16 = vadd.f32 %v1338_v13, %v1337_v14  ;;  %1505 = vrot.lane.b32.xlu1 %v1503_v15, %s6516_s13 }
 0x82a   :  { %v1428_v17 = vpack.c.bf16 %v7004_v16, %v7004_v16 }
 0x82c   :  { %1430 = vrot.lane.b32.xlu1 %v1428_v17, %s6516_s13 }
 0x89a   :  { %v1506_v19 = vpop.permute.xlu1 %1505 }
 0x89b   :  { %5676 = vmatmul.mubr.msk.bf16.vlgmr.msra.gmra.mxu1 %vm167_vm1, %v1506_v19 }
 0x89c   :  { %5688 = vmatpush3.bf16.msra.mxu1 %v6856_v27  ;;  %5691 = vmatprep.mubr.msk.bf16.mxu1 %vm6514_vm0, %v6513_v1 }
 0x89d   :  { %5689 = vmatprep.subr.bf16.mxu1 %v6513_v1 }
 0x89e   :  { %v1431_v20 = vpop.permute.xlu1 %1430 }
 0x89f   :  { %5668 = vmatmul.mubr.msk.bf16.vlgmr.msra.gmra.mxu0 %vm167_vm1, %v1431_v20 }
 0x8a0   :  { %5680 = vmatpush3.bf16.msra.mxu0 %v6802_v24  ;;  %5690 = vmatpush3.bf16.msra.mxu1 %v6864_v28 }
 0x8a1   :  { %5681 = vmatprep.subr.bf16.mxu0 %v6513_v1  ;;  %5683 = vmatprep.mubr.msk.bf16.mxu0 %vm6514_vm0, %v6513_v1 }
 0x8a2   :  { %5703 = vmatprep.subr.bf16.mxu1 %v6513_v1 }
 0x8a4   :  { %5682 = vmatpush3.bf16.msra.mxu0 %v6814_v25 }
 0x8a5   :  { %5695 = vmatprep.subr.bf16.mxu0 %v6513_v1 }
 0x95b   :  { %v1544_v21 = vpop.f32.mrf.mxu1 }
 0x95c   :  { %v1557_v22 = vadd.f32 %v1544_v21, %v6920_v58  ;;  %v1550_v41 = vadd.f32 %v1544_v21, %v1502_v39 }
 0x95d   :  { %v5677_v23 = vpop.f32.mrf.mxu1 }
 0x95e   :  { %1559 = vrot.lane.b32.xlu0 %v1557_v22, %s6508_s7  ;;  %v5131_v43 = vmul.f32 -1.442695, %v1550_v41 }
 0x95f   :  { %v1469_v31 = vpop.f32.mrf.mxu0  ;;  %v1547_v32 = vpop.f32.mrf.mxu1 }
 0x960   :  { %v1482_v33 = vadd.f32 %v1469_v31, %v6922_v60  ;;  %v1475_v44 = vadd.f32 %v1469_v31, %v1427_v42  ;;  %6230 = vpow2.f32 %v5131_v43 }
 0x961   :  { %v5669_v35 = vpop.f32.mrf.mxu0  ;;  %v5678_v36 = vpop.f32.mrf.mxu1 }
 0x962   :  { %1484 = vrot.lane.b32.xlu0 %v1482_v33, %s6508_s7  ;;  %v5129_v45 = vmul.f32 -1.442695, %v1475_v44  ;;  %v1664_v35 = vld [vmem:[#allocation5 + $0x6] sm:$0x3] }
 0x963   :  { %v1472_v37 = vpop.f32.mrf.mxu0 }
 0x964   :  { %6232 = vpow2.f32 %v5129_v45  ;;  %v1589_v37 = vld [vmem:[#allocation4 + $0x8] sm:$0x3] }
 0x965   :  { %v5670_v38 = vpop.f32.mrf.mxu0 }
 0x96d   :  { %v6231_v46 = vpop.eup %6230 }
 0x96e   :  { %v1554_v47 = vadd.f32 1.0, %v6231_v46 }
 0x970   :  { %6234 = vrcp.f32 %v1554_v47 }
 0x971   :  { %v6233_v48 = vpop.eup %6232 }
 0x972   :  { %v1479_v49 = vadd.f32 1.0, %v6233_v48 }
 0x974   :  { %6236 = vrcp.f32 %v1479_v49 }
 0x97d   :  { %v6235_v50 = vpop.eup %6234 }
 0x97e   :  { %v1569_v0 = vsub.f32 1.0, %v6235_v50  ;;  %v1575_v40 = vmul.f32 %v6235_v50, %v6999_v10 }
 0x981   :  { %v6237_v53 = vpop.eup %6236 }
 0x982   :  { %v1494_v5 = vsub.f32 1.0, %v6237_v53  ;;  %v1500_v7 = vmul.f32 %v6237_v53, %v7004_v16 }
 0x9d0   :  { %v1560_v51 = vpop.permute.xlu0 %1559 }
 0x9d1   :  { %v1562_v52 = vmul.f32 %v6235_v50, %v1560_v51 }
 0x9d3   :  { %1564 = vrot.lane.b32.xlu1 %v1562_v52, %s6508_s7 }
 0x9d4   :  { %v1485_v54 = vpop.permute.xlu0 %1484 }
 0x9d5   :  { %v1487_v55 = vmul.f32 %v6237_v53, %v1485_v54 }
 0x9d7   :  { %1489 = vrot.lane.b32.xlu0 %v1487_v55, %s6508_s7 }
 0xa45   :  { %v1565_v56 = vpop.permute.xlu1 %1564 }
 0xa46   :  { %v1567_v57 = vadd.f32 %v1565_v56, %v1502_v39 }
 0xa48   :  { %6238 = vtanh.f32 %v1567_v57 }
 0xa49   :  { %v1490_v59 = vpop.permute.xlu0 %1489 }
 0xa4a   :  { %v1492_v61 = vadd.f32 %v1490_v59, %v1427_v42 }
 0xa4c   :  { %6240 = vtanh.f32 %v1492_v61 }
 0xa55   :  { %v6239_v62 = vpop.eup %6238 }
 0xa56   :  { %1571 = vrot.lane.b32.xlu1 %v6239_v62, %s6516_s13 }
 0xa59   :  { %v6241_v63 = vpop.eup %6240 }
 0xa5a   :  { %1496 = vrot.lane.b32.xlu0 %v6241_v63, %s6516_s13 }
 0xac8   :  { %v1572_v2 = vpop.permute.xlu1 %1571 }
 0xac9   :  { %v1574_v3 = vmul.f32 %v1572_v2, %v1569_v0 }
 0xacb   :  { %v7033_v4 = vadd.f32 %v1575_v40, %v1574_v3 }
 0xacc   :  { %v1497_v6 = vpop.permute.xlu0 %1496 }
 0xacd   :  { %v1499_v8 = vmul.f32 %v1497_v6, %v1494_v5  ;;  %v1665_v9 = vpack.c.bf16 %v7033_v4, %v7033_v4 }
 0xacf   :  { %v7038_v11 = vadd.f32 %v1500_v7, %v1499_v8  ;;  %1667 = vrot.lane.b32.xlu1 %v1665_v9, %s6516_s13 }
 0xad1   :  { %v1590_v12 = vpack.c.bf16 %v7038_v11, %v7038_v11 }
 0xad3   :  { %1592 = vrot.lane.b32.xlu1 %v1590_v12, %s6516_s13 }
 0xb41   :  { %v1668_v13 = vpop.permute.xlu1 %1667 }
 0xb42   :  { %5692 = vmatmul.mubr.msk.bf16.vlgmr.msra.gmra.mxu1 %vm167_vm1, %v1668_v13 }
 0xb43   :  { %5704 = vmatpush3.bf16.msra.mxu1 %v6856_v27  ;;  %5707 = vmatprep.mubr.msk.bf16.mxu1 %vm6514_vm0, %v6513_v1 }
 0xb44   :  { %5705 = vmatprep.subr.bf16.mxu1 %v6513_v1 }
 0xb45   :  { %v1593_v14 = vpop.permute.xlu1 %1592 }
 0xb46   :  { %5684 = vmatmul.mubr.msk.bf16.vlgmr.msra.gmra.mxu0 %vm167_vm1, %v1593_v14 }
 0xb47   :  { %5696 = vmatpush3.bf16.msra.mxu0 %v6802_v24  ;;  %5706 = vmatpush3.bf16.msra.mxu1 %v6864_v28 }
 0xb48   :  { %5697 = vmatprep.subr.bf16.mxu0 %v6513_v1  ;;  %5699 = vmatprep.mubr.msk.bf16.mxu0 %vm6514_vm0, %v6513_v1 }
 0xb49   :  { %5719 = vmatprep.subr.bf16.mxu1 %v6513_v1 }
 0xb4b   :  { %5698 = vmatpush3.bf16.msra.mxu0 %v6814_v25 }
 0xb4c   :  { %5711 = vmatprep.subr.bf16.mxu0 %v6513_v1 }
 0xc02   :  { %v1706_v15 = vpop.f32.mrf.mxu1 }
 0xc03   :  { %v1719_v17 = vadd.f32 %v1706_v15, %v6920_v58  ;;  %v1712_v36 = vadd.f32 %v1706_v15, %v1664_v35 }
 0xc04   :  { %v5693_v19 = vpop.f32.mrf.mxu1 }
 0xc05   :  { %1721 = vrot.lane.b32.xlu0 %v1719_v17, %s6508_s7  ;;  %v5135_v38 = vmul.f32 -1.442695, %v1712_v36 }
 0xc06   :  { %v1631_v20 = vpop.f32.mrf.mxu0  ;;  %v1709_v21 = vpop.f32.mrf.mxu1 }
 0xc07   :  { %v1644_v22 = vadd.f32 %v1631_v20, %v6922_v60  ;;  %v1637_v39 = vadd.f32 %v1631_v20, %v1589_v37  ;;  %6242 = vpow2.f32 %v5135_v38 }
 0xc08   :  { %v5685_v23 = vpop.f32.mrf.mxu0  ;;  %v5694_v31 = vpop.f32.mrf.mxu1 }
 0xc09   :  { %1646 = vrot.lane.b32.xlu0 %v1644_v22, %s6508_s7  ;;  %v5133_v41 = vmul.f32 -1.442695, %v1637_v39  ;;  %v1826_v22 = vld [vmem:[#allocation5 + $0x4] sm:$0x3]  ;;  %v1751_v23 = vld [vmem:[#allocation4 + $0xa] sm:$0x3] }
 0xc0a   :  { %v1634_v32 = vpop.f32.mrf.mxu0 }
 0xc0b   :  { %6244 = vpow2.f32 %v5133_v41 }
 0xc0c   :  { %v5686_v33 = vpop.f32.mrf.mxu0 }
 0xc14   :  { %v6243_v42 = vpop.eup %6242 }
 0xc15   :  { %v1716_v43 = vadd.f32 1.0, %v6243_v42 }
 0xc17   :  { %6246 = vrcp.f32 %v1716_v43 }
 0xc18   :  { %v6245_v44 = vpop.eup %6244 }
 0xc19   :  { %v1641_v45 = vadd.f32 1.0, %v6245_v44 }
 0xc1b   :  { %6248 = vrcp.f32 %v1641_v45 }
 0xc24   :  { %v6247_v46 = vpop.eup %6246 }
 0xc25   :  { %v1731_v59 = vsub.f32 1.0, %v6247_v46  ;;  %v1737_v62 = vmul.f32 %v6247_v46, %v7033_v4 }
 0xc28   :  { %v6249_v49 = vpop.eup %6248 }
 0xc29   :  { %v1656_v2 = vsub.f32 1.0, %v6249_v49  ;;  %v1662_v3 = vmul.f32 %v6249_v49, %v7038_v11 }
 0xc77   :  { %v1722_v47 = vpop.permute.xlu0 %1721 }
 0xc78   :  { %v1724_v48 = vmul.f32 %v6247_v46, %v1722_v47 }
 0xc7a   :  { %1726 = vrot.lane.b32.xlu1 %v1724_v48, %s6508_s7 }
 0xc7b   :  { %v1647_v50 = vpop.permute.xlu0 %1646 }
 0xc7c   :  { %v1649_v51 = vmul.f32 %v6249_v49, %v1647_v50 }
 0xc7e   :  { %1651 = vrot.lane.b32.xlu0 %v1649_v51, %s6508_s7 }
 0xcec   :  { %v1727_v52 = vpop.permute.xlu1 %1726 }
 0xced   :  { %v1729_v53 = vadd.f32 %v1727_v52, %v1664_v35 }
 0xcef   :  { %6250 = vtanh.f32 %v1729_v53 }
 0xcf0   :  { %v1652_v54 = vpop.permute.xlu0 %1651 }
 0xcf1   :  { %v1654_v55 = vadd.f32 %v1652_v54, %v1589_v37 }
 0xcf3   :  { %6252 = vtanh.f32 %v1654_v55 }
 0xcfc   :  { %v6251_v56 = vpop.eup %6250 }
 0xcfd   :  { %1733 = vrot.lane.b32.xlu1 %v6251_v56, %s6516_s13 }
 0xd00   :  { %v6253_v57 = vpop.eup %6252 }
 0xd01   :  { %1658 = vrot.lane.b32.xlu0 %v6253_v57, %s6516_s13 }
 0xd6f   :  { %v1734_v61 = vpop.permute.xlu1 %1733 }
 0xd70   :  { %v1736_v63 = vmul.f32 %v1734_v61, %v1731_v59 }
 0xd72   :  { %v7067_v0 = vadd.f32 %v1737_v62, %v1736_v63 }
 0xd73   :  { %v1659_v40 = vpop.permute.xlu0 %1658 }
 0xd74   :  { %v1661_v5 = vmul.f32 %v1659_v40, %v1656_v2  ;;  %v1827_v6 = vpack.c.bf16 %v7067_v0, %v7067_v0 }
 0xd76   :  { %v7072_v7 = vadd.f32 %v1662_v3, %v1661_v5  ;;  %1829 = vrot.lane.b32.xlu1 %v1827_v6, %s6516_s13  ;;  %v6392_v5 = vld [vmem:[%s7978_s11 + $0x8] sm:$0xff]  }
 0xd78   :  { %v1752_v8 = vpack.c.bf16 %v7072_v7, %v7072_v7 }
 0xd7a   :  { %1754 = vrot.lane.b32.xlu1 %v1752_v8, %s6516_s13  ;;  %v6393_v8 = vld [vmem:[%s7977_s22 + $0x8] sm:$0xff]  }
 0xde8   :  { %v1830_v9 = vpop.permute.xlu1 %1829 }
 0xde9   :  { %5708 = vmatmul.mubr.msk.bf16.vlgmr.msra.gmra.mxu1 %vm167_vm1, %v1830_v9  ;;  %v6394_v9 = vld [vmem:[%s7978_s11] sm:$0xff]  }
 0xdea   :  { %5720 = vmatpush3.bf16.msra.mxu1 %v6856_v27  ;;  %5723 = vmatprep.mubr.msk.bf16.mxu1 %vm6514_vm0, %v6513_v1 }
 0xdeb   :  { %5721 = vmatprep.subr.bf16.mxu1 %v6513_v1 }
 0xdec   :  { %v1755_v12 = vpop.permute.xlu1 %1754 }
 0xded   :  { %5700 = vmatmul.mubr.msk.bf16.vlgmr.msra.gmra.mxu0 %vm167_vm1, %v1755_v12  ;;  %v6395_v12 = vld [vmem:[%s7977_s22] sm:$0xff]  }
 0xdee   :  { %5712 = vmatpush3.bf16.msra.mxu0 %v6802_v24  ;;  %5722 = vmatpush3.bf16.msra.mxu1 %v6864_v28 }
 0xdef   :  { %5713 = vmatprep.subr.bf16.mxu0 %v6513_v1  ;;  %5715 = vmatprep.mubr.msk.bf16.mxu0 %vm6514_vm0, %v6513_v1 }
 0xdf0   :  { %5735 = vmatprep.subr.bf16.mxu1 %v6513_v1 }
 0xdf2   :  { %5714 = vmatpush3.bf16.msra.mxu0 %v6814_v25 }
 0xdf3   :  { %5727 = vmatprep.subr.bf16.mxu0 %v6513_v1 }
 0xea9   :  { %v1868_v27 = vpop.f32.mrf.mxu1 }
 0xeaa   :  { %v1881_v13 = vadd.f32 %v1868_v27, %v6920_v58  ;;  %v1874_v25 = vadd.f32 %v1868_v27, %v1826_v22 }
 0xeab   :  { %v5709_v14 = vpop.f32.mrf.mxu1 }
 0xeac   :  { %1883 = vrot.lane.b32.xlu0 %v1881_v13, %s6508_s7  ;;  %v5139_v31 = vmul.f32 -1.442695, %v1874_v25 }
 0xead   :  { %v1793_v24 = vpop.f32.mrf.mxu0  ;;  %v1871_v15 = vpop.f32.mrf.mxu1 }
 0xeae   :  { %v1806_v28 = vadd.f32 %v1793_v24, %v6922_v60  ;;  %v1799_v32 = vadd.f32 %v1793_v24, %v1751_v23  ;;  %6254 = vpow2.f32 %v5139_v31 }
 0xeaf   :  { %v5701_v17 = vpop.f32.mrf.mxu0  ;;  %v5710_v19 = vpop.f32.mrf.mxu1 }
 0xeb0   :  { %1808 = vrot.lane.b32.xlu0 %v1806_v28, %s6508_s7  ;;  %v5137_v33 = vmul.f32 -1.442695, %v1799_v32 }
 0xeb1   :  { %v1796_v20 = vpop.f32.mrf.mxu0 }
 0xeb2   :  { %6256 = vpow2.f32 %v5137_v33 }
 0xeb3   :  { %v5702_v21 = vpop.f32.mrf.mxu0 }
 0xebb   :  { %v6255_v35 = vpop.eup %6254 }
 0xebc   :  { %v1878_v36 = vadd.f32 1.0, %v6255_v35 }
 0xebe   :  { %6258 = vrcp.f32 %v1878_v36 }
 0xebf   :  { %v6257_v37 = vpop.eup %6256 }
 0xec0   :  { %v1803_v38 = vadd.f32 1.0, %v6257_v37 }
 0xec2   :  { %6260 = vrcp.f32 %v1803_v38 }
 0xecb   :  { %v6259_v39 = vpop.eup %6258 }
 0xecc   :  { %v1893_v52 = vsub.f32 1.0, %v6259_v39  ;;  %v1899_v54 = vmul.f32 %v6259_v39, %v7067_v0 }
 0xecf   :  { %v6261_v43 = vpop.eup %6260 }
 0xed0   :  { %v1818_v57 = vsub.f32 1.0, %v6261_v43  ;;  %v1824_v61 = vmul.f32 %v6261_v43, %v7072_v7 }
 0xf1e   :  { %v1884_v41 = vpop.permute.xlu0 %1883 }
 0xf1f   :  { %v1886_v42 = vmul.f32 %v6259_v39, %v1884_v41 }
 0xf21   :  { %1888 = vrot.lane.b32.xlu1 %v1886_v42, %s6508_s7 }
 0xf22   :  { %v1809_v44 = vpop.permute.xlu0 %1808 }
 0xf23   :  { %v1811_v45 = vmul.f32 %v6261_v43, %v1809_v44 }
 0xf25   :  { %1813 = vrot.lane.b32.xlu0 %v1811_v45, %s6508_s7 }
 0xf93   :  { %v1889_v46 = vpop.permute.xlu1 %1888 }
 0xf94   :  { %v1891_v47 = vadd.f32 %v1889_v46, %v1826_v22  ;;  %v1988_v22 = vld [vmem:[#allocation5 + $0x2] sm:$0x3] }
 0xf96   :  { %6262 = vtanh.f32 %v1891_v47 }
 0xf97   :  { %v1814_v48 = vpop.permute.xlu0 %1813 }
 0xf98   :  { %v1816_v49 = vadd.f32 %v1814_v48, %v1751_v23  ;;  %v1913_v23 = vld [vmem:[#allocation4 + $0xc] sm:$0x3] }
 0xf9a   :  { %6264 = vtanh.f32 %v1816_v49 }
 0xfa3   :  { %v6263_v50 = vpop.eup %6262 }
 0xfa4   :  { %1895 = vrot.lane.b32.xlu1 %v6263_v50, %s6516_s13 }
 0xfa7   :  { %v6265_v51 = vpop.eup %6264 }
 0xfa8   :  { %1820 = vrot.lane.b32.xlu0 %v6265_v51, %s6516_s13 }
0x1016   :  { %v1896_v53 = vpop.permute.xlu1 %1895 }
0x1017   :  { %v1898_v55 = vmul.f32 %v1896_v53, %v1893_v52 }
0x1019   :  { %v7101_v56 = vadd.f32 %v1899_v54, %v1898_v55 }
0x101a   :  { %v1821_v59 = vpop.permute.xlu0 %1820 }
0x101b   :  { %v1823_v62 = vmul.f32 %v1821_v59, %v1818_v57  ;;  %v1989_v63 = vpack.c.bf16 %v7101_v56, %v7101_v56 }
0x101d   :  { %v7106_v2 = vadd.f32 %v1824_v61, %v1823_v62  ;;  %1991 = vrot.lane.b32.xlu1 %v1989_v63, %s6516_s13 }
0x101f   :  { %v1914_v40 = vpack.c.bf16 %v7106_v2, %v7106_v2 }
0x1021   :  { %1916 = vrot.lane.b32.xlu1 %v1914_v40, %s6516_s13 }
0x108f   :  { %v1992_v3 = vpop.permute.xlu1 %1991 }
0x1090   :  { %5724 = vmatmul.mubr.msk.bf16.vlgmr.msra.gmra.mxu1 %vm167_vm1, %v1992_v3 }
0x1091   :  { %5736 = vmatpush3.bf16.msra.mxu1 %v6392_v5  ;;  %5739 = vmatprep.mubr.msk.bf16.mxu1 %vm6514_vm0, %v6513_v1 }
0x1092   :  { %5737 = vmatprep.subr.bf16.mxu1 %v6513_v1 }
0x1093   :  { %v1917_v6 = vpop.permute.xlu1 %1916 }
0x1094   :  { %5716 = vmatmul.mubr.msk.bf16.vlgmr.msra.gmra.mxu0 %vm167_vm1, %v1917_v6 }
0x1095   :  { %5728 = vmatpush3.bf16.msra.mxu0 %v6393_v8  ;;  %5738 = vmatpush3.bf16.msra.mxu1 %v6394_v9 }
0x1096   :  { %5729 = vmatprep.subr.bf16.mxu0 %v6513_v1  ;;  %5731 = vmatprep.mubr.msk.bf16.mxu0 %vm6514_vm0, %v6513_v1 }
0x1097   :  { %5751 = vmatprep.subr.bf16.mxu1 %v6513_v1 }
0x1099   :  { %5730 = vmatpush3.bf16.msra.mxu0 %v6395_v12 }
0x109a   :  { %5743 = vmatprep.subr.bf16.mxu0 %v6513_v1 }
0x1150   :  { %v2030_v27 = vpop.f32.mrf.mxu1 }
0x1151   :  { %v2043_v13 = vadd.f32 %v2030_v27, %v6920_v58  ;;  %v2036_v25 = vadd.f32 %v2030_v27, %v1988_v22 }
0x1152   :  { %v5725_v14 = vpop.f32.mrf.mxu1 }
0x1153   :  { %2045 = vrot.lane.b32.xlu0 %v2043_v13, %s6508_s7  ;;  %v5143_v31 = vmul.f32 -1.442695, %v2036_v25 }
0x1154   :  { %v1955_v24 = vpop.f32.mrf.mxu0  ;;  %v2033_v15 = vpop.f32.mrf.mxu1 }
0x1155   :  { %v1968_v28 = vadd.f32 %v1955_v24, %v6922_v60  ;;  %v1961_v32 = vadd.f32 %v1955_v24, %v1913_v23  ;;  %6266 = vpow2.f32 %v5143_v31 }
0x1156   :  { %v5717_v17 = vpop.f32.mrf.mxu0  ;;  %v5726_v19 = vpop.f32.mrf.mxu1 }
0x1157   :  { %1970 = vrot.lane.b32.xlu0 %v1968_v28, %s6508_s7  ;;  %v5141_v33 = vmul.f32 -1.442695, %v1961_v32 }
0x1158   :  { %v1958_v20 = vpop.f32.mrf.mxu0 }
0x1159   :  { %6268 = vpow2.f32 %v5141_v33  ;;  %v2150_v20 = vld [vmem:[#allocation5] sm:$0x3] }
0x115a   :  { %v5718_v21 = vpop.f32.mrf.mxu0 }
0x1162   :  { %v6267_v35 = vpop.eup %6266 }
0x1163   :  { %v2040_v36 = vadd.f32 1.0, %v6267_v35  ;;  %v7170_v35 = vld [vmem:[%s7945_s9 + $0x8] sm:$0xff]  }
0x1165   :  { %6270 = vrcp.f32 %v2040_v36 }
0x1166   :  { %v6269_v37 = vpop.eup %6268 }
0x1167   :  { %v1965_v38 = vadd.f32 1.0, %v6269_v37 }
0x1169   :  { %6272 = vrcp.f32 %v1965_v38 }
0x1172   :  { %v6271_v39 = vpop.eup %6270 }
0x1173   :  { %v2055_v52 = vsub.f32 1.0, %v6271_v39  ;;  %v2061_v54 = vmul.f32 %v6271_v39, %v7101_v56 }
0x1176   :  { %v6273_v43 = vpop.eup %6272 }
0x1177   :  { %v1980_v59 = vsub.f32 1.0, %v6273_v43  ;;  %v1986_v62 = vmul.f32 %v6273_v43, %v7106_v2 }
0x11c5   :  { %v2046_v41 = vpop.permute.xlu0 %2045 }
0x11c6   :  { %v2048_v42 = vmul.f32 %v6271_v39, %v2046_v41  ;;  %v7180_v39 = vld [vmem:[%s7945_s9] sm:$0xff]  }
0x11c8   :  { %2050 = vrot.lane.b32.xlu1 %v2048_v42, %s6508_s7 }
0x11c9   :  { %v1971_v44 = vpop.permute.xlu0 %1970 }
0x11ca   :  { %v1973_v45 = vmul.f32 %v6273_v43, %v1971_v44 }
0x11cc   :  { %1975 = vrot.lane.b32.xlu0 %v1973_v45, %s6508_s7 }
0x123a   :  { %v2051_v46 = vpop.permute.xlu1 %2050 }
0x123b   :  { %v2053_v47 = vadd.f32 %v2051_v46, %v1988_v22  ;;  %v7164_v22 = vld [vmem:[#allocation4 + $0xe] sm:$0x3] }
0x123d   :  { %6274 = vtanh.f32 %v2053_v47  ;;  %v7221_v47 = vld [vmem:[%s7950_s14] sm:$0xff]  }
0x123e   :  { %v1976_v48 = vpop.permute.xlu0 %1975 }
0x123f   :  { %v1978_v49 = vadd.f32 %v1976_v48, %v1913_v23 }
0x1241   :  { %6276 = vtanh.f32 %v1978_v49 }
0x124a   :  { %v6275_v50 = vpop.eup %6274 }
0x124b   :  { %2057 = vrot.lane.b32.xlu1 %v6275_v50, %s6516_s13 }
0x124e   :  { %v6277_v51 = vpop.eup %6276 }
0x124f   :  { %1982 = vrot.lane.b32.xlu0 %v6277_v51, %s6516_s13 }
0x12bd   :  { %v2058_v53 = vpop.permute.xlu1 %2057 }
0x12be   :  { %v2060_v55 = vmul.f32 %v2058_v53, %v2055_v52 }
0x12c0   :  { %v7143_v57 = vadd.f32 %v2061_v54, %v2060_v55 }
0x12c1   :  { %v1983_v61 = vpop.permute.xlu0 %1982 }
0x12c2   :  { %v1985_v63 = vmul.f32 %v1983_v61, %v1980_v59  ;;  %v2151_v40 = vpack.c.bf16 %v7143_v57, %v7143_v57 }
0x12c4   :  { %v7148_v3 = vadd.f32 %v1986_v62, %v1985_v63  ;;  %2153 = vrot.lane.b32.xlu1 %v2151_v40, %s6516_s13  ;;  %v7285_v62 = vld [vmem:[%s7946_s10 + $0x8] sm:$0xff]   ;;  %v7292_v63 = vld [vmem:[%s7946_s10] sm:$0xff]  }
0x12c6   :  { %v2076_v5 = vpack.c.bf16 %v7148_v3, %v7148_v3 }
0x12c8   :  { %2078 = vrot.lane.b32.xlu1 %v2076_v5, %s6516_s13 }
0x1336   :  { %v2154_v6 = vpop.permute.xlu1 %2153 }
0x1337   :  { %5740 = vmatmul.mubr.msk.bf16.vlgmr.msra.gmra.mxu1 %vm167_vm1, %v2154_v6 }
0x1338   :  { %5755 = vmatprep.mubr.msk.bf16.mxu1 %vm6514_vm0, %v6513_v1  ;;  %5752 = vmatpush3.bf16.msra.mxu1 %v7170_v35 }
0x1339   :  { %5753 = vmatprep.subr.bf16.mxu1 %v6513_v1 }
0x133a   :  { %v2079_v8 = vpop.permute.xlu1 %2078 }
0x133b   :  { %5732 = vmatmul.mubr.msk.bf16.vlgmr.msra.gmra.mxu0 %vm167_vm1, %v2079_v8 }
0x133c   :  { %5747 = vmatprep.mubr.msk.bf16.mxu0 %vm6514_vm0, %v6513_v1  ;;  %5754 = vmatpush3.bf16.msra.mxu1 %v7180_v39 }
0x133d   :  { %5767 = vmatprep.subr.bf16.mxu1 %v6513_v1  ;;  %5744 = vmatpush3.bf16.msra.mxu0 %v7285_v62 }
0x133e   :  { %5745 = vmatprep.subr.bf16.mxu0 %v6513_v1 }
0x1341   :  { %5746 = vmatpush3.bf16.msra.mxu0 %v7292_v63 }
0x1342   :  { %5759 = vmatprep.subr.bf16.mxu0 %v6513_v1 }
0x13f7   :  { %v2192_v9 = vpop.f32.mrf.mxu1 }
0x13f8   :  { %v2205_v12 = vadd.f32 %v2192_v9, %v6920_v58  ;;  %v2198_v21 = vadd.f32 %v2192_v9, %v2150_v20 }
0x13f9   :  { %v5741_v27 = vpop.f32.mrf.mxu1 }
0x13fa   :  { %2207 = vrot.lane.b32.xlu0 %v2205_v12, %s6508_s7  ;;  %v5147_v25 = vmul.f32 -1.442695, %v2198_v21 }
0x13fb   :  { %v2117_v13 = vpop.f32.mrf.mxu0  ;;  %v2195_v14 = vpop.f32.mrf.mxu1 }
0x13fc   :  { %v2130_v24 = vadd.f32 %v2117_v13, %v6922_v60  ;;  %v2123_v58 = vadd.f32 %v2117_v13, %v7164_v22  ;;  %6278 = vpow2.f32 %v5147_v25 }
0x13fd   :  { %v5733_v15 = vpop.f32.mrf.mxu0  ;;  %v5742_v28 = vpop.f32.mrf.mxu1 }
0x13fe   :  { %2132 = vrot.lane.b32.xlu0 %v2130_v24, %s6508_s7  ;;  %v5145_v23 = vmul.f32 -1.442695, %v2123_v58 }
0x13ff   :  { %v2120_v17 = vpop.f32.mrf.mxu0 }
0x1400   :  { %6280 = vpow2.f32 %v5145_v23 }
0x1401   :  { %v5734_v19 = vpop.f32.mrf.mxu0 }
0x1409   :  { %v6279_v31 = vpop.eup %6278 }
0x140a   :  { %v2202_v32 = vadd.f32 1.0, %v6279_v31 }
0x140c   :  { %6282 = vrcp.f32 %v2202_v32 }
0x140d   :  { %v6281_v33 = vpop.eup %6280 }
0x140e   :  { %v2127_v60 = vadd.f32 1.0, %v6281_v33 }
0x1410   :  { %6284 = vrcp.f32 %v2127_v60 }
0x1419   :  { %v7172_v36 = vpop.eup %6282 }
0x141a   :  { %v2217_v40 = vsub.f32 1.0, %v7172_v36  ;;  %v2223_v6 = vmul.f32 %v7172_v36, %v7143_v57 }
0x141d   :  { %v7183_v41 = vpop.eup %6284 }
0x146c   :  { %v2208_v37 = vpop.permute.xlu0 %2207 }
0x146d   :  { %v2210_v38 = vmul.f32 %v7172_v36, %v2208_v37 }
0x146f   :  { %2212 = vrot.lane.b32.xlu1 %v2210_v38, %s6508_s7 }
0x1470   :  { %v2133_v42 = vpop.permute.xlu0 %2132 }
0x1471   :  { %v2135_v43 = vmul.f32 %v7183_v41, %v2133_v42 }
0x1473   :  { %2137 = vrot.lane.b32.xlu0 %v2135_v43, %s6508_s7 }
0x1477   :  { %1092 = vrot.lane.b32.xlu0 %v6936_v29, %s6516_s13 }
0x147b   :  { %1254 = vrot.lane.b32.xlu0 %v6970_v30, %s6516_s13 }
0x147f   :  { %1416 = vrot.lane.b32.xlu0 %v7004_v16, %s6516_s13 }
0x1483   :  { %1578 = vrot.lane.b32.xlu0 %v7038_v11, %s6516_s13 }
0x1487   :  { %1584 = vrot.lane.b32.xlu0 %v7033_v4, %s6516_s13 }
0x148b   :  { %1422 = vrot.lane.b32.xlu0 %v6999_v10, %s6516_s13 }
0x148f   :  { %1260 = vrot.lane.b32.xlu0 %v6965_v18, %s6516_s13  ;;  %v7212_v18 = vld [vmem:[%s7950_s14 + $0x8] sm:$0xff]  }
0x1493   :  { %1098 = vrot.lane.b32.xlu0 %v6932_v34, %s6516_s13 }
0x14e1   :  { %v2213_v29 = vpop.permute.xlu1 %2212 }
0x14e2   :  { %v2215_v30 = vadd.f32 %v2213_v29, %v2150_v20 }
0x14e4   :  { %6286 = vtanh.f32 %v2215_v30  ;;  %v7335_v30 = vld [vmem:[%s7951_s15 + $0x8] sm:$0xff]  }
0x14e5   :  { %v7205_v44 = vpop.permute.xlu0 %2137 }
0x14e6   :  { %v2140_v9 = vadd.f32 %v7205_v44, %v7164_v22 }
0x14e8   :  { %6288 = vtanh.f32 %v2140_v9 }
0x14e9   :  { %v1093_v16 = vpop.permute.xlu0 %1092 }
0x14ea   :  { %1096 = vst.msk [vmem:[#allocation2] sm:$0x3] %vm1095_vm3, %v1093_v16 }
0x14ed   :  { %v1255_v11 = vpop.permute.xlu0 %1254 }
0x14ee   :  { %1258 = vst.msk [vmem:[#allocation2 + $0x2] sm:$0x3] %vm1095_vm3, %v1255_v11 }
0x14f1   :  { %v6287_v4 = vpop.eup %6286  ;;  %v1417_v10 = vpop.permute.xlu0 %1416  ;;  %v2254_v45 = vld [vmem:[#allocation2] sm:$0x3] }
0x14f2   :  { %1420 = vst.msk [vmem:[#allocation2 + $0x4] sm:$0x3] %vm1095_vm3, %v1417_v10  ;;  %2219 = vrot.lane.b32.xlu1 %v6287_v4, %s6516_s13  ;;  %v2255_v34 = vpack.c.bf16 %v2254_v45, %v2254_v45  ;;  %v7345_v10 = vld [vmem:[%s7951_s15] sm:$0xff]  }
0x14f4   :  { %5756 = vmatmul.mubr.msk.bf16.vlgmr.msra.gmra.mxu1 %vm167_vm1, %v2255_v34 }
0x14f5   :  { %5768 = vmatpush3.bf16.msra.mxu1 %v7212_v18  ;;  %v1579_v46 = vpop.permute.xlu0 %1578  ;;  %5771 = vmatprep.mubr.msk.bf16.mxu1 %vm6514_vm0, %v6513_v1  ;;  %v2488_v50 = vld [vmem:[#allocation2 + $0x2] sm:$0x3]  ;;  %v6289_v27 = vpop.eup %6288 }
0x14f6   :  { %1582 = vst.msk [vmem:[#allocation2 + $0x6] sm:$0x3] %vm1095_vm3, %v1579_v46  ;;  %5769 = vmatprep.subr.bf16.mxu1 %v6513_v1  ;;  %v2489_v52 = vpack.c.bf16 %v2488_v50, %v2488_v50  ;;  %v2142_v46 = vsub.f32 1.0, %v7183_v41 }
0x14f9   :  { %5770 = vmatpush3.bf16.msra.mxu1 %v7221_v47  ;;  %v1585_v48 = vpop.permute.xlu0 %1584  ;;  %v2662_v54 = vld [vmem:[#allocation2 + $0x4] sm:$0x3] }
0x14fa   :  { %1588 = vst.msk [vmem:[#allocation3 + $0x8] sm:$0x3] %vm1095_vm3, %v1585_v48  ;;  %5783 = vmatprep.subr.bf16.mxu1 %v6513_v1  ;;  %v2663_v55 = vpack.c.bf16 %v2662_v54, %v2662_v54 }
0x14fc   :  { %5772 = vmatmul.mubr.msk.bf16.vlgmr.msra.gmra.mxu1 %vm167_vm1, %v2255_v34 }
0x14fd   :  { %5784 = vmatpush3.bf16.msra.mxu1 %v7170_v35  ;;  %v1423_v49 = vpop.permute.xlu0 %1422  ;;  %5787 = vmatprep.mubr.msk.bf16.mxu1 %vm6514_vm0, %v6513_v1  ;;  %v2836_v59 = vld [vmem:[#allocation2 + $0x6] sm:$0x3] }
0x14fe   :  { %1426 = vst.msk [vmem:[#allocation3 + $0xa] sm:$0x3] %vm1095_vm3, %v1423_v49  ;;  %5785 = vmatprep.subr.bf16.mxu1 %v6513_v1  ;;  %v2837_v61 = vpack.c.bf16 %v2836_v59, %v2836_v59  ;;  %v2148_v49 = vmul.f32 %v7183_v41, %v7148_v3 }
0x1501   :  { %5786 = vmatpush3.bf16.msra.mxu1 %v7180_v39  ;;  %v1261_v51 = vpop.permute.xlu0 %1260 }
0x1502   :  { %1264 = vst.msk [vmem:[#allocation3 + $0xc] sm:$0x3] %vm1095_vm3, %v1261_v51  ;;  %5799 = vmatprep.subr.bf16.mxu1 %v6513_v1 }
0x1504   :  { %5788 = vmatmul.mubr.msk.bf16.vlgmr.msra.gmra.mxu1 %vm167_vm1, %v2489_v52 }
0x1505   :  { %5800 = vmatpush3.bf16.msra.mxu1 %v7212_v18  ;;  %v1099_v53 = vpop.permute.xlu0 %1098  ;;  %5803 = vmatprep.mubr.msk.bf16.mxu1 %vm6514_vm0, %v6513_v1 }
0x1506   :  { %1102 = vst.msk [vmem:[#allocation3 + $0xe] sm:$0x3] %vm1095_vm3, %v1099_v53  ;;  %5801 = vmatprep.subr.bf16.mxu1 %v6513_v1 }
0x1509   :  { %5802 = vmatpush3.bf16.msra.mxu1 %v7221_v47 }
0x150a   :  { %5815 = vmatprep.subr.bf16.mxu1 %v6513_v1 }
0x150c   :  { %5804 = vmatmul.mubr.msk.bf16.vlgmr.msra.gmra.mxu1 %vm167_vm1, %v2489_v52 }
0x150d   :  { %5816 = vmatpush3.bf16.msra.mxu1 %v7170_v35  ;;  %5819 = vmatprep.mubr.msk.bf16.mxu1 %vm6514_vm0, %v6513_v1 }
0x150e   :  { %5817 = vmatprep.subr.bf16.mxu1 %v6513_v1 }
0x1511   :  { %5818 = vmatpush3.bf16.msra.mxu1 %v7180_v39 }
0x1512   :  { %5831 = vmatprep.subr.bf16.mxu1 %v6513_v1 }
0x1514   :  { %5820 = vmatmul.mubr.msk.bf16.vlgmr.msra.gmra.mxu1 %vm167_vm1, %v2663_v55 }
0x1515   :  { %5832 = vmatpush3.bf16.msra.mxu1 %v7212_v18  ;;  %5835 = vmatprep.mubr.msk.bf16.mxu1 %vm6514_vm0, %v6513_v1 }
0x1516   :  { %5833 = vmatprep.subr.bf16.mxu1 %v6513_v1 }
0x1519   :  { %5834 = vmatpush3.bf16.msra.mxu1 %v7221_v47 }
0x151a   :  { %5847 = vmatprep.subr.bf16.mxu1 %v6513_v1 }
0x151c   :  { %5836 = vmatmul.mubr.msk.bf16.vlgmr.msra.gmra.mxu1 %vm167_vm1, %v2663_v55 }
0x151d   :  { %5848 = vmatpush3.bf16.msra.mxu1 %v7170_v35  ;;  %5851 = vmatprep.mubr.msk.bf16.mxu1 %vm6514_vm0, %v6513_v1 }
0x151e   :  { %5849 = vmatprep.subr.bf16.mxu1 %v6513_v1 }
0x1521   :  { %5850 = vmatpush3.bf16.msra.mxu1 %v7180_v39 }
0x1522   :  { %5863 = vmatprep.subr.bf16.mxu1 %v6513_v1 }
0x1524   :  { %5852 = vmatmul.mubr.msk.bf16.vlgmr.msra.gmra.mxu1 %vm167_vm1, %v2837_v61 }
0x1525   :  { %5864 = vmatpush3.bf16.msra.mxu1 %v7212_v18  ;;  %5867 = vmatprep.mubr.msk.bf16.mxu1 %vm6514_vm0, %v6513_v1 }
0x1526   :  { %5865 = vmatprep.subr.bf16.mxu1 %v6513_v1 }
0x1529   :  { %5866 = vmatpush3.bf16.msra.mxu1 %v7221_v47 }
0x152a   :  { %5879 = vmatprep.subr.bf16.mxu1 %v6513_v1 }
0x152c   :  { %5868 = vmatmul.mubr.msk.bf16.vlgmr.msra.gmra.mxu1 %vm167_vm1, %v2837_v61 }
0x152d   :  { %5880 = vmatpush3.bf16.msra.mxu1 %v7170_v35  ;;  %5883 = vmatprep.mubr.msk.bf16.mxu1 %vm6514_vm0, %v6513_v1 }
0x152e   :  { %5881 = vmatprep.subr.bf16.mxu1 %v6513_v1 }
0x1531   :  { %5882 = vmatpush3.bf16.msra.mxu1 %v7180_v39 }
0x1532   :  { %5895 = vmatprep.subr.bf16.mxu1 %v6513_v1 }
0x1564   :  { %v2220_v5 = vpop.permute.xlu1 %2219 }
0x1565   :  { %v2222_v8 = vmul.f32 %v2220_v5, %v2217_v40 }
0x1567   :  { %v7301_v12 = vadd.f32 %v2223_v6, %v2222_v8 }
0x1569   :  { %2232 = vrot.lane.b32.xlu1 %v7301_v12, %s6516_s13 }
0x156d   :  { %2070 = vrot.lane.b32.xlu1 %v7143_v57, %s6516_s13 }
0x1571   :  { %1908 = vrot.lane.b32.xlu1 %v7101_v56, %s6516_s13 }
0x1575   :  { %1746 = vrot.lane.b32.xlu1 %v7067_v0, %s6516_s13 }
0x1579   :  { %2144 = vrot.lane.b32.xlu1 %v6289_v27, %s6516_s13 }
0x157d   :  { %1740 = vrot.lane.b32.xlu1 %v7072_v7, %s6516_s13 }
0x1581   :  { %1902 = vrot.lane.b32.xlu1 %v7106_v2, %s6516_s13 }
0x1585   :  { %2064 = vrot.lane.b32.xlu1 %v7148_v3, %s6516_s13 }
0x15b4   :  { %v7318_v13 = vpop.f32.mrf.mxu1 }
0x15b6   :  { %v5757_v57 = vpop.f32.mrf.mxu1 }
0x15b8   :  { %v2365_v14 = vpop.f32.mrf.mxu1 }
0x15ba   :  { %v5758_v56 = vpop.f32.mrf.mxu1 }
0x15bc   :  { %v7320_v24 = vpop.f32.mrf.mxu1 }
0x15be   :  { %v5773_v0 = vpop.f32.mrf.mxu1 }
0x15c0   :  { %v2477_v15 = vpop.f32.mrf.mxu1 }
0x15c2   :  { %v5774_v28 = vpop.f32.mrf.mxu1 }
0x15c3   :  { %v3012_v28 = vld [vmem:[#allocation3 + $0x8] sm:$0x3] }
0x15c4   :  { %v7322_v17 = vpop.f32.mrf.mxu1 }
0x15c6   :  { %v5789_v19 = vpop.f32.mrf.mxu1 }
0x15c7   :  { %v3013_v19 = vpack.c.bf16 %v3012_v28, %v3012_v28 }
0x15c8   :  { %v2575_v7 = vpop.f32.mrf.mxu1 }
0x15c9   :  { %v5193_v7 = vld [vmem:[#allocation9] ss:$0 sm:$0xff] }
0x15ca   :  { %v5790_v20 = vpop.f32.mrf.mxu1  ;;  %3781 = vrot.lane.b32.xlu0 %v5193_v7, %s6508_s7 }
0x15cb   :  { %v3360_v20 = vld [vmem:[#allocation3 + $0xc] sm:$0x3] }
0x15cc   :  { %v7324_v21 = vpop.f32.mrf.mxu1 }
0x15ce   :  { %v5805_v2 = vpop.f32.mrf.mxu1 }
0x15cf   :  { %v3361_v2 = vpack.c.bf16 %v3360_v20, %v3360_v20 }
0x15d0   :  { %v2657_v22 = vpop.f32.mrf.mxu1 }
0x15d1   :  { %v5197_v22 = vld [vmem:[#allocation14] ss:$0 sm:$0xff] }
0x15d2   :  { %v5806_v25 = vpop.f32.mrf.mxu1 }
0x15d3   :  { %v3534_v25 = vld [vmem:[#allocation3 + $0xe] sm:$0x3] }
0x15d4   :  { %v7326_v58 = vpop.f32.mrf.mxu1 }
0x15d6   :  { %v5821_v23 = vpop.f32.mrf.mxu1 }
0x15d7   :  { %v3535_v23 = vpack.c.bf16 %v3534_v25, %v3534_v25 }
0x15d8   :  { %v2749_v31 = vpop.f32.mrf.mxu1 }
0x15da   :  { %v5822_v32 = vpop.f32.mrf.mxu1 }
0x15db   :  { %v2233_v33 = vpop.permute.xlu1 %2232 }
0x15dc   :  { %2235 = vst.msk [vmem:[#allocation3] sm:$0x3] %vm1095_vm3, %v2233_v33  ;;  %v7329_v60 = vpop.f32.mrf.mxu1 }
0x15de   :  { %v5837_v36 = vpop.f32.mrf.mxu1 }
0x15df   :  { %v2071_v37 = vpop.permute.xlu1 %2070  ;;  %v7538_v36 = vld [vmem:[#allocation12 + $0x8] sm:$0xff]  }
0x15e0   :  { %2074 = vst.msk [vmem:[#allocation3 + $0x2] sm:$0x3] %vm1095_vm3, %v2071_v37  ;;  %v2831_v38 = vpop.f32.mrf.mxu1  ;;  %v7543_v37 = vld [vmem:[#allocation12] sm:$0xff]  }
0x15e2   :  { %v5838_v42 = vpop.f32.mrf.mxu1 }
0x15e3   :  { %v1909_v43 = vpop.permute.xlu1 %1908  ;;  %v2256_v29 = vld [vmem:[#allocation3] sm:$0x3] }
0x15e4   :  { %1912 = vst.msk [vmem:[#allocation3 + $0x4] sm:$0x3] %vm1095_vm3, %v1909_v43  ;;  %v7338_v44 = vpop.f32.mrf.mxu1  ;;  %v2257_v16 = vpack.c.bf16 %v2256_v29, %v2256_v29 }
0x15e6   :  { %5748 = vmatmul.mubr.msk.bf16.vlgmr.msra.gmra.mxu0 %vm167_vm1, %v2257_v16  ;;  %v5853_v11 = vpop.f32.mrf.mxu1 }
0x15e7   :  { %5760 = vmatpush3.bf16.msra.mxu0 %v7335_v30  ;;  %v1747_v4 = vpop.permute.xlu1 %1746  ;;  %5763 = vmatprep.mubr.msk.bf16.mxu0 %vm6514_vm0, %v6513_v1  ;;  %v2490_v41 = vld [vmem:[#allocation3 + $0x2] sm:$0x3] }
0x15e8   :  { %1750 = vst.msk [vmem:[#allocation3 + $0x6] sm:$0x3] %vm1095_vm3, %v1747_v4  ;;  %v2923_v45 = vpop.f32.mrf.mxu1  ;;  %5761 = vmatprep.subr.bf16.mxu0 %v6513_v1  ;;  %v2491_v61 = vpack.c.bf16 %v2490_v41, %v2490_v41 }
0x15ea   :  { %v5854_v34 = vpop.f32.mrf.mxu1 }
0x15eb   :  { %5762 = vmatpush3.bf16.msra.mxu0 %v7345_v10  ;;  %v2145_v48 = vpop.permute.xlu1 %2144  ;;  %v2664_v8 = vld [vmem:[#allocation3 + $0x4] sm:$0x3] }
0x15ec   :  { %v2147_v50 = vmul.f32 %v2145_v48, %v2142_v46  ;;  %v7355_v51 = vpop.f32.mrf.mxu1  ;;  %5775 = vmatprep.subr.bf16.mxu0 %v6513_v1  ;;  %v2665_v9 = vpack.c.bf16 %v2664_v8, %v2664_v8 }
0x15ee   :  { %v2149_v52 = vadd.f32 %v2148_v49, %v2147_v50  ;;  %5764 = vmatmul.mubr.msk.bf16.vlgmr.msra.gmra.mxu0 %vm167_vm1, %v2257_v16  ;;  %v5869_v53 = vpop.f32.mrf.mxu1 }
0x15ef   :  { %5776 = vmatpush3.bf16.msra.mxu0 %v7285_v62  ;;  %v1741_v54 = vpop.permute.xlu1 %1740  ;;  %5779 = vmatprep.mubr.msk.bf16.mxu0 %vm6514_vm0, %v6513_v1  ;;  %v2838_v14 = vld [vmem:[#allocation3 + $0x6] sm:$0x3] }
0x15f0   :  { %1744 = vst.msk [vmem:[#allocation2 + $0x8] sm:$0x3] %vm1095_vm3, %v1741_v54  ;;  %2226 = vrot.lane.b32.xlu1 %v2149_v52, %s6516_s13  ;;  %v3005_v3 = vpop.f32.mrf.mxu1  ;;  %5777 = vmatprep.subr.bf16.mxu0 %v6513_v1  ;;  %v2839_v56 = vpack.c.bf16 %v2838_v14, %v2838_v14 }
0x15f2   :  { %v5870_v55 = vpop.f32.mrf.mxu1 }
0x15f3   :  { %5778 = vmatpush3.bf16.msra.mxu0 %v7292_v63  ;;  %v1903_v59 = vpop.permute.xlu1 %1902 }
0x15f4   :  { %1906 = vst.msk [vmem:[#allocation2 + $0xa] sm:$0x3] %vm1095_vm3, %v1903_v59  ;;  %5791 = vmatprep.subr.bf16.mxu0 %v6513_v1  ;;  %3869 = vrot.lane.b32.xlu1 %v5197_v22, %s6508_s7 }
0x15f6   :  { %5780 = vmatmul.mubr.msk.bf16.vlgmr.msra.gmra.mxu0 %vm167_vm1, %v2491_v61 }
0x15f7   :  { %5792 = vmatpush3.bf16.msra.mxu0 %v7335_v30  ;;  %v2065_v40 = vpop.permute.xlu1 %2064  ;;  %v3010_v5 = vld [vmem:[#allocation2 + $0x8] sm:$0x3]  ;;  %5795 = vmatprep.mubr.msk.bf16.mxu0 %vm6514_vm0, %v6513_v1 }
0x15f8   :  { %2068 = vst.msk [vmem:[#allocation2 + $0xc] sm:$0x3] %vm1095_vm3, %v2065_v40  ;;  %5793 = vmatprep.subr.bf16.mxu0 %v6513_v1  ;;  %v3011_v6 = vpack.c.bf16 %v3010_v5, %v3010_v5 }
0x15fa   :  { %5884 = vmatmul.mubr.msk.bf16.vlgmr.msra.gmra.mxu1 %vm167_vm1, %v3011_v6 }
0x15fb   :  { %5794 = vmatpush3.bf16.msra.mxu0 %v7345_v10  ;;  %5896 = vmatpush3.bf16.msra.mxu1 %v7212_v18  ;;  %v3184_v27 = vld [vmem:[#allocation2 + $0xa] sm:$0x3] }
0x15fc   :  { %5807 = vmatprep.subr.bf16.mxu0 %v6513_v1  ;;  %5897 = vmatprep.subr.bf16.mxu1 %v6513_v1  ;;  %v3185_v57 = vpack.c.bf16 %v3184_v27, %v3184_v27 }
0x15fd   :  { %5899 = vmatprep.mubr.msk.bf16.mxu1 %vm6514_vm0, %v6513_v1 }
0x15fe   :  { %5796 = vmatmul.mubr.msk.bf16.vlgmr.msra.gmra.mxu0 %vm167_vm1, %v2491_v61 }
0x15ff   :  { %5808 = vmatpush3.bf16.msra.mxu0 %v7285_v62  ;;  %5898 = vmatpush3.bf16.msra.mxu1 %v7221_v47  ;;  %v3358_v0 = vld [vmem:[#allocation2 + $0xc] sm:$0x3] }
0x1600   :  { %5809 = vmatprep.subr.bf16.mxu0 %v6513_v1  ;;  %5911 = vmatprep.subr.bf16.mxu1 %v6513_v1  ;;  %v3359_v15 = vpack.c.bf16 %v3358_v0, %v3358_v0 }
0x1601   :  { %5811 = vmatprep.mubr.msk.bf16.mxu0 %vm6514_vm0, %v6513_v1 }
0x1602   :  { %5900 = vmatmul.mubr.msk.bf16.vlgmr.msra.gmra.mxu1 %vm167_vm1, %v3011_v6 }
0x1603   :  { %5810 = vmatpush3.bf16.msra.mxu0 %v7292_v63  ;;  %5912 = vmatpush3.bf16.msra.mxu1 %v7170_v35 }
0x1604   :  { %5823 = vmatprep.subr.bf16.mxu0 %v6513_v1  ;;  %5913 = vmatprep.subr.bf16.mxu1 %v6513_v1 }
0x1605   :  { %5915 = vmatprep.mubr.msk.bf16.mxu1 %vm6514_vm0, %v6513_v1 }
0x1606   :  { %5812 = vmatmul.mubr.msk.bf16.vlgmr.msra.gmra.mxu0 %vm167_vm1, %v2665_v9 }
0x1607   :  { %5824 = vmatpush3.bf16.msra.mxu0 %v7335_v30  ;;  %5914 = vmatpush3.bf16.msra.mxu1 %v7180_v39 }
0x1608   :  { %5825 = vmatprep.subr.bf16.mxu0 %v6513_v1  ;;  %5927 = vmatprep.subr.bf16.mxu1 %v6513_v1 }
0x1609   :  { %5827 = vmatprep.mubr.msk.bf16.mxu0 %vm6514_vm0, %v6513_v1 }
0x160a   :  { %5916 = vmatmul.mubr.msk.bf16.vlgmr.msra.gmra.mxu1 %vm167_vm1, %v3185_v57 }
0x160b   :  { %5826 = vmatpush3.bf16.msra.mxu0 %v7345_v10  ;;  %5928 = vmatpush3.bf16.msra.mxu1 %v7212_v18 }
0x160c   :  { %5839 = vmatprep.subr.bf16.mxu0 %v6513_v1  ;;  %5929 = vmatprep.subr.bf16.mxu1 %v6513_v1 }
0x160d   :  { %5931 = vmatprep.mubr.msk.bf16.mxu1 %vm6514_vm0, %v6513_v1 }
0x160e   :  { %5828 = vmatmul.mubr.msk.bf16.vlgmr.msra.gmra.mxu0 %vm167_vm1, %v2665_v9 }
0x160f   :  { %5840 = vmatpush3.bf16.msra.mxu0 %v7285_v62  ;;  %5930 = vmatpush3.bf16.msra.mxu1 %v7221_v47 }
0x1610   :  { %5841 = vmatprep.subr.bf16.mxu0 %v6513_v1  ;;  %5943 = vmatprep.subr.bf16.mxu1 %v6513_v1 }
0x1611   :  { %5843 = vmatprep.mubr.msk.bf16.mxu0 %vm6514_vm0, %v6513_v1 }
0x1612   :  { %5932 = vmatmul.mubr.msk.bf16.vlgmr.msra.gmra.mxu1 %vm167_vm1, %v3185_v57 }
0x1613   :  { %5842 = vmatpush3.bf16.msra.mxu0 %v7292_v63  ;;  %5944 = vmatpush3.bf16.msra.mxu1 %v7170_v35 }
0x1614   :  { %5855 = vmatprep.subr.bf16.mxu0 %v6513_v1  ;;  %5945 = vmatprep.subr.bf16.mxu1 %v6513_v1 }
0x1615   :  { %5947 = vmatprep.mubr.msk.bf16.mxu1 %vm6514_vm0, %v6513_v1 }
0x1616   :  { %5844 = vmatmul.mubr.msk.bf16.vlgmr.msra.gmra.mxu0 %vm167_vm1, %v2839_v56 }
0x1617   :  { %5856 = vmatpush3.bf16.msra.mxu0 %v7335_v30  ;;  %5946 = vmatpush3.bf16.msra.mxu1 %v7180_v39 }
0x1618   :  { %5857 = vmatprep.subr.bf16.mxu0 %v6513_v1  ;;  %5959 = vmatprep.subr.bf16.mxu1 %v6513_v1 }
0x1619   :  { %5859 = vmatprep.mubr.msk.bf16.mxu0 %vm6514_vm0, %v6513_v1 }
0x161a   :  { %5948 = vmatmul.mubr.msk.bf16.vlgmr.msra.gmra.mxu1 %vm167_vm1, %v3359_v15 }
0x161b   :  { %5858 = vmatpush3.bf16.msra.mxu0 %v7345_v10  ;;  %5960 = vmatpush3.bf16.msra.mxu1 %v7212_v18 }
0x161c   :  { %5871 = vmatprep.subr.bf16.mxu0 %v6513_v1  ;;  %5961 = vmatprep.subr.bf16.mxu1 %v6513_v1 }
0x161d   :  { %5963 = vmatprep.mubr.msk.bf16.mxu1 %vm6514_vm0, %v6513_v1 }
0x161e   :  { %5860 = vmatmul.mubr.msk.bf16.vlgmr.msra.gmra.mxu0 %vm167_vm1, %v2839_v56 }
0x161f   :  { %5872 = vmatpush3.bf16.msra.mxu0 %v7285_v62  ;;  %5962 = vmatpush3.bf16.msra.mxu1 %v7221_v47 }
0x1620   :  { %5873 = vmatprep.subr.bf16.mxu0 %v6513_v1  ;;  %5875 = vmatprep.mubr.msk.bf16.mxu0 %vm6514_vm0, %v6513_v1 }
0x1621   :  { %5975 = vmatprep.subr.bf16.mxu1 %v6513_v1 }
0x1622   :  { %5964 = vmatmul.mubr.msk.bf16.vlgmr.msra.gmra.mxu1 %vm167_vm1, %v3359_v15 }
0x1623   :  { %5874 = vmatpush3.bf16.msra.mxu0 %v7292_v63  ;;  %5976 = vmatpush3.bf16.msra.mxu1 %v7170_v35  ;;  %v3186_v35 = vld [vmem:[#allocation3 + $0xa] sm:$0x3] }
0x1624   :  { %5887 = vmatprep.subr.bf16.mxu0 %v6513_v1  ;;  %5977 = vmatprep.subr.bf16.mxu1 %v6513_v1 }
0x1625   :  { %5979 = vmatprep.mubr.msk.bf16.mxu1 %vm6514_vm0, %v6513_v1 }
0x1626   :  { %5876 = vmatmul.mubr.msk.bf16.vlgmr.msra.gmra.mxu0 %vm167_vm1, %v3013_v19 }
0x1627   :  { %5888 = vmatpush3.bf16.msra.mxu0 %v7335_v30  ;;  %5891 = vmatprep.mubr.msk.bf16.mxu0 %vm6514_vm0, %v6513_v1 }
0x1628   :  { %5889 = vmatprep.subr.bf16.mxu0 %v6513_v1  ;;  %5978 = vmatpush3.bf16.msra.mxu1 %v7180_v39  ;;  %v3187_v39 = vpack.c.bf16 %v3186_v35, %v3186_v35 }
0x1629   :  { %5991 = vmatprep.subr.bf16.mxu1 %v6513_v1 }
0x162b   :  { %5890 = vmatpush3.bf16.msra.mxu0 %v7345_v10 }
0x162c   :  { %5903 = vmatprep.subr.bf16.mxu0 %v6513_v1 }
0x162e   :  { %5892 = vmatmul.mubr.msk.bf16.vlgmr.msra.gmra.mxu0 %vm167_vm1, %v3013_v19 }
0x162f   :  { %5904 = vmatpush3.bf16.msra.mxu0 %v7285_v62  ;;  %5907 = vmatprep.mubr.msk.bf16.mxu0 %vm6514_vm0, %v6513_v1 }
0x1630   :  { %5905 = vmatprep.subr.bf16.mxu0 %v6513_v1 }
0x1633   :  { %5906 = vmatpush3.bf16.msra.mxu0 %v7292_v63 }
0x1634   :  { %5919 = vmatprep.subr.bf16.mxu0 %v6513_v1 }
0x1636   :  { %5908 = vmatmul.mubr.msk.bf16.vlgmr.msra.gmra.mxu0 %vm167_vm1, %v3187_v39 }
0x1637   :  { %5920 = vmatpush3.bf16.msra.mxu0 %v7335_v30  ;;  %5923 = vmatprep.mubr.msk.bf16.mxu0 %vm6514_vm0, %v6513_v1 }
0x1638   :  { %5921 = vmatprep.subr.bf16.mxu0 %v6513_v1 }
0x163b   :  { %5922 = vmatpush3.bf16.msra.mxu0 %v7345_v10 }
0x163c   :  { %5935 = vmatprep.subr.bf16.mxu0 %v6513_v1 }
0x163e   :  { %5924 = vmatmul.mubr.msk.bf16.vlgmr.msra.gmra.mxu0 %vm167_vm1, %v3187_v39 }
0x163f   :  { %5936 = vmatpush3.bf16.msra.mxu0 %v7285_v62  ;;  %5939 = vmatprep.mubr.msk.bf16.mxu0 %vm6514_vm0, %v6513_v1 }
0x1640   :  { %5937 = vmatprep.subr.bf16.mxu0 %v6513_v1 }
0x1643   :  { %5938 = vmatpush3.bf16.msra.mxu0 %v7292_v63 }
0x1644   :  { %5951 = vmatprep.subr.bf16.mxu0 %v6513_v1 }
0x1646   :  { %5940 = vmatmul.mubr.msk.bf16.vlgmr.msra.gmra.mxu0 %vm167_vm1, %v3361_v2 }
0x1647   :  { %5952 = vmatpush3.bf16.msra.mxu0 %v7335_v30  ;;  %5955 = vmatprep.mubr.msk.bf16.mxu0 %vm6514_vm0, %v6513_v1 }
0x1648   :  { %5953 = vmatprep.subr.bf16.mxu0 %v6513_v1 }
0x164b   :  { %5954 = vmatpush3.bf16.msra.mxu0 %v7345_v10 }
0x164c   :  { %5967 = vmatprep.subr.bf16.mxu0 %v6513_v1 }
0x164e   :  { %5956 = vmatmul.mubr.msk.bf16.vlgmr.msra.gmra.mxu0 %vm167_vm1, %v3361_v2 }
0x164f   :  { %5968 = vmatpush3.bf16.msra.mxu0 %v7285_v62  ;;  %5971 = vmatprep.mubr.msk.bf16.mxu0 %vm6514_vm0, %v6513_v1  ;;  %v7506_v62 = vld [vmem:[%s7948_s12 + $0x8] sm:$0xff]  }
0x1650   :  { %5969 = vmatprep.subr.bf16.mxu0 %v6513_v1 }
0x1653   :  { %5970 = vmatpush3.bf16.msra.mxu0 %v7292_v63  ;;  %v7514_v63 = vld [vmem:[%s7948_s12] sm:$0xff]  }
0x1654   :  { %5983 = vmatprep.subr.bf16.mxu0 %v6513_v1 }
0x1656   :  { %5972 = vmatmul.mubr.msk.bf16.vlgmr.msra.gmra.mxu0 %vm167_vm1, %v3535_v23 }
0x1657   :  { %5984 = vmatpush3.bf16.msra.mxu0 %v7335_v30  ;;  %5987 = vmatprep.mubr.msk.bf16.mxu0 %vm6514_vm0, %v6513_v1  ;;  %v7562_v30 = vld [vmem:[#allocation11] ss:$0 sm:$0xff] }
0x1658   :  { %5985 = vmatprep.subr.bf16.mxu0 %v6513_v1 }
0x165b   :  { %5986 = vmatpush3.bf16.msra.mxu0 %v7345_v10 }
0x165c   :  { %5999 = vmatprep.subr.bf16.mxu0 %v6513_v1 }
0x165e   :  { %5988 = vmatmul.mubr.msk.bf16.vlgmr.msra.gmra.mxu0 %vm167_vm1, %v3535_v23 }
0x165f   :  { %6000 = vmatpush3.bf16.msra.mxu0 %v7506_v62  ;;  %6003 = vmatprep.mubr.msk.bf16.mxu0 %vm6514_vm0, %v6513_v1 }
0x1660   :  { %6001 = vmatprep.subr.bf16.mxu0 %v6513_v1 }
0x1662   :  { %v7519_v31 = vpop.permute.xlu1 %2226 }
0x1663   :  { %2230 = vst.msk [vmem:[#allocation2 + $0xe] sm:$0x3] %vm1095_vm3, %v7519_v31  ;;  %6002 = vmatpush3.bf16.msra.mxu0 %v7514_v63 }
0x1664   :  { %6015 = vmatprep.subr.bf16.mxu0 %v6513_v1 }
0x1666   :  { %6004 = vmatmul.mubr.bf16.vlgmr.msra.gmra.mxu0 %v6515_v26 }
0x1667   :  { %6016 = vmatpush3.bf16.msra.mxu0 %v7506_v62  ;;  %6019 = vmatprep.mubr.msk.bf16.mxu0 %vm6514_vm0, %v6513_v1 }
0x1668   :  { %6017 = vmatprep.subr.bf16.mxu0 %v6513_v1 }
0x166a   :  { %v3532_v32 = vld [vmem:[#allocation2 + $0xe] sm:$0x3] }
0x166b   :  { %v3533_v33 = vpack.c.bf16 %v3532_v32, %v3532_v32  ;;  %6018 = vmatpush3.bf16.msra.mxu0 %v7514_v63 }
0x166c   :  { %6031 = vmatprep.subr.bf16.mxu0 %v6513_v1 }
0x166d   :  { %5980 = vmatmul.mubr.msk.bf16.vlgmr.msra.gmra.mxu1 %vm167_vm1, %v3533_v33 }
0x166e   :  { %5992 = vmatpush3.bf16.msra.mxu1 %v7212_v18  ;;  %5995 = vmatprep.mubr.msk.bf16.mxu1 %vm6514_vm0, %v6513_v1  ;;  %v7557_v18 = vld [vmem:[#allocation7] ss:$0 sm:$0xff] }
0x166f   :  { %5993 = vmatprep.subr.bf16.mxu1 %v6513_v1 }
0x1672   :  { %5994 = vmatpush3.bf16.msra.mxu1 %v7221_v47 }
0x1673   :  { %6007 = vmatprep.subr.bf16.mxu1 %v6513_v1 }
0x1675   :  { %5996 = vmatmul.mubr.msk.bf16.vlgmr.msra.gmra.mxu1 %vm167_vm1, %v3533_v33 }
0x1676   :  { %6008 = vmatpush3.bf16.msra.mxu1 %v7538_v36  ;;  %6011 = vmatprep.mubr.msk.bf16.mxu1 %vm6514_vm0, %v6513_v1 }
0x1677   :  { %6009 = vmatprep.subr.bf16.mxu1 %v6513_v1 }
0x167a   :  { %6010 = vmatpush3.bf16.msra.mxu1 %v7543_v37 }
0x167b   :  { %6023 = vmatprep.subr.bf16.mxu1 %v6513_v1 }
0x167d   :  { %6012 = vmatmul.mubr.bf16.vlgmr.msra.gmra.mxu1 %v6515_v26 }
0x167e   :  { %6024 = vmatpush3.bf16.msra.mxu1 %v7538_v36  ;;  %6027 = vmatprep.mubr.msk.bf16.mxu1 %vm6514_vm0, %v6513_v1 }
0x167f   :  { %6025 = vmatprep.subr.bf16.mxu1 %v6513_v1 }
0x1682   :  { %6026 = vmatpush3.bf16.msra.mxu1 %v7543_v37 }
0x1683   :  { %6039 = vmatprep.subr.bf16.mxu1 %v6513_v1 }
0x16a6   :  { %v2307_v47 = vpop.f32.mrf.mxu0 }
0x16a7   :  { %v2363_v38 = vadd.f32 %v7318_v13, %v2307_v47 }
0x16a8   :  { %v5749_v42 = vpop.f32.mrf.mxu0 }
0x16a9   :  { %v2374_v43 = vadd.f32 %v7557_v18, %v2363_v38 }
0x16aa   :  { %v2310_v26 = vpop.f32.mrf.mxu0 }
0x16ab   :  { %2375 = vst.msk [vmem:[#allocation4] sm:$0x3] %vm211_vm2, %v2374_v43 }
0x16ac   :  { %v5750_v29 = vpop.f32.mrf.mxu0 }
0x16ae   :  { %v2422_v16 = vpop.f32.mrf.mxu0 }
0x16af   :  { %v2475_v11 = vadd.f32 %v7320_v24, %v2422_v16 }
0x16b0   :  { %v5765_v4 = vpop.f32.mrf.mxu0 }
0x16b1   :  { %v2486_v10 = vadd.f32 %v7562_v30, %v2475_v11 }
0x16b2   :  { %v2425_v45 = vpop.f32.mrf.mxu0 }
0x16b3   :  { %2487 = vst.msk [vmem:[#allocation5] sm:$0x3] %vm211_vm2, %v2486_v10 }
0x16b4   :  { %v5766_v34 = vpop.f32.mrf.mxu0 }
0x16b6   :  { %v2529_v13 = vpop.f32.mrf.mxu0 }
0x16b7   :  { %v2573_v46 = vadd.f32 %v7322_v17, %v2529_v13 }
0x16b8   :  { %v5781_v48 = vpop.f32.mrf.mxu0 }
0x16b9   :  { %v2578_v49 = vadd.f32 %v7557_v18, %v2573_v46 }
0x16ba   :  { %v2532_v50 = vpop.f32.mrf.mxu0  ;;  %v3094_v52 = vpop.f32.mrf.mxu1 }
0x16bb   :  { %2579 = vst.msk [vmem:[#allocation4 + $0x2] sm:$0x3] %vm211_vm2, %v2578_v49 }
0x16bc   :  { %v5782_v53 = vpop.f32.mrf.mxu0  ;;  %v5885_v54 = vpop.f32.mrf.mxu1 }
0x16be   :  { %v2614_v24 = vpop.f32.mrf.mxu0  ;;  %v3097_v3 = vpop.f32.mrf.mxu1 }
0x16bf   :  { %v2655_v41 = vadd.f32 %v7324_v21, %v2614_v24 }
0x16c0   :  { %v5797_v55 = vpop.f32.mrf.mxu0  ;;  %v5886_v59 = vpop.f32.mrf.mxu1 }
0x16c1   :  { %v2660_v61 = vadd.f32 %v7562_v30, %v2655_v41 }
0x16c2   :  { %v2617_v40 = vpop.f32.mrf.mxu0  ;;  %v3176_v5 = vpop.f32.mrf.mxu1 }
0x16c3   :  { %2661 = vst.msk [vmem:[#allocation5 + $0x2] sm:$0x3] %vm211_vm2, %v2660_v61 }
0x16c4   :  { %v5798_v17 = vpop.f32.mrf.mxu0  ;;  %v5901_v6 = vpop.f32.mrf.mxu1 }
0x16c6   :  { %v2703_v8 = vpop.f32.mrf.mxu0  ;;  %v3179_v9 = vpop.f32.mrf.mxu1 }
0x16c7   :  { %v2747_v27 = vadd.f32 %v7326_v58, %v2703_v8 }
0x16c8   :  { %v5813_v57 = vpop.f32.mrf.mxu0  ;;  %v5902_v14 = vpop.f32.mrf.mxu1 }
0x16c9   :  { %v2752_v56 = vadd.f32 %v7557_v18, %v2747_v27 }
0x16ca   :  { %v2706_v0 = vpop.f32.mrf.mxu0  ;;  %v3268_v21 = vpop.f32.mrf.mxu1 }
0x16cb   :  { %2753 = vst.msk [vmem:[#allocation4 + $0x4] sm:$0x3] %vm211_vm2, %v2752_v56 }
0x16cc   :  { %v5814_v15 = vpop.f32.mrf.mxu0  ;;  %v5917_v28 = vpop.f32.mrf.mxu1 }
0x16ce   :  { %v2788_v19 = vpop.f32.mrf.mxu0  ;;  %v3271_v35 = vpop.f32.mrf.mxu1 }
0x16cf   :  { %v2829_v7 = vadd.f32 %v7329_v60, %v2788_v19 }
0x16d0   :  { %v5829_v39 = vpop.f32.mrf.mxu0  ;;  %v5918_v20 = vpop.f32.mrf.mxu1 }
0x16d1   :  { %v2834_v2 = vadd.f32 %v7562_v30, %v2829_v7 }
0x16d2   :  { %v2791_v22 = vpop.f32.mrf.mxu0  ;;  %v3350_v58 = vpop.f32.mrf.mxu1 }
0x16d3   :  { %2835 = vst.msk [vmem:[#allocation5 + $0x4] sm:$0x3] %vm211_vm2, %v2834_v2 }
0x16d4   :  { %v5830_v25 = vpop.f32.mrf.mxu0  ;;  %v5933_v23 = vpop.f32.mrf.mxu1 }
0x16d6   :  { %v2877_v32 = vpop.f32.mrf.mxu0  ;;  %v3353_v33 = vpop.f32.mrf.mxu1 }
0x16d7   :  { %v2921_v47 = vadd.f32 %v7338_v44, %v2877_v32 }
0x16d8   :  { %v5845_v38 = vpop.f32.mrf.mxu0  ;;  %v5934_v42 = vpop.f32.mrf.mxu1 }
0x16d9   :  { %v2926_v43 = vadd.f32 %v7557_v18, %v2921_v47 }
0x16da   :  { %v2880_v26 = vpop.f32.mrf.mxu0  ;;  %v3442_v60 = vpop.f32.mrf.mxu1 }
0x16db   :  { %2927 = vst.msk [vmem:[#allocation4 + $0x6] sm:$0x3] %vm211_vm2, %v2926_v43 }
0x16dc   :  { %v5846_v29 = vpop.f32.mrf.mxu0  ;;  %v5949_v16 = vpop.f32.mrf.mxu1 }
0x16de   :  { %v2962_v11 = vpop.f32.mrf.mxu0  ;;  %v3445_v4 = vpop.f32.mrf.mxu1 }
0x16df   :  { %v3003_v10 = vadd.f32 %v7355_v51, %v2962_v11  ;;  %v7597_v4 = vpop.permute.xlu0 %3781 }
0x16e0   :  { %v5861_v45 = vpop.f32.mrf.mxu0  ;;  %v5950_v34 = vpop.f32.mrf.mxu1 }
0x16e1   :  { %v3008_v13 = vadd.f32 %v7562_v30, %v3003_v10 }
0x16e2   :  { %v2965_v46 = vpop.f32.mrf.mxu0  ;;  %v3524_v44 = vpop.f32.mrf.mxu1 }
0x16e3   :  { %3009 = vst.msk [vmem:[#allocation5 + $0x6] sm:$0x3] %vm211_vm2, %v3008_v13 }
0x16e4   :  { %v5862_v48 = vpop.f32.mrf.mxu0  ;;  %v5965_v49 = vpop.f32.mrf.mxu1 }
0x16e6   :  { %v3051_v50 = vpop.f32.mrf.mxu0  ;;  %v3527_v53 = vpop.f32.mrf.mxu1 }
0x16e7   :  { %v3095_v54 = vadd.f32 %v3094_v52, %v3051_v50 }
0x16e8   :  { %v5877_v24 = vpop.f32.mrf.mxu0  ;;  %v5966_v3 = vpop.f32.mrf.mxu1 }
0x16e9   :  { %v3100_v41 = vadd.f32 %v7557_v18, %v3095_v54 }
0x16ea   :  { %v3054_v55 = vpop.f32.mrf.mxu0 }
0x16eb   :  { %3101 = vst.msk [vmem:[#allocation4 + $0x8] sm:$0x3] %vm211_vm2, %v3100_v41 }
0x16ec   :  { %v5878_v51 = vpop.f32.mrf.mxu0 }
0x16ee   :  { %v3136_v59 = vpop.f32.mrf.mxu0 }
0x16ef   :  { %v3177_v61 = vadd.f32 %v3176_v5, %v3136_v59 }
0x16f0   :  { %v5893_v40 = vpop.f32.mrf.mxu0 }
0x16f1   :  { %v3182_v17 = vadd.f32 %v7562_v30, %v3177_v61  ;;  %v7605_v61 = vpop.permute.xlu1 %3869 }
0x16f2   :  { %v3139_v6 = vpop.f32.mrf.mxu0 }
0x16f3   :  { %3183 = vst.msk [vmem:[#allocation5 + $0x8] sm:$0x3] %vm211_vm2, %v3182_v17 }
0x16f4   :  { %v5894_v8 = vpop.f32.mrf.mxu0 }
0x16f6   :  { %v3225_v9 = vpop.f32.mrf.mxu0 }
0x16f7   :  { %v3269_v27 = vadd.f32 %v3268_v21, %v3225_v9  ;;  %v3716_v9 = vld [vmem:[#allocation4] sm:$0x3] }
0x16f8   :  { %v5909_v52 = vpop.f32.mrf.mxu0 }
0x16f9   :  { %v3274_v57 = vadd.f32 %v7557_v18, %v3269_v27 }
0x16fa   :  { %v3228_v14 = vpop.f32.mrf.mxu0 }
0x16fb   :  { %3275 = vst.msk [vmem:[#allocation4 + $0xa] sm:$0x3] %vm211_vm2, %v3274_v57 }
0x16fc   :  { %v5910_v56 = vpop.f32.mrf.mxu0 }
0x16fe   :  { %v3310_v0 = vpop.f32.mrf.mxu0 }
0x16ff   :  { %v3351_v15 = vadd.f32 %v3350_v58, %v3310_v0 }
0x1700   :  { %v5925_v28 = vpop.f32.mrf.mxu0 }
0x1701   :  { %v3356_v5 = vadd.f32 %v7562_v30, %v3351_v15 }
0x1702   :  { %v3313_v19 = vpop.f32.mrf.mxu0 }
0x1703   :  { %3357 = vst.msk [vmem:[#allocation5 + $0xa] sm:$0x3] %vm211_vm2, %v3356_v5 }
0x1704   :  { %v5926_v35 = vpop.f32.mrf.mxu0 }
0x1706   :  { %v3399_v7 = vpop.f32.mrf.mxu0 }
0x1707   :  { %v3443_v39 = vadd.f32 %v3442_v60, %v3399_v7 }
0x1708   :  { %v5941_v20 = vpop.f32.mrf.mxu0 }
0x1709   :  { %v3448_v21 = vadd.f32 %v7557_v18, %v3443_v39 }
0x170a   :  { %v3402_v2 = vpop.f32.mrf.mxu0 }
0x170b   :  { %3449 = vst.msk [vmem:[#allocation4 + $0xc] sm:$0x3] %vm211_vm2, %v3448_v21 }
0x170c   :  { %v5942_v22 = vpop.f32.mrf.mxu0 }
0x170e   :  { %v3484_v25 = vpop.f32.mrf.mxu0 }
0x170f   :  { %v3525_v23 = vadd.f32 %v3524_v44, %v3484_v25 }
0x1710   :  { %v5957_v32 = vpop.f32.mrf.mxu0 }
0x1711   :  { %v3530_v58 = vadd.f32 %v7562_v30, %v3525_v23 }
0x1712   :  { %v3487_v33 = vpop.f32.mrf.mxu0 }
0x1713   :  { %3531 = vst.msk [vmem:[#allocation5 + $0xc] sm:$0x3] %vm211_vm2, %v3530_v58 }
0x1714   :  { %v5958_v47 = vpop.f32.mrf.mxu0 }
0x1716   :  { %v3573_v38 = vpop.f32.mrf.mxu0 }
0x1718   :  { %v5973_v42 = vpop.f32.mrf.mxu0 }
0x171a   :  { %v3576_v43 = vpop.f32.mrf.mxu0 }
0x171c   :  { %v5974_v26 = vpop.f32.mrf.mxu0 }
0x171e   :  { %v3658_v60 = vpop.f32.mrf.mxu0 }
0x1720   :  { %v5989_v29 = vpop.f32.mrf.mxu0 }
0x1722   :  { %v3661_v16 = vpop.f32.mrf.mxu0 }
0x1724   :  { %v5990_v11 = vpop.f32.mrf.mxu0 }
0x1726   :  { %v3763_v10 = vpop.f32.mrf.mxu0 }
0x1727   :  { %v3784_v45 = vadd.f32 %v7597_v4, %v3763_v10  ;;  %v3769_v27 = vadd.f32 %v3763_v10, %v3716_v9 }
0x1728   :  { %v6005_v34 = vpop.f32.mrf.mxu0 }
0x1729   :  { %3786 = vrot.lane.b32.xlu0 %v3784_v45, %s6508_s7  ;;  %v5192_v52 = vmul.f32 -1.442695, %v3769_v27 }
0x172a   :  { %v3766_v13 = vpop.f32.mrf.mxu0 }
0x172b   :  { %6290 = vpow2.f32 %v5192_v52 }
0x172c   :  { %v6006_v46 = vpop.f32.mrf.mxu0 }
0x172d   :  { %v3616_v44 = vpop.f32.mrf.mxu1 }
0x172e   :  { %v3617_v48 = vadd.f32 %v3616_v44, %v3573_v38 }
0x172f   :  { %v5981_v49 = vpop.f32.mrf.mxu1 }
0x1730   :  { %v3622_v50 = vadd.f32 %v7557_v18, %v3617_v48 }
0x1731   :  { %v3619_v53 = vpop.f32.mrf.mxu1 }
0x1732   :  { %3623 = vst.msk [vmem:[#allocation4 + $0xe] sm:$0x3] %vm211_vm2, %v3622_v50 }
0x1733   :  { %v5982_v54 = vpop.f32.mrf.mxu1 }
0x1735   :  { %v3698_v24 = vpop.f32.mrf.mxu1 }
0x1736   :  { %v3699_v3 = vadd.f32 %v3698_v24, %v3658_v60 }
0x1737   :  { %v5997_v41 = vpop.f32.mrf.mxu1 }
0x1738   :  { %v3704_v55 = vadd.f32 %v7562_v30, %v3699_v3  ;;  %v6291_v30 = vpop.eup %6290  ;;  %v3892_v41 = vld [vmem:[#allocation4 + $0x2] sm:$0x3] }
0x1739   :  { %v3701_v51 = vpop.f32.mrf.mxu1  ;;  %v3773_v56 = vadd.f32 1.0, %v6291_v30 }
0x173a   :  { %3705 = vst.msk [vmem:[#allocation5 + $0xe] sm:$0x3] %vm211_vm2, %v3704_v55 }
0x173b   :  { %v5998_v59 = vpop.f32.mrf.mxu1  ;;  %6292 = vrcp.f32 %v3773_v56 }
0x173d   :  { %v3851_v40 = vpop.f32.mrf.mxu1 }
0x173e   :  { %v3872_v17 = vadd.f32 %v7605_v61, %v3851_v40 }
0x173f   :  { %v6013_v6 = vpop.f32.mrf.mxu1 }
0x1740   :  { %3874 = vrot.lane.b32.xlu1 %v3872_v17, %s6508_s7 }
0x1741   :  { %v3854_v18 = vpop.f32.mrf.mxu1  ;;  %v3804_v57 = vld [vmem:[#allocation5 + $0xe] sm:$0x3] }
0x1742   :  { %v3857_v14 = vadd.f32 %v3851_v40, %v3804_v57  ;;  %v3967_v40 = vld [vmem:[#allocation5 + $0xc] sm:$0x3] }
0x1743   :  { %v6014_v8 = vpop.f32.mrf.mxu1 }
0x1744   :  { %v5196_v0 = vmul.f32 -1.442695, %v3857_v14 }
0x1746   :  { %6294 = vpow2.f32 %v5196_v0 }
0x1748   :  { %v6293_v15 = vpop.eup %6292 }
0x1749   :  { %v3796_v58 = vsub.f32 1.0, %v6293_v15  ;;  %v3802_v47 = vmul.f32 0.0, %v6293_v15 }
0x1753   :  { %v6295_v19 = vpop.eup %6294 }
0x1754   :  { %v3861_v35 = vadd.f32 1.0, %v6295_v19 }
0x1756   :  { %6296 = vrcp.f32 %v3861_v35 }
0x1763   :  { %v6297_v7 = vpop.eup %6296 }
0x1764   :  { %v3884_v26 = vsub.f32 1.0, %v6297_v7  ;;  %v3890_v29 = vmul.f32 0.0, %v6297_v7 }
0x179b   :  { %v3787_v28 = vpop.permute.xlu0 %3786 }
0x179c   :  { %v3789_v5 = vmul.f32 %v6293_v15, %v3787_v28 }
0x179e   :  { %3791 = vrot.lane.b32.xlu0 %v3789_v5, %s6508_s7 }
0x17b2   :  { %v3875_v39 = vpop.permute.xlu1 %3874 }
0x17b3   :  { %v3877_v20 = vmul.f32 %v6297_v7, %v3875_v39 }
0x17b5   :  { %3879 = vrot.lane.b32.xlu1 %v3877_v20, %s6508_s7 }
0x1810   :  { %v3792_v21 = vpop.permute.xlu0 %3791 }
0x1811   :  { %v3794_v2 = vadd.f32 %v3792_v21, %v3716_v9 }
0x1813   :  { %6298 = vtanh.f32 %v3794_v2 }
0x1820   :  { %v6299_v22 = vpop.eup %6298 }
0x1821   :  { %3798 = vrot.lane.b32.xlu0 %v6299_v22, %s6516_s13 }
0x1827   :  { %v3880_v25 = vpop.permute.xlu1 %3879 }
0x1828   :  { %v3882_v23 = vadd.f32 %v3880_v25, %v3804_v57 }
0x182a   :  { %6300 = vtanh.f32 %v3882_v23 }
0x1837   :  { %v6301_v32 = vpop.eup %6300 }
0x1838   :  { %3886 = vrot.lane.b32.xlu1 %v6301_v32, %s6516_s13 }
0x1893   :  { %v3799_v33 = vpop.permute.xlu0 %3798 }
0x1894   :  { %v3801_v38 = vmul.f32 %v3799_v33, %v3796_v58 }
0x1896   :  { %v7613_v42 = vadd.f32 %v3802_v47, %v3801_v38 }
0x1898   :  { %v3893_v43 = vpack.c.bf16 %v7613_v42, %v7613_v42 }
0x189a   :  { %3895 = vrot.lane.b32.xlu0 %v3893_v43, %s6516_s13 }
0x18aa   :  { %v3887_v60 = vpop.permute.xlu1 %3886 }
0x18ab   :  { %v3889_v16 = vmul.f32 %v3887_v60, %v3884_v26 }
0x18ad   :  { %v7618_v11 = vadd.f32 %v3890_v29, %v3889_v16 }
0x18af   :  { %v3968_v10 = vpack.c.bf16 %v7618_v11, %v7618_v11 }
0x18b1   :  { %3970 = vrot.lane.b32.xlu1 %v3968_v10, %s6516_s13 }
0x190c   :  { %v3896_v45 = vpop.permute.xlu0 %3895 }
0x190d   :  { %6020 = vmatmul.mubr.msk.bf16.vlgmr.msra.gmra.mxu0 %vm167_vm1, %v3896_v45 }
0x190e   :  { %6032 = vmatpush3.bf16.msra.mxu0 %v7506_v62  ;;  %6035 = vmatprep.mubr.msk.bf16.mxu0 %vm6514_vm0, %v6513_v1 }
0x190f   :  { %6033 = vmatprep.subr.bf16.mxu0 %v6513_v1 }
0x1912   :  { %6034 = vmatpush3.bf16.msra.mxu0 %v7514_v63 }
0x1913   :  { %6047 = vmatprep.subr.bf16.mxu0 %v6513_v1 }
0x1923   :  { %v3971_v34 = vpop.permute.xlu1 %3970 }
0x1924   :  { %6028 = vmatmul.mubr.msk.bf16.vlgmr.msra.gmra.mxu1 %vm167_vm1, %v3971_v34 }
0x1925   :  { %6040 = vmatpush3.bf16.msra.mxu1 %v7538_v36  ;;  %6043 = vmatprep.mubr.msk.bf16.mxu1 %vm6514_vm0, %v6513_v1 }
0x1926   :  { %6041 = vmatprep.subr.bf16.mxu1 %v6513_v1 }
0x1929   :  { %6042 = vmatpush3.bf16.msra.mxu1 %v7543_v37 }
0x192a   :  { %6055 = vmatprep.subr.bf16.mxu1 %v6513_v1 }
0x19cd   :  { %v3934_v13 = vpop.f32.mrf.mxu0 }
0x19ce   :  { %v3947_v46 = vadd.f32 %v3934_v13, %v7597_v4  ;;  %v3940_v55 = vadd.f32 %v3934_v13, %v3892_v41 }
0x19cf   :  { %v6021_v44 = vpop.f32.mrf.mxu0 }
0x19d0   :  { %3949 = vrot.lane.b32.xlu0 %v3947_v46, %s6508_s7  ;;  %v5199_v51 = vmul.f32 -1.442695, %v3940_v55  ;;  %v4042_v46 = vld [vmem:[#allocation4 + $0x4] sm:$0x3] }
0x19d1   :  { %v3937_v48 = vpop.f32.mrf.mxu0 }
0x19d2   :  { %6302 = vpow2.f32 %v5199_v51 }
0x19d3   :  { %v6022_v49 = vpop.f32.mrf.mxu0 }
0x19df   :  { %v6303_v59 = vpop.eup %6302 }
0x19e0   :  { %v3944_v6 = vadd.f32 1.0, %v6303_v59 }
0x19e2   :  { %6304 = vrcp.f32 %v3944_v6 }
0x19e4   :  { %v4009_v50 = vpop.f32.mrf.mxu1 }
0x19e5   :  { %v4022_v53 = vadd.f32 %v4009_v50, %v7605_v61  ;;  %v4015_v17 = vadd.f32 %v4009_v50, %v3967_v40  ;;  %v4117_v50 = vld [vmem:[#allocation5 + $0xa] sm:$0x3] }
0x19e6   :  { %v6029_v54 = vpop.f32.mrf.mxu1 }
0x19e7   :  { %4024 = vrot.lane.b32.xlu1 %v4022_v53, %s6508_s7  ;;  %v5201_v18 = vmul.f32 -1.442695, %v4015_v17 }
0x19e8   :  { %v4012_v24 = vpop.f32.mrf.mxu1 }
0x19e9   :  { %6306 = vpow2.f32 %v5201_v18 }
0x19ea   :  { %v6030_v3 = vpop.f32.mrf.mxu1 }
0x19ef   :  { %v6305_v8 = vpop.eup %6304 }
0x19f0   :  { %v3959_v7 = vsub.f32 1.0, %v6305_v8  ;;  %v3965_v20 = vmul.f32 %v6305_v8, %v7613_v42 }
0x19f6   :  { %v6307_v52 = vpop.eup %6306 }
0x19f7   :  { %v4019_v57 = vadd.f32 1.0, %v6307_v52 }
0x19f9   :  { %6308 = vrcp.f32 %v4019_v57 }
0x1a06   :  { %v6309_v30 = vpop.eup %6308 }
0x1a07   :  { %v4034_v25 = vsub.f32 1.0, %v6309_v30  ;;  %v4040_v32 = vmul.f32 %v6309_v30, %v7618_v11 }
0x1a42   :  { %v3950_v9 = vpop.permute.xlu0 %3949 }
0x1a43   :  { %v3952_v27 = vmul.f32 %v6305_v8, %v3950_v9 }
0x1a45   :  { %3954 = vrot.lane.b32.xlu0 %v3952_v27, %s6508_s7 }
0x1a59   :  { %v4025_v14 = vpop.permute.xlu1 %4024 }
0x1a5a   :  { %v4027_v56 = vmul.f32 %v6309_v30, %v4025_v14 }
0x1a5c   :  { %4029 = vrot.lane.b32.xlu1 %v4027_v56, %s6508_s7 }
0x1ab7   :  { %v3955_v0 = vpop.permute.xlu0 %3954 }
0x1ab8   :  { %v3957_v15 = vadd.f32 %v3955_v0, %v3892_v41 }
0x1aba   :  { %6310 = vtanh.f32 %v3957_v15 }
0x1ac7   :  { %v6311_v28 = vpop.eup %6310 }
0x1ac8   :  { %3961 = vrot.lane.b32.xlu0 %v6311_v28, %s6516_s13 }
0x1ace   :  { %v4030_v5 = vpop.permute.xlu1 %4029 }
0x1acf   :  { %v4032_v19 = vadd.f32 %v4030_v5, %v3967_v40 }
0x1ad1   :  { %6312 = vtanh.f32 %v4032_v19 }
0x1ade   :  { %v6313_v35 = vpop.eup %6312 }
0x1adf   :  { %4036 = vrot.lane.b32.xlu1 %v6313_v35, %s6516_s13 }
0x1b3a   :  { %v3962_v39 = vpop.permute.xlu0 %3961 }
0x1b3b   :  { %v3964_v21 = vmul.f32 %v3962_v39, %v3959_v7 }
0x1b3d   :  { %v7646_v2 = vadd.f32 %v3965_v20, %v3964_v21 }
0x1b3f   :  { %v4043_v22 = vpack.c.bf16 %v7646_v2, %v7646_v2 }
0x1b41   :  { %4045 = vrot.lane.b32.xlu0 %v4043_v22, %s6516_s13 }
0x1b51   :  { %v4037_v23 = vpop.permute.xlu1 %4036 }
0x1b52   :  { %v4039_v58 = vmul.f32 %v4037_v23, %v4034_v25 }
0x1b54   :  { %v7652_v33 = vadd.f32 %v4040_v32, %v4039_v58 }
0x1b56   :  { %v4118_v47 = vpack.c.bf16 %v7652_v33, %v7652_v33 }
0x1b58   :  { %4120 = vrot.lane.b32.xlu1 %v4118_v47, %s6516_s13 }
0x1bb3   :  { %v4046_v38 = vpop.permute.xlu0 %4045 }
0x1bb4   :  { %6036 = vmatmul.mubr.msk.bf16.vlgmr.msra.gmra.mxu0 %vm167_vm1, %v4046_v38 }
0x1bb5   :  { %6048 = vmatpush3.bf16.msra.mxu0 %v7506_v62  ;;  %6051 = vmatprep.mubr.msk.bf16.mxu0 %vm6514_vm0, %v6513_v1 }
0x1bb6   :  { %6049 = vmatprep.subr.bf16.mxu0 %v6513_v1 }
0x1bb9   :  { %6050 = vmatpush3.bf16.msra.mxu0 %v7514_v63 }
0x1bba   :  { %6063 = vmatprep.subr.bf16.mxu0 %v6513_v1 }
0x1bca   :  { %v4121_v42 = vpop.permute.xlu1 %4120 }
0x1bcb   :  { %6044 = vmatmul.mubr.msk.bf16.vlgmr.msra.gmra.mxu1 %vm167_vm1, %v4121_v42 }
0x1bcc   :  { %6056 = vmatpush3.bf16.msra.mxu1 %v7538_v36  ;;  %6059 = vmatprep.mubr.msk.bf16.mxu1 %vm6514_vm0, %v6513_v1 }
0x1bcd   :  { %6057 = vmatprep.subr.bf16.mxu1 %v6513_v1 }
0x1bd0   :  { %6058 = vmatpush3.bf16.msra.mxu1 %v7543_v37 }
0x1bd1   :  { %6071 = vmatprep.subr.bf16.mxu1 %v6513_v1 }
0x1c74   :  { %v4084_v43 = vpop.f32.mrf.mxu0 }
0x1c75   :  { %v4097_v26 = vadd.f32 %v4084_v43, %v7597_v4  ;;  %v4090_v44 = vadd.f32 %v4084_v43, %v4042_v46 }
0x1c76   :  { %v6037_v60 = vpop.f32.mrf.mxu0 }
0x1c77   :  { %4099 = vrot.lane.b32.xlu0 %v4097_v26, %s6508_s7  ;;  %v5203_v48 = vmul.f32 -1.442695, %v4090_v44  ;;  %v4192_v26 = vld [vmem:[#allocation4 + $0x6] sm:$0x3] }
0x1c78   :  { %v4087_v29 = vpop.f32.mrf.mxu0 }
0x1c79   :  { %6314 = vpow2.f32 %v5203_v48 }
0x1c7a   :  { %v6038_v16 = vpop.f32.mrf.mxu0 }
0x1c86   :  { %v6315_v49 = vpop.eup %6314 }
0x1c87   :  { %v4094_v54 = vadd.f32 1.0, %v6315_v49 }
0x1c89   :  { %6316 = vrcp.f32 %v4094_v54 }
0x1c8b   :  { %v4159_v11 = vpop.f32.mrf.mxu1 }
0x1c8c   :  { %v4172_v10 = vadd.f32 %v4159_v11, %v7605_v61  ;;  %v4165_v53 = vadd.f32 %v4159_v11, %v4117_v50  ;;  %v4267_v11 = vld [vmem:[#allocation5 + $0x8] sm:$0x3] }
0x1c8d   :  { %v6045_v45 = vpop.f32.mrf.mxu1 }
0x1c8e   :  { %4174 = vrot.lane.b32.xlu1 %v4172_v10, %s6508_s7  ;;  %v5205_v24 = vmul.f32 -1.442695, %v4165_v53 }
0x1c8f   :  { %v4162_v34 = vpop.f32.mrf.mxu1 }
0x1c90   :  { %6318 = vpow2.f32 %v5205_v24 }
0x1c91   :  { %v6046_v13 = vpop.f32.mrf.mxu1 }
0x1c96   :  { %v6317_v3 = vpop.eup %6316 }
0x1c97   :  { %v4109_v30 = vsub.f32 1.0, %v6317_v3  ;;  %v4115_v56 = vmul.f32 %v6317_v3, %v7646_v2 }
0x1c9d   :  { %v6319_v51 = vpop.eup %6318 }
0x1c9e   :  { %v4169_v59 = vadd.f32 1.0, %v6319_v51 }
0x1ca0   :  { %6320 = vrcp.f32 %v4169_v59 }
0x1cad   :  { %v6321_v40 = vpop.eup %6320 }
0x1cae   :  { %v4184_v5 = vsub.f32 1.0, %v6321_v40  ;;  %v4190_v35 = vmul.f32 %v6321_v40, %v7652_v33 }
0x1ce9   :  { %v4100_v41 = vpop.permute.xlu0 %4099 }
0x1cea   :  { %v4102_v55 = vmul.f32 %v6317_v3, %v4100_v41 }
0x1cec   :  { %4104 = vrot.lane.b32.xlu0 %v4102_v55, %s6508_s7 }
0x1d00   :  { %v4175_v17 = vpop.permute.xlu1 %4174 }
0x1d01   :  { %v4177_v6 = vmul.f32 %v6321_v40, %v4175_v17 }
0x1d03   :  { %4179 = vrot.lane.b32.xlu1 %v4177_v6, %s6508_s7 }
0x1d5e   :  { %v4105_v18 = vpop.permute.xlu0 %4104 }
0x1d5f   :  { %v4107_v8 = vadd.f32 %v4105_v18, %v4042_v46 }
0x1d61   :  { %6322 = vtanh.f32 %v4107_v8 }
0x1d6e   :  { %v6323_v9 = vpop.eup %6322 }
0x1d6f   :  { %4111 = vrot.lane.b32.xlu0 %v6323_v9, %s6516_s13 }
0x1d75   :  { %v4180_v27 = vpop.permute.xlu1 %4179 }
0x1d76   :  { %v4182_v52 = vadd.f32 %v4180_v27, %v4117_v50 }
0x1d78   :  { %6324 = vtanh.f32 %v4182_v52 }
0x1d85   :  { %v6325_v57 = vpop.eup %6324 }
0x1d86   :  { %4186 = vrot.lane.b32.xlu1 %v6325_v57, %s6516_s13 }
0x1de1   :  { %v4112_v14 = vpop.permute.xlu0 %4111 }
0x1de2   :  { %v4114_v0 = vmul.f32 %v4112_v14, %v4109_v30 }
0x1de4   :  { %v7680_v15 = vadd.f32 %v4115_v56, %v4114_v0 }
0x1de6   :  { %v4193_v28 = vpack.c.bf16 %v7680_v15, %v7680_v15 }
0x1de8   :  { %4195 = vrot.lane.b32.xlu0 %v4193_v28, %s6516_s13 }
0x1df8   :  { %v4187_v19 = vpop.permute.xlu1 %4186 }
0x1df9   :  { %v4189_v7 = vmul.f32 %v4187_v19, %v4184_v5 }
0x1dfb   :  { %v7686_v39 = vadd.f32 %v4190_v35, %v4189_v7 }
0x1dfd   :  { %v4268_v20 = vpack.c.bf16 %v7686_v39, %v7686_v39 }
0x1dff   :  { %4270 = vrot.lane.b32.xlu1 %v4268_v20, %s6516_s13 }
0x1e5a   :  { %v4196_v21 = vpop.permute.xlu0 %4195 }
0x1e5b   :  { %6052 = vmatmul.mubr.msk.bf16.vlgmr.msra.gmra.mxu0 %vm167_vm1, %v4196_v21  ;;  %v4342_v21 = vld [vmem:[#allocation4 + $0x8] sm:$0x3] }
0x1e5c   :  { %6064 = vmatpush3.bf16.msra.mxu0 %v7506_v62  ;;  %6067 = vmatprep.mubr.msk.bf16.mxu0 %vm6514_vm0, %v6513_v1 }
0x1e5d   :  { %6065 = vmatprep.subr.bf16.mxu0 %v6513_v1 }
0x1e60   :  { %6066 = vmatpush3.bf16.msra.mxu0 %v7514_v63 }
0x1e61   :  { %6079 = vmatprep.subr.bf16.mxu0 %v6513_v1 }
0x1e71   :  { %v4271_v2 = vpop.permute.xlu1 %4270 }
0x1e72   :  { %6060 = vmatmul.mubr.msk.bf16.vlgmr.msra.gmra.mxu1 %vm167_vm1, %v4271_v2 }
0x1e73   :  { %6072 = vmatpush3.bf16.msra.mxu1 %v7538_v36  ;;  %6075 = vmatprep.mubr.msk.bf16.mxu1 %vm6514_vm0, %v6513_v1 }
0x1e74   :  { %6073 = vmatprep.subr.bf16.mxu1 %v6513_v1 }
0x1e77   :  { %6074 = vmatpush3.bf16.msra.mxu1 %v7543_v37 }
0x1e78   :  { %6087 = vmatprep.subr.bf16.mxu1 %v6513_v1 }
0x1f1b   :  { %v4234_v22 = vpop.f32.mrf.mxu0 }
0x1f1c   :  { %v4247_v25 = vadd.f32 %v4234_v22, %v7597_v4  ;;  %v4240_v60 = vadd.f32 %v4234_v22, %v4192_v26 }
0x1f1d   :  { %v6053_v23 = vpop.f32.mrf.mxu0 }
0x1f1e   :  { %4249 = vrot.lane.b32.xlu0 %v4247_v25, %s6508_s7  ;;  %v5207_v29 = vmul.f32 -1.442695, %v4240_v60  ;;  %v4417_v25 = vld [vmem:[#allocation5 + $0x6] sm:$0x3] }
0x1f1f   :  { %v4237_v32 = vpop.f32.mrf.mxu0 }
0x1f20   :  { %6326 = vpow2.f32 %v5207_v29 }
0x1f21   :  { %v6054_v58 = vpop.f32.mrf.mxu0 }
0x1f2d   :  { %v6327_v16 = vpop.eup %6326 }
0x1f2e   :  { %v4244_v45 = vadd.f32 1.0, %v6327_v16 }
0x1f30   :  { %6328 = vrcp.f32 %v4244_v45 }
0x1f32   :  { %v4309_v33 = vpop.f32.mrf.mxu1 }
0x1f33   :  { %v4322_v47 = vadd.f32 %v4309_v33, %v7605_v61  ;;  %v4315_v10 = vadd.f32 %v4309_v33, %v4267_v11 }
0x1f34   :  { %v6061_v38 = vpop.f32.mrf.mxu1 }
0x1f35   :  { %4324 = vrot.lane.b32.xlu1 %v4322_v47, %s6508_s7  ;;  %v5209_v34 = vmul.f32 -1.442695, %v4315_v10 }
0x1f36   :  { %v4312_v42 = vpop.f32.mrf.mxu1 }
0x1f37   :  { %6330 = vpow2.f32 %v5209_v34 }
0x1f38   :  { %v6062_v43 = vpop.f32.mrf.mxu1 }
0x1f3d   :  { %v6329_v13 = vpop.eup %6328 }
0x1f3e   :  { %v4259_v40 = vsub.f32 1.0, %v6329_v13  ;;  %v4265_v6 = vmul.f32 %v6329_v13, %v7680_v15 }
0x1f44   :  { %v6331_v48 = vpop.eup %6330 }
0x1f45   :  { %v4319_v49 = vadd.f32 1.0, %v6331_v48 }
0x1f47   :  { %6332 = vrcp.f32 %v4319_v49 }
0x1f54   :  { %v6333_v50 = vpop.eup %6332 }
0x1f55   :  { %v4334_v27 = vsub.f32 1.0, %v6333_v50  ;;  %v4340_v57 = vmul.f32 %v6333_v50, %v7686_v39 }
0x1f90   :  { %v4250_v46 = vpop.permute.xlu0 %4249 }
0x1f91   :  { %v4252_v44 = vmul.f32 %v6329_v13, %v4250_v46 }
0x1f93   :  { %4254 = vrot.lane.b32.xlu0 %v4252_v44, %s6508_s7 }
0x1fa7   :  { %v4325_v53 = vpop.permute.xlu1 %4324 }
0x1fa8   :  { %v4327_v54 = vmul.f32 %v6333_v50, %v4325_v53 }
0x1faa   :  { %4329 = vrot.lane.b32.xlu1 %v4327_v54, %s6508_s7 }
0x2005   :  { %v4255_v24 = vpop.permute.xlu0 %4254 }
0x2006   :  { %v4257_v3 = vadd.f32 %v4255_v24, %v4192_v26 }
0x2008   :  { %6334 = vtanh.f32 %v4257_v3 }
0x2015   :  { %v6335_v41 = vpop.eup %6334 }
0x2016   :  { %4261 = vrot.lane.b32.xlu0 %v6335_v41, %s6516_s13 }
0x201c   :  { %v4330_v55 = vpop.permute.xlu1 %4329 }
0x201d   :  { %v4332_v51 = vadd.f32 %v4330_v55, %v4267_v11 }
0x201f   :  { %6336 = vtanh.f32 %v4332_v51 }
0x202c   :  { %v6337_v59 = vpop.eup %6336 }
0x202d   :  { %4336 = vrot.lane.b32.xlu1 %v6337_v59, %s6516_s13 }
0x2088   :  { %v4262_v17 = vpop.permute.xlu0 %4261 }
0x2089   :  { %v4264_v18 = vmul.f32 %v4262_v17, %v4259_v40  ;;  %v7763_v40 = vld [vmem:[%s7948_s12 + $0x8] sm:$0xff]   ;;  %v7772_v17 = vld [vmem:[%s7948_s12] sm:$0xff]  }
0x208b   :  { %v7714_v8 = vadd.f32 %v4265_v6, %v4264_v18  ;;  %v7777_v18 = vld [vmem:[#allocation12 + $0x8] sm:$0xff]  }
0x208d   :  { %v4343_v9 = vpack.c.bf16 %v7714_v8, %v7714_v8 }
0x208f   :  { %4345 = vrot.lane.b32.xlu0 %v4343_v9, %s6516_s13 }
0x209f   :  { %v4337_v52 = vpop.permute.xlu1 %4336 }
0x20a0   :  { %v4339_v30 = vmul.f32 %v4337_v52, %v4334_v27 }
0x20a2   :  { %v7720_v14 = vadd.f32 %v4340_v57, %v4339_v30 }
0x20a4   :  { %v4418_v56 = vpack.c.bf16 %v7720_v14, %v7720_v14 }
0x20a6   :  { %4420 = vrot.lane.b32.xlu1 %v4418_v56, %s6516_s13 }
0x2101   :  { %v4346_v0 = vpop.permute.xlu0 %4345 }
0x2102   :  { %6068 = vmatmul.mubr.msk.bf16.vlgmr.msra.gmra.mxu0 %vm167_vm1, %v4346_v0 }
0x2103   :  { %6080 = vmatpush3.bf16.msra.mxu0 %v7506_v62  ;;  %6083 = vmatprep.mubr.msk.bf16.mxu0 %vm6514_vm0, %v6513_v1 }
0x2104   :  { %6081 = vmatprep.subr.bf16.mxu0 %v6513_v1 }
0x2107   :  { %6082 = vmatpush3.bf16.msra.mxu0 %v7514_v63 }
0x2108   :  { %6095 = vmatprep.subr.bf16.mxu0 %v6513_v1 }
0x2118   :  { %v4421_v15 = vpop.permute.xlu1 %4420 }
0x2119   :  { %6076 = vmatmul.mubr.msk.bf16.vlgmr.msra.gmra.mxu1 %vm167_vm1, %v4421_v15 }
0x211a   :  { %6088 = vmatpush3.bf16.msra.mxu1 %v7538_v36  ;;  %6091 = vmatprep.mubr.msk.bf16.mxu1 %vm6514_vm0, %v6513_v1 }
0x211b   :  { %6089 = vmatprep.subr.bf16.mxu1 %v6513_v1 }
0x211e   :  { %6090 = vmatpush3.bf16.msra.mxu1 %v7543_v37 }
0x211f   :  { %6103 = vmatprep.subr.bf16.mxu1 %v6513_v1 }
0x21c2   :  { %v4384_v62 = vpop.f32.mrf.mxu0 }
0x21c3   :  { %v4397_v28 = vadd.f32 %v4384_v62, %v7597_v4  ;;  %v4390_v37 = vadd.f32 %v4384_v62, %v4342_v21 }
0x21c4   :  { %v6069_v63 = vpop.f32.mrf.mxu0 }
0x21c5   :  { %4399 = vrot.lane.b32.xlu0 %v4397_v28, %s6508_s7  ;;  %v5211_v2 = vmul.f32 -1.442695, %v4390_v37  ;;  %v4492_v28 = vld [vmem:[#allocation4 + $0xa] sm:$0x3] }
0x21c6   :  { %v4387_v5 = vpop.f32.mrf.mxu0 }
0x21c7   :  { %6338 = vpow2.f32 %v5211_v2 }
0x21c8   :  { %v6070_v19 = vpop.f32.mrf.mxu0 }
0x21d4   :  { %v6339_v22 = vpop.eup %6338 }
0x21d5   :  { %v4394_v32 = vadd.f32 1.0, %v6339_v22 }
0x21d7   :  { %6340 = vrcp.f32 %v4394_v32 }
0x21d9   :  { %v4459_v35 = vpop.f32.mrf.mxu1 }
0x21da   :  { %v4472_v36 = vadd.f32 %v4459_v35, %v7605_v61  ;;  %v4465_v23 = vadd.f32 %v4459_v35, %v4417_v25  ;;  %v4567_v35 = vld [vmem:[#allocation5 + $0x4] sm:$0x3] }
0x21db   :  { %v6077_v7 = vpop.f32.mrf.mxu1 }
0x21dc   :  { %4474 = vrot.lane.b32.xlu1 %v4472_v36, %s6508_s7  ;;  %v5213_v58 = vmul.f32 -1.442695, %v4465_v23 }
0x21dd   :  { %v4462_v39 = vpop.f32.mrf.mxu1 }
0x21de   :  { %6342 = vpow2.f32 %v5213_v58 }
0x21df   :  { %v6078_v20 = vpop.f32.mrf.mxu1 }
0x21e4   :  { %v6341_v33 = vpop.eup %6340 }
0x21e5   :  { %v4409_v46 = vsub.f32 1.0, %v6341_v33  ;;  %v4415_v48 = vmul.f32 %v6341_v33, %v7714_v8  ;;  %v7783_v8 = vld [vmem:[#allocation12] sm:$0xff]  }
0x21eb   :  { %v6343_v42 = vpop.eup %6342 }
0x21ec   :  { %v4469_v43 = vadd.f32 1.0, %v6343_v42 }
0x21ee   :  { %6344 = vrcp.f32 %v4469_v43 }
0x21fb   :  { %v6345_v26 = vpop.eup %6344 }
0x21fc   :  { %v4484_v54 = vsub.f32 1.0, %v6345_v26  ;;  %v4490_v3 = vmul.f32 %v6345_v26, %v7720_v14 }
0x2237   :  { %v4400_v47 = vpop.permute.xlu0 %4399 }
0x2238   :  { %v4402_v38 = vmul.f32 %v6341_v33, %v4400_v47 }
0x223a   :  { %4404 = vrot.lane.b32.xlu0 %v4402_v38, %s6508_s7 }
0x224e   :  { %v4475_v60 = vpop.permute.xlu1 %4474 }
0x224f   :  { %v4477_v29 = vmul.f32 %v6345_v26, %v4475_v60 }
0x2251   :  { %4479 = vrot.lane.b32.xlu1 %v4477_v29, %s6508_s7 }
0x22ac   :  { %v4405_v16 = vpop.permute.xlu0 %4404 }
0x22ad   :  { %v4407_v11 = vadd.f32 %v4405_v16, %v4342_v21 }
0x22af   :  { %6346 = vtanh.f32 %v4407_v11 }
0x22bc   :  { %v6347_v10 = vpop.eup %6346 }
0x22bd   :  { %4411 = vrot.lane.b32.xlu0 %v6347_v10, %s6516_s13 }
0x22c3   :  { %v4480_v45 = vpop.permute.xlu1 %4479 }
0x22c4   :  { %v4482_v34 = vadd.f32 %v4480_v45, %v4417_v25 }
0x22c6   :  { %6348 = vtanh.f32 %v4482_v34 }
0x22d3   :  { %v6349_v13 = vpop.eup %6348 }
0x22d4   :  { %4486 = vrot.lane.b32.xlu1 %v6349_v13, %s6516_s13 }
0x232f   :  { %v4412_v44 = vpop.permute.xlu0 %4411 }
0x2330   :  { %v4414_v49 = vmul.f32 %v4412_v44, %v4409_v46 }
0x2332   :  { %v7748_v50 = vadd.f32 %v4415_v48, %v4414_v49 }
0x2334   :  { %v4493_v53 = vpack.c.bf16 %v7748_v50, %v7748_v50 }
0x2336   :  { %4495 = vrot.lane.b32.xlu0 %v4493_v53, %s6516_s13 }
0x2346   :  { %v4487_v24 = vpop.permute.xlu1 %4486 }
0x2347   :  { %v4489_v41 = vmul.f32 %v4487_v24, %v4484_v54 }
0x2349   :  { %v7754_v55 = vadd.f32 %v4490_v3, %v4489_v41 }
0x234b   :  { %v4568_v51 = vpack.c.bf16 %v7754_v55, %v7754_v55 }
0x234d   :  { %4570 = vrot.lane.b32.xlu1 %v4568_v51, %s6516_s13 }
0x23a8   :  { %v4496_v59 = vpop.permute.xlu0 %4495 }
0x23a9   :  { %6084 = vmatmul.mubr.msk.bf16.vlgmr.msra.gmra.mxu0 %vm167_vm1, %v4496_v59 }
0x23aa   :  { %6096 = vmatpush3.bf16.msra.mxu0 %v7763_v40  ;;  %6099 = vmatprep.mubr.msk.bf16.mxu0 %vm6514_vm0, %v6513_v1 }
0x23ab   :  { %6097 = vmatprep.subr.bf16.mxu0 %v6513_v1 }
0x23ae   :  { %6098 = vmatpush3.bf16.msra.mxu0 %v7772_v17 }
0x23af   :  { %6111 = vmatprep.subr.bf16.mxu0 %v6513_v1 }
0x23bf   :  { %v4571_v6 = vpop.permute.xlu1 %4570 }
0x23c0   :  { %6092 = vmatmul.mubr.msk.bf16.vlgmr.msra.gmra.mxu1 %vm167_vm1, %v4571_v6  ;;  %v4642_v6 = vld [vmem:[#allocation4 + $0xc] sm:$0x3] }
0x23c1   :  { %6104 = vmatpush3.bf16.msra.mxu1 %v7777_v18  ;;  %6107 = vmatprep.mubr.msk.bf16.mxu1 %vm6514_vm0, %v6513_v1 }
0x23c2   :  { %6105 = vmatprep.subr.bf16.mxu1 %v6513_v1 }
0x23c5   :  { %6106 = vmatpush3.bf16.msra.mxu1 %v7783_v8 }
0x23c6   :  { %6119 = vmatprep.subr.bf16.mxu1 %v6513_v1 }
0x2469   :  { %v4534_v9 = vpop.f32.mrf.mxu0 }
0x246a   :  { %v4547_v27 = vadd.f32 %v4534_v9, %v7597_v4  ;;  %v4540_v63 = vadd.f32 %v4534_v9, %v4492_v28 }
0x246b   :  { %v6085_v52 = vpop.f32.mrf.mxu0 }
0x246c   :  { %4549 = vrot.lane.b32.xlu0 %v4547_v27, %s6508_s7  ;;  %v5215_v5 = vmul.f32 -1.442695, %v4540_v63  ;;  %v4717_v27 = vld [vmem:[#allocation5 + $0x2] sm:$0x3] }
0x246d   :  { %v4537_v57 = vpop.f32.mrf.mxu0 }
0x246e   :  { %6350 = vpow2.f32 %v5215_v5 }
0x246f   :  { %v6086_v30 = vpop.f32.mrf.mxu0 }
0x247b   :  { %v6351_v19 = vpop.eup %6350 }
0x247c   :  { %v4544_v7 = vadd.f32 1.0, %v6351_v19 }
0x247e   :  { %6352 = vrcp.f32 %v4544_v7 }
0x2480   :  { %v4609_v14 = vpop.f32.mrf.mxu1 }
0x2481   :  { %v4622_v56 = vadd.f32 %v4609_v14, %v7605_v61  ;;  %v4615_v36 = vadd.f32 %v4609_v14, %v4567_v35 }
0x2482   :  { %v6093_v0 = vpop.f32.mrf.mxu1 }
0x2483   :  { %4624 = vrot.lane.b32.xlu1 %v4622_v56, %s6508_s7  ;;  %v5217_v39 = vmul.f32 -1.442695, %v4615_v36 }
0x2484   :  { %v4612_v15 = vpop.f32.mrf.mxu1 }
0x2485   :  { %6354 = vpow2.f32 %v5217_v39 }
0x2486   :  { %v6094_v62 = vpop.f32.mrf.mxu1 }
0x248b   :  { %v6353_v20 = vpop.eup %6352 }
0x248c   :  { %v4559_v26 = vsub.f32 1.0, %v6353_v20  ;;  %v4565_v29 = vmul.f32 %v6353_v20, %v7748_v50 }
0x2492   :  { %v6355_v2 = vpop.eup %6354 }
0x2493   :  { %v4619_v22 = vadd.f32 1.0, %v6355_v2 }
0x2495   :  { %6356 = vrcp.f32 %v4619_v22 }
0x24a2   :  { %v6357_v25 = vpop.eup %6356 }
0x24a3   :  { %v4634_v45 = vsub.f32 1.0, %v6357_v25  ;;  %v4640_v13 = vmul.f32 %v6357_v25, %v7754_v55 }
0x24de   :  { %v4550_v21 = vpop.permute.xlu0 %4549 }
0x24df   :  { %v4552_v37 = vmul.f32 %v6353_v20, %v4550_v21 }
0x24e1   :  { %4554 = vrot.lane.b32.xlu0 %v4552_v37, %s6508_s7 }
0x24f5   :  { %v4625_v23 = vpop.permute.xlu1 %4624 }
0x24f6   :  { %v4627_v32 = vmul.f32 %v6357_v25, %v4625_v23 }
0x24f8   :  { %4629 = vrot.lane.b32.xlu1 %v4627_v32, %s6508_s7 }
0x2553   :  { %v4555_v58 = vpop.permute.xlu0 %4554 }
0x2554   :  { %v4557_v33 = vadd.f32 %v4555_v58, %v4492_v28 }
0x2556   :  { %6358 = vtanh.f32 %v4557_v33 }
0x2563   :  { %v6359_v47 = vpop.eup %6358 }
0x2564   :  { %4561 = vrot.lane.b32.xlu0 %v6359_v47, %s6516_s13 }
0x256a   :  { %v4630_v38 = vpop.permute.xlu1 %4629 }
0x256b   :  { %v4632_v42 = vadd.f32 %v4630_v38, %v4567_v35 }
0x256d   :  { %6360 = vtanh.f32 %v4632_v42 }
0x257a   :  { %v6361_v43 = vpop.eup %6360 }
0x257b   :  { %4636 = vrot.lane.b32.xlu1 %v6361_v43, %s6516_s13 }
0x25d6   :  { %v4562_v60 = vpop.permute.xlu0 %4561 }
0x25d7   :  { %v4564_v16 = vmul.f32 %v4562_v60, %v4559_v26 }
0x25d9   :  { %v7796_v11 = vadd.f32 %v4565_v29, %v4564_v16 }
0x25db   :  { %v4643_v10 = vpack.c.bf16 %v7796_v11, %v7796_v11 }
0x25dd   :  { %4645 = vrot.lane.b32.xlu0 %v4643_v10, %s6516_s13 }
0x25ed   :  { %v4637_v34 = vpop.permute.xlu1 %4636 }
0x25ee   :  { %v4639_v46 = vmul.f32 %v4637_v34, %v4634_v45 }
0x25f0   :  { %v7802_v44 = vadd.f32 %v4640_v13, %v4639_v46 }
0x25f2   :  { %v4718_v48 = vpack.c.bf16 %v7802_v44, %v7802_v44 }
0x25f4   :  { %4720 = vrot.lane.b32.xlu1 %v4718_v48, %s6516_s13  ;;  %v4792_v48 = vld [vmem:[#allocation4 + $0xe] sm:$0x3] }
0x264f   :  { %v4646_v49 = vpop.permute.xlu0 %4645 }
0x2650   :  { %6100 = vmatmul.mubr.msk.bf16.vlgmr.msra.gmra.mxu0 %vm167_vm1, %v4646_v49 }
0x2651   :  { %6112 = vmatpush3.bf16.msra.mxu0 %v7763_v40  ;;  %6115 = vmatprep.mubr.msk.bf16.mxu0 %vm6514_vm0, %v6513_v1 }
0x2652   :  { %6113 = vmatprep.subr.bf16.mxu0 %v6513_v1 }
0x2655   :  { %6114 = vmatpush3.bf16.msra.mxu0 %v7772_v17 }
0x2656   :  { %6127 = vmatprep.subr.mxu0 %v6513_v1 }
0x2666   :  { %v4721_v50 = vpop.permute.xlu1 %4720 }
0x2667   :  { %6108 = vmatmul.mubr.msk.bf16.vlgmr.msra.gmra.mxu1 %vm167_vm1, %v4721_v50 }
0x2668   :  { %6120 = vmatpush3.bf16.msra.mxu1 %v7777_v18  ;;  %6123 = vmatprep.mubr.msk.bf16.mxu1 %vm6514_vm0, %v6513_v1 }
0x2669   :  { %6121 = vmatprep.subr.bf16.mxu1 %v6513_v1 }
0x266c   :  { %6122 = vmatpush3.bf16.msra.mxu1 %v7783_v8 }
0x2710   :  { %v4684_v53 = vpop.f32.mrf.mxu0 }
0x2711   :  { %v4697_v54 = vadd.f32 %v4684_v53, %v7597_v4  ;;  %v4690_v18 = vadd.f32 %v4684_v53, %v4642_v6 }
0x2712   :  { %v6101_v24 = vpop.f32.mrf.mxu0 }
0x2713   :  { %4699 = vrot.lane.b32.xlu0 %v4697_v54, %s6508_s7  ;;  %v5219_v9 = vmul.f32 -1.442695, %v4690_v18  ;;  %v4867_v54 = vld [vmem:[#allocation5] sm:$0x3] }
0x2714   :  { %v4687_v3 = vpop.f32.mrf.mxu0 }
0x2715   :  { %6362 = vpow2.f32 %v5219_v9 }
0x2716   :  { %v6102_v41 = vpop.f32.mrf.mxu0 }
0x2722   :  { %v6363_v8 = vpop.eup %6362 }
0x2723   :  { %v4694_v57 = vadd.f32 1.0, %v6363_v8 }
0x2725   :  { %6364 = vrcp.f32 %v4694_v57  ;;  %v4970_v57 = vld [vmem:[%s7955_s19 + $0x78] sm:$0xff] }
0x2727   :  { %v4759_v55 = vpop.f32.mrf.mxu1 }
0x2728   :  { %v4772_v51 = vadd.f32 %v4759_v55, %v7605_v61  ;;  %v4765_v52 = vadd.f32 %v4759_v55, %v4717_v27 }
0x2729   :  { %v6109_v59 = vpop.f32.mrf.mxu1 }
0x272a   :  { %4774 = vrot.lane.b32.xlu1 %v4772_v51, %s6508_s7  ;;  %v5221_v30 = vmul.f32 -1.442695, %v4765_v52 }
0x272b   :  { %v4762_v40 = vpop.f32.mrf.mxu1 }
0x272c   :  { %6366 = vpow2.f32 %v5221_v30  ;;  %v4969_v30 = vld [vmem:[%s7955_s19 + $0x70] sm:$0xff] }
0x272d   :  { %v6110_v17 = vpop.f32.mrf.mxu1 }
0x2732   :  { %v6365_v14 = vpop.eup %6364 }
0x2733   :  { %v4709_v21 = vsub.f32 1.0, %v6365_v14  ;;  %v4715_v2 = vmul.f32 %v6365_v14, %v7796_v11 }
0x2739   :  { %v6367_v15 = vpop.eup %6366 }
0x273a   :  { %v4769_v62 = vadd.f32 1.0, %v6367_v15  ;;  %v4966_v15 = vld [vmem:[%s7955_s19 + $0x58] sm:$0xff] }
0x273c   :  { %6368 = vrcp.f32 %v4769_v62  ;;  %v4965_v62 = vld [vmem:[%s7955_s19 + $0x50] sm:$0xff] }
0x2749   :  { %v6369_v28 = vpop.eup %6368 }
0x274a   :  { %v4784_v32 = vsub.f32 1.0, %v6369_v28  ;;  %v4790_v33 = vmul.f32 %v6369_v28, %v7802_v44 }
0x2785   :  { %v4700_v56 = vpop.permute.xlu0 %4699 }
0x2786   :  { %v4702_v0 = vmul.f32 %v6365_v14, %v4700_v56  ;;  %v4968_v14 = vld [vmem:[%s7955_s19 + $0x68] sm:$0xff]  ;;  %v4967_v56 = vld [vmem:[%s7955_s19 + $0x60] sm:$0xff] }
0x2788   :  { %4704 = vrot.lane.b32.xlu0 %v4702_v0, %s6508_s7 }
0x279c   :  { %v4775_v63 = vpop.permute.xlu1 %4774 }
0x279d   :  { %v4777_v5 = vmul.f32 %v6369_v28, %v4775_v63  ;;  %v4964_v28 = vld [vmem:[%s7955_s19 + $0x48] sm:$0xff]  ;;  %v4963_v63 = vld [vmem:[%s7955_s19 + $0x40] sm:$0xff] }
0x279f   :  { %4779 = vrot.lane.b32.xlu1 %v4777_v5, %s6508_s7  ;;  %v4962_v5 = vld [vmem:[%s7955_s19 + $0x38] sm:$0xff] }
0x27fa   :  { %v4705_v19 = vpop.permute.xlu0 %4704 }
0x27fb   :  { %v4707_v35 = vadd.f32 %v4705_v19, %v4642_v6 }
0x27fd   :  { %6370 = vtanh.f32 %v4707_v35 }
0x280a   :  { %v6371_v36 = vpop.eup %6370 }
0x280b   :  { %4711 = vrot.lane.b32.xlu0 %v6371_v36, %s6516_s13  ;;  %v4961_v36 = vld [vmem:[%s7955_s19 + $0x30] sm:$0xff] }
0x2811   :  { %v4780_v7 = vpop.permute.xlu1 %4779 }
0x2812   :  { %v4782_v39 = vadd.f32 %v4780_v7, %v4717_v27 }
0x2814   :  { %6372 = vtanh.f32 %v4782_v39 }
0x2821   :  { %v6373_v20 = vpop.eup %6372 }
0x2822   :  { %4786 = vrot.lane.b32.xlu1 %v6373_v20, %s6516_s13  ;;  %v4960_v20 = vld [vmem:[%s7955_s19 + $0x28] sm:$0xff] }
0x287d   :  { %v4712_v37 = vpop.permute.xlu0 %4711 }
0x287e   :  { %v4714_v22 = vmul.f32 %v4712_v37, %v4709_v21  ;;  %v4959_v37 = vld [vmem:[%s7955_s19 + $0x20] sm:$0xff] }
0x2880   :  { %v7829_v25 = vadd.f32 %v4715_v2, %v4714_v22  ;;  %v4958_v2 = vld [vmem:[%s7955_s19 + $0x18] sm:$0xff]  ;;  %v4957_v22 = vld [vmem:[%s7955_s19 + $0x10] sm:$0xff] }
0x2882   :  { %v4793_v23 = vpack.c.bf16 %v7829_v25, %v7829_v25 }
0x2884   :  { %4795 = vrot.lane.b32.xlu0 %v4793_v23, %s6516_s13  ;;  %v4955_v23 = vld [vmem:[%s7955_s19] sm:$0xff] }
0x2894   :  { %v4787_v58 = vpop.permute.xlu1 %4786 }
0x2895   :  { %v4789_v47 = vmul.f32 %v4787_v58, %v4784_v32 }
0x2897   :  { %v7835_v38 = vadd.f32 %v4790_v33, %v4789_v47 }
0x2899   :  { %v4868_v42 = vpack.c.bf16 %v7835_v38, %v7835_v38 }
0x289b   :  { %4870 = vrot.lane.b32.xlu1 %v4868_v42, %s6516_s13 }
0x28f6   :  { %v4796_v43 = vpop.permute.xlu0 %4795 }
0x28f7   :  { %6116 = vmatmul.mubr.msk.bf16.vlgmr.msra.gmra.mxu0 %vm167_vm1, %v4796_v43 }
0x28f8   :  { %6159 = vmatprep.mubr.msk.f32.mxu0 %vm6514_vm0, %v6513_v1  ;;  %6128 = vmatpush3.msra.mxu0 %v4970_v57 }
0x28f9   :  { %6129 = vmatprep.subr.mxu0 %v6513_v1 }
0x28fa   :  { %6130 = vmatpush3.msra.mxu0 %v4969_v30 }
0x28fb   :  { %6131 = vmatprep.subr.mxu0 %v6513_v1 }
0x28fc   :  { %6132 = vmatpush3.msra.mxu0 %v4968_v14 }
0x28fd   :  { %6133 = vmatprep.subr.mxu0 %v6513_v1 }
0x28fe   :  { %6134 = vmatpush3.msra.mxu0 %v4967_v56 }
0x28ff   :  { %6135 = vmatprep.subr.mxu0 %v6513_v1 }
0x2900   :  { %6136 = vmatpush3.msra.mxu0 %v4966_v15 }
0x2901   :  { %6137 = vmatprep.subr.mxu0 %v6513_v1 }
0x2902   :  { %6138 = vmatpush3.msra.mxu0 %v4965_v62 }
0x2903   :  { %6139 = vmatprep.subr.mxu0 %v6513_v1 }
0x2904   :  { %6140 = vmatpush3.msra.mxu0 %v4964_v28 }
0x2905   :  { %6141 = vmatprep.subr.mxu0 %v6513_v1 }
0x2906   :  { %6142 = vmatpush3.msra.mxu0 %v4963_v63 }
0x2907   :  { %6143 = vmatprep.subr.mxu0 %v6513_v1 }
0x2908   :  { %6144 = vmatpush3.msra.mxu0 %v4962_v5 }
0x2909   :  { %6145 = vmatprep.subr.mxu0 %v6513_v1 }
0x290a   :  { %6146 = vmatpush3.msra.mxu0 %v4961_v36 }
0x290b   :  { %6147 = vmatprep.subr.mxu0 %v6513_v1 }
0x290c   :  { %6148 = vmatpush3.msra.mxu0 %v4960_v20 }
0x290d   :  { %v4871_v26 = vpop.permute.xlu1 %4870  ;;  %6149 = vmatprep.subr.mxu0 %v6513_v1 }
0x290e   :  { %6124 = vmatmul.mubr.msk.bf16.vlgmr.msra.gmra.mxu1 %vm167_vm1, %v4871_v26  ;;  %6150 = vmatpush3.msra.mxu0 %v4959_v37 }
0x290f   :  { %6151 = vmatprep.subr.mxu0 %v6513_v1 }
0x2910   :  { %6152 = vmatpush3.msra.mxu0 %v4958_v2 }
0x2911   :  { %6153 = vmatprep.subr.mxu0 %v6513_v1 }
0x2912   :  { %6154 = vmatpush3.msra.mxu0 %v4957_v22 }
0x2913   :  { %6155 = vmatprep.subr.mxu0 %v6513_v1 }
0x29b7   :  { %v4834_v60 = vpop.f32.mrf.mxu0 }
0x29b8   :  { %v4847_v29 = vadd.f32 %v4834_v60, %v7597_v4  ;;  %v4840_v49 = vadd.f32 %v4834_v60, %v4792_v48 }
0x29b9   :  { %v6117_v16 = vpop.f32.mrf.mxu0 }
0x29ba   :  { %4849 = vrot.lane.b32.xlu0 %v4847_v29, %s6508_s7  ;;  %v5223_v50 = vmul.f32 -1.442695, %v4840_v49  ;;  %v5226_v16 = vld [vmem:[%s7956_s20] ss:$0 sm:$0xff] }
0x29bb   :  { %v4837_v11 = vpop.f32.mrf.mxu0 }
0x29bc   :  { %6374 = vpow2.f32 %v5223_v50 }
0x29bd   :  { %v6118_v10 = vpop.f32.mrf.mxu0 }
0x29c9   :  { %v6375_v53 = vpop.eup %6374 }
0x29ca   :  { %v4844_v24 = vadd.f32 1.0, %v6375_v53 }
0x29cc   :  { %6376 = vrcp.f32 %v4844_v24 }
0x29ce   :  { %v4909_v45 = vpop.f32.mrf.mxu1 }
0x29cf   :  { %v4922_v34 = vadd.f32 %v4909_v45, %v7605_v61  ;;  %v4915_v4 = vadd.f32 %v4909_v45, %v4867_v54  ;;  %v5227_v45 = vld [vmem:[%s7957_s21] ss:$0 sm:$0xff] }
0x29d0   :  { %v6125_v13 = vpop.f32.mrf.mxu1 }
0x29d1   :  { %4924 = vrot.lane.b32.xlu1 %v4922_v34, %s6508_s7  ;;  %v5225_v3 = vmul.f32 -1.442695, %v4915_v4 }
0x29d2   :  { %v4912_v46 = vpop.f32.mrf.mxu1 }
0x29d3   :  { %6378 = vpow2.f32 %v5225_v3 }
0x29d4   :  { %v6126_v44 = vpop.f32.mrf.mxu1 }
0x29d9   :  { %v6377_v41 = vpop.eup %6376 }
0x29da   :  { %v4859_v19 = vsub.f32 1.0, %v6377_v41  ;;  %v4865_v7 = vmul.f32 %v6377_v41, %v7829_v25  ;;  %v4956_v25 = vld [vmem:[%s7955_s19 + $0x8] sm:$0xff] }
0x29db   :  { %6156 = vmatpush3.msra.mxu0 %v4956_v25 }
0x29dc   :  { %6157 = vmatprep.subr.mxu0 %v6513_v1  ;;  %v4950_v1 = vsel %vm167_vm1, %v7519_v31, %v7301_v12  ;;  %v5228_v31 = vld [vmem:[#allocation6] ss:$0 sm:$0xff] }
0x29dd   :  { %6158 = vmatpush3.msra.mxu0 %v4955_v23 }
0x29e0   :  { %v6379_v61 = vpop.eup %6378 }
0x29e1   :  { %v4919_v59 = vadd.f32 1.0, %v6379_v61 }
0x29e3   :  { %6380 = vrcp.f32 %v4919_v59 }
0x29f0   :  { %v7849_v40 = vpop.eup %6380 }
0x29f1   :  { %v4934_v32 = vsub.f32 1.0, %v7849_v40  ;;  %v4940_v33 = vmul.f32 %v7849_v40, %v7835_v38 }
0x2a2c   :  { %v4850_v55 = vpop.permute.xlu0 %4849 }
0x2a2d   :  { %v4852_v51 = vmul.f32 %v6377_v41, %v4850_v55 }
0x2a2f   :  { %4854 = vrot.lane.b32.xlu0 %v4852_v51, %s6508_s7 }
0x2a43   :  { %v4925_v17 = vpop.permute.xlu1 %4924 }
0x2a44   :  { %v4927_v6 = vmul.f32 %v7849_v40, %v4925_v17 }
0x2a46   :  { %4929 = vrot.lane.b32.xlu1 %v4927_v6, %s6508_s7 }
0x2aa1   :  { %v4855_v18 = vpop.permute.xlu0 %4854 }
0x2aa2   :  { %v4857_v9 = vadd.f32 %v4855_v18, %v4792_v48 }
0x2aa4   :  { %6382 = vtanh.f32 %v4857_v9 }
0x2ab1   :  { %v6383_v8 = vpop.eup %6382 }
0x2ab2   :  { %4861 = vrot.lane.b32.xlu0 %v6383_v8, %s6516_s13 }
0x2ab8   :  { %v4930_v27 = vpop.permute.xlu1 %4929 }
0x2ab9   :  { %v4932_v52 = vadd.f32 %v4930_v27, %v4867_v54 }
0x2abb   :  { %6384 = vtanh.f32 %v4932_v52 }
0x2ac8   :  { %v6385_v0 = vpop.eup %6384 }
0x2ac9   :  { %4936 = vrot.lane.b32.xlu1 %v6385_v0, %s6516_s13 }
0x2b24   :  { %v4862_v35 = vpop.permute.xlu0 %4861 }
0x2b25   :  { %v4864_v39 = vmul.f32 %v4862_v35, %v4859_v19 }
0x2b27   :  { %v4866_v21 = vadd.f32 %v4865_v7, %v4864_v39 }
0x2b29   :  { %4943 = vrot.lane.b32.xlu0 %v4866_v21, %s6517_s25 }
0x2b3b   :  { %v4937_v58 = vpop.permute.xlu1 %4936 }
0x2b3c   :  { %v4939_v47 = vmul.f32 %v4937_v58, %v4934_v32 }
0x2b3e   :  { %v4941_v42 = vadd.f32 %v4940_v33, %v4939_v47 }
0x2b40   :  { %4947 = vrot.lane.b32.xlu1 %v4941_v42, %s6508_s7 }
0x2b9b   :  { %v4944_v43 = vpop.permute.xlu0 %4943 }
0x2b9c   :  { %v4952_v26 = vsel %vm4951_vm4, %v4950_v1, %v4944_v43 }
0x2bb2   :  { %v4948_v60 = vpop.permute.xlu1 %4947 }
0x2bb3   :  { %v4954_v29 = vsel %vm4953_vm5, %v4952_v26, %v4948_v60 }
0x2bb4   :  { %6160 = vmatmul.mubr.f32.vlgmr.msra.gmra.mxu0 %v4954_v29 }
0x2c74   :  { %v5044_v38 = vpop.f32.mrf.mxu0 }
0x2c75   :  { %v5045_v11 = vadd.f32 %v5226_v16, %v5044_v38 }
0x2c76   :  { %v6161_v10 = vpop.f32.mrf.mxu0 }
0x2c77   :  { %6386 = vtanh.f32 %v5045_v11 }
0x2c84   :  { %v6387_v34 = vpop.eup %6386 }
0x2c85   :  { %v5056_v13 = vmul.f32 %v6387_v34, %v5227_v45 }
0x2c87   :  { %v5057_v12 = vsel %vm1095_vm3, %v5056_v13, 0.0 }
0x2c88   :  { %5058 = vadd.xlane.f32.xlu0 %v5057_v12 }
0x2d11   :  { %v5059_v46 = vpop.xlane.xlu0 %5058 }
0x2d12   :  { %v5067_v44 = vadd.f32 %v5228_v31, %v5059_v46 }
0x2d14   :  { %v5229_v48 = vmul.f32 -1.442695, %v5067_v44 }
0x2d16   :  { %6388 = vpow2.f32 %v5229_v48 }
0x2d23   :  { %v6389_v49 = vpop.eup %6388 }
0x2d24   :  { %v5071_v50 = vadd.f32 1.0, %v6389_v49 }
0x2d26   :  { %6390 = vrcp.f32 %v5071_v50 }
0x2d33   :  { %v6391_v53 = vpop.eup %6390 }
0x2d34   :  { %5075 = vst.msk [vmem:[%s7959_s23] sm:$0x3] %vm5074_vm6, %v6391_v53 }
0x2d35   :  { %5080 = vsyncpa [#allocation8], 1 }
0x2d36   :  { %5081 = vsyncpa [#allocation10], 1 }
0x2d37   :  { %5082 = vsyncpa [#allocation13], 1 }

</bundles_post_ra>
